<compile_context>
chip_gen: v5e
topology: v5e:2x2
jax: 0.10.0
libtpu: 0.0.40
codegen_flags: <defaults>
</compile_context>

<pallas_src>
import functools
import math

import jax
import jax.numpy as jnp
from jax.experimental import pallas as pl
from jax.experimental.pallas import tpu as pltpu

# Python-float constants only (a jnp scalar here becomes an illegal captured constant).
_INV_SQRT2 = float(1.0 / math.sqrt(2.0))
_LN_EPS = 1e-5
_MAX_FUSED_LN_K = 2048          # largest contraction dim we hold in one k-step for fused LN


@functools.lru_cache(maxsize=None)
def _vmem_limit():
    """Per-generation VMEM budget: ~3/4 of physical (96 MiB v5e/v6e, 48 MiB v7x)."""
    try:
        cap = int(pltpu.get_tpu_info().vmem_capacity_bytes)
        return max(32 * 1024 * 1024, min(cap * 3 // 4, 112 * 1024 * 1024))
    except Exception:
        return 48 * 1024 * 1024   # conservative: fits under v7x's 64 MiB physical


def _round_up(x, m):
    return (x + m - 1) // m * m


def _choose_tile(dim, candidates, align):
    """Largest candidate tile whose padding overhead is small; else minimal-padding tile."""
    dim_a = _round_up(dim, align)
    if dim_a <= candidates[0]:
        return dim_a
    for t in candidates:                       # prefer big (256/512-aligned) tiles
        if _round_up(dim_a, t) - dim <= max(dim // 16, align):
            return t
    best_t, best_pad = align, dim_a - dim
    for t in candidates:
        pad = _round_up(dim_a, t) - dim
        if pad < best_pad or (pad == best_pad and t > best_t):
            best_t, best_pad = t, pad
    return best_t


# ----------------------------- Pallas kernels ------------------------------ #

def _linear_kernel(x_ref, w_ref, b_ref, *rest, n_k, gelu, has_residual, has_ln, k_true):
    # y = [LN](x) @ W (accumulated over the k grid axis) + b [+ GELU] [+ residual]
    idx = 0
    if has_ln:
        g_ref, beta_ref = rest[0], rest[1]
        idx = 2
    if has_residual:
        r_ref = rest[idx]
        idx += 1
    o_ref, acc_ref = rest[idx], rest[idx + 1]
    k = pl.program_id(2)

    @pl.when(k == 0)
    def _():
        acc_ref[...] = jnp.zeros_like(acc_ref)

    x = x_ref[...]                               # bf16 block
    if has_ln:
        # LayerNorm fused into the matmul prologue (requires n_k == 1, i.e. tk == Kp).
        xf = x.astype(jnp.float32)
        if k_true != xf.shape[-1]:               # K was padded: mask the pad columns
            mask = jax.lax.broadcasted_iota(jnp.int32, xf.shape, 1) < k_true
            xf = jnp.where(mask, xf, 0.0)
            mu = jnp.sum(xf, axis=-1, keepdims=True) * (1.0 / k_true)
            d = jnp.where(mask, xf - mu, 0.0)
        else:
            mu = jnp.mean(xf, axis=-1, keepdims=True)
            d = xf - mu
        var = jnp.sum(d * d, axis=-1, keepdims=True) * (1.0 / k_true)
        xf = d * jax.lax.rsqrt(var + _LN_EPS) * g_ref[...] + beta_ref[...]
        x = xf.astype(jnp.bfloat16)

    # bf16 operands straight to the MXU; accumulate in f32.
    acc_ref[...] += jnp.dot(x, w_ref[...], preferred_element_type=jnp.float32)

    @pl.when(k == n_k - 1)
    def _():
        y = acc_ref[...] + b_ref[...]
        if gelu:  # exact erf-based GELU (torch.nn.GELU default)
            y = 0.5 * y * (1.0 + jax.lax.erf(y * _INV_SQRT2))
        if has_residual:
            y = y + r_ref[...].astype(jnp.float32)
        o_ref[...] = y.astype(o_ref.dtype)


def _layernorm_kernel(x_ref, g_ref, b_ref, o_ref, *, eps):
    # Fallback standalone LayerNorm (bf16 I/O, f32 math).
    x = x_ref[...].astype(jnp.float32)
    mu = jnp.mean(x, axis=-1, keepdims=True)
    var = jnp.mean((x - mu) ** 2, axis=-1, keepdims=True)
    o_ref[...] = ((x - mu) * jax.lax.rsqrt(var + eps) * g_ref[...]
                  + b_ref[...]).astype(o_ref.dtype)


def _attn_kernel(qkv_ref, o_ref, *, num_heads, scale, nb):
    # A batch of `nb` windows per grid step; all heads handled inside.
    # qkv_ref: (nb, S, 3C) bf16    o_ref: (nb, S, C) bf16
    C = o_ref.shape[-1]
    Dh = C // num_heads
    for w in range(nb):                          # static unroll over windows in the block
        qkv = qkv_ref[w]                         # (S, 3C) bf16, VMEM resident
        for h in range(num_heads):               # static unroll over heads
            q = qkv[:, h * Dh:(h + 1) * Dh]
            k = qkv[:, C + h * Dh:C + (h + 1) * Dh]
            v = qkv[:, 2 * C + h * Dh:2 * C + (h + 1) * Dh]
            # scores = (q @ k^T) * scale  (contract Dh; scale applied to f32 scores)
            s = jax.lax.dot_general(
                q, k, (((1,), (1,)), ((), ())),
                preferred_element_type=jnp.float32) * scale
            s = s - jnp.max(s, axis=-1, keepdims=True)
            p = jnp.exp(s)
            p = p * pl.reciprocal(jnp.sum(p, axis=-1, keepdims=True), approx=True)
            o = jnp.dot(p.astype(jnp.bfloat16), v, preferred_element_type=jnp.float32)
            # incremental per-head store (no concat, no all-heads-live f32 epilogue)
            o_ref[w, :, h * Dh:(h + 1) * Dh] = o.astype(o_ref.dtype)


def _tail_kernel(x_ref, g_ref, b_ref, w_ref, hb_ref, o_ref):
    # token mean -> final LayerNorm -> classifier head, for one batch tile.
    x = jnp.mean(x_ref[...].astype(jnp.float32), axis=1)        # (tb, C)
    mu = jnp.mean(x, axis=-1, keepdims=True)
    var = jnp.mean((x - mu) ** 2, axis=-1, keepdims=True)
    y = (x - mu) * jax.lax.rsqrt(var + _LN_EPS) * g_ref[...] + b_ref[...]
    o_ref[...] = jnp.dot(y.astype(jnp.bfloat16), w_ref[...],
                         preferred_element_type=jnp.float32) + hb_ref[...]


# ----------------------------- kernel wrappers ------------------------------ #

def linear(x, w, b, *, gelu=False, residual=None, ln=None):
    """Tiled y = [LN](x) @ w + b with optional fused GELU / residual add.  bf16 I/O."""
    M, K = x.shape
    N = w.shape[1]
    if x.dtype != jnp.bfloat16:
        x = x.astype(jnp.bfloat16)

    if ln is not None and _round_up(K, 128) > _MAX_FUSED_LN_K:
        # Contraction dim too large to hold one full row per k-step: standalone LN.
        x = layernorm(x, ln[0], ln[1])
        ln = None

    tm = _choose_tile(M, (512, 256, 128, 64, 32, 16, 8), 8)
    tn = _choose_tile(N, (512, 256, 128), 128)
    tk = _round_up(K, 128) if ln is not None else _choose_tile(K, (1024, 512, 256, 128), 128)
    Mp, Np, Kp = _round_up(M, tm), _round_up(N, tn), _round_up(K, tk)
    if ln is not None:
        assert Kp == tk   # fused LN requires a single k-step

    def pad2(a, rows, cols):
        r, c = a.shape
        return a if (r, c) == (rows, cols) else jnp.pad(a, ((0, rows - r), (0, cols - c)))

    args = [pad2(x, Mp, Kp), pad2(w, Kp, Np),
            pad2(b.reshape(1, N).astype(jnp.float32), 1, Np)]
    in_specs = [
        pl.BlockSpec((tm, tk), lambda i, j, k: (i, k)),
        pl.BlockSpec((tk, tn), lambda i, j, k: (k, j)),
        pl.BlockSpec((1, tn), lambda i, j, k: (0, j)),
    ]
    if ln is not None:
        g, beta = ln
        args.append(pad2(g.reshape(1, K).astype(jnp.float32), 1, Kp))
        args.append(pad2(beta.reshape(1, K).astype(jnp.float32), 1, Kp))
        in_specs.append(pl.BlockSpec((1, tk), lambda i, j, k: (0, k)))
        in_specs.append(pl.BlockSpec((1, tk), lambda i, j, k: (0, k)))
    if residual is not None:
        args.append(pad2(residual.astype(jnp.bfloat16), Mp, Np))
        # index independent of k -> block stays resident, DMA'd once per (i, j)
        in_specs.append(pl.BlockSpec((tm, tn), lambda i, j, k: (i, j)))

    n_k = Kp // tk
    out = pl.pallas_call(
        functools.partial(_linear_kernel, n_k=n_k, gelu=gelu,
                          has_residual=residual is not None,
                          has_ln=ln is not None, k_true=K),
        out_shape=jax.ShapeDtypeStruct((Mp, Np), jnp.bfloat16),
        grid=(Mp // tm, Np // tn, n_k),
        in_specs=in_specs,
        out_specs=pl.BlockSpec((tm, tn), lambda i, j, k: (i, j)),
        scratch_shapes=[pltpu.VMEM((tm, tn), jnp.float32)],
        compiler_params=pltpu.CompilerParams(
            dimension_semantics=("parallel", "parallel", "arbitrary"),
            vmem_limit_bytes=_vmem_limit()),
    )(*args)
    return out if (Mp, Np) == (M, N) else out[:M, :N]


def layernorm(x, g, b, eps=_LN_EPS):
    """Fallback standalone LayerNorm (bf16 in / bf16 out, f32 math)."""
    M, C = x.shape
    tm = _choose_tile(M, (1024, 512, 256, 128, 64, 32, 16, 8), 8)
    Mp = _round_up(M, tm)
    xp = x if Mp == M else jnp.pad(x, ((0, Mp - M), (0, 0)))
    out = pl.pallas_call(
        functools.partial(_layernorm_kernel, eps=eps),
        out_shape=jax.ShapeDtypeStruct((Mp, C), x.dtype),
        grid=(Mp // tm,),
        in_specs=[pl.BlockSpec((tm, C), lambda i: (i, 0)),
                  pl.BlockSpec((1, C), lambda i: (0, 0)),
                  pl.BlockSpec((1, C), lambda i: (0, 0))],
        out_specs=pl.BlockSpec((tm, C), lambda i: (i, 0)),
        compiler_params=pltpu.CompilerParams(
            dimension_semantics=("parallel",), vmem_limit_bytes=_vmem_limit()),
    )(xp, g.reshape(1, C).astype(jnp.float32), b.reshape(1, C).astype(jnp.float32))
    return out if Mp == M else out[:M]


def attention(qkv, num_heads):
    # qkv: (Bw, S, 3C) bf16 straight from the qkv matmul -> (Bw, S, C) bf16
    Bw, S, threeC = qkv.shape
    C = threeC // 3
    Dh = C // num_heads
    # Batch several windows per grid step (amortize ~0.35us/step + give DMA big blocks).
    bytes_per_window = S * (threeC + C) * 2
    nb = max(1, min(Bw, 8, (2 << 20) // max(bytes_per_window, 1)))
    Bp = _round_up(Bw, nb)
    if Bp != Bw:
        qkv = jnp.pad(qkv, ((0, Bp - Bw), (0, 0), (0, 0)))   # zero windows: safe, sliced off
    out = pl.pallas_call(
        functools.partial(_attn_kernel, num_heads=num_heads, scale=Dh ** -0.5, nb=nb),
        out_shape=jax.ShapeDtypeStruct((Bp, S, C), qkv.dtype),
        grid=(Bp // nb,),
        in_specs=[pl.BlockSpec((nb, S, threeC), lambda b: (b, 0, 0))],
        out_specs=pl.BlockSpec((nb, S, C), lambda b: (b, 0, 0)),
        compiler_params=pltpu.CompilerParams(
            dimension_semantics=("parallel",), vmem_limit_bytes=_vmem_limit()),
    )(qkv)
    return out if Bp == Bw else out[:Bw]


def classifier_tail(x, norm_w, norm_b, head_w, head_b):
    # x: (B, N, C) bf16 -> (B, num_classes) f32; fused mean + LN + head, tiled over batch.
    B, N, C = x.shape
    NC = head_w.shape[1]
    tb = B if B <= 8 else 8
    Bp = _round_up(B, tb)
    if Bp != B:
        x = jnp.pad(x, ((0, Bp - B), (0, 0), (0, 0)))
    out = pl.pallas_call(
        _tail_kernel,
        out_shape=jax.ShapeDtypeStruct((Bp, NC), jnp.float32),
        grid=(Bp // tb,),
        in_specs=[pl.BlockSpec((tb, N, C), lambda i: (i, 0, 0)),
                  pl.BlockSpec((1, C), lambda i: (0, 0)),
                  pl.BlockSpec((1, C), lambda i: (0, 0)),
                  pl.BlockSpec((C, NC), lambda i: (0, 0)),
                  pl.BlockSpec((1, NC), lambda i: (0, 0))],
        out_specs=pl.BlockSpec((tb, NC), lambda i: (i, 0)),
        compiler_params=pltpu.CompilerParams(
            dimension_semantics=("parallel",), vmem_limit_bytes=_vmem_limit()),
    )(x, norm_w.reshape(1, C).astype(jnp.float32), norm_b.reshape(1, C).astype(jnp.float32),
      head_w, head_b.reshape(1, NC).astype(jnp.float32))
    return out if Bp == B else out[:B]


# ----------------------------- plain-JAX glue ------------------------------- #
# TODO(synk): window partition/unpartition could be expressed as BlockSpec index_maps
# over (ws, ws, C) tiles to avoid these XLA 6-D transposes at large resolutions.

def window_partition(x, ws):
    B, H, W, C = x.shape
    pad_h = (ws - H % ws) % ws
    pad_w = (ws - W % ws) % ws
    if pad_h or pad_w:
        x = jnp.pad(x, ((0, 0), (0, pad_h), (0, pad_w), (0, 0)))
    Hp, Wp = H + pad_h, W + pad_w
    x = x.reshape(B, Hp // ws, ws, Wp // ws, ws, C)
    windows = x.transpose(0, 1, 3, 2, 4, 5).reshape(-1, ws, ws, C)
    return windows, (Hp, Wp)


def window_unpartition(windows, ws, pad_hw, hw):
    Hp, Wp = pad_hw
    H, W = hw
    B = windows.shape[0] // (Hp * Wp // ws // ws)
    x = windows.reshape(B, Hp // ws, Wp // ws, ws, ws, -1)
    x = x.transpose(0, 1, 3, 2, 4, 5).reshape(B, Hp, Wp, -1)
    if Hp > H or Wp > W:
        x = x[:, :H, :W, :]
    return x


def block_forward(x, p, window_size, num_heads):
    B, H, W, C = x.shape
    shortcut = x.reshape(-1, C)

    ln1 = (p["ln1_w"], p["ln1_b"])
    needs_pad = window_size > 0 and (H % window_size or W % window_size)
    if needs_pad:
        # LN must precede the zero-padding of window_partition so pad tokens stay exactly 0.
        x_in = layernorm(shortcut, *ln1).reshape(B, H, W, C)
        ln1 = None
    else:
        x_in = x            # LN1 is per-token -> commutes with windowing -> fuse into qkv

    if window_size > 0:
        x_in, pad_hw = window_partition(x_in, window_size)
    Bw, Hw, Ww, _ = x_in.shape
    S = Hw * Ww

    qkv = linear(x_in.reshape(Bw * S, C), p["qkv_w"], p["qkv_b"], ln=ln1)   # (Bw*S, 3C)
    o = attention(qkv.reshape(Bw, S, 3 * C), num_heads)                     # (Bw, S, C)
    o = o.reshape(Bw, Hw, Ww, C)
    if window_size > 0:
        o = window_unpartition(o, window_size, pad_hw, (H, W))
    # proj is per-token, so applying it after unpartition is equivalent; this lets the
    # residual add (x = shortcut + attn(x)) be fused into the matmul epilogue.
    x = linear(o.reshape(-1, C), p["proj_w"], p["proj_b"], residual=shortcut)
    # ln2 fused into the fc1 matmul prologue; fc2 fuses the second residual add.
    z = linear(x, p["fc1_w"], p["fc1_b"], gelu=True, ln=(p["ln2_w"], p["ln2_b"]))
    x = linear(z, p["fc2_w"], p["fc2_b"], residual=x)
    return x.reshape(B, H, W, C)   # drop_path == identity at inference


def simple_vit_forward(x, params, *, patch_size, num_heads, window_size,
                       window_block_indexes):
    B, Cin, H, W = x.shape
    ph = pw = patch_size
    Hp, Wp = H // ph, W // pw

    # PatchEmbed: Conv2d(k=stride=patch) == patch extraction + matmul (NHWC output)
    patches = (
        x.reshape(B, Cin, Hp, ph, Wp, pw)
        .transpose(0, 2, 4, 1, 3, 5)              # (B, Hp, Wp, Cin, ph, pw)
        .reshape(B * Hp * Wp, Cin * ph * pw)
    )
    x = linear(patches, params["patch_w"], params["patch_b"]).reshape(B, Hp, Wp, -1)
    C = x.shape[-1]

    # absolute positional embedding (bf16)
    n_patches = params["pos_embed"].shape[1]
    pps = int(math.sqrt(n_patches))
    assert pps == Hp and pps == Wp
    # TODO(synk): bicubic F.interpolate resize of pos_embed when grid != pretrain grid
    x = x + params["pos_embed"].reshape(1, Hp, Wp, C)

    for i, bp in enumerate(params["blocks"]):
        ws = window_size if i in window_block_indexes else 0
        x = block_forward(x, bp, ws, num_heads)

    # fused, batch-tiled: token mean -> final LayerNorm -> classifier head
    return classifier_tail(x.reshape(B, Hp * Wp, C),
                           params["norm_w"], params["norm_b"],
                           params["head_w"], params["head_b"])


# ----------------------------- parameter init ------------------------------- #

def init_params(key, *, img_size, patch_size, in_chans, embed_dim, depth,
                num_heads, mlp_ratio, num_classes):
    keys = iter(jax.random.split(key, 64))

    def tn(shape, std=0.02):  # trunc_normal_(std=0.02)
        return std * jax.random.truncated_normal(next(keys), -2.0, 2.0, shape,
                                                 jnp.float32)

    n_patches = (img_size // patch_size) ** 2
    hidden = int(embed_dim * mlp_ratio)
    zeros = lambda n: jnp.zeros((n,), jnp.float32)
    ones = lambda n: jnp.ones((n,), jnp.float32)

    params = {
        "pos_embed": tn((1, n_patches, embed_dim)),
        "patch_w": tn((in_chans * patch_size * patch_size, embed_dim)),
        "patch_b": zeros(embed_dim),
        "blocks": [],
        "norm_w": ones(embed_dim), "norm_b": zeros(embed_dim),
        "head_w": tn((embed_dim, num_classes)), "head_b": zeros(num_classes),
    }
    for _ in range(depth):
        params["blocks"].append({
            "ln1_w": ones(embed_dim), "ln1_b": zeros(embed_dim),
            "qkv_w": tn((embed_dim, 3 * embed_dim)), "qkv_b": zeros(3 * embed_dim),
            "proj_w": tn((embed_dim, embed_dim)), "proj_b": zeros(embed_dim),
            "ln2_w": ones(embed_dim), "ln2_b": zeros(embed_dim),
            "fc1_w": tn((embed_dim, hidden)), "fc1_b": zeros(hidden),
            "fc2_w": tn((hidden, embed_dim)), "fc2_b": zeros(embed_dim),
        })
    return params


def prepare_params(params):
    """One-time param-load step: pre-cast matmul operands (weights, pos_embed) to bf16.

    Biases and LayerNorm scale/shift stay f32 (they live in the f32 epilogue / prologue).
    """
    bf16 = lambda a: a.astype(jnp.bfloat16)
    p = dict(params)
    p["pos_embed"] = bf16(params["pos_embed"])
    p["patch_w"] = bf16(params["patch_w"])
    p["head_w"] = bf16(params["head_w"])
    p["blocks"] = []
    for bp in params["blocks"]:
        nbp = dict(bp)
        for k in ("qkv_w", "proj_w", "fc1_w", "fc2_w"):
            nbp[k] = bf16(bp[k])
        p["blocks"].append(nbp)
    return p


# --------------------------------- main ------------------------------------ #

if __name__ == "__main__":
    IMG, PATCH, CIN = 16, 4, 3          # 4x4 patch grid -> 16 tokens
    DIM, DEPTH, HEADS = 32, 4, 4        # head_dim = 8
    WS, WIN_BLOCKS = 2, (0, 2)          # local-window attention in blocks 0 and 2
    NUM_CLASSES = 10
    BATCH = 2

    key = jax.random.PRNGKey(0)
    kx, kp = jax.random.split(key)
    x = jax.random.normal(kx, (BATCH, CIN, IMG, IMG), jnp.float32)   # NCHW, like PyTorch
    params = init_params(kp, img_size=IMG, patch_size=PATCH, in_chans=CIN,
                         embed_dim=DIM, depth=DEPTH, num_heads=HEADS,
                         mlp_ratio=4.0, num_classes=NUM_CLASSES)
    params = prepare_params(params)     # pre-cast matmul weights to bf16 once

    fwd = jax.jit(functools.partial(
        simple_vit_forward, patch_size=PATCH, num_heads=HEADS,
        window_size=WS, window_block_indexes=WIN_BLOCKS))

    out = fwd(x, params)
    jax.block_until_ready(out)
    assert out.shape == (BATCH, NUM_CLASSES) and out.dtype == jnp.float32
    print("KERNEL_OK")
</pallas_src>

<mosaic_0001>
module attributes {stable_mosaic.version = 11 : i64} {
  func.func @_linear_kernel(%arg0: i32, %arg1: i32, %arg2: i32, %arg3: memref<32x128xbf16, #tpu.memory_space<vmem>>, %arg4: memref<128x128xbf16, #tpu.memory_space<vmem>>, %arg5: memref<1x128xf32, #tpu.memory_space<vmem>>, %arg6: memref<32x128xbf16, #tpu.memory_space<vmem>>, %arg7: memref<32x128xf32, #tpu.memory_space<vmem>>) attributes {dimension_semantics = [#tpu.dimension_semantics<parallel>, #tpu.dimension_semantics<parallel>, #tpu.dimension_semantics<arbitrary>], iteration_bounds = array<i64: 1, 1, 1>, scalar_prefetch = 0 : i64, scratch_operands = 1 : i64, tpu.core_type = #tpu.core_type<tc>, window_params = [{transform_indices = @transform_0, window_bounds = array<i64: 32, 128>}, {transform_indices = @transform_1, window_bounds = array<i64: 128, 128>}, {transform_indices = @transform_2, window_bounds = array<i64: 1, 128>}, {transform_indices = @transform_3, window_bounds = array<i64: 32, 128>}]} {
    %c0_i32 = arith.constant 0 : i32
    %0 = arith.cmpi eq, %arg2, %c0_i32 : i32
    %1 = arith.extui %0 : i1 to i32
    %c0_i32_0 = arith.constant 0 : i32
    %2 = arith.cmpi ne, %1, %c0_i32_0 : i32
    scf.if %2 {
      %cst_10 = arith.constant 0.000000e+00 : f32
      %12 = vector.broadcast %cst_10 : f32 to vector<32x128xf32>
      %c0_11 = arith.constant 0 : index
      %c0_12 = arith.constant 0 : index
      %13 = vector.load %arg7[%c0_11, %c0_12] : memref<32x128xf32, #tpu.memory_space<vmem>>, vector<32x128xf32>
      tpu.vector_store %arg7[%c0_11, %c0_12], %12 {strides = array<i32>} : memref<32x128xf32, #tpu.memory_space<vmem>>, vector<32x128xf32>,
    } else {
    }
    %c0 = arith.constant 0 : index
    %c0_1 = arith.constant 0 : index
    %3 = vector.load %arg3[%c0, %c0_1] : memref<32x128xbf16, #tpu.memory_space<vmem>>, vector<32x128xbf16>
    %c0_2 = arith.constant 0 : index
    %c0_3 = arith.constant 0 : index
    %4 = vector.load %arg7[%c0_2, %c0_3] : memref<32x128xf32, #tpu.memory_space<vmem>>, vector<32x128xf32>
    %c0_4 = arith.constant 0 : index
    %c0_5 = arith.constant 0 : index
    %5 = vector.load %arg4[%c0_4, %c0_5] : memref<128x128xbf16, #tpu.memory_space<vmem>>, vector<128x128xbf16>
    %cst = arith.constant dense<0.000000e+00> : vector<32x128xf32>
    %6 = tpu.matmul %3, %5, %cst {dimension_numbers = #tpu.dot_dimension_numbers<[1], [0], [0], [1], [0, 0, 1, 1], [], []>} : vector<32x128xbf16>, vector<128x128xbf16>, vector<32x128xf32> -> vector<32x128xf32>
    %7 = arith.addf %4, %6 : vector<32x128xf32>
    %c0_6 = arith.constant 0 : index
    %c0_7 = arith.constant 0 : index
    %8 = vector.load %arg7[%c0_6, %c0_7] : memref<32x128xf32, #tpu.memory_space<vmem>>, vector<32x128xf32>
    tpu.vector_store %arg7[%c0_6, %c0_7], %7 {strides = array<i32>} : memref<32x128xf32, #tpu.memory_space<vmem>>, vector<32x128xf32>,
    %c0_i32_8 = arith.constant 0 : i32
    %9 = arith.cmpi eq, %arg2, %c0_i32_8 : i32
    %10 = arith.extui %9 : i1 to i32
    %c0_i32_9 = arith.constant 0 : i32
    %11 = arith.cmpi ne, %10, %c0_i32_9 : i32
    scf.if %11 {
      %c0_10 = arith.constant 0 : index
      %c0_11 = arith.constant 0 : index
      %12 = vector.load %arg7[%c0_10, %c0_11] : memref<32x128xf32, #tpu.memory_space<vmem>>, vector<32x128xf32>
      %c0_12 = arith.constant 0 : index
      %c0_13 = arith.constant 0 : index
      %13 = vector.load %arg5[%c0_12, %c0_13] : memref<1x128xf32, #tpu.memory_space<vmem>>, vector<1x128xf32>
      %14 = vector.broadcast %13 : vector<1x128xf32> to vector<32x128xf32>
      %15 = arith.addf %12, %14 : vector<32x128xf32>
      %16 = arith.truncf %15 : vector<32x128xf32> to vector<32x128xbf16>
      %c0_14 = arith.constant 0 : index
      %c0_15 = arith.constant 0 : index
      %17 = vector.load %arg6[%c0_14, %c0_15] : memref<32x128xbf16, #tpu.memory_space<vmem>>, vector<32x128xbf16>
      tpu.vector_store %arg6[%c0_14, %c0_15], %16 {strides = array<i32>} : memref<32x128xbf16, #tpu.memory_space<vmem>>, vector<32x128xbf16>,
    } else {
    }
    return
  }
  func.func @transform_0(%arg0: i32, %arg1: i32, %arg2: i32) -> (i32, i32) {
    %c0_i32 = arith.constant 0 : i32
    return %arg0, %arg2 : i32, i32
  }
  func.func @transform_1(%arg0: i32, %arg1: i32, %arg2: i32) -> (i32, i32) {
    %c0_i32 = arith.constant 0 : i32
    return %arg2, %arg1 : i32, i32
  }
  func.func @transform_2(%arg0: i32, %arg1: i32, %arg2: i32) -> (i32, i32) {
    %c0_i32 = arith.constant 0 : i32
    %c0_i32_0 = arith.constant 0 : i32
    return %c0_i32, %arg1 : i32, i32
  }
  func.func @transform_3(%arg0: i32, %arg1: i32, %arg2: i32) -> (i32, i32) {
    %c0_i32 = arith.constant 0 : i32
    return %arg0, %arg1 : i32, i32
  }
}

module attributes {stable_mosaic.version = 11 : i64} {
  func.func @_linear_kernel(%arg0: i32, %arg1: i32, %arg2: i32, %arg3: memref<32x128xbf16, #tpu.memory_space<vmem>>, %arg4: memref<128x128xbf16, #tpu.memory_space<vmem>>, %arg5: memref<1x128xf32, #tpu.memory_space<vmem>>, %arg6: memref<1x128xf32, #tpu.memory_space<vmem>>, %arg7: memref<1x128xf32, #tpu.memory_space<vmem>>, %arg8: memref<32x128xbf16, #tpu.memory_space<vmem>>, %arg9: memref<32x128xf32, #tpu.memory_space<vmem>>) attributes {dimension_semantics = [#tpu.dimension_semantics<parallel>, #tpu.dimension_semantics<parallel>, #tpu.dimension_semantics<arbitrary>], iteration_bounds = array<i64: 1, 1, 1>, scalar_prefetch = 0 : i64, scratch_operands = 1 : i64, tpu.core_type = #tpu.core_type<tc>, window_params = [{transform_indices = @transform_0, window_bounds = array<i64: 32, 128>}, {transform_indices = @transform_1, window_bounds = array<i64: 128, 128>}, {transform_indices = @transform_2, window_bounds = array<i64: 1, 128>}, {transform_indices = @transform_3, window_bounds = array<i64: 1, 128>}, {transform_indices = @transform_4, window_bounds = array<i64: 1, 128>}, {transform_indices = @transform_5, window_bounds = array<i64: 32, 128>}]} {
    %c0_i32 = arith.constant 0 : i32
    %0 = arith.cmpi eq, %arg2, %c0_i32 : i32
    %1 = arith.extui %0 : i1 to i32
    %c0_i32_0 = arith.constant 0 : i32
    %2 = arith.cmpi ne, %1, %c0_i32_0 : i32
    scf.if %2 {
      %cst_21 = arith.constant 0.000000e+00 : f32
      %43 = vector.broadcast %cst_21 : f32 to vector<32x128xf32>
      %c0_22 = arith.constant 0 : index
      %c0_23 = arith.constant 0 : index
      %44 = vector.load %arg9[%c0_22, %c0_23] : memref<32x128xf32, #tpu.memory_space<vmem>>, vector<32x128xf32>
      tpu.vector_store %arg9[%c0_22, %c0_23], %43 {strides = array<i32>} : memref<32x128xf32, #tpu.memory_space<vmem>>, vector<32x128xf32>,
    } else {
    }
    %c0 = arith.constant 0 : index
    %c0_1 = arith.constant 0 : index
    %3 = vector.load %arg3[%c0, %c0_1] : memref<32x128xbf16, #tpu.memory_space<vmem>>, vector<32x128xbf16>
    %4 = arith.extf %3 : vector<32x128xbf16> to vector<32x128xf32>
    %5 = tpu.iota {dimensions = array<i32: 1>} : vector<32x128xi32>
    %c32_i32 = arith.constant 32 : i32
    %6 = vector.broadcast %c32_i32 : i32 to vector<32x128xi32>
    %7 = arith.cmpi slt, %5, %6 : vector<32x128xi32>
    %cst = arith.constant 0.000000e+00 : f32
    %8 = vector.broadcast %cst : f32 to vector<32x128xf32>
    %9 = arith.select %7, %4, %8 : vector<32x128xi1>, vector<32x128xf32>
    %cst_2 = arith.constant dense<0.000000e+00> : vector<32xf32>
    %10 = vector.multi_reduction <add>, %9, %cst_2 [1] : vector<32x128xf32> to vector<32xf32>
    %11 = vector.shape_cast %10 : vector<32xf32> to vector<32x1xf32>
    %cst_3 = arith.constant 3.125000e-02 : f32
    %12 = vector.broadcast %cst_3 : f32 to vector<32x1xf32>
    %13 = arith.mulf %11, %12 : vector<32x1xf32>
    %14 = vector.broadcast %13 : vector<32x1xf32> to vector<32x128xf32>
    %15 = arith.subf %9, %14 : vector<32x128xf32>
    %cst_4 = arith.constant 0.000000e+00 : f32
    %16 = vector.broadcast %cst_4 : f32 to vector<32x128xf32>
    %17 = arith.select %7, %15, %16 : vector<32x128xi1>, vector<32x128xf32>
    %18 = arith.mulf %17, %17 : vector<32x128xf32>
    %cst_5 = arith.constant dense<0.000000e+00> : vector<32xf32>
    %19 = vector.multi_reduction <add>, %18, %cst_5 [1] : vector<32x128xf32> to vector<32xf32>
    %20 = vector.shape_cast %19 : vector<32xf32> to vector<32x1xf32>
    %cst_6 = arith.constant 3.125000e-02 : f32
    %21 = vector.broadcast %cst_6 : f32 to vector<32x1xf32>
    %22 = arith.mulf %20, %21 : vector<32x1xf32>
    %cst_7 = arith.constant 9.99999974E-6 : f32
    %23 = vector.broadcast %cst_7 : f32 to vector<32x1xf32>
    %24 = arith.addf %22, %23 : vector<32x1xf32>
    %25 = math.rsqrt %24 : vector<32x1xf32>
    %26 = vector.broadcast %25 : vector<32x1xf32> to vector<32x128xf32>
    %27 = arith.mulf %17, %26 : vector<32x128xf32>
    %c0_8 = arith.constant 0 : index
    %c0_9 = arith.constant 0 : index
    %28 = vector.load %arg6[%c0_8, %c0_9] : memref<1x128xf32, #tpu.memory_space<vmem>>, vector<1x128xf32>
    %29 = vector.broadcast %28 : vector<1x128xf32> to vector<32x128xf32>
    %30 = arith.mulf %27, %29 : vector<32x128xf32>
    %c0_10 = arith.constant 0 : index
    %c0_11 = arith.constant 0 : index
    %31 = vector.load %arg7[%c0_10, %c0_11] : memref<1x128xf32, #tpu.memory_space<vmem>>, vector<1x128xf32>
    %32 = vector.broadcast %31 : vector<1x128xf32> to vector<32x128xf32>
    %33 = arith.addf %30, %32 : vector<32x128xf32>
    %34 = arith.truncf %33 : vector<32x128xf32> to vector<32x128xbf16>
    %c0_12 = arith.constant 0 : index
    %c0_13 = arith.constant 0 : index
    %35 = vector.load %arg9[%c0_12, %c0_13] : memref<32x128xf32, #tpu.memory_space<vmem>>, vector<32x128xf32>
    %c0_14 = arith.constant 0 : index
    %c0_15 = arith.constant 0 : index
    %36 = vector.load %arg4[%c0_14, %c0_15] : memref<128x128xbf16, #tpu.memory_space<vmem>>, vector<128x128xbf16>
    %cst_16 = arith.constant dense<0.000000e+00> : vector<32x128xf32>
    %37 = tpu.matmul %34, %36, %cst_16 {dimension_numbers = #tpu.dot_dimension_numbers<[1], [0], [0], [1], [0, 0, 1, 1], [], []>} : vector<32x128xbf16>, vector<128x128xbf16>, vector<32x128xf32> -> vector<32x128xf32>
    %38 = arith.addf %35, %37 : vector<32x128xf32>
    %c0_17 = arith.constant 0 : index
    %c0_18 = arith.constant 0 : index
    %39 = vector.load %arg9[%c0_17, %c0_18] : memref<32x128xf32, #tpu.memory_space<vmem>>, vector<32x128xf32>
    tpu.vector_store %arg9[%c0_17, %c0_18], %38 {strides = array<i32>} : memref<32x128xf32, #tpu.memory_space<vmem>>, vector<32x128xf32>,
    %c0_i32_19 = arith.constant 0 : i32
    %40 = arith.cmpi eq, %arg2, %c0_i32_19 : i32
    %41 = arith.extui %40 : i1 to i32
    %c0_i32_20 = arith.constant 0 : i32
    %42 = arith.cmpi ne, %41, %c0_i32_20 : i32
    scf.if %42 {
      %c0_21 = arith.constant 0 : index
      %c0_22 = arith.constant 0 : index
      %43 = vector.load %arg9[%c0_21, %c0_22] : memref<32x128xf32, #tpu.memory_space<vmem>>, vector<32x128xf32>
      %c0_23 = arith.constant 0 : index
      %c0_24 = arith.constant 0 : index
      %44 = vector.load %arg5[%c0_23, %c0_24] : memref<1x128xf32, #tpu.memory_space<vmem>>, vector<1x128xf32>
      %45 = vector.broadcast %44 : vector<1x128xf32> to vector<32x128xf32>
      %46 = arith.addf %43, %45 : vector<32x128xf32>
      %47 = arith.truncf %46 : vector<32x128xf32> to vector<32x128xbf16>
      %c0_25 = arith.constant 0 : index
      %c0_26 = arith.constant 0 : index
      %48 = vector.load %arg8[%c0_25, %c0_26] : memref<32x128xbf16, #tpu.memory_space<vmem>>, vector<32x128xbf16>
      tpu.vector_store %arg8[%c0_25, %c0_26], %47 {strides = array<i32>} : memref<32x128xbf16, #tpu.memory_space<vmem>>, vector<32x128xbf16>,
    } else {
    }
    return
  }
  func.func @transform_0(%arg0: i32, %arg1: i32, %arg2: i32) -> (i32, i32) {
    %c0_i32 = arith.constant 0 : i32
    return %arg0, %arg2 : i32, i32
  }
  func.func @transform_1(%arg0: i32, %arg1: i32, %arg2: i32) -> (i32, i32) {
    %c0_i32 = arith.constant 0 : i32
    return %arg2, %arg1 : i32, i32
  }
  func.func @transform_2(%arg0: i32, %arg1: i32, %arg2: i32) -> (i32, i32) {
    %c0_i32 = arith.constant 0 : i32
    %c0_i32_0 = arith.constant 0 : i32
    return %c0_i32, %arg1 : i32, i32
  }
  func.func @transform_3(%arg0: i32, %arg1: i32, %arg2: i32) -> (i32, i32) {
    %c0_i32 = arith.constant 0 : i32
    %c0_i32_0 = arith.constant 0 : i32
    return %c0_i32, %arg2 : i32, i32
  }
  func.func @transform_4(%arg0: i32, %arg1: i32, %arg2: i32) -> (i32, i32) {
    %c0_i32 = arith.constant 0 : i32
    %c0_i32_0 = arith.constant 0 : i32
    return %c0_i32, %arg2 : i32, i32
  }
  func.func @transform_5(%arg0: i32, %arg1: i32, %arg2: i32) -> (i32, i32) {
    %c0_i32 = arith.constant 0 : i32
    return %arg0, %arg1 : i32, i32
  }
}

module attributes {stable_mosaic.version = 11 : i64} {
  func.func @_linear_kernel(%arg0: i32, %arg1: i32, %arg2: i32, %arg3: memref<32x128xbf16, #tpu.memory_space<vmem>>, %arg4: memref<128x128xbf16, #tpu.memory_space<vmem>>, %arg5: memref<1x128xf32, #tpu.memory_space<vmem>>, %arg6: memref<32x128xbf16, #tpu.memory_space<vmem>>, %arg7: memref<32x128xbf16, #tpu.memory_space<vmem>>, %arg8: memref<32x128xf32, #tpu.memory_space<vmem>>) attributes {dimension_semantics = [#tpu.dimension_semantics<parallel>, #tpu.dimension_semantics<parallel>, #tpu.dimension_semantics<arbitrary>], iteration_bounds = array<i64: 1, 1, 1>, scalar_prefetch = 0 : i64, scratch_operands = 1 : i64, tpu.core_type = #tpu.core_type<tc>, window_params = [{transform_indices = @transform_0, window_bounds = array<i64: 32, 128>}, {transform_indices = @transform_1, window_bounds = array<i64: 128, 128>}, {transform_indices = @transform_2, window_bounds = array<i64: 1, 128>}, {transform_indices = @transform_3, window_bounds = array<i64: 32, 128>}, {transform_indices = @transform_4, window_bounds = array<i64: 32, 128>}]} {
    %c0_i32 = arith.constant 0 : i32
    %0 = arith.cmpi eq, %arg2, %c0_i32 : i32
    %1 = arith.extui %0 : i1 to i32
    %c0_i32_0 = arith.constant 0 : i32
    %2 = arith.cmpi ne, %1, %c0_i32_0 : i32
    scf.if %2 {
      %cst_10 = arith.constant 0.000000e+00 : f32
      %12 = vector.broadcast %cst_10 : f32 to vector<32x128xf32>
      %c0_11 = arith.constant 0 : index
      %c0_12 = arith.constant 0 : index
      %13 = vector.load %arg8[%c0_11, %c0_12] : memref<32x128xf32, #tpu.memory_space<vmem>>, vector<32x128xf32>
      tpu.vector_store %arg8[%c0_11, %c0_12], %12 {strides = array<i32>} : memref<32x128xf32, #tpu.memory_space<vmem>>, vector<32x128xf32>,
    } else {
    }
    %c0 = arith.constant 0 : index
    %c0_1 = arith.constant 0 : index
    %3 = vector.load %arg3[%c0, %c0_1] : memref<32x128xbf16, #tpu.memory_space<vmem>>, vector<32x128xbf16>
    %c0_2 = arith.constant 0 : index
    %c0_3 = arith.constant 0 : index
    %4 = vector.load %arg8[%c0_2, %c0_3] : memref<32x128xf32, #tpu.memory_space<vmem>>, vector<32x128xf32>
    %c0_4 = arith.constant 0 : index
    %c0_5 = arith.constant 0 : index
    %5 = vector.load %arg4[%c0_4, %c0_5] : memref<128x128xbf16, #tpu.memory_space<vmem>>, vector<128x128xbf16>
    %cst = arith.constant dense<0.000000e+00> : vector<32x128xf32>
    %6 = tpu.matmul %3, %5, %cst {dimension_numbers = #tpu.dot_dimension_numbers<[1], [0], [0], [1], [0, 0, 1, 1], [], []>} : vector<32x128xbf16>, vector<128x128xbf16>, vector<32x128xf32> -> vector<32x128xf32>
    %7 = arith.addf %4, %6 : vector<32x128xf32>
    %c0_6 = arith.constant 0 : index
    %c0_7 = arith.constant 0 : index
    %8 = vector.load %arg8[%c0_6, %c0_7] : memref<32x128xf32, #tpu.memory_space<vmem>>, vector<32x128xf32>
    tpu.vector_store %arg8[%c0_6, %c0_7], %7 {strides = array<i32>} : memref<32x128xf32, #tpu.memory_space<vmem>>, vector<32x128xf32>,
    %c0_i32_8 = arith.constant 0 : i32
    %9 = arith.cmpi eq, %arg2, %c0_i32_8 : i32
    %10 = arith.extui %9 : i1 to i32
    %c0_i32_9 = arith.constant 0 : i32
    %11 = arith.cmpi ne, %10, %c0_i32_9 : i32
    scf.if %11 {
      %c0_10 = arith.constant 0 : index
      %c0_11 = arith.constant 0 : index
      %12 = vector.load %arg8[%c0_10, %c0_11] : memref<32x128xf32, #tpu.memory_space<vmem>>, vector<32x128xf32>
      %c0_12 = arith.constant 0 : index
      %c0_13 = arith.constant 0 : index
      %13 = vector.load %arg5[%c0_12, %c0_13] : memref<1x128xf32, #tpu.memory_space<vmem>>, vector<1x128xf32>
      %14 = vector.broadcast %13 : vector<1x128xf32> to vector<32x128xf32>
      %15 = arith.addf %12, %14 : vector<32x128xf32>
      %c0_14 = arith.constant 0 : index
      %c0_15 = arith.constant 0 : index
      %16 = vector.load %arg6[%c0_14, %c0_15] : memref<32x128xbf16, #tpu.memory_space<vmem>>, vector<32x128xbf16>
      %17 = arith.extf %16 : vector<32x128xbf16> to vector<32x128xf32>
      %18 = arith.addf %15, %17 : vector<32x128xf32>
      %19 = arith.truncf %18 : vector<32x128xf32> to vector<32x128xbf16>
      %c0_16 = arith.constant 0 : index
      %c0_17 = arith.constant 0 : index
      %20 = vector.load %arg7[%c0_16, %c0_17] : memref<32x128xbf16, #tpu.memory_space<vmem>>, vector<32x128xbf16>
      tpu.vector_store %arg7[%c0_16, %c0_17], %19 {strides = array<i32>} : memref<32x128xbf16, #tpu.memory_space<vmem>>, vector<32x128xbf16>,
    } else {
    }
    return
  }
  func.func @transform_0(%arg0: i32, %arg1: i32, %arg2: i32) -> (i32, i32) {
    %c0_i32 = arith.constant 0 : i32
    return %arg0, %arg2 : i32, i32
  }
  func.func @transform_1(%arg0: i32, %arg1: i32, %arg2: i32) -> (i32, i32) {
    %c0_i32 = arith.constant 0 : i32
    return %arg2, %arg1 : i32, i32
  }
  func.func @transform_2(%arg0: i32, %arg1: i32, %arg2: i32) -> (i32, i32) {
    %c0_i32 = arith.constant 0 : i32
    %c0_i32_0 = arith.constant 0 : i32
    return %c0_i32, %arg1 : i32, i32
  }
  func.func @transform_3(%arg0: i32, %arg1: i32, %arg2: i32) -> (i32, i32) {
    %c0_i32 = arith.constant 0 : i32
    return %arg0, %arg1 : i32, i32
  }
  func.func @transform_4(%arg0: i32, %arg1: i32, %arg2: i32) -> (i32, i32) {
    %c0_i32 = arith.constant 0 : i32
    return %arg0, %arg1 : i32, i32
  }
}

module attributes {stable_mosaic.version = 11 : i64} {
  func.func @_attn_kernel(%arg0: i32, %arg1: memref<8x4x96xbf16, #tpu.memory_space<vmem>>, %arg2: memref<8x4x32xbf16, #tpu.memory_space<vmem>>) attributes {dimension_semantics = [#tpu.dimension_semantics<parallel>], iteration_bounds = array<i64: 1>, scalar_prefetch = 0 : i64, scratch_operands = 0 : i64, tpu.core_type = #tpu.core_type<tc>, window_params = [{transform_indices = @transform_0, window_bounds = array<i64: 8, 4, 96>}, {transform_indices = @transform_1, window_bounds = array<i64: 8, 4, 32>}]} {
    %c0 = arith.constant 0 : index
    %c0_0 = arith.constant 0 : index
    %c0_1 = arith.constant 0 : index
    %0 = vector.load %arg1[%c0, %c0_0, %c0_1] : memref<8x4x96xbf16, #tpu.memory_space<vmem>>, vector<1x4x96xbf16>
    %1 = vector.shape_cast %0 : vector<1x4x96xbf16> to vector<4x96xbf16>
    %2 = vector.extract_strided_slice %1 {offsets = [0, 0], sizes = [4, 8], strides = [1, 1]} : vector<4x96xbf16> to vector<4x8xbf16>
    %3 = vector.extract_strided_slice %1 {offsets = [0, 32], sizes = [4, 8], strides = [1, 1]} : vector<4x96xbf16> to vector<4x8xbf16>
    %4 = vector.extract_strided_slice %1 {offsets = [0, 64], sizes = [4, 8], strides = [1, 1]} : vector<4x96xbf16> to vector<4x8xbf16>
    %cst = arith.constant dense<0.000000e+00> : vector<4x4xf32>
    %5 = tpu.matmul %2, %3, %cst {dimension_numbers = #tpu.dot_dimension_numbers<[1], [1], [0], [0], [0, 0, 1, 0], [], []>} : vector<4x8xbf16>, vector<4x8xbf16>, vector<4x4xf32> -> vector<4x4xf32>
    %cst_2 = arith.constant 0.353553385 : f32
    %6 = vector.broadcast %cst_2 : f32 to vector<4x4xf32>
    %7 = arith.mulf %5, %6 : vector<4x4xf32>
    %cst_3 = arith.constant dense<0xFF800000> : vector<4xf32>
    %8 = vector.multi_reduction <maximumf>, %7, %cst_3 [1] : vector<4x4xf32> to vector<4xf32>
    %9 = vector.shape_cast %8 : vector<4xf32> to vector<4x1xf32>
    %10 = vector.broadcast %9 : vector<4x1xf32> to vector<4x4xf32>
    %11 = arith.subf %7, %10 : vector<4x4xf32>
    %12 = math.exp %11 : vector<4x4xf32>
    %cst_4 = arith.constant dense<0.000000e+00> : vector<4xf32>
    %13 = vector.multi_reduction <add>, %12, %cst_4 [1] : vector<4x4xf32> to vector<4xf32>
    %14 = vector.shape_cast %13 : vector<4xf32> to vector<4x1xf32>
    %15 = tpu.reciprocal %14 {approx = true} : vector<4x1xf32> -> vector<4x1xf32>
    %16 = vector.broadcast %15 : vector<4x1xf32> to vector<4x4xf32>
    %17 = arith.mulf %12, %16 : vector<4x4xf32>
    %18 = arith.truncf %17 : vector<4x4xf32> to vector<4x4xbf16>
    %cst_5 = arith.constant dense<0.000000e+00> : vector<4x8xf32>
    %19 = tpu.matmul %18, %4, %cst_5 {dimension_numbers = #tpu.dot_dimension_numbers<[1], [0], [0], [1], [0, 0, 1, 1], [], []>} : vector<4x4xbf16>, vector<4x8xbf16>, vector<4x8xf32> -> vector<4x8xf32>
    %20 = arith.truncf %19 : vector<4x8xf32> to vector<4x8xbf16>
    %c0_6 = arith.constant 0 : index
    %c0_7 = arith.constant 0 : index
    %c0_8 = arith.constant 0 : index
    %21 = vector.load %arg2[%c0_6, %c0_7, %c0_8] : memref<8x4x32xbf16, #tpu.memory_space<vmem>>, vector<1x4x8xbf16>
    %22 = vector.shape_cast %21 : vector<1x4x8xbf16> to vector<4x8xbf16>
    %23 = vector.shape_cast %20 : vector<4x8xbf16> to vector<1x4x8xbf16>
    tpu.vector_store %arg2[%c0_6, %c0_7, %c0_8], %23 {strides = array<i32>} : memref<8x4x32xbf16, #tpu.memory_space<vmem>>, vector<1x4x8xbf16>,
    %24 = vector.extract_strided_slice %1 {offsets = [0, 8], sizes = [4, 8], strides = [1, 1]} : vector<4x96xbf16> to vector<4x8xbf16>
    %25 = vector.extract_strided_slice %1 {offsets = [0, 40], sizes = [4, 8], strides = [1, 1]} : vector<4x96xbf16> to vector<4x8xbf16>
    %26 = vector.extract_strided_slice %1 {offsets = [0, 72], sizes = [4, 8], strides = [1, 1]} : vector<4x96xbf16> to vector<4x8xbf16>
    %cst_9 = arith.constant dense<0.000000e+00> : vector<4x4xf32>
    %27 = tpu.matmul %24, %25, %cst_9 {dimension_numbers = #tpu.dot_dimension_numbers<[1], [1], [0], [0], [0, 0, 1, 0], [], []>} : vector<4x8xbf16>, vector<4x8xbf16>, vector<4x4xf32> -> vector<4x4xf32>
    %cst_10 = arith.constant 0.353553385 : f32
    %28 = vector.broadcast %cst_10 : f32 to vector<4x4xf32>
    %29 = arith.mulf %27, %28 : vector<4x4xf32>
    %cst_11 = arith.constant dense<0xFF800000> : vector<4xf32>
    %30 = vector.multi_reduction <maximumf>, %29, %cst_11 [1] : vector<4x4xf32> to vector<4xf32>
    %31 = vector.shape_cast %30 : vector<4xf32> to vector<4x1xf32>
    %32 = vector.broadcast %31 : vector<4x1xf32> to vector<4x4xf32>
    %33 = arith.subf %29, %32 : vector<4x4xf32>
    %34 = math.exp %33 : vector<4x4xf32>
    %cst_12 = arith.constant dense<0.000000e+00> : vector<4xf32>
    %35 = vector.multi_reduction <add>, %34, %cst_12 [1] : vector<4x4xf32> to vector<4xf32>
    %36 = vector.shape_cast %35 : vector<4xf32> to vector<4x1xf32>
    %37 = tpu.reciprocal %36 {approx = true} : vector<4x1xf32> -> vector<4x1xf32>
    %38 = vector.broadcast %37 : vector<4x1xf32> to vector<4x4xf32>
    %39 = arith.mulf %34, %38 : vector<4x4xf32>
    %40 = arith.truncf %39 : vector<4x4xf32> to vector<4x4xbf16>
    %cst_13 = arith.constant dense<0.000000e+00> : vector<4x8xf32>
    %41 = tpu.matmul %40, %26, %cst_13 {dimension_numbers = #tpu.dot_dimension_numbers<[1], [0], [0], [1], [0, 0, 1, 1], [], []>} : vector<4x4xbf16>, vector<4x8xbf16>, vector<4x8xf32> -> vector<4x8xf32>
    %42 = arith.truncf %41 : vector<4x8xf32> to vector<4x8xbf16>
    %c0_14 = arith.constant 0 : index
    %c0_15 = arith.constant 0 : index
    %c8 = arith.constant 8 : index
    %43 = vector.load %arg2[%c0_14, %c0_15, %c8] : memref<8x4x32xbf16, #tpu.memory_space<vmem>>, vector<1x4x8xbf16>
    %44 = vector.shape_cast %43 : vector<1x4x8xbf16> to vector<4x8xbf16>
    %45 = vector.shape_cast %42 : vector<4x8xbf16> to vector<1x4x8xbf16>
    tpu.vector_store %arg2[%c0_14, %c0_15, %c8], %45 {strides = array<i32>} : memref<8x4x32xbf16, #tpu.memory_space<vmem>>, vector<1x4x8xbf16>,
    %46 = vector.extract_strided_slice %1 {offsets = [0, 16], sizes = [4, 8], strides = [1, 1]} : vector<4x96xbf16> to vector<4x8xbf16>
    %47 = vector.extract_strided_slice %1 {offsets = [0, 48], sizes = [4, 8], strides = [1, 1]} : vector<4x96xbf16> to vector<4x8xbf16>
    %48 = vector.extract_strided_slice %1 {offsets = [0, 80], sizes = [4, 8], strides = [1, 1]} : vector<4x96xbf16> to vector<4x8xbf16>
    %cst_16 = arith.constant dense<0.000000e+00> : vector<4x4xf32>
    %49 = tpu.matmul %46, %47, %cst_16 {dimension_numbers = #tpu.dot_dimension_numbers<[1], [1], [0], [0], [0, 0, 1, 0], [], []>} : vector<4x8xbf16>, vector<4x8xbf16>, vector<4x4xf32> -> vector<4x4xf32>
    %cst_17 = arith.constant 0.353553385 : f32
    %50 = vector.broadcast %cst_17 : f32 to vector<4x4xf32>
    %51 = arith.mulf %49, %50 : vector<4x4xf32>
    %cst_18 = arith.constant dense<0xFF800000> : vector<4xf32>
    %52 = vector.multi_reduction <maximumf>, %51, %cst_18 [1] : vector<4x4xf32> to vector<4xf32>
    %53 = vector.shape_cast %52 : vector<4xf32> to vector<4x1xf32>
    %54 = vector.broadcast %53 : vector<4x1xf32> to vector<4x4xf32>
    %55 = arith.subf %51, %54 : vector<4x4xf32>
    %56 = math.exp %55 : vector<4x4xf32>
    %cst_19 = arith.constant dense<0.000000e+00> : vector<4xf32>
    %57 = vector.multi_reduction <add>, %56, %cst_19 [1] : vector<4x4xf32> to vector<4xf32>
    %58 = vector.shape_cast %57 : vector<4xf32> to vector<4x1xf32>
    %59 = tpu.reciprocal %58 {approx = true} : vector<4x1xf32> -> vector<4x1xf32>
    %60 = vector.broadcast %59 : vector<4x1xf32> to vector<4x4xf32>
    %61 = arith.mulf %56, %60 : vector<4x4xf32>
    %62 = arith.truncf %61 : vector<4x4xf32> to vector<4x4xbf16>
    %cst_20 = arith.constant dense<0.000000e+00> : vector<4x8xf32>
    %63 = tpu.matmul %62, %48, %cst_20 {dimension_numbers = #tpu.dot_dimension_numbers<[1], [0], [0], [1], [0, 0, 1, 1], [], []>} : vector<4x4xbf16>, vector<4x8xbf16>, vector<4x8xf32> -> vector<4x8xf32>
    %64 = arith.truncf %63 : vector<4x8xf32> to vector<4x8xbf16>
    %c0_21 = arith.constant 0 : index
    %c0_22 = arith.constant 0 : index
    %c16 = arith.constant 16 : index
    %65 = vector.load %arg2[%c0_21, %c0_22, %c16] : memref<8x4x32xbf16, #tpu.memory_space<vmem>>, vector<1x4x8xbf16>
    %66 = vector.shape_cast %65 : vector<1x4x8xbf16> to vector<4x8xbf16>
    %67 = vector.shape_cast %64 : vector<4x8xbf16> to vector<1x4x8xbf16>
    tpu.vector_store %arg2[%c0_21, %c0_22, %c16], %67 {strides = array<i32>} : memref<8x4x32xbf16, #tpu.memory_space<vmem>>, vector<1x4x8xbf16>,
    %68 = vector.extract_strided_slice %1 {offsets = [0, 24], sizes = [4, 8], strides = [1, 1]} : vector<4x96xbf16> to vector<4x8xbf16>
    %69 = vector.extract_strided_slice %1 {offsets = [0, 56], sizes = [4, 8], strides = [1, 1]} : vector<4x96xbf16> to vector<4x8xbf16>
    %70 = vector.extract_strided_slice %1 {offsets = [0, 88], sizes = [4, 8], strides = [1, 1]} : vector<4x96xbf16> to vector<4x8xbf16>
    %cst_23 = arith.constant dense<0.000000e+00> : vector<4x4xf32>
    %71 = tpu.matmul %68, %69, %cst_23 {dimension_numbers = #tpu.dot_dimension_numbers<[1], [1], [0], [0], [0, 0, 1, 0], [], []>} : vector<4x8xbf16>, vector<4x8xbf16>, vector<4x4xf32> -> vector<4x4xf32>
    %cst_24 = arith.constant 0.353553385 : f32
    %72 = vector.broadcast %cst_24 : f32 to vector<4x4xf32>
    %73 = arith.mulf %71, %72 : vector<4x4xf32>
    %cst_25 = arith.constant dense<0xFF800000> : vector<4xf32>
    %74 = vector.multi_reduction <maximumf>, %73, %cst_25 [1] : vector<4x4xf32> to vector<4xf32>
    %75 = vector.shape_cast %74 : vector<4xf32> to vector<4x1xf32>
    %76 = vector.broadcast %75 : vector<4x1xf32> to vector<4x4xf32>
    %77 = arith.subf %73, %76 : vector<4x4xf32>
    %78 = math.exp %77 : vector<4x4xf32>
    %cst_26 = arith.constant dense<0.000000e+00> : vector<4xf32>
    %79 = vector.multi_reduction <add>, %78, %cst_26 [1] : vector<4x4xf32> to vector<4xf32>
    %80 = vector.shape_cast %79 : vector<4xf32> to vector<4x1xf32>
    %81 = tpu.reciprocal %80 {approx = true} : vector<4x1xf32> -> vector<4x1xf32>
    %82 = vector.broadcast %81 : vector<4x1xf32> to vector<4x4xf32>
    %83 = arith.mulf %78, %82 : vector<4x4xf32>
    %84 = arith.truncf %83 : vector<4x4xf32> to vector<4x4xbf16>
    %cst_27 = arith.constant dense<0.000000e+00> : vector<4x8xf32>
    %85 = tpu.matmul %84, %70, %cst_27 {dimension_numbers = #tpu.dot_dimension_numbers<[1], [0], [0], [1], [0, 0, 1, 1], [], []>} : vector<4x4xbf16>, vector<4x8xbf16>, vector<4x8xf32> -> vector<4x8xf32>
    %86 = arith.truncf %85 : vector<4x8xf32> to vector<4x8xbf16>
    %c0_28 = arith.constant 0 : index
    %c0_29 = arith.constant 0 : index
    %c24 = arith.constant 24 : index
    %87 = vector.load %arg2[%c0_28, %c0_29, %c24] : memref<8x4x32xbf16, #tpu.memory_space<vmem>>, vector<1x4x8xbf16>
    %88 = vector.shape_cast %87 : vector<1x4x8xbf16> to vector<4x8xbf16>
    %89 = vector.shape_cast %86 : vector<4x8xbf16> to vector<1x4x8xbf16>
    tpu.vector_store %arg2[%c0_28, %c0_29, %c24], %89 {strides = array<i32>} : memref<8x4x32xbf16, #tpu.memory_space<vmem>>, vector<1x4x8xbf16>,
    %c1 = arith.constant 1 : index
    %c0_30 = arith.constant 0 : index
    %c0_31 = arith.constant 0 : index
    %90 = vector.load %arg1[%c1, %c0_30, %c0_31] : memref<8x4x96xbf16, #tpu.memory_space<vmem>>, vector<1x4x96xbf16>
    %91 = vector.shape_cast %90 : vector<1x4x96xbf16> to vector<4x96xbf16>
    %92 = vector.extract_strided_slice %91 {offsets = [0, 0], sizes = [4, 8], strides = [1, 1]} : vector<4x96xbf16> to vector<4x8xbf16>
    %93 = vector.extract_strided_slice %91 {offsets = [0, 32], sizes = [4, 8], strides = [1, 1]} : vector<4x96xbf16> to vector<4x8xbf16>
    %94 = vector.extract_strided_slice %91 {offsets = [0, 64], sizes = [4, 8], strides = [1, 1]} : vector<4x96xbf16> to vector<4x8xbf16>
    %cst_32 = arith.constant dense<0.000000e+00> : vector<4x4xf32>
    %95 = tpu.matmul %92, %93, %cst_32 {dimension_numbers = #tpu.dot_dimension_numbers<[1], [1], [0], [0], [0, 0, 1, 0], [], []>} : vector<4x8xbf16>, vector<4x8xbf16>, vector<4x4xf32> -> vector<4x4xf32>
    %cst_33 = arith.constant 0.353553385 : f32
    %96 = vector.broadcast %cst_33 : f32 to vector<4x4xf32>
    %97 = arith.mulf %95, %96 : vector<4x4xf32>
    %cst_34 = arith.constant dense<0xFF800000> : vector<4xf32>
    %98 = vector.multi_reduction <maximumf>, %97, %cst_34 [1] : vector<4x4xf32> to vector<4xf32>
    %99 = vector.shape_cast %98 : vector<4xf32> to vector<4x1xf32>
    %100 = vector.broadcast %99 : vector<4x1xf32> to vector<4x4xf32>
    %101 = arith.subf %97, %100 : vector<4x4xf32>
    %102 = math.exp %101 : vector<4x4xf32>
    %cst_35 = arith.constant dense<0.000000e+00> : vector<4xf32>
    %103 = vector.multi_reduction <add>, %102, %cst_35 [1] : vector<4x4xf32> to vector<4xf32>
    %104 = vector.shape_cast %103 : vector<4xf32> to vector<4x1xf32>
    %105 = tpu.reciprocal %104 {approx = true} : vector<4x1xf32> -> vector<4x1xf32>
    %106 = vector.broadcast %105 : vector<4x1xf32> to vector<4x4xf32>
    %107 = arith.mulf %102, %106 : vector<4x4xf32>
    %108 = arith.truncf %107 : vector<4x4xf32> to vector<4x4xbf16>
    %cst_36 = arith.constant dense<0.000000e+00> : vector<4x8xf32>
    %109 = tpu.matmul %108, %94, %cst_36 {dimension_numbers = #tpu.dot_dimension_numbers<[1], [0], [0], [1], [0, 0, 1, 1], [], []>} : vector<4x4xbf16>, vector<4x8xbf16>, vector<4x8xf32> -> vector<4x8xf32>
    %110 = arith.truncf %109 : vector<4x8xf32> to vector<4x8xbf16>
    %c1_37 = arith.constant 1 : index
    %c0_38 = arith.constant 0 : index
    %c0_39 = arith.constant 0 : index
    %111 = vector.load %arg2[%c1_37, %c0_38, %c0_39] : memref<8x4x32xbf16, #tpu.memory_space<vmem>>, vector<1x4x8xbf16>
    %112 = vector.shape_cast %111 : vector<1x4x8xbf16> to vector<4x8xbf16>
    %113 = vector.shape_cast %110 : vector<4x8xbf16> to vector<1x4x8xbf16>
    tpu.vector_store %arg2[%c1_37, %c0_38, %c0_39], %113 {strides = array<i32>} : memref<8x4x32xbf16, #tpu.memory_space<vmem>>, vector<1x4x8xbf16>,
    %114 = vector.extract_strided_slice %91 {offsets = [0, 8], sizes = [4, 8], strides = [1, 1]} : vector<4x96xbf16> to vector<4x8xbf16>
    %115 = vector.extract_strided_slice %91 {offsets = [0, 40], sizes = [4, 8], strides = [1, 1]} : vector<4x96xbf16> to vector<4x8xbf16>
    %116 = vector.extract_strided_slice %91 {offsets = [0, 72], sizes = [4, 8], strides = [1, 1]} : vector<4x96xbf16> to vector<4x8xbf16>
    %cst_40 = arith.constant dense<0.000000e+00> : vector<4x4xf32>
    %117 = tpu.matmul %114, %115, %cst_40 {dimension_numbers = #tpu.dot_dimension_numbers<[1], [1], [0], [0], [0, 0, 1, 0], [], []>} : vector<4x8xbf16>, vector<4x8xbf16>, vector<4x4xf32> -> vector<4x4xf32>
    %cst_41 = arith.constant 0.353553385 : f32
    %118 = vector.broadcast %cst_41 : f32 to vector<4x4xf32>
    %119 = arith.mulf %117, %118 : vector<4x4xf32>
    %cst_42 = arith.constant dense<0xFF800000> : vector<4xf32>
    %120 = vector.multi_reduction <maximumf>, %119, %cst_42 [1] : vector<4x4xf32> to vector<4xf32>
    %121 = vector.shape_cast %120 : vector<4xf32> to vector<4x1xf32>
    %122 = vector.broadcast %121 : vector<4x1xf32> to vector<4x4xf32>
    %123 = arith.subf %119, %122 : vector<4x4xf32>
    %124 = math.exp %123 : vector<4x4xf32>
    %cst_43 = arith.constant dense<0.000000e+00> : vector<4xf32>
    %125 = vector.multi_reduction <add>, %124, %cst_43 [1] : vector<4x4xf32> to vector<4xf32>
    %126 = vector.shape_cast %125 : vector<4xf32> to vector<4x1xf32>
    %127 = tpu.reciprocal %126 {approx = true} : vector<4x1xf32> -> vector<4x1xf32>
    %128 = vector.broadcast %127 : vector<4x1xf32> to vector<4x4xf32>
    %129 = arith.mulf %124, %128 : vector<4x4xf32>
    %130 = arith.truncf %129 : vector<4x4xf32> to vector<4x4xbf16>
    %cst_44 = arith.constant dense<0.000000e+00> : vector<4x8xf32>
    %131 = tpu.matmul %130, %116, %cst_44 {dimension_numbers = #tpu.dot_dimension_numbers<[1], [0], [0], [1], [0, 0, 1, 1], [], []>} : vector<4x4xbf16>, vector<4x8xbf16>, vector<4x8xf32> -> vector<4x8xf32>
    %132 = arith.truncf %131 : vector<4x8xf32> to vector<4x8xbf16>
    %c1_45 = arith.constant 1 : index
    %c0_46 = arith.constant 0 : index
    %c8_47 = arith.constant 8 : index
    %133 = vector.load %arg2[%c1_45, %c0_46, %c8_47] : memref<8x4x32xbf16, #tpu.memory_space<vmem>>, vector<1x4x8xbf16>
    %134 = vector.shape_cast %133 : vector<1x4x8xbf16> to vector<4x8xbf16>
    %135 = vector.shape_cast %132 : vector<4x8xbf16> to vector<1x4x8xbf16>
    tpu.vector_store %arg2[%c1_45, %c0_46, %c8_47], %135 {strides = array<i32>} : memref<8x4x32xbf16, #tpu.memory_space<vmem>>, vector<1x4x8xbf16>,
    %136 = vector.extract_strided_slice %91 {offsets = [0, 16], sizes = [4, 8], strides = [1, 1]} : vector<4x96xbf16> to vector<4x8xbf16>
    %137 = vector.extract_strided_slice %91 {offsets = [0, 48], sizes = [4, 8], strides = [1, 1]} : vector<4x96xbf16> to vector<4x8xbf16>
    %138 = vector.extract_strided_slice %91 {offsets = [0, 80], sizes = [4, 8], strides = [1, 1]} : vector<4x96xbf16> to vector<4x8xbf16>
    %cst_48 = arith.constant dense<0.000000e+00> : vector<4x4xf32>
    %139 = tpu.matmul %136, %137, %cst_48 {dimension_numbers = #tpu.dot_dimension_numbers<[1], [1], [0], [0], [0, 0, 1, 0], [], []>} : vector<4x8xbf16>, vector<4x8xbf16>, vector<4x4xf32> -> vector<4x4xf32>
    %cst_49 = arith.constant 0.353553385 : f32
    %140 = vector.broadcast %cst_49 : f32 to vector<4x4xf32>
    %141 = arith.mulf %139, %140 : vector<4x4xf32>
    %cst_50 = arith.constant dense<0xFF800000> : vector<4xf32>
    %142 = vector.multi_reduction <maximumf>, %141, %cst_50 [1] : vector<4x4xf32> to vector<4xf32>
    %143 = vector.shape_cast %142 : vector<4xf32> to vector<4x1xf32>
    %144 = vector.broadcast %143 : vector<4x1xf32> to vector<4x4xf32>
    %145 = arith.subf %141, %144 : vector<4x4xf32>
    %146 = math.exp %145 : vector<4x4xf32>
    %cst_51 = arith.constant dense<0.000000e+00> : vector<4xf32>
    %147 = vector.multi_reduction <add>, %146, %cst_51 [1] : vector<4x4xf32> to vector<4xf32>
    %148 = vector.shape_cast %147 : vector<4xf32> to vector<4x1xf32>
    %149 = tpu.reciprocal %148 {approx = true} : vector<4x1xf32> -> vector<4x1xf32>
    %150 = vector.broadcast %149 : vector<4x1xf32> to vector<4x4xf32>
    %151 = arith.mulf %146, %150 : vector<4x4xf32>
    %152 = arith.truncf %151 : vector<4x4xf32> to vector<4x4xbf16>
    %cst_52 = arith.constant dense<0.000000e+00> : vector<4x8xf32>
    %153 = tpu.matmul %152, %138, %cst_52 {dimension_numbers = #tpu.dot_dimension_numbers<[1], [0], [0], [1], [0, 0, 1, 1], [], []>} : vector<4x4xbf16>, vector<4x8xbf16>, vector<4x8xf32> -> vector<4x8xf32>
    %154 = arith.truncf %153 : vector<4x8xf32> to vector<4x8xbf16>
    %c1_53 = arith.constant 1 : index
    %c0_54 = arith.constant 0 : index
    %c16_55 = arith.constant 16 : index
    %155 = vector.load %arg2[%c1_53, %c0_54, %c16_55] : memref<8x4x32xbf16, #tpu.memory_space<vmem>>, vector<1x4x8xbf16>
    %156 = vector.shape_cast %155 : vector<1x4x8xbf16> to vector<4x8xbf16>
    %157 = vector.shape_cast %154 : vector<4x8xbf16> to vector<1x4x8xbf16>
    tpu.vector_store %arg2[%c1_53, %c0_54, %c16_55], %157 {strides = array<i32>} : memref<8x4x32xbf16, #tpu.memory_space<vmem>>, vector<1x4x8xbf16>,
    %158 = vector.extract_strided_slice %91 {offsets = [0, 24], sizes = [4, 8], strides = [1, 1]} : vector<4x96xbf16> to vector<4x8xbf16>
    %159 = vector.extract_strided_slice %91 {offsets = [0, 56], sizes = [4, 8], strides = [1, 1]} : vector<4x96xbf16> to vector<4x8xbf16>
    %160 = vector.extract_strided_slice %91 {offsets = [0, 88], sizes = [4, 8], strides = [1, 1]} : vector<4x96xbf16> to vector<4x8xbf16>
    %cst_56 = arith.constant dense<0.000000e+00> : vector<4x4xf32>
    %161 = tpu.matmul %158, %159, %cst_56 {dimension_numbers = #tpu.dot_dimension_numbers<[1], [1], [0], [0], [0, 0, 1, 0], [], []>} : vector<4x8xbf16>, vector<4x8xbf16>, vector<4x4xf32> -> vector<4x4xf32>
    %cst_57 = arith.constant 0.353553385 : f32
    %162 = vector.broadcast %cst_57 : f32 to vector<4x4xf32>
    %163 = arith.mulf %161, %162 : vector<4x4xf32>
    %cst_58 = arith.constant dense<0xFF800000> : vector<4xf32>
    %164 = vector.multi_reduction <maximumf>, %163, %cst_58 [1] : vector<4x4xf32> to vector<4xf32>
    %165 = vector.shape_cast %164 : vector<4xf32> to vector<4x1xf32>
    %166 = vector.broadcast %165 : vector<4x1xf32> to vector<4x4xf32>
    %167 = arith.subf %163, %166 : vector<4x4xf32>
    %168 = math.exp %167 : vector<4x4xf32>
    %cst_59 = arith.constant dense<0.000000e+00> : vector<4xf32>
    %169 = vector.multi_reduction <add>, %168, %cst_59 [1] : vector<4x4xf32> to vector<4xf32>
    %170 = vector.shape_cast %169 : vector<4xf32> to vector<4x1xf32>
    %171 = tpu.reciprocal %170 {approx = true} : vector<4x1xf32> -> vector<4x1xf32>
    %172 = vector.broadcast %171 : vector<4x1xf32> to vector<4x4xf32>
    %173 = arith.mulf %168, %172 : vector<4x4xf32>
    %174 = arith.truncf %173 : vector<4x4xf32> to vector<4x4xbf16>
    %cst_60 = arith.constant dense<0.000000e+00> : vector<4x8xf32>
    %175 = tpu.matmul %174, %160, %cst_60 {dimension_numbers = #tpu.dot_dimension_numbers<[1], [0], [0], [1], [0, 0, 1, 1], [], []>} : vector<4x4xbf16>, vector<4x8xbf16>, vector<4x8xf32> -> vector<4x8xf32>
    %176 = arith.truncf %175 : vector<4x8xf32> to vector<4x8xbf16>
    %c1_61 = arith.constant 1 : index
    %c0_62 = arith.constant 0 : index
    %c24_63 = arith.constant 24 : index
    %177 = vector.load %arg2[%c1_61, %c0_62, %c24_63] : memref<8x4x32xbf16, #tpu.memory_space<vmem>>, vector<1x4x8xbf16>
    %178 = vector.shape_cast %177 : vector<1x4x8xbf16> to vector<4x8xbf16>
    %179 = vector.shape_cast %176 : vector<4x8xbf16> to vector<1x4x8xbf16>
    tpu.vector_store %arg2[%c1_61, %c0_62, %c24_63], %179 {strides = array<i32>} : memref<8x4x32xbf16, #tpu.memory_space<vmem>>, vector<1x4x8xbf16>,
    %c2 = arith.constant 2 : index
    %c0_64 = arith.constant 0 : index
    %c0_65 = arith.constant 0 : index
    %180 = vector.load %arg1[%c2, %c0_64, %c0_65] : memref<8x4x96xbf16, #tpu.memory_space<vmem>>, vector<1x4x96xbf16>
    %181 = vector.shape_cast %180 : vector<1x4x96xbf16> to vector<4x96xbf16>
    %182 = vector.extract_strided_slice %181 {offsets = [0, 0], sizes = [4, 8], strides = [1, 1]} : vector<4x96xbf16> to vector<4x8xbf16>
    %183 = vector.extract_strided_slice %181 {offsets = [0, 32], sizes = [4, 8], strides = [1, 1]} : vector<4x96xbf16> to vector<4x8xbf16>
    %184 = vector.extract_strided_slice %181 {offsets = [0, 64], sizes = [4, 8], strides = [1, 1]} : vector<4x96xbf16> to vector<4x8xbf16>
    %cst_66 = arith.constant dense<0.000000e+00> : vector<4x4xf32>
    %185 = tpu.matmul %182, %183, %cst_66 {dimension_numbers = #tpu.dot_dimension_numbers<[1], [1], [0], [0], [0, 0, 1, 0], [], []>} : vector<4x8xbf16>, vector<4x8xbf16>, vector<4x4xf32> -> vector<4x4xf32>
    %cst_67 = arith.constant 0.353553385 : f32
    %186 = vector.broadcast %cst_67 : f32 to vector<4x4xf32>
    %187 = arith.mulf %185, %186 : vector<4x4xf32>
    %cst_68 = arith.constant dense<0xFF800000> : vector<4xf32>
    %188 = vector.multi_reduction <maximumf>, %187, %cst_68 [1] : vector<4x4xf32> to vector<4xf32>
    %189 = vector.shape_cast %188 : vector<4xf32> to vector<4x1xf32>
    %190 = vector.broadcast %189 : vector<4x1xf32> to vector<4x4xf32>
    %191 = arith.subf %187, %190 : vector<4x4xf32>
    %192 = math.exp %191 : vector<4x4xf32>
    %cst_69 = arith.constant dense<0.000000e+00> : vector<4xf32>
    %193 = vector.multi_reduction <add>, %192, %cst_69 [1] : vector<4x4xf32> to vector<4xf32>
    %194 = vector.shape_cast %193 : vector<4xf32> to vector<4x1xf32>
    %195 = tpu.reciprocal %194 {approx = true} : vector<4x1xf32> -> vector<4x1xf32>
    %196 = vector.broadcast %195 : vector<4x1xf32> to vector<4x4xf32>
    %197 = arith.mulf %192, %196 : vector<4x4xf32>
    %198 = arith.truncf %197 : vector<4x4xf32> to vector<4x4xbf16>
    %cst_70 = arith.constant dense<0.000000e+00> : vector<4x8xf32>
    %199 = tpu.matmul %198, %184, %cst_70 {dimension_numbers = #tpu.dot_dimension_numbers<[1], [0], [0], [1], [0, 0, 1, 1], [], []>} : vector<4x4xbf16>, vector<4x8xbf16>, vector<4x8xf32> -> vector<4x8xf32>
    %200 = arith.truncf %199 : vector<4x8xf32> to vector<4x8xbf16>
    %c2_71 = arith.constant 2 : index
    %c0_72 = arith.constant 0 : index
    %c0_73 = arith.constant 0 : index
    %201 = vector.load %arg2[%c2_71, %c0_72, %c0_73] : memref<8x4x32xbf16, #tpu.memory_space<vmem>>, vector<1x4x8xbf16>
    %202 = vector.shape_cast %201 : vector<1x4x8xbf16> to vector<4x8xbf16>
    %203 = vector.shape_cast %200 : vector<4x8xbf16> to vector<1x4x8xbf16>
    tpu.vector_store %arg2[%c2_71, %c0_72, %c0_73], %203 {strides = array<i32>} : memref<8x4x32xbf16, #tpu.memory_space<vmem>>, vector<1x4x8xbf16>,
    %204 = vector.extract_strided_slice %181 {offsets = [0, 8], sizes = [4, 8], strides = [1, 1]} : vector<4x96xbf16> to vector<4x8xbf16>
    %205 = vector.extract_strided_slice %181 {offsets = [0, 40], sizes = [4, 8], strides = [1, 1]} : vector<4x96xbf16> to vector<4x8xbf16>
    %206 = vector.extract_strided_slice %181 {offsets = [0, 72], sizes = [4, 8], strides = [1, 1]} : vector<4x96xbf16> to vector<4x8xbf16>
    %cst_74 = arith.constant dense<0.000000e+00> : vector<4x4xf32>
    %207 = tpu.matmul %204, %205, %cst_74 {dimension_numbers = #tpu.dot_dimension_numbers<[1], [1], [0], [0], [0, 0, 1, 0], [], []>} : vector<4x8xbf16>, vector<4x8xbf16>, vector<4x4xf32> -> vector<4x4xf32>
    %cst_75 = arith.constant 0.353553385 : f32
    %208 = vector.broadcast %cst_75 : f32 to vector<4x4xf32>
    %209 = arith.mulf %207, %208 : vector<4x4xf32>
    %cst_76 = arith.constant dense<0xFF800000> : vector<4xf32>
    %210 = vector.multi_reduction <maximumf>, %209, %cst_76 [1] : vector<4x4xf32> to vector<4xf32>
    %211 = vector.shape_cast %210 : vector<4xf32> to vector<4x1xf32>
    %212 = vector.broadcast %211 : vector<4x1xf32> to vector<4x4xf32>
    %213 = arith.subf %209, %212 : vector<4x4xf32>
    %214 = math.exp %213 : vector<4x4xf32>
    %cst_77 = arith.constant dense<0.000000e+00> : vector<4xf32>
    %215 = vector.multi_reduction <add>, %214, %cst_77 [1] : vector<4x4xf32> to vector<4xf32>
    %216 = vector.shape_cast %215 : vector<4xf32> to vector<4x1xf32>
    %217 = tpu.reciprocal %216 {approx = true} : vector<4x1xf32> -> vector<4x1xf32>
    %218 = vector.broadcast %217 : vector<4x1xf32> to vector<4x4xf32>
    %219 = arith.mulf %214, %218 : vector<4x4xf32>
    %220 = arith.truncf %219 : vector<4x4xf32> to vector<4x4xbf16>
    %cst_78 = arith.constant dense<0.000000e+00> : vector<4x8xf32>
    %221 = tpu.matmul %220, %206, %cst_78 {dimension_numbers = #tpu.dot_dimension_numbers<[1], [0], [0], [1], [0, 0, 1, 1], [], []>} : vector<4x4xbf16>, vector<4x8xbf16>, vector<4x8xf32> -> vector<4x8xf32>
    %222 = arith.truncf %221 : vector<4x8xf32> to vector<4x8xbf16>
    %c2_79 = arith.constant 2 : index
    %c0_80 = arith.constant 0 : index
    %c8_81 = arith.constant 8 : index
    %223 = vector.load %arg2[%c2_79, %c0_80, %c8_81] : memref<8x4x32xbf16, #tpu.memory_space<vmem>>, vector<1x4x8xbf16>
    %224 = vector.shape_cast %223 : vector<1x4x8xbf16> to vector<4x8xbf16>
    %225 = vector.shape_cast %222 : vector<4x8xbf16> to vector<1x4x8xbf16>
    tpu.vector_store %arg2[%c2_79, %c0_80, %c8_81], %225 {strides = array<i32>} : memref<8x4x32xbf16, #tpu.memory_space<vmem>>, vector<1x4x8xbf16>,
    %226 = vector.extract_strided_slice %181 {offsets = [0, 16], sizes = [4, 8], strides = [1, 1]} : vector<4x96xbf16> to vector<4x8xbf16>
    %227 = vector.extract_strided_slice %181 {offsets = [0, 48], sizes = [4, 8], strides = [1, 1]} : vector<4x96xbf16> to vector<4x8xbf16>
    %228 = vector.extract_strided_slice %181 {offsets = [0, 80], sizes = [4, 8], strides = [1, 1]} : vector<4x96xbf16> to vector<4x8xbf16>
    %cst_82 = arith.constant dense<0.000000e+00> : vector<4x4xf32>
    %229 = tpu.matmul %226, %227, %cst_82 {dimension_numbers = #tpu.dot_dimension_numbers<[1], [1], [0], [0], [0, 0, 1, 0], [], []>} : vector<4x8xbf16>, vector<4x8xbf16>, vector<4x4xf32> -> vector<4x4xf32>
    %cst_83 = arith.constant 0.353553385 : f32
    %230 = vector.broadcast %cst_83 : f32 to vector<4x4xf32>
    %231 = arith.mulf %229, %230 : vector<4x4xf32>
    %cst_84 = arith.constant dense<0xFF800000> : vector<4xf32>
    %232 = vector.multi_reduction <maximumf>, %231, %cst_84 [1] : vector<4x4xf32> to vector<4xf32>
    %233 = vector.shape_cast %232 : vector<4xf32> to vector<4x1xf32>
    %234 = vector.broadcast %233 : vector<4x1xf32> to vector<4x4xf32>
    %235 = arith.subf %231, %234 : vector<4x4xf32>
    %236 = math.exp %235 : vector<4x4xf32>
    %cst_85 = arith.constant dense<0.000000e+00> : vector<4xf32>
    %237 = vector.multi_reduction <add>, %236, %cst_85 [1] : vector<4x4xf32> to vector<4xf32>
    %238 = vector.shape_cast %237 : vector<4xf32> to vector<4x1xf32>
    %239 = tpu.reciprocal %238 {approx = true} : vector<4x1xf32> -> vector<4x1xf32>
    %240 = vector.broadcast %239 : vector<4x1xf32> to vector<4x4xf32>
    %241 = arith.mulf %236, %240 : vector<4x4xf32>
    %242 = arith.truncf %241 : vector<4x4xf32> to vector<4x4xbf16>
    %cst_86 = arith.constant dense<0.000000e+00> : vector<4x8xf32>
    %243 = tpu.matmul %242, %228, %cst_86 {dimension_numbers = #tpu.dot_dimension_numbers<[1], [0], [0], [1], [0, 0, 1, 1], [], []>} : vector<4x4xbf16>, vector<4x8xbf16>, vector<4x8xf32> -> vector<4x8xf32>
    %244 = arith.truncf %243 : vector<4x8xf32> to vector<4x8xbf16>
    %c2_87 = arith.constant 2 : index
    %c0_88 = arith.constant 0 : index
    %c16_89 = arith.constant 16 : index
    %245 = vector.load %arg2[%c2_87, %c0_88, %c16_89] : memref<8x4x32xbf16, #tpu.memory_space<vmem>>, vector<1x4x8xbf16>
    %246 = vector.shape_cast %245 : vector<1x4x8xbf16> to vector<4x8xbf16>
    %247 = vector.shape_cast %244 : vector<4x8xbf16> to vector<1x4x8xbf16>
    tpu.vector_store %arg2[%c2_87, %c0_88, %c16_89], %247 {strides = array<i32>} : memref<8x4x32xbf16, #tpu.memory_space<vmem>>, vector<1x4x8xbf16>,
    %248 = vector.extract_strided_slice %181 {offsets = [0, 24], sizes = [4, 8], strides = [1, 1]} : vector<4x96xbf16> to vector<4x8xbf16>
    %249 = vector.extract_strided_slice %181 {offsets = [0, 56], sizes = [4, 8], strides = [1, 1]} : vector<4x96xbf16> to vector<4x8xbf16>
    %250 = vector.extract_strided_slice %181 {offsets = [0, 88], sizes = [4, 8], strides = [1, 1]} : vector<4x96xbf16> to vector<4x8xbf16>
    %cst_90 = arith.constant dense<0.000000e+00> : vector<4x4xf32>
    %251 = tpu.matmul %248, %249, %cst_90 {dimension_numbers = #tpu.dot_dimension_numbers<[1], [1], [0], [0], [0, 0, 1, 0], [], []>} : vector<4x8xbf16>, vector<4x8xbf16>, vector<4x4xf32> -> vector<4x4xf32>
    %cst_91 = arith.constant 0.353553385 : f32
    %252 = vector.broadcast %cst_91 : f32 to vector<4x4xf32>
    %253 = arith.mulf %251, %252 : vector<4x4xf32>
    %cst_92 = arith.constant dense<0xFF800000> : vector<4xf32>
    %254 = vector.multi_reduction <maximumf>, %253, %cst_92 [1] : vector<4x4xf32> to vector<4xf32>
    %255 = vector.shape_cast %254 : vector<4xf32> to vector<4x1xf32>
    %256 = vector.broadcast %255 : vector<4x1xf32> to vector<4x4xf32>
    %257 = arith.subf %253, %256 : vector<4x4xf32>
    %258 = math.exp %257 : vector<4x4xf32>
    %cst_93 = arith.constant dense<0.000000e+00> : vector<4xf32>
    %259 = vector.multi_reduction <add>, %258, %cst_93 [1] : vector<4x4xf32> to vector<4xf32>
    %260 = vector.shape_cast %259 : vector<4xf32> to vector<4x1xf32>
    %261 = tpu.reciprocal %260 {approx = true} : vector<4x1xf32> -> vector<4x1xf32>
    %262 = vector.broadcast %261 : vector<4x1xf32> to vector<4x4xf32>
    %263 = arith.mulf %258, %262 : vector<4x4xf32>
    %264 = arith.truncf %263 : vector<4x4xf32> to vector<4x4xbf16>
    %cst_94 = arith.constant dense<0.000000e+00> : vector<4x8xf32>
    %265 = tpu.matmul %264, %250, %cst_94 {dimension_numbers = #tpu.dot_dimension_numbers<[1], [0], [0], [1], [0, 0, 1, 1], [], []>} : vector<4x4xbf16>, vector<4x8xbf16>, vector<4x8xf32> -> vector<4x8xf32>
    %266 = arith.truncf %265 : vector<4x8xf32> to vector<4x8xbf16>
    %c2_95 = arith.constant 2 : index
    %c0_96 = arith.constant 0 : index
    %c24_97 = arith.constant 24 : index
    %267 = vector.load %arg2[%c2_95, %c0_96, %c24_97] : memref<8x4x32xbf16, #tpu.memory_space<vmem>>, vector<1x4x8xbf16>
    %268 = vector.shape_cast %267 : vector<1x4x8xbf16> to vector<4x8xbf16>
    %269 = vector.shape_cast %266 : vector<4x8xbf16> to vector<1x4x8xbf16>
    tpu.vector_store %arg2[%c2_95, %c0_96, %c24_97], %269 {strides = array<i32>} : memref<8x4x32xbf16, #tpu.memory_space<vmem>>, vector<1x4x8xbf16>,
    %c3 = arith.constant 3 : index
    %c0_98 = arith.constant 0 : index
    %c0_99 = arith.constant 0 : index
    %270 = vector.load %arg1[%c3, %c0_98, %c0_99] : memref<8x4x96xbf16, #tpu.memory_space<vmem>>, vector<1x4x96xbf16>
    %271 = vector.shape_cast %270 : vector<1x4x96xbf16> to vector<4x96xbf16>
    %272 = vector.extract_strided_slice %271 {offsets = [0, 0], sizes = [4, 8], strides = [1, 1]} : vector<4x96xbf16> to vector<4x8xbf16>
    %273 = vector.extract_strided_slice %271 {offsets = [0, 32], sizes = [4, 8], strides = [1, 1]} : vector<4x96xbf16> to vector<4x8xbf16>
    %274 = vector.extract_strided_slice %271 {offsets = [0, 64], sizes = [4, 8], strides = [1, 1]} : vector<4x96xbf16> to vector<4x8xbf16>
    %cst_100 = arith.constant dense<0.000000e+00> : vector<4x4xf32>
    %275 = tpu.matmul %272, %273, %cst_100 {dimension_numbers = #tpu.dot_dimension_numbers<[1], [1], [0], [0], [0, 0, 1, 0], [], []>} : vector<4x8xbf16>, vector<4x8xbf16>, vector<4x4xf32> -> vector<4x4xf32>
    %cst_101 = arith.constant 0.353553385 : f32
    %276 = vector.broadcast %cst_101 : f32 to vector<4x4xf32>
    %277 = arith.mulf %275, %276 : vector<4x4xf32>
    %cst_102 = arith.constant dense<0xFF800000> : vector<4xf32>
    %278 = vector.multi_reduction <maximumf>, %277, %cst_102 [1] : vector<4x4xf32> to vector<4xf32>
    %279 = vector.shape_cast %278 : vector<4xf32> to vector<4x1xf32>
    %280 = vector.broadcast %279 : vector<4x1xf32> to vector<4x4xf32>
    %281 = arith.subf %277, %280 : vector<4x4xf32>
    %282 = math.exp %281 : vector<4x4xf32>
    %cst_103 = arith.constant dense<0.000000e+00> : vector<4xf32>
    %283 = vector.multi_reduction <add>, %282, %cst_103 [1] : vector<4x4xf32> to vector<4xf32>
    %284 = vector.shape_cast %283 : vector<4xf32> to vector<4x1xf32>
    %285 = tpu.reciprocal %284 {approx = true} : vector<4x1xf32> -> vector<4x1xf32>
    %286 = vector.broadcast %285 : vector<4x1xf32> to vector<4x4xf32>
    %287 = arith.mulf %282, %286 : vector<4x4xf32>
    %288 = arith.truncf %287 : vector<4x4xf32> to vector<4x4xbf16>
    %cst_104 = arith.constant dense<0.000000e+00> : vector<4x8xf32>
    %289 = tpu.matmul %288, %274, %cst_104 {dimension_numbers = #tpu.dot_dimension_numbers<[1], [0], [0], [1], [0, 0, 1, 1], [], []>} : vector<4x4xbf16>, vector<4x8xbf16>, vector<4x8xf32> -> vector<4x8xf32>
    %290 = arith.truncf %289 : vector<4x8xf32> to vector<4x8xbf16>
    %c3_105 = arith.constant 3 : index
    %c0_106 = arith.constant 0 : index
    %c0_107 = arith.constant 0 : index
    %291 = vector.load %arg2[%c3_105, %c0_106, %c0_107] : memref<8x4x32xbf16, #tpu.memory_space<vmem>>, vector<1x4x8xbf16>
    %292 = vector.shape_cast %291 : vector<1x4x8xbf16> to vector<4x8xbf16>
    %293 = vector.shape_cast %290 : vector<4x8xbf16> to vector<1x4x8xbf16>
    tpu.vector_store %arg2[%c3_105, %c0_106, %c0_107], %293 {strides = array<i32>} : memref<8x4x32xbf16, #tpu.memory_space<vmem>>, vector<1x4x8xbf16>,
    %294 = vector.extract_strided_slice %271 {offsets = [0, 8], sizes = [4, 8], strides = [1, 1]} : vector<4x96xbf16> to vector<4x8xbf16>
    %295 = vector.extract_strided_slice %271 {offsets = [0, 40], sizes = [4, 8], strides = [1, 1]} : vector<4x96xbf16> to vector<4x8xbf16>
    %296 = vector.extract_strided_slice %271 {offsets = [0, 72], sizes = [4, 8], strides = [1, 1]} : vector<4x96xbf16> to vector<4x8xbf16>
    %cst_108 = arith.constant dense<0.000000e+00> : vector<4x4xf32>
    %297 = tpu.matmul %294, %295, %cst_108 {dimension_numbers = #tpu.dot_dimension_numbers<[1], [1], [0], [0], [0, 0, 1, 0], [], []>} : vector<4x8xbf16>, vector<4x8xbf16>, vector<4x4xf32> -> vector<4x4xf32>
    %cst_109 = arith.constant 0.353553385 : f32
    %298 = vector.broadcast %cst_109 : f32 to vector<4x4xf32>
    %299 = arith.mulf %297, %298 : vector<4x4xf32>
    %cst_110 = arith.constant dense<0xFF800000> : vector<4xf32>
    %300 = vector.multi_reduction <maximumf>, %299, %cst_110 [1] : vector<4x4xf32> to vector<4xf32>
    %301 = vector.shape_cast %300 : vector<4xf32> to vector<4x1xf32>
    %302 = vector.broadcast %301 : vector<4x1xf32> to vector<4x4xf32>
    %303 = arith.subf %299, %302 : vector<4x4xf32>
    %304 = math.exp %303 : vector<4x4xf32>
    %cst_111 = arith.constant dense<0.000000e+00> : vector<4xf32>
    %305 = vector.multi_reduction <add>, %304, %cst_111 [1] : vector<4x4xf32> to vector<4xf32>
    %306 = vector.shape_cast %305 : vector<4xf32> to vector<4x1xf32>
    %307 = tpu.reciprocal %306 {approx = true} : vector<4x1xf32> -> vector<4x1xf32>
    %308 = vector.broadcast %307 : vector<4x1xf32> to vector<4x4xf32>
    %309 = arith.mulf %304, %308 : vector<4x4xf32>
    %310 = arith.truncf %309 : vector<4x4xf32> to vector<4x4xbf16>
    %cst_112 = arith.constant dense<0.000000e+00> : vector<4x8xf32>
    %311 = tpu.matmul %310, %296, %cst_112 {dimension_numbers = #tpu.dot_dimension_numbers<[1], [0], [0], [1], [0, 0, 1, 1], [], []>} : vector<4x4xbf16>, vector<4x8xbf16>, vector<4x8xf32> -> vector<4x8xf32>
    %312 = arith.truncf %311 : vector<4x8xf32> to vector<4x8xbf16>
    %c3_113 = arith.constant 3 : index
    %c0_114 = arith.constant 0 : index
    %c8_115 = arith.constant 8 : index
    %313 = vector.load %arg2[%c3_113, %c0_114, %c8_115] : memref<8x4x32xbf16, #tpu.memory_space<vmem>>, vector<1x4x8xbf16>
    %314 = vector.shape_cast %313 : vector<1x4x8xbf16> to vector<4x8xbf16>
    %315 = vector.shape_cast %312 : vector<4x8xbf16> to vector<1x4x8xbf16>
    tpu.vector_store %arg2[%c3_113, %c0_114, %c8_115], %315 {strides = array<i32>} : memref<8x4x32xbf16, #tpu.memory_space<vmem>>, vector<1x4x8xbf16>,
    %316 = vector.extract_strided_slice %271 {offsets = [0, 16], sizes = [4, 8], strides = [1, 1]} : vector<4x96xbf16> to vector<4x8xbf16>
    %317 = vector.extract_strided_slice %271 {offsets = [0, 48], sizes = [4, 8], strides = [1, 1]} : vector<4x96xbf16> to vector<4x8xbf16>
    %318 = vector.extract_strided_slice %271 {offsets = [0, 80], sizes = [4, 8], strides = [1, 1]} : vector<4x96xbf16> to vector<4x8xbf16>
    %cst_116 = arith.constant dense<0.000000e+00> : vector<4x4xf32>
    %319 = tpu.matmul %316, %317, %cst_116 {dimension_numbers = #tpu.dot_dimension_numbers<[1], [1], [0], [0], [0, 0, 1, 0], [], []>} : vector<4x8xbf16>, vector<4x8xbf16>, vector<4x4xf32> -> vector<4x4xf32>
    %cst_117 = arith.constant 0.353553385 : f32
    %320 = vector.broadcast %cst_117 : f32 to vector<4x4xf32>
    %321 = arith.mulf %319, %320 : vector<4x4xf32>
    %cst_118 = arith.constant dense<0xFF800000> : vector<4xf32>
    %322 = vector.multi_reduction <maximumf>, %321, %cst_118 [1] : vector<4x4xf32> to vector<4xf32>
    %323 = vector.shape_cast %322 : vector<4xf32> to vector<4x1xf32>
    %324 = vector.broadcast %323 : vector<4x1xf32> to vector<4x4xf32>
    %325 = arith.subf %321, %324 : vector<4x4xf32>
    %326 = math.exp %325 : vector<4x4xf32>
    %cst_119 = arith.constant dense<0.000000e+00> : vector<4xf32>
    %327 = vector.multi_reduction <add>, %326, %cst_119 [1] : vector<4x4xf32> to vector<4xf32>
    %328 = vector.shape_cast %327 : vector<4xf32> to vector<4x1xf32>
    %329 = tpu.reciprocal %328 {approx = true} : vector<4x1xf32> -> vector<4x1xf32>
    %330 = vector.broadcast %329 : vector<4x1xf32> to vector<4x4xf32>
    %331 = arith.mulf %326, %330 : vector<4x4xf32>
    %332 = arith.truncf %331 : vector<4x4xf32> to vector<4x4xbf16>
    %cst_120 = arith.constant dense<0.000000e+00> : vector<4x8xf32>
    %333 = tpu.matmul %332, %318, %cst_120 {dimension_numbers = #tpu.dot_dimension_numbers<[1], [0], [0], [1], [0, 0, 1, 1], [], []>} : vector<4x4xbf16>, vector<4x8xbf16>, vector<4x8xf32> -> vector<4x8xf32>
    %334 = arith.truncf %333 : vector<4x8xf32> to vector<4x8xbf16>
    %c3_121 = arith.constant 3 : index
    %c0_122 = arith.constant 0 : index
    %c16_123 = arith.constant 16 : index
    %335 = vector.load %arg2[%c3_121, %c0_122, %c16_123] : memref<8x4x32xbf16, #tpu.memory_space<vmem>>, vector<1x4x8xbf16>
    %336 = vector.shape_cast %335 : vector<1x4x8xbf16> to vector<4x8xbf16>
    %337 = vector.shape_cast %334 : vector<4x8xbf16> to vector<1x4x8xbf16>
    tpu.vector_store %arg2[%c3_121, %c0_122, %c16_123], %337 {strides = array<i32>} : memref<8x4x32xbf16, #tpu.memory_space<vmem>>, vector<1x4x8xbf16>,
    %338 = vector.extract_strided_slice %271 {offsets = [0, 24], sizes = [4, 8], strides = [1, 1]} : vector<4x96xbf16> to vector<4x8xbf16>
    %339 = vector.extract_strided_slice %271 {offsets = [0, 56], sizes = [4, 8], strides = [1, 1]} : vector<4x96xbf16> to vector<4x8xbf16>
    %340 = vector.extract_strided_slice %271 {offsets = [0, 88], sizes = [4, 8], strides = [1, 1]} : vector<4x96xbf16> to vector<4x8xbf16>
    %cst_124 = arith.constant dense<0.000000e+00> : vector<4x4xf32>
    %341 = tpu.matmul %338, %339, %cst_124 {dimension_numbers = #tpu.dot_dimension_numbers<[1], [1], [0], [0], [0, 0, 1, 0], [], []>} : vector<4x8xbf16>, vector<4x8xbf16>, vector<4x4xf32> -> vector<4x4xf32>
    %cst_125 = arith.constant 0.353553385 : f32
    %342 = vector.broadcast %cst_125 : f32 to vector<4x4xf32>
    %343 = arith.mulf %341, %342 : vector<4x4xf32>
    %cst_126 = arith.constant dense<0xFF800000> : vector<4xf32>
    %344 = vector.multi_reduction <maximumf>, %343, %cst_126 [1] : vector<4x4xf32> to vector<4xf32>
    %345 = vector.shape_cast %344 : vector<4xf32> to vector<4x1xf32>
    %346 = vector.broadcast %345 : vector<4x1xf32> to vector<4x4xf32>
    %347 = arith.subf %343, %346 : vector<4x4xf32>
    %348 = math.exp %347 : vector<4x4xf32>
    %cst_127 = arith.constant dense<0.000000e+00> : vector<4xf32>
    %349 = vector.multi_reduction <add>, %348, %cst_127 [1] : vector<4x4xf32> to vector<4xf32>
    %350 = vector.shape_cast %349 : vector<4xf32> to vector<4x1xf32>
    %351 = tpu.reciprocal %350 {approx = true} : vector<4x1xf32> -> vector<4x1xf32>
    %352 = vector.broadcast %351 : vector<4x1xf32> to vector<4x4xf32>
    %353 = arith.mulf %348, %352 : vector<4x4xf32>
    %354 = arith.truncf %353 : vector<4x4xf32> to vector<4x4xbf16>
    %cst_128 = arith.constant dense<0.000000e+00> : vector<4x8xf32>
    %355 = tpu.matmul %354, %340, %cst_128 {dimension_numbers = #tpu.dot_dimension_numbers<[1], [0], [0], [1], [0, 0, 1, 1], [], []>} : vector<4x4xbf16>, vector<4x8xbf16>, vector<4x8xf32> -> vector<4x8xf32>
    %356 = arith.truncf %355 : vector<4x8xf32> to vector<4x8xbf16>
    %c3_129 = arith.constant 3 : index
    %c0_130 = arith.constant 0 : index
    %c24_131 = arith.constant 24 : index
    %357 = vector.load %arg2[%c3_129, %c0_130, %c24_131] : memref<8x4x32xbf16, #tpu.memory_space<vmem>>, vector<1x4x8xbf16>
    %358 = vector.shape_cast %357 : vector<1x4x8xbf16> to vector<4x8xbf16>
    %359 = vector.shape_cast %356 : vector<4x8xbf16> to vector<1x4x8xbf16>
    tpu.vector_store %arg2[%c3_129, %c0_130, %c24_131], %359 {strides = array<i32>} : memref<8x4x32xbf16, #tpu.memory_space<vmem>>, vector<1x4x8xbf16>,
    %c4 = arith.constant 4 : index
    %c0_132 = arith.constant 0 : index
    %c0_133 = arith.constant 0 : index
    %360 = vector.load %arg1[%c4, %c0_132, %c0_133] : memref<8x4x96xbf16, #tpu.memory_space<vmem>>, vector<1x4x96xbf16>
    %361 = vector.shape_cast %360 : vector<1x4x96xbf16> to vector<4x96xbf16>
    %362 = vector.extract_strided_slice %361 {offsets = [0, 0], sizes = [4, 8], strides = [1, 1]} : vector<4x96xbf16> to vector<4x8xbf16>
    %363 = vector.extract_strided_slice %361 {offsets = [0, 32], sizes = [4, 8], strides = [1, 1]} : vector<4x96xbf16> to vector<4x8xbf16>
    %364 = vector.extract_strided_slice %361 {offsets = [0, 64], sizes = [4, 8], strides = [1, 1]} : vector<4x96xbf16> to vector<4x8xbf16>
    %cst_134 = arith.constant dense<0.000000e+00> : vector<4x4xf32>
    %365 = tpu.matmul %362, %363, %cst_134 {dimension_numbers = #tpu.dot_dimension_numbers<[1], [1], [0], [0], [0, 0, 1, 0], [], []>} : vector<4x8xbf16>, vector<4x8xbf16>, vector<4x4xf32> -> vector<4x4xf32>
    %cst_135 = arith.constant 0.353553385 : f32
    %366 = vector.broadcast %cst_135 : f32 to vector<4x4xf32>
    %367 = arith.mulf %365, %366 : vector<4x4xf32>
    %cst_136 = arith.constant dense<0xFF800000> : vector<4xf32>
    %368 = vector.multi_reduction <maximumf>, %367, %cst_136 [1] : vector<4x4xf32> to vector<4xf32>
    %369 = vector.shape_cast %368 : vector<4xf32> to vector<4x1xf32>
    %370 = vector.broadcast %369 : vector<4x1xf32> to vector<4x4xf32>
    %371 = arith.subf %367, %370 : vector<4x4xf32>
    %372 = math.exp %371 : vector<4x4xf32>
    %cst_137 = arith.constant dense<0.000000e+00> : vector<4xf32>
    %373 = vector.multi_reduction <add>, %372, %cst_137 [1] : vector<4x4xf32> to vector<4xf32>
    %374 = vector.shape_cast %373 : vector<4xf32> to vector<4x1xf32>
    %375 = tpu.reciprocal %374 {approx = true} : vector<4x1xf32> -> vector<4x1xf32>
    %376 = vector.broadcast %375 : vector<4x1xf32> to vector<4x4xf32>
    %377 = arith.mulf %372, %376 : vector<4x4xf32>
    %378 = arith.truncf %377 : vector<4x4xf32> to vector<4x4xbf16>
    %cst_138 = arith.constant dense<0.000000e+00> : vector<4x8xf32>
    %379 = tpu.matmul %378, %364, %cst_138 {dimension_numbers = #tpu.dot_dimension_numbers<[1], [0], [0], [1], [0, 0, 1, 1], [], []>} : vector<4x4xbf16>, vector<4x8xbf16>, vector<4x8xf32> -> vector<4x8xf32>
    %380 = arith.truncf %379 : vector<4x8xf32> to vector<4x8xbf16>
    %c4_139 = arith.constant 4 : index
    %c0_140 = arith.constant 0 : index
    %c0_141 = arith.constant 0 : index
    %381 = vector.load %arg2[%c4_139, %c0_140, %c0_141] : memref<8x4x32xbf16, #tpu.memory_space<vmem>>, vector<1x4x8xbf16>
    %382 = vector.shape_cast %381 : vector<1x4x8xbf16> to vector<4x8xbf16>
    %383 = vector.shape_cast %380 : vector<4x8xbf16> to vector<1x4x8xbf16>
    tpu.vector_store %arg2[%c4_139, %c0_140, %c0_141], %383 {strides = array<i32>} : memref<8x4x32xbf16, #tpu.memory_space<vmem>>, vector<1x4x8xbf16>,
    %384 = vector.extract_strided_slice %361 {offsets = [0, 8], sizes = [4, 8], strides = [1, 1]} : vector<4x96xbf16> to vector<4x8xbf16>
    %385 = vector.extract_strided_slice %361 {offsets = [0, 40], sizes = [4, 8], strides = [1, 1]} : vector<4x96xbf16> to vector<4x8xbf16>
    %386 = vector.extract_strided_slice %361 {offsets = [0, 72], sizes = [4, 8], strides = [1, 1]} : vector<4x96xbf16> to vector<4x8xbf16>
    %cst_142 = arith.constant dense<0.000000e+00> : vector<4x4xf32>
    %387 = tpu.matmul %384, %385, %cst_142 {dimension_numbers = #tpu.dot_dimension_numbers<[1], [1], [0], [0], [0, 0, 1, 0], [], []>} : vector<4x8xbf16>, vector<4x8xbf16>, vector<4x4xf32> -> vector<4x4xf32>
    %cst_143 = arith.constant 0.353553385 : f32
    %388 = vector.broadcast %cst_143 : f32 to vector<4x4xf32>
    %389 = arith.mulf %387, %388 : vector<4x4xf32>
    %cst_144 = arith.constant dense<0xFF800000> : vector<4xf32>
    %390 = vector.multi_reduction <maximumf>, %389, %cst_144 [1] : vector<4x4xf32> to vector<4xf32>
    %391 = vector.shape_cast %390 : vector<4xf32> to vector<4x1xf32>
    %392 = vector.broadcast %391 : vector<4x1xf32> to vector<4x4xf32>
    %393 = arith.subf %389, %392 : vector<4x4xf32>
    %394 = math.exp %393 : vector<4x4xf32>
    %cst_145 = arith.constant dense<0.000000e+00> : vector<4xf32>
    %395 = vector.multi_reduction <add>, %394, %cst_145 [1] : vector<4x4xf32> to vector<4xf32>
    %396 = vector.shape_cast %395 : vector<4xf32> to vector<4x1xf32>
    %397 = tpu.reciprocal %396 {approx = true} : vector<4x1xf32> -> vector<4x1xf32>
    %398 = vector.broadcast %397 : vector<4x1xf32> to vector<4x4xf32>
    %399 = arith.mulf %394, %398 : vector<4x4xf32>
    %400 = arith.truncf %399 : vector<4x4xf32> to vector<4x4xbf16>
    %cst_146 = arith.constant dense<0.000000e+00> : vector<4x8xf32>
    %401 = tpu.matmul %400, %386, %cst_146 {dimension_numbers = #tpu.dot_dimension_numbers<[1], [0], [0], [1], [0, 0, 1, 1], [], []>} : vector<4x4xbf16>, vector<4x8xbf16>, vector<4x8xf32> -> vector<4x8xf32>
    %402 = arith.truncf %401 : vector<4x8xf32> to vector<4x8xbf16>
    %c4_147 = arith.constant 4 : index
    %c0_148 = arith.constant 0 : index
    %c8_149 = arith.constant 8 : index
    %403 = vector.load %arg2[%c4_147, %c0_148, %c8_149] : memref<8x4x32xbf16, #tpu.memory_space<vmem>>, vector<1x4x8xbf16>
    %404 = vector.shape_cast %403 : vector<1x4x8xbf16> to vector<4x8xbf16>
    %405 = vector.shape_cast %402 : vector<4x8xbf16> to vector<1x4x8xbf16>
    tpu.vector_store %arg2[%c4_147, %c0_148, %c8_149], %405 {strides = array<i32>} : memref<8x4x32xbf16, #tpu.memory_space<vmem>>, vector<1x4x8xbf16>,
    %406 = vector.extract_strided_slice %361 {offsets = [0, 16], sizes = [4, 8], strides = [1, 1]} : vector<4x96xbf16> to vector<4x8xbf16>
    %407 = vector.extract_strided_slice %361 {offsets = [0, 48], sizes = [4, 8], strides = [1, 1]} : vector<4x96xbf16> to vector<4x8xbf16>
    %408 = vector.extract_strided_slice %361 {offsets = [0, 80], sizes = [4, 8], strides = [1, 1]} : vector<4x96xbf16> to vector<4x8xbf16>
    %cst_150 = arith.constant dense<0.000000e+00> : vector<4x4xf32>
    %409 = tpu.matmul %406, %407, %cst_150 {dimension_numbers = #tpu.dot_dimension_numbers<[1], [1], [0], [0], [0, 0, 1, 0], [], []>} : vector<4x8xbf16>, vector<4x8xbf16>, vector<4x4xf32> -> vector<4x4xf32>
    %cst_151 = arith.constant 0.353553385 : f32
    %410 = vector.broadcast %cst_151 : f32 to vector<4x4xf32>
    %411 = arith.mulf %409, %410 : vector<4x4xf32>
    %cst_152 = arith.constant dense<0xFF800000> : vector<4xf32>
    %412 = vector.multi_reduction <maximumf>, %411, %cst_152 [1] : vector<4x4xf32> to vector<4xf32>
    %413 = vector.shape_cast %412 : vector<4xf32> to vector<4x1xf32>
    %414 = vector.broadcast %413 : vector<4x1xf32> to vector<4x4xf32>
    %415 = arith.subf %411, %414 : vector<4x4xf32>
    %416 = math.exp %415 : vector<4x4xf32>
    %cst_153 = arith.constant dense<0.000000e+00> : vector<4xf32>
    %417 = vector.multi_reduction <add>, %416, %cst_153 [1] : vector<4x4xf32> to vector<4xf32>
    %418 = vector.shape_cast %417 : vector<4xf32> to vector<4x1xf32>
    %419 = tpu.reciprocal %418 {approx = true} : vector<4x1xf32> -> vector<4x1xf32>
    %420 = vector.broadcast %419 : vector<4x1xf32> to vector<4x4xf32>
    %421 = arith.mulf %416, %420 : vector<4x4xf32>
    %422 = arith.truncf %421 : vector<4x4xf32> to vector<4x4xbf16>
    %cst_154 = arith.constant dense<0.000000e+00> : vector<4x8xf32>
    %423 = tpu.matmul %422, %408, %cst_154 {dimension_numbers = #tpu.dot_dimension_numbers<[1], [0], [0], [1], [0, 0, 1, 1], [], []>} : vector<4x4xbf16>, vector<4x8xbf16>, vector<4x8xf32> -> vector<4x8xf32>
    %424 = arith.truncf %423 : vector<4x8xf32> to vector<4x8xbf16>
    %c4_155 = arith.constant 4 : index
    %c0_156 = arith.constant 0 : index
    %c16_157 = arith.constant 16 : index
    %425 = vector.load %arg2[%c4_155, %c0_156, %c16_157] : memref<8x4x32xbf16, #tpu.memory_space<vmem>>, vector<1x4x8xbf16>
    %426 = vector.shape_cast %425 : vector<1x4x8xbf16> to vector<4x8xbf16>
    %427 = vector.shape_cast %424 : vector<4x8xbf16> to vector<1x4x8xbf16>
    tpu.vector_store %arg2[%c4_155, %c0_156, %c16_157], %427 {strides = array<i32>} : memref<8x4x32xbf16, #tpu.memory_space<vmem>>, vector<1x4x8xbf16>,
    %428 = vector.extract_strided_slice %361 {offsets = [0, 24], sizes = [4, 8], strides = [1, 1]} : vector<4x96xbf16> to vector<4x8xbf16>
    %429 = vector.extract_strided_slice %361 {offsets = [0, 56], sizes = [4, 8], strides = [1, 1]} : vector<4x96xbf16> to vector<4x8xbf16>
    %430 = vector.extract_strided_slice %361 {offsets = [0, 88], sizes = [4, 8], strides = [1, 1]} : vector<4x96xbf16> to vector<4x8xbf16>
    %cst_158 = arith.constant dense<0.000000e+00> : vector<4x4xf32>
    %431 = tpu.matmul %428, %429, %cst_158 {dimension_numbers = #tpu.dot_dimension_numbers<[1], [1], [0], [0], [0, 0, 1, 0], [], []>} : vector<4x8xbf16>, vector<4x8xbf16>, vector<4x4xf32> -> vector<4x4xf32>
    %cst_159 = arith.constant 0.353553385 : f32
    %432 = vector.broadcast %cst_159 : f32 to vector<4x4xf32>
    %433 = arith.mulf %431, %432 : vector<4x4xf32>
    %cst_160 = arith.constant dense<0xFF800000> : vector<4xf32>
    %434 = vector.multi_reduction <maximumf>, %433, %cst_160 [1] : vector<4x4xf32> to vector<4xf32>
    %435 = vector.shape_cast %434 : vector<4xf32> to vector<4x1xf32>
    %436 = vector.broadcast %435 : vector<4x1xf32> to vector<4x4xf32>
    %437 = arith.subf %433, %436 : vector<4x4xf32>
    %438 = math.exp %437 : vector<4x4xf32>
    %cst_161 = arith.constant dense<0.000000e+00> : vector<4xf32>
    %439 = vector.multi_reduction <add>, %438, %cst_161 [1] : vector<4x4xf32> to vector<4xf32>
    %440 = vector.shape_cast %439 : vector<4xf32> to vector<4x1xf32>
    %441 = tpu.reciprocal %440 {approx = true} : vector<4x1xf32> -> vector<4x1xf32>
    %442 = vector.broadcast %441 : vector<4x1xf32> to vector<4x4xf32>
    %443 = arith.mulf %438, %442 : vector<4x4xf32>
    %444 = arith.truncf %443 : vector<4x4xf32> to vector<4x4xbf16>
    %cst_162 = arith.constant dense<0.000000e+00> : vector<4x8xf32>
    %445 = tpu.matmul %444, %430, %cst_162 {dimension_numbers = #tpu.dot_dimension_numbers<[1], [0], [0], [1], [0, 0, 1, 1], [], []>} : vector<4x4xbf16>, vector<4x8xbf16>, vector<4x8xf32> -> vector<4x8xf32>
    %446 = arith.truncf %445 : vector<4x8xf32> to vector<4x8xbf16>
    %c4_163 = arith.constant 4 : index
    %c0_164 = arith.constant 0 : index
    %c24_165 = arith.constant 24 : index
    %447 = vector.load %arg2[%c4_163, %c0_164, %c24_165] : memref<8x4x32xbf16, #tpu.memory_space<vmem>>, vector<1x4x8xbf16>
    %448 = vector.shape_cast %447 : vector<1x4x8xbf16> to vector<4x8xbf16>
    %449 = vector.shape_cast %446 : vector<4x8xbf16> to vector<1x4x8xbf16>
    tpu.vector_store %arg2[%c4_163, %c0_164, %c24_165], %449 {strides = array<i32>} : memref<8x4x32xbf16, #tpu.memory_space<vmem>>, vector<1x4x8xbf16>,
    %c5 = arith.constant 5 : index
    %c0_166 = arith.constant 0 : index
    %c0_167 = arith.constant 0 : index
    %450 = vector.load %arg1[%c5, %c0_166, %c0_167] : memref<8x4x96xbf16, #tpu.memory_space<vmem>>, vector<1x4x96xbf16>
    %451 = vector.shape_cast %450 : vector<1x4x96xbf16> to vector<4x96xbf16>
    %452 = vector.extract_strided_slice %451 {offsets = [0, 0], sizes = [4, 8], strides = [1, 1]} : vector<4x96xbf16> to vector<4x8xbf16>
    %453 = vector.extract_strided_slice %451 {offsets = [0, 32], sizes = [4, 8], strides = [1, 1]} : vector<4x96xbf16> to vector<4x8xbf16>
    %454 = vector.extract_strided_slice %451 {offsets = [0, 64], sizes = [4, 8], strides = [1, 1]} : vector<4x96xbf16> to vector<4x8xbf16>
    %cst_168 = arith.constant dense<0.000000e+00> : vector<4x4xf32>
    %455 = tpu.matmul %452, %453, %cst_168 {dimension_numbers = #tpu.dot_dimension_numbers<[1], [1], [0], [0], [0, 0, 1, 0], [], []>} : vector<4x8xbf16>, vector<4x8xbf16>, vector<4x4xf32> -> vector<4x4xf32>
    %cst_169 = arith.constant 0.353553385 : f32
    %456 = vector.broadcast %cst_169 : f32 to vector<4x4xf32>
    %457 = arith.mulf %455, %456 : vector<4x4xf32>
    %cst_170 = arith.constant dense<0xFF800000> : vector<4xf32>
    %458 = vector.multi_reduction <maximumf>, %457, %cst_170 [1] : vector<4x4xf32> to vector<4xf32>
    %459 = vector.shape_cast %458 : vector<4xf32> to vector<4x1xf32>
    %460 = vector.broadcast %459 : vector<4x1xf32> to vector<4x4xf32>
    %461 = arith.subf %457, %460 : vector<4x4xf32>
    %462 = math.exp %461 : vector<4x4xf32>
    %cst_171 = arith.constant dense<0.000000e+00> : vector<4xf32>
    %463 = vector.multi_reduction <add>, %462, %cst_171 [1] : vector<4x4xf32> to vector<4xf32>
    %464 = vector.shape_cast %463 : vector<4xf32> to vector<4x1xf32>
    %465 = tpu.reciprocal %464 {approx = true} : vector<4x1xf32> -> vector<4x1xf32>
    %466 = vector.broadcast %465 : vector<4x1xf32> to vector<4x4xf32>
    %467 = arith.mulf %462, %466 : vector<4x4xf32>
    %468 = arith.truncf %467 : vector<4x4xf32> to vector<4x4xbf16>
    %cst_172 = arith.constant dense<0.000000e+00> : vector<4x8xf32>
    %469 = tpu.matmul %468, %454, %cst_172 {dimension_numbers = #tpu.dot_dimension_numbers<[1], [0], [0], [1], [0, 0, 1, 1], [], []>} : vector<4x4xbf16>, vector<4x8xbf16>, vector<4x8xf32> -> vector<4x8xf32>
    %470 = arith.truncf %469 : vector<4x8xf32> to vector<4x8xbf16>
    %c5_173 = arith.constant 5 : index
    %c0_174 = arith.constant 0 : index
    %c0_175 = arith.constant 0 : index
    %471 = vector.load %arg2[%c5_173, %c0_174, %c0_175] : memref<8x4x32xbf16, #tpu.memory_space<vmem>>, vector<1x4x8xbf16>
    %472 = vector.shape_cast %471 : vector<1x4x8xbf16> to vector<4x8xbf16>
    %473 = vector.shape_cast %470 : vector<4x8xbf16> to vector<1x4x8xbf16>
    tpu.vector_store %arg2[%c5_173, %c0_174, %c0_175], %473 {strides = array<i32>} : memref<8x4x32xbf16, #tpu.memory_space<vmem>>, vector<1x4x8xbf16>,
    %474 = vector.extract_strided_slice %451 {offsets = [0, 8], sizes = [4, 8], strides = [1, 1]} : vector<4x96xbf16> to vector<4x8xbf16>
    %475 = vector.extract_strided_slice %451 {offsets = [0, 40], sizes = [4, 8], strides = [1, 1]} : vector<4x96xbf16> to vector<4x8xbf16>
    %476 = vector.extract_strided_slice %451 {offsets = [0, 72], sizes = [4, 8], strides = [1, 1]} : vector<4x96xbf16> to vector<4x8xbf16>
    %cst_176 = arith.constant dense<0.000000e+00> : vector<4x4xf32>
    %477 = tpu.matmul %474, %475, %cst_176 {dimension_numbers = #tpu.dot_dimension_numbers<[1], [1], [0], [0], [0, 0, 1, 0], [], []>} : vector<4x8xbf16>, vector<4x8xbf16>, vector<4x4xf32> -> vector<4x4xf32>
    %cst_177 = arith.constant 0.353553385 : f32
    %478 = vector.broadcast %cst_177 : f32 to vector<4x4xf32>
    %479 = arith.mulf %477, %478 : vector<4x4xf32>
    %cst_178 = arith.constant dense<0xFF800000> : vector<4xf32>
    %480 = vector.multi_reduction <maximumf>, %479, %cst_178 [1] : vector<4x4xf32> to vector<4xf32>
    %481 = vector.shape_cast %480 : vector<4xf32> to vector<4x1xf32>
    %482 = vector.broadcast %481 : vector<4x1xf32> to vector<4x4xf32>
    %483 = arith.subf %479, %482 : vector<4x4xf32>
    %484 = math.exp %483 : vector<4x4xf32>
    %cst_179 = arith.constant dense<0.000000e+00> : vector<4xf32>
    %485 = vector.multi_reduction <add>, %484, %cst_179 [1] : vector<4x4xf32> to vector<4xf32>
    %486 = vector.shape_cast %485 : vector<4xf32> to vector<4x1xf32>
    %487 = tpu.reciprocal %486 {approx = true} : vector<4x1xf32> -> vector<4x1xf32>
    %488 = vector.broadcast %487 : vector<4x1xf32> to vector<4x4xf32>
    %489 = arith.mulf %484, %488 : vector<4x4xf32>
    %490 = arith.truncf %489 : vector<4x4xf32> to vector<4x4xbf16>
    %cst_180 = arith.constant dense<0.000000e+00> : vector<4x8xf32>
    %491 = tpu.matmul %490, %476, %cst_180 {dimension_numbers = #tpu.dot_dimension_numbers<[1], [0], [0], [1], [0, 0, 1, 1], [], []>} : vector<4x4xbf16>, vector<4x8xbf16>, vector<4x8xf32> -> vector<4x8xf32>
    %492 = arith.truncf %491 : vector<4x8xf32> to vector<4x8xbf16>
    %c5_181 = arith.constant 5 : index
    %c0_182 = arith.constant 0 : index
    %c8_183 = arith.constant 8 : index
    %493 = vector.load %arg2[%c5_181, %c0_182, %c8_183] : memref<8x4x32xbf16, #tpu.memory_space<vmem>>, vector<1x4x8xbf16>
    %494 = vector.shape_cast %493 : vector<1x4x8xbf16> to vector<4x8xbf16>
    %495 = vector.shape_cast %492 : vector<4x8xbf16> to vector<1x4x8xbf16>
    tpu.vector_store %arg2[%c5_181, %c0_182, %c8_183], %495 {strides = array<i32>} : memref<8x4x32xbf16, #tpu.memory_space<vmem>>, vector<1x4x8xbf16>,
    %496 = vector.extract_strided_slice %451 {offsets = [0, 16], sizes = [4, 8], strides = [1, 1]} : vector<4x96xbf16> to vector<4x8xbf16>
    %497 = vector.extract_strided_slice %451 {offsets = [0, 48], sizes = [4, 8], strides = [1, 1]} : vector<4x96xbf16> to vector<4x8xbf16>
    %498 = vector.extract_strided_slice %451 {offsets = [0, 80], sizes = [4, 8], strides = [1, 1]} : vector<4x96xbf16> to vector<4x8xbf16>
    %cst_184 = arith.constant dense<0.000000e+00> : vector<4x4xf32>
    %499 = tpu.matmul %496, %497, %cst_184 {dimension_numbers = #tpu.dot_dimension_numbers<[1], [1], [0], [0], [0, 0, 1, 0], [], []>} : vector<4x8xbf16>, vector<4x8xbf16>, vector<4x4xf32> -> vector<4x4xf32>
    %cst_185 = arith.constant 0.353553385 : f32
    %500 = vector.broadcast %cst_185 : f32 to vector<4x4xf32>
    %501 = arith.mulf %499, %500 : vector<4x4xf32>
    %cst_186 = arith.constant dense<0xFF800000> : vector<4xf32>
    %502 = vector.multi_reduction <maximumf>, %501, %cst_186 [1] : vector<4x4xf32> to vector<4xf32>
    %503 = vector.shape_cast %502 : vector<4xf32> to vector<4x1xf32>
    %504 = vector.broadcast %503 : vector<4x1xf32> to vector<4x4xf32>
    %505 = arith.subf %501, %504 : vector<4x4xf32>
    %506 = math.exp %505 : vector<4x4xf32>
    %cst_187 = arith.constant dense<0.000000e+00> : vector<4xf32>
    %507 = vector.multi_reduction <add>, %506, %cst_187 [1] : vector<4x4xf32> to vector<4xf32>
    %508 = vector.shape_cast %507 : vector<4xf32> to vector<4x1xf32>
    %509 = tpu.reciprocal %508 {approx = true} : vector<4x1xf32> -> vector<4x1xf32>
    %510 = vector.broadcast %509 : vector<4x1xf32> to vector<4x4xf32>
    %511 = arith.mulf %506, %510 : vector<4x4xf32>
    %512 = arith.truncf %511 : vector<4x4xf32> to vector<4x4xbf16>
    %cst_188 = arith.constant dense<0.000000e+00> : vector<4x8xf32>
    %513 = tpu.matmul %512, %498, %cst_188 {dimension_numbers = #tpu.dot_dimension_numbers<[1], [0], [0], [1], [0, 0, 1, 1], [], []>} : vector<4x4xbf16>, vector<4x8xbf16>, vector<4x8xf32> -> vector<4x8xf32>
    %514 = arith.truncf %513 : vector<4x8xf32> to vector<4x8xbf16>
    %c5_189 = arith.constant 5 : index
    %c0_190 = arith.constant 0 : index
    %c16_191 = arith.constant 16 : index
    %515 = vector.load %arg2[%c5_189, %c0_190, %c16_191] : memref<8x4x32xbf16, #tpu.memory_space<vmem>>, vector<1x4x8xbf16>
    %516 = vector.shape_cast %515 : vector<1x4x8xbf16> to vector<4x8xbf16>
    %517 = vector.shape_cast %514 : vector<4x8xbf16> to vector<1x4x8xbf16>
    tpu.vector_store %arg2[%c5_189, %c0_190, %c16_191], %517 {strides = array<i32>} : memref<8x4x32xbf16, #tpu.memory_space<vmem>>, vector<1x4x8xbf16>,
    %518 = vector.extract_strided_slice %451 {offsets = [0, 24], sizes = [4, 8], strides = [1, 1]} : vector<4x96xbf16> to vector<4x8xbf16>
    %519 = vector.extract_strided_slice %451 {offsets = [0, 56], sizes = [4, 8], strides = [1, 1]} : vector<4x96xbf16> to vector<4x8xbf16>
    %520 = vector.extract_strided_slice %451 {offsets = [0, 88], sizes = [4, 8], strides = [1, 1]} : vector<4x96xbf16> to vector<4x8xbf16>
    %cst_192 = arith.constant dense<0.000000e+00> : vector<4x4xf32>
    %521 = tpu.matmul %518, %519, %cst_192 {dimension_numbers = #tpu.dot_dimension_numbers<[1], [1], [0], [0], [0, 0, 1, 0], [], []>} : vector<4x8xbf16>, vector<4x8xbf16>, vector<4x4xf32> -> vector<4x4xf32>
    %cst_193 = arith.constant 0.353553385 : f32
    %522 = vector.broadcast %cst_193 : f32 to vector<4x4xf32>
    %523 = arith.mulf %521, %522 : vector<4x4xf32>
    %cst_194 = arith.constant dense<0xFF800000> : vector<4xf32>
    %524 = vector.multi_reduction <maximumf>, %523, %cst_194 [1] : vector<4x4xf32> to vector<4xf32>
    %525 = vector.shape_cast %524 : vector<4xf32> to vector<4x1xf32>
    %526 = vector.broadcast %525 : vector<4x1xf32> to vector<4x4xf32>
    %527 = arith.subf %523, %526 : vector<4x4xf32>
    %528 = math.exp %527 : vector<4x4xf32>
    %cst_195 = arith.constant dense<0.000000e+00> : vector<4xf32>
    %529 = vector.multi_reduction <add>, %528, %cst_195 [1] : vector<4x4xf32> to vector<4xf32>
    %530 = vector.shape_cast %529 : vector<4xf32> to vector<4x1xf32>
    %531 = tpu.reciprocal %530 {approx = true} : vector<4x1xf32> -> vector<4x1xf32>
    %532 = vector.broadcast %531 : vector<4x1xf32> to vector<4x4xf32>
    %533 = arith.mulf %528, %532 : vector<4x4xf32>
    %534 = arith.truncf %533 : vector<4x4xf32> to vector<4x4xbf16>
    %cst_196 = arith.constant dense<0.000000e+00> : vector<4x8xf32>
    %535 = tpu.matmul %534, %520, %cst_196 {dimension_numbers = #tpu.dot_dimension_numbers<[1], [0], [0], [1], [0, 0, 1, 1], [], []>} : vector<4x4xbf16>, vector<4x8xbf16>, vector<4x8xf32> -> vector<4x8xf32>
    %536 = arith.truncf %535 : vector<4x8xf32> to vector<4x8xbf16>
    %c5_197 = arith.constant 5 : index
    %c0_198 = arith.constant 0 : index
    %c24_199 = arith.constant 24 : index
    %537 = vector.load %arg2[%c5_197, %c0_198, %c24_199] : memref<8x4x32xbf16, #tpu.memory_space<vmem>>, vector<1x4x8xbf16>
    %538 = vector.shape_cast %537 : vector<1x4x8xbf16> to vector<4x8xbf16>
    %539 = vector.shape_cast %536 : vector<4x8xbf16> to vector<1x4x8xbf16>
    tpu.vector_store %arg2[%c5_197, %c0_198, %c24_199], %539 {strides = array<i32>} : memref<8x4x32xbf16, #tpu.memory_space<vmem>>, vector<1x4x8xbf16>,
    %c6 = arith.constant 6 : index
    %c0_200 = arith.constant 0 : index
    %c0_201 = arith.constant 0 : index
    %540 = vector.load %arg1[%c6, %c0_200, %c0_201] : memref<8x4x96xbf16, #tpu.memory_space<vmem>>, vector<1x4x96xbf16>
    %541 = vector.shape_cast %540 : vector<1x4x96xbf16> to vector<4x96xbf16>
    %542 = vector.extract_strided_slice %541 {offsets = [0, 0], sizes = [4, 8], strides = [1, 1]} : vector<4x96xbf16> to vector<4x8xbf16>
    %543 = vector.extract_strided_slice %541 {offsets = [0, 32], sizes = [4, 8], strides = [1, 1]} : vector<4x96xbf16> to vector<4x8xbf16>
    %544 = vector.extract_strided_slice %541 {offsets = [0, 64], sizes = [4, 8], strides = [1, 1]} : vector<4x96xbf16> to vector<4x8xbf16>
    %cst_202 = arith.constant dense<0.000000e+00> : vector<4x4xf32>
    %545 = tpu.matmul %542, %543, %cst_202 {dimension_numbers = #tpu.dot_dimension_numbers<[1], [1], [0], [0], [0, 0, 1, 0], [], []>} : vector<4x8xbf16>, vector<4x8xbf16>, vector<4x4xf32> -> vector<4x4xf32>
    %cst_203 = arith.constant 0.353553385 : f32
    %546 = vector.broadcast %cst_203 : f32 to vector<4x4xf32>
    %547 = arith.mulf %545, %546 : vector<4x4xf32>
    %cst_204 = arith.constant dense<0xFF800000> : vector<4xf32>
    %548 = vector.multi_reduction <maximumf>, %547, %cst_204 [1] : vector<4x4xf32> to vector<4xf32>
    %549 = vector.shape_cast %548 : vector<4xf32> to vector<4x1xf32>
    %550 = vector.broadcast %549 : vector<4x1xf32> to vector<4x4xf32>
    %551 = arith.subf %547, %550 : vector<4x4xf32>
    %552 = math.exp %551 : vector<4x4xf32>
    %cst_205 = arith.constant dense<0.000000e+00> : vector<4xf32>
    %553 = vector.multi_reduction <add>, %552, %cst_205 [1] : vector<4x4xf32> to vector<4xf32>
    %554 = vector.shape_cast %553 : vector<4xf32> to vector<4x1xf32>
    %555 = tpu.reciprocal %554 {approx = true} : vector<4x1xf32> -> vector<4x1xf32>
    %556 = vector.broadcast %555 : vector<4x1xf32> to vector<4x4xf32>
    %557 = arith.mulf %552, %556 : vector<4x4xf32>
    %558 = arith.truncf %557 : vector<4x4xf32> to vector<4x4xbf16>
    %cst_206 = arith.constant dense<0.000000e+00> : vector<4x8xf32>
    %559 = tpu.matmul %558, %544, %cst_206 {dimension_numbers = #tpu.dot_dimension_numbers<[1], [0], [0], [1], [0, 0, 1, 1], [], []>} : vector<4x4xbf16>, vector<4x8xbf16>, vector<4x8xf32> -> vector<4x8xf32>
    %560 = arith.truncf %559 : vector<4x8xf32> to vector<4x8xbf16>
    %c6_207 = arith.constant 6 : index
    %c0_208 = arith.constant 0 : index
    %c0_209 = arith.constant 0 : index
    %561 = vector.load %arg2[%c6_207, %c0_208, %c0_209] : memref<8x4x32xbf16, #tpu.memory_space<vmem>>, vector<1x4x8xbf16>
    %562 = vector.shape_cast %561 : vector<1x4x8xbf16> to vector<4x8xbf16>
    %563 = vector.shape_cast %560 : vector<4x8xbf16> to vector<1x4x8xbf16>
    tpu.vector_store %arg2[%c6_207, %c0_208, %c0_209], %563 {strides = array<i32>} : memref<8x4x32xbf16, #tpu.memory_space<vmem>>, vector<1x4x8xbf16>,
    %564 = vector.extract_strided_slice %541 {offsets = [0, 8], sizes = [4, 8], strides = [1, 1]} : vector<4x96xbf16> to vector<4x8xbf16>
    %565 = vector.extract_strided_slice %541 {offsets = [0, 40], sizes = [4, 8], strides = [1, 1]} : vector<4x96xbf16> to vector<4x8xbf16>
    %566 = vector.extract_strided_slice %541 {offsets = [0, 72], sizes = [4, 8], strides = [1, 1]} : vector<4x96xbf16> to vector<4x8xbf16>
    %cst_210 = arith.constant dense<0.000000e+00> : vector<4x4xf32>
    %567 = tpu.matmul %564, %565, %cst_210 {dimension_numbers = #tpu.dot_dimension_numbers<[1], [1], [0], [0], [0, 0, 1, 0], [], []>} : vector<4x8xbf16>, vector<4x8xbf16>, vector<4x4xf32> -> vector<4x4xf32>
    %cst_211 = arith.constant 0.353553385 : f32
    %568 = vector.broadcast %cst_211 : f32 to vector<4x4xf32>
    %569 = arith.mulf %567, %568 : vector<4x4xf32>
    %cst_212 = arith.constant dense<0xFF800000> : vector<4xf32>
    %570 = vector.multi_reduction <maximumf>, %569, %cst_212 [1] : vector<4x4xf32> to vector<4xf32>
    %571 = vector.shape_cast %570 : vector<4xf32> to vector<4x1xf32>
    %572 = vector.broadcast %571 : vector<4x1xf32> to vector<4x4xf32>
    %573 = arith.subf %569, %572 : vector<4x4xf32>
    %574 = math.exp %573 : vector<4x4xf32>
    %cst_213 = arith.constant dense<0.000000e+00> : vector<4xf32>
    %575 = vector.multi_reduction <add>, %574, %cst_213 [1] : vector<4x4xf32> to vector<4xf32>
    %576 = vector.shape_cast %575 : vector<4xf32> to vector<4x1xf32>
    %577 = tpu.reciprocal %576 {approx = true} : vector<4x1xf32> -> vector<4x1xf32>
    %578 = vector.broadcast %577 : vector<4x1xf32> to vector<4x4xf32>
    %579 = arith.mulf %574, %578 : vector<4x4xf32>
    %580 = arith.truncf %579 : vector<4x4xf32> to vector<4x4xbf16>
    %cst_214 = arith.constant dense<0.000000e+00> : vector<4x8xf32>
    %581 = tpu.matmul %580, %566, %cst_214 {dimension_numbers = #tpu.dot_dimension_numbers<[1], [0], [0], [1], [0, 0, 1, 1], [], []>} : vector<4x4xbf16>, vector<4x8xbf16>, vector<4x8xf32> -> vector<4x8xf32>
    %582 = arith.truncf %581 : vector<4x8xf32> to vector<4x8xbf16>
    %c6_215 = arith.constant 6 : index
    %c0_216 = arith.constant 0 : index
    %c8_217 = arith.constant 8 : index
    %583 = vector.load %arg2[%c6_215, %c0_216, %c8_217] : memref<8x4x32xbf16, #tpu.memory_space<vmem>>, vector<1x4x8xbf16>
    %584 = vector.shape_cast %583 : vector<1x4x8xbf16> to vector<4x8xbf16>
    %585 = vector.shape_cast %582 : vector<4x8xbf16> to vector<1x4x8xbf16>
    tpu.vector_store %arg2[%c6_215, %c0_216, %c8_217], %585 {strides = array<i32>} : memref<8x4x32xbf16, #tpu.memory_space<vmem>>, vector<1x4x8xbf16>,
    %586 = vector.extract_strided_slice %541 {offsets = [0, 16], sizes = [4, 8], strides = [1, 1]} : vector<4x96xbf16> to vector<4x8xbf16>
    %587 = vector.extract_strided_slice %541 {offsets = [0, 48], sizes = [4, 8], strides = [1, 1]} : vector<4x96xbf16> to vector<4x8xbf16>
    %588 = vector.extract_strided_slice %541 {offsets = [0, 80], sizes = [4, 8], strides = [1, 1]} : vector<4x96xbf16> to vector<4x8xbf16>
    %cst_218 = arith.constant dense<0.000000e+00> : vector<4x4xf32>
    %589 = tpu.matmul %586, %587, %cst_218 {dimension_numbers = #tpu.dot_dimension_numbers<[1], [1], [0], [0], [0, 0, 1, 0], [], []>} : vector<4x8xbf16>, vector<4x8xbf16>, vector<4x4xf32> -> vector<4x4xf32>
    %cst_219 = arith.constant 0.353553385 : f32
    %590 = vector.broadcast %cst_219 : f32 to vector<4x4xf32>
    %591 = arith.mulf %589, %590 : vector<4x4xf32>
    %cst_220 = arith.constant dense<0xFF800000> : vector<4xf32>
    %592 = vector.multi_reduction <maximumf>, %591, %cst_220 [1] : vector<4x4xf32> to vector<4xf32>
    %593 = vector.shape_cast %592 : vector<4xf32> to vector<4x1xf32>
    %594 = vector.broadcast %593 : vector<4x1xf32> to vector<4x4xf32>
    %595 = arith.subf %591, %594 : vector<4x4xf32>
    %596 = math.exp %595 : vector<4x4xf32>
    %cst_221 = arith.constant dense<0.000000e+00> : vector<4xf32>
    %597 = vector.multi_reduction <add>, %596, %cst_221 [1] : vector<4x4xf32> to vector<4xf32>
    %598 = vector.shape_cast %597 : vector<4xf32> to vector<4x1xf32>
    %599 = tpu.reciprocal %598 {approx = true} : vector<4x1xf32> -> vector<4x1xf32>
    %600 = vector.broadcast %599 : vector<4x1xf32> to vector<4x4xf32>
    %601 = arith.mulf %596, %600 : vector<4x4xf32>
    %602 = arith.truncf %601 : vector<4x4xf32> to vector<4x4xbf16>
    %cst_222 = arith.constant dense<0.000000e+00> : vector<4x8xf32>
    %603 = tpu.matmul %602, %588, %cst_222 {dimension_numbers = #tpu.dot_dimension_numbers<[1], [0], [0], [1], [0, 0, 1, 1], [], []>} : vector<4x4xbf16>, vector<4x8xbf16>, vector<4x8xf32> -> vector<4x8xf32>
    %604 = arith.truncf %603 : vector<4x8xf32> to vector<4x8xbf16>
    %c6_223 = arith.constant 6 : index
    %c0_224 = arith.constant 0 : index
    %c16_225 = arith.constant 16 : index
    %605 = vector.load %arg2[%c6_223, %c0_224, %c16_225] : memref<8x4x32xbf16, #tpu.memory_space<vmem>>, vector<1x4x8xbf16>
    %606 = vector.shape_cast %605 : vector<1x4x8xbf16> to vector<4x8xbf16>
    %607 = vector.shape_cast %604 : vector<4x8xbf16> to vector<1x4x8xbf16>
    tpu.vector_store %arg2[%c6_223, %c0_224, %c16_225], %607 {strides = array<i32>} : memref<8x4x32xbf16, #tpu.memory_space<vmem>>, vector<1x4x8xbf16>,
    %608 = vector.extract_strided_slice %541 {offsets = [0, 24], sizes = [4, 8], strides = [1, 1]} : vector<4x96xbf16> to vector<4x8xbf16>
    %609 = vector.extract_strided_slice %541 {offsets = [0, 56], sizes = [4, 8], strides = [1, 1]} : vector<4x96xbf16> to vector<4x8xbf16>
    %610 = vector.extract_strided_slice %541 {offsets = [0, 88], sizes = [4, 8], strides = [1, 1]} : vector<4x96xbf16> to vector<4x8xbf16>
    %cst_226 = arith.constant dense<0.000000e+00> : vector<4x4xf32>
    %611 = tpu.matmul %608, %609, %cst_226 {dimension_numbers = #tpu.dot_dimension_numbers<[1], [1], [0], [0], [0, 0, 1, 0], [], []>} : vector<4x8xbf16>, vector<4x8xbf16>, vector<4x4xf32> -> vector<4x4xf32>
    %cst_227 = arith.constant 0.353553385 : f32
    %612 = vector.broadcast %cst_227 : f32 to vector<4x4xf32>
    %613 = arith.mulf %611, %612 : vector<4x4xf32>
    %cst_228 = arith.constant dense<0xFF800000> : vector<4xf32>
    %614 = vector.multi_reduction <maximumf>, %613, %cst_228 [1] : vector<4x4xf32> to vector<4xf32>
    %615 = vector.shape_cast %614 : vector<4xf32> to vector<4x1xf32>
    %616 = vector.broadcast %615 : vector<4x1xf32> to vector<4x4xf32>
    %617 = arith.subf %613, %616 : vector<4x4xf32>
    %618 = math.exp %617 : vector<4x4xf32>
    %cst_229 = arith.constant dense<0.000000e+00> : vector<4xf32>
    %619 = vector.multi_reduction <add>, %618, %cst_229 [1] : vector<4x4xf32> to vector<4xf32>
    %620 = vector.shape_cast %619 : vector<4xf32> to vector<4x1xf32>
    %621 = tpu.reciprocal %620 {approx = true} : vector<4x1xf32> -> vector<4x1xf32>
    %622 = vector.broadcast %621 : vector<4x1xf32> to vector<4x4xf32>
    %623 = arith.mulf %618, %622 : vector<4x4xf32>
    %624 = arith.truncf %623 : vector<4x4xf32> to vector<4x4xbf16>
    %cst_230 = arith.constant dense<0.000000e+00> : vector<4x8xf32>
    %625 = tpu.matmul %624, %610, %cst_230 {dimension_numbers = #tpu.dot_dimension_numbers<[1], [0], [0], [1], [0, 0, 1, 1], [], []>} : vector<4x4xbf16>, vector<4x8xbf16>, vector<4x8xf32> -> vector<4x8xf32>
    %626 = arith.truncf %625 : vector<4x8xf32> to vector<4x8xbf16>
    %c6_231 = arith.constant 6 : index
    %c0_232 = arith.constant 0 : index
    %c24_233 = arith.constant 24 : index
    %627 = vector.load %arg2[%c6_231, %c0_232, %c24_233] : memref<8x4x32xbf16, #tpu.memory_space<vmem>>, vector<1x4x8xbf16>
    %628 = vector.shape_cast %627 : vector<1x4x8xbf16> to vector<4x8xbf16>
    %629 = vector.shape_cast %626 : vector<4x8xbf16> to vector<1x4x8xbf16>
    tpu.vector_store %arg2[%c6_231, %c0_232, %c24_233], %629 {strides = array<i32>} : memref<8x4x32xbf16, #tpu.memory_space<vmem>>, vector<1x4x8xbf16>,
    %c7 = arith.constant 7 : index
    %c0_234 = arith.constant 0 : index
    %c0_235 = arith.constant 0 : index
    %630 = vector.load %arg1[%c7, %c0_234, %c0_235] : memref<8x4x96xbf16, #tpu.memory_space<vmem>>, vector<1x4x96xbf16>
    %631 = vector.shape_cast %630 : vector<1x4x96xbf16> to vector<4x96xbf16>
    %632 = vector.extract_strided_slice %631 {offsets = [0, 0], sizes = [4, 8], strides = [1, 1]} : vector<4x96xbf16> to vector<4x8xbf16>
    %633 = vector.extract_strided_slice %631 {offsets = [0, 32], sizes = [4, 8], strides = [1, 1]} : vector<4x96xbf16> to vector<4x8xbf16>
    %634 = vector.extract_strided_slice %631 {offsets = [0, 64], sizes = [4, 8], strides = [1, 1]} : vector<4x96xbf16> to vector<4x8xbf16>
    %cst_236 = arith.constant dense<0.000000e+00> : vector<4x4xf32>
    %635 = tpu.matmul %632, %633, %cst_236 {dimension_numbers = #tpu.dot_dimension_numbers<[1], [1], [0], [0], [0, 0, 1, 0], [], []>} : vector<4x8xbf16>, vector<4x8xbf16>, vector<4x4xf32> -> vector<4x4xf32>
    %cst_237 = arith.constant 0.353553385 : f32
    %636 = vector.broadcast %cst_237 : f32 to vector<4x4xf32>
    %637 = arith.mulf %635, %636 : vector<4x4xf32>
    %cst_238 = arith.constant dense<0xFF800000> : vector<4xf32>
    %638 = vector.multi_reduction <maximumf>, %637, %cst_238 [1] : vector<4x4xf32> to vector<4xf32>
    %639 = vector.shape_cast %638 : vector<4xf32> to vector<4x1xf32>
    %640 = vector.broadcast %639 : vector<4x1xf32> to vector<4x4xf32>
    %641 = arith.subf %637, %640 : vector<4x4xf32>
    %642 = math.exp %641 : vector<4x4xf32>
    %cst_239 = arith.constant dense<0.000000e+00> : vector<4xf32>
    %643 = vector.multi_reduction <add>, %642, %cst_239 [1] : vector<4x4xf32> to vector<4xf32>
    %644 = vector.shape_cast %643 : vector<4xf32> to vector<4x1xf32>
    %645 = tpu.reciprocal %644 {approx = true} : vector<4x1xf32> -> vector<4x1xf32>
    %646 = vector.broadcast %645 : vector<4x1xf32> to vector<4x4xf32>
    %647 = arith.mulf %642, %646 : vector<4x4xf32>
    %648 = arith.truncf %647 : vector<4x4xf32> to vector<4x4xbf16>
    %cst_240 = arith.constant dense<0.000000e+00> : vector<4x8xf32>
    %649 = tpu.matmul %648, %634, %cst_240 {dimension_numbers = #tpu.dot_dimension_numbers<[1], [0], [0], [1], [0, 0, 1, 1], [], []>} : vector<4x4xbf16>, vector<4x8xbf16>, vector<4x8xf32> -> vector<4x8xf32>
    %650 = arith.truncf %649 : vector<4x8xf32> to vector<4x8xbf16>
    %c7_241 = arith.constant 7 : index
    %c0_242 = arith.constant 0 : index
    %c0_243 = arith.constant 0 : index
    %651 = vector.load %arg2[%c7_241, %c0_242, %c0_243] : memref<8x4x32xbf16, #tpu.memory_space<vmem>>, vector<1x4x8xbf16>
    %652 = vector.shape_cast %651 : vector<1x4x8xbf16> to vector<4x8xbf16>
    %653 = vector.shape_cast %650 : vector<4x8xbf16> to vector<1x4x8xbf16>
    tpu.vector_store %arg2[%c7_241, %c0_242, %c0_243], %653 {strides = array<i32>} : memref<8x4x32xbf16, #tpu.memory_space<vmem>>, vector<1x4x8xbf16>,
    %654 = vector.extract_strided_slice %631 {offsets = [0, 8], sizes = [4, 8], strides = [1, 1]} : vector<4x96xbf16> to vector<4x8xbf16>
    %655 = vector.extract_strided_slice %631 {offsets = [0, 40], sizes = [4, 8], strides = [1, 1]} : vector<4x96xbf16> to vector<4x8xbf16>
    %656 = vector.extract_strided_slice %631 {offsets = [0, 72], sizes = [4, 8], strides = [1, 1]} : vector<4x96xbf16> to vector<4x8xbf16>
    %cst_244 = arith.constant dense<0.000000e+00> : vector<4x4xf32>
    %657 = tpu.matmul %654, %655, %cst_244 {dimension_numbers = #tpu.dot_dimension_numbers<[1], [1], [0], [0], [0, 0, 1, 0], [], []>} : vector<4x8xbf16>, vector<4x8xbf16>, vector<4x4xf32> -> vector<4x4xf32>
    %cst_245 = arith.constant 0.353553385 : f32
    %658 = vector.broadcast %cst_245 : f32 to vector<4x4xf32>
    %659 = arith.mulf %657, %658 : vector<4x4xf32>
    %cst_246 = arith.constant dense<0xFF800000> : vector<4xf32>
    %660 = vector.multi_reduction <maximumf>, %659, %cst_246 [1] : vector<4x4xf32> to vector<4xf32>
    %661 = vector.shape_cast %660 : vector<4xf32> to vector<4x1xf32>
    %662 = vector.broadcast %661 : vector<4x1xf32> to vector<4x4xf32>
    %663 = arith.subf %659, %662 : vector<4x4xf32>
    %664 = math.exp %663 : vector<4x4xf32>
    %cst_247 = arith.constant dense<0.000000e+00> : vector<4xf32>
    %665 = vector.multi_reduction <add>, %664, %cst_247 [1] : vector<4x4xf32> to vector<4xf32>
    %666 = vector.shape_cast %665 : vector<4xf32> to vector<4x1xf32>
    %667 = tpu.reciprocal %666 {approx = true} : vector<4x1xf32> -> vector<4x1xf32>
    %668 = vector.broadcast %667 : vector<4x1xf32> to vector<4x4xf32>
    %669 = arith.mulf %664, %668 : vector<4x4xf32>
    %670 = arith.truncf %669 : vector<4x4xf32> to vector<4x4xbf16>
    %cst_248 = arith.constant dense<0.000000e+00> : vector<4x8xf32>
    %671 = tpu.matmul %670, %656, %cst_248 {dimension_numbers = #tpu.dot_dimension_numbers<[1], [0], [0], [1], [0, 0, 1, 1], [], []>} : vector<4x4xbf16>, vector<4x8xbf16>, vector<4x8xf32> -> vector<4x8xf32>
    %672 = arith.truncf %671 : vector<4x8xf32> to vector<4x8xbf16>
    %c7_249 = arith.constant 7 : index
    %c0_250 = arith.constant 0 : index
    %c8_251 = arith.constant 8 : index
    %673 = vector.load %arg2[%c7_249, %c0_250, %c8_251] : memref<8x4x32xbf16, #tpu.memory_space<vmem>>, vector<1x4x8xbf16>
    %674 = vector.shape_cast %673 : vector<1x4x8xbf16> to vector<4x8xbf16>
    %675 = vector.shape_cast %672 : vector<4x8xbf16> to vector<1x4x8xbf16>
    tpu.vector_store %arg2[%c7_249, %c0_250, %c8_251], %675 {strides = array<i32>} : memref<8x4x32xbf16, #tpu.memory_space<vmem>>, vector<1x4x8xbf16>,
    %676 = vector.extract_strided_slice %631 {offsets = [0, 16], sizes = [4, 8], strides = [1, 1]} : vector<4x96xbf16> to vector<4x8xbf16>
    %677 = vector.extract_strided_slice %631 {offsets = [0, 48], sizes = [4, 8], strides = [1, 1]} : vector<4x96xbf16> to vector<4x8xbf16>
    %678 = vector.extract_strided_slice %631 {offsets = [0, 80], sizes = [4, 8], strides = [1, 1]} : vector<4x96xbf16> to vector<4x8xbf16>
    %cst_252 = arith.constant dense<0.000000e+00> : vector<4x4xf32>
    %679 = tpu.matmul %676, %677, %cst_252 {dimension_numbers = #tpu.dot_dimension_numbers<[1], [1], [0], [0], [0, 0, 1, 0], [], []>} : vector<4x8xbf16>, vector<4x8xbf16>, vector<4x4xf32> -> vector<4x4xf32>
    %cst_253 = arith.constant 0.353553385 : f32
    %680 = vector.broadcast %cst_253 : f32 to vector<4x4xf32>
    %681 = arith.mulf %679, %680 : vector<4x4xf32>
    %cst_254 = arith.constant dense<0xFF800000> : vector<4xf32>
    %682 = vector.multi_reduction <maximumf>, %681, %cst_254 [1] : vector<4x4xf32> to vector<4xf32>
    %683 = vector.shape_cast %682 : vector<4xf32> to vector<4x1xf32>
    %684 = vector.broadcast %683 : vector<4x1xf32> to vector<4x4xf32>
    %685 = arith.subf %681, %684 : vector<4x4xf32>
    %686 = math.exp %685 : vector<4x4xf32>
    %cst_255 = arith.constant dense<0.000000e+00> : vector<4xf32>
    %687 = vector.multi_reduction <add>, %686, %cst_255 [1] : vector<4x4xf32> to vector<4xf32>
    %688 = vector.shape_cast %687 : vector<4xf32> to vector<4x1xf32>
    %689 = tpu.reciprocal %688 {approx = true} : vector<4x1xf32> -> vector<4x1xf32>
    %690 = vector.broadcast %689 : vector<4x1xf32> to vector<4x4xf32>
    %691 = arith.mulf %686, %690 : vector<4x4xf32>
    %692 = arith.truncf %691 : vector<4x4xf32> to vector<4x4xbf16>
    %cst_256 = arith.constant dense<0.000000e+00> : vector<4x8xf32>
    %693 = tpu.matmul %692, %678, %cst_256 {dimension_numbers = #tpu.dot_dimension_numbers<[1], [0], [0], [1], [0, 0, 1, 1], [], []>} : vector<4x4xbf16>, vector<4x8xbf16>, vector<4x8xf32> -> vector<4x8xf32>
    %694 = arith.truncf %693 : vector<4x8xf32> to vector<4x8xbf16>
    %c7_257 = arith.constant 7 : index
    %c0_258 = arith.constant 0 : index
    %c16_259 = arith.constant 16 : index
    %695 = vector.load %arg2[%c7_257, %c0_258, %c16_259] : memref<8x4x32xbf16, #tpu.memory_space<vmem>>, vector<1x4x8xbf16>
    %696 = vector.shape_cast %695 : vector<1x4x8xbf16> to vector<4x8xbf16>
    %697 = vector.shape_cast %694 : vector<4x8xbf16> to vector<1x4x8xbf16>
    tpu.vector_store %arg2[%c7_257, %c0_258, %c16_259], %697 {strides = array<i32>} : memref<8x4x32xbf16, #tpu.memory_space<vmem>>, vector<1x4x8xbf16>,
    %698 = vector.extract_strided_slice %631 {offsets = [0, 24], sizes = [4, 8], strides = [1, 1]} : vector<4x96xbf16> to vector<4x8xbf16>
    %699 = vector.extract_strided_slice %631 {offsets = [0, 56], sizes = [4, 8], strides = [1, 1]} : vector<4x96xbf16> to vector<4x8xbf16>
    %700 = vector.extract_strided_slice %631 {offsets = [0, 88], sizes = [4, 8], strides = [1, 1]} : vector<4x96xbf16> to vector<4x8xbf16>
    %cst_260 = arith.constant dense<0.000000e+00> : vector<4x4xf32>
    %701 = tpu.matmul %698, %699, %cst_260 {dimension_numbers = #tpu.dot_dimension_numbers<[1], [1], [0], [0], [0, 0, 1, 0], [], []>} : vector<4x8xbf16>, vector<4x8xbf16>, vector<4x4xf32> -> vector<4x4xf32>
    %cst_261 = arith.constant 0.353553385 : f32
    %702 = vector.broadcast %cst_261 : f32 to vector<4x4xf32>
    %703 = arith.mulf %701, %702 : vector<4x4xf32>
    %cst_262 = arith.constant dense<0xFF800000> : vector<4xf32>
    %704 = vector.multi_reduction <maximumf>, %703, %cst_262 [1] : vector<4x4xf32> to vector<4xf32>
    %705 = vector.shape_cast %704 : vector<4xf32> to vector<4x1xf32>
    %706 = vector.broadcast %705 : vector<4x1xf32> to vector<4x4xf32>
    %707 = arith.subf %703, %706 : vector<4x4xf32>
    %708 = math.exp %707 : vector<4x4xf32>
    %cst_263 = arith.constant dense<0.000000e+00> : vector<4xf32>
    %709 = vector.multi_reduction <add>, %708, %cst_263 [1] : vector<4x4xf32> to vector<4xf32>
    %710 = vector.shape_cast %709 : vector<4xf32> to vector<4x1xf32>
    %711 = tpu.reciprocal %710 {approx = true} : vector<4x1xf32> -> vector<4x1xf32>
    %712 = vector.broadcast %711 : vector<4x1xf32> to vector<4x4xf32>
    %713 = arith.mulf %708, %712 : vector<4x4xf32>
    %714 = arith.truncf %713 : vector<4x4xf32> to vector<4x4xbf16>
    %cst_264 = arith.constant dense<0.000000e+00> : vector<4x8xf32>
    %715 = tpu.matmul %714, %700, %cst_264 {dimension_numbers = #tpu.dot_dimension_numbers<[1], [0], [0], [1], [0, 0, 1, 1], [], []>} : vector<4x4xbf16>, vector<4x8xbf16>, vector<4x8xf32> -> vector<4x8xf32>
    %716 = arith.truncf %715 : vector<4x8xf32> to vector<4x8xbf16>
    %c7_265 = arith.constant 7 : index
    %c0_266 = arith.constant 0 : index
    %c24_267 = arith.constant 24 : index
    %717 = vector.load %arg2[%c7_265, %c0_266, %c24_267] : memref<8x4x32xbf16, #tpu.memory_space<vmem>>, vector<1x4x8xbf16>
    %718 = vector.shape_cast %717 : vector<1x4x8xbf16> to vector<4x8xbf16>
    %719 = vector.shape_cast %716 : vector<4x8xbf16> to vector<1x4x8xbf16>
    tpu.vector_store %arg2[%c7_265, %c0_266, %c24_267], %719 {strides = array<i32>} : memref<8x4x32xbf16, #tpu.memory_space<vmem>>, vector<1x4x8xbf16>,
    return
  }
  func.func @transform_0(%arg0: i32) -> (i32, i32, i32) {
    %c0_i32 = arith.constant 0 : i32
    %c0_i32_0 = arith.constant 0 : i32
    %c0_i32_1 = arith.constant 0 : i32
    return %arg0, %c0_i32, %c0_i32_0 : i32, i32, i32
  }
  func.func @transform_1(%arg0: i32) -> (i32, i32, i32) {
    %c0_i32 = arith.constant 0 : i32
    %c0_i32_0 = arith.constant 0 : i32
    %c0_i32_1 = arith.constant 0 : i32
    return %arg0, %c0_i32, %c0_i32_0 : i32, i32, i32
  }
}

module attributes {stable_mosaic.version = 11 : i64} {
  func.func @_linear_kernel(%arg0: i32, %arg1: i32, %arg2: i32, %arg3: memref<32x128xbf16, #tpu.memory_space<vmem>>, %arg4: memref<128x128xbf16, #tpu.memory_space<vmem>>, %arg5: memref<1x128xf32, #tpu.memory_space<vmem>>, %arg6: memref<1x128xf32, #tpu.memory_space<vmem>>, %arg7: memref<1x128xf32, #tpu.memory_space<vmem>>, %arg8: memref<32x128xbf16, #tpu.memory_space<vmem>>, %arg9: memref<32x128xf32, #tpu.memory_space<vmem>>) attributes {dimension_semantics = [#tpu.dimension_semantics<parallel>, #tpu.dimension_semantics<parallel>, #tpu.dimension_semantics<arbitrary>], iteration_bounds = array<i64: 1, 1, 1>, scalar_prefetch = 0 : i64, scratch_operands = 1 : i64, tpu.core_type = #tpu.core_type<tc>, window_params = [{transform_indices = @transform_0, window_bounds = array<i64: 32, 128>}, {transform_indices = @transform_1, window_bounds = array<i64: 128, 128>}, {transform_indices = @transform_2, window_bounds = array<i64: 1, 128>}, {transform_indices = @transform_3, window_bounds = array<i64: 1, 128>}, {transform_indices = @transform_4, window_bounds = array<i64: 1, 128>}, {transform_indices = @transform_5, window_bounds = array<i64: 32, 128>}]} {
    %c0_i32 = arith.constant 0 : i32
    %0 = arith.cmpi eq, %arg2, %c0_i32 : i32
    %1 = arith.extui %0 : i1 to i32
    %c0_i32_0 = arith.constant 0 : i32
    %2 = arith.cmpi ne, %1, %c0_i32_0 : i32
    scf.if %2 {
      %cst_21 = arith.constant 0.000000e+00 : f32
      %43 = vector.broadcast %cst_21 : f32 to vector<32x128xf32>
      %c0_22 = arith.constant 0 : index
      %c0_23 = arith.constant 0 : index
      %44 = vector.load %arg9[%c0_22, %c0_23] : memref<32x128xf32, #tpu.memory_space<vmem>>, vector<32x128xf32>
      tpu.vector_store %arg9[%c0_22, %c0_23], %43 {strides = array<i32>} : memref<32x128xf32, #tpu.memory_space<vmem>>, vector<32x128xf32>,
    } else {
    }
    %c0 = arith.constant 0 : index
    %c0_1 = arith.constant 0 : index
    %3 = vector.load %arg3[%c0, %c0_1] : memref<32x128xbf16, #tpu.memory_space<vmem>>, vector<32x128xbf16>
    %4 = arith.extf %3 : vector<32x128xbf16> to vector<32x128xf32>
    %5 = tpu.iota {dimensions = array<i32: 1>} : vector<32x128xi32>
    %c32_i32 = arith.constant 32 : i32
    %6 = vector.broadcast %c32_i32 : i32 to vector<32x128xi32>
    %7 = arith.cmpi slt, %5, %6 : vector<32x128xi32>
    %cst = arith.constant 0.000000e+00 : f32
    %8 = vector.broadcast %cst : f32 to vector<32x128xf32>
    %9 = arith.select %7, %4, %8 : vector<32x128xi1>, vector<32x128xf32>
    %cst_2 = arith.constant dense<0.000000e+00> : vector<32xf32>
    %10 = vector.multi_reduction <add>, %9, %cst_2 [1] : vector<32x128xf32> to vector<32xf32>
    %11 = vector.shape_cast %10 : vector<32xf32> to vector<32x1xf32>
    %cst_3 = arith.constant 3.125000e-02 : f32
    %12 = vector.broadcast %cst_3 : f32 to vector<32x1xf32>
    %13 = arith.mulf %11, %12 : vector<32x1xf32>
    %14 = vector.broadcast %13 : vector<32x1xf32> to vector<32x128xf32>
    %15 = arith.subf %9, %14 : vector<32x128xf32>
    %cst_4 = arith.constant 0.000000e+00 : f32
    %16 = vector.broadcast %cst_4 : f32 to vector<32x128xf32>
    %17 = arith.select %7, %15, %16 : vector<32x128xi1>, vector<32x128xf32>
    %18 = arith.mulf %17, %17 : vector<32x128xf32>
    %cst_5 = arith.constant dense<0.000000e+00> : vector<32xf32>
    %19 = vector.multi_reduction <add>, %18, %cst_5 [1] : vector<32x128xf32> to vector<32xf32>
    %20 = vector.shape_cast %19 : vector<32xf32> to vector<32x1xf32>
    %cst_6 = arith.constant 3.125000e-02 : f32
    %21 = vector.broadcast %cst_6 : f32 to vector<32x1xf32>
    %22 = arith.mulf %20, %21 : vector<32x1xf32>
    %cst_7 = arith.constant 9.99999974E-6 : f32
    %23 = vector.broadcast %cst_7 : f32 to vector<32x1xf32>
    %24 = arith.addf %22, %23 : vector<32x1xf32>
    %25 = math.rsqrt %24 : vector<32x1xf32>
    %26 = vector.broadcast %25 : vector<32x1xf32> to vector<32x128xf32>
    %27 = arith.mulf %17, %26 : vector<32x128xf32>
    %c0_8 = arith.constant 0 : index
    %c0_9 = arith.constant 0 : index
    %28 = vector.load %arg6[%c0_8, %c0_9] : memref<1x128xf32, #tpu.memory_space<vmem>>, vector<1x128xf32>
    %29 = vector.broadcast %28 : vector<1x128xf32> to vector<32x128xf32>
    %30 = arith.mulf %27, %29 : vector<32x128xf32>
    %c0_10 = arith.constant 0 : index
    %c0_11 = arith.constant 0 : index
    %31 = vector.load %arg7[%c0_10, %c0_11] : memref<1x128xf32, #tpu.memory_space<vmem>>, vector<1x128xf32>
    %32 = vector.broadcast %31 : vector<1x128xf32> to vector<32x128xf32>
    %33 = arith.addf %30, %32 : vector<32x128xf32>
    %34 = arith.truncf %33 : vector<32x128xf32> to vector<32x128xbf16>
    %c0_12 = arith.constant 0 : index
    %c0_13 = arith.constant 0 : index
    %35 = vector.load %arg9[%c0_12, %c0_13] : memref<32x128xf32, #tpu.memory_space<vmem>>, vector<32x128xf32>
    %c0_14 = arith.constant 0 : index
    %c0_15 = arith.constant 0 : index
    %36 = vector.load %arg4[%c0_14, %c0_15] : memref<128x128xbf16, #tpu.memory_space<vmem>>, vector<128x128xbf16>
    %cst_16 = arith.constant dense<0.000000e+00> : vector<32x128xf32>
    %37 = tpu.matmul %34, %36, %cst_16 {dimension_numbers = #tpu.dot_dimension_numbers<[1], [0], [0], [1], [0, 0, 1, 1], [], []>} : vector<32x128xbf16>, vector<128x128xbf16>, vector<32x128xf32> -> vector<32x128xf32>
    %38 = arith.addf %35, %37 : vector<32x128xf32>
    %c0_17 = arith.constant 0 : index
    %c0_18 = arith.constant 0 : index
    %39 = vector.load %arg9[%c0_17, %c0_18] : memref<32x128xf32, #tpu.memory_space<vmem>>, vector<32x128xf32>
    tpu.vector_store %arg9[%c0_17, %c0_18], %38 {strides = array<i32>} : memref<32x128xf32, #tpu.memory_space<vmem>>, vector<32x128xf32>,
    %c0_i32_19 = arith.constant 0 : i32
    %40 = arith.cmpi eq, %arg2, %c0_i32_19 : i32
    %41 = arith.extui %40 : i1 to i32
    %c0_i32_20 = arith.constant 0 : i32
    %42 = arith.cmpi ne, %41, %c0_i32_20 : i32
    scf.if %42 {
      %c0_21 = arith.constant 0 : index
      %c0_22 = arith.constant 0 : index
      %43 = vector.load %arg9[%c0_21, %c0_22] : memref<32x128xf32, #tpu.memory_space<vmem>>, vector<32x128xf32>
      %c0_23 = arith.constant 0 : index
      %c0_24 = arith.constant 0 : index
      %44 = vector.load %arg5[%c0_23, %c0_24] : memref<1x128xf32, #tpu.memory_space<vmem>>, vector<1x128xf32>
      %45 = vector.broadcast %44 : vector<1x128xf32> to vector<32x128xf32>
      %46 = arith.addf %43, %45 : vector<32x128xf32>
      %cst_25 = arith.constant 5.000000e-01 : f32
      %47 = vector.broadcast %cst_25 : f32 to vector<32x128xf32>
      %48 = arith.mulf %47, %46 : vector<32x128xf32>
      %cst_26 = arith.constant 0.707106769 : f32
      %49 = vector.broadcast %cst_26 : f32 to vector<32x128xf32>
      %50 = arith.mulf %46, %49 : vector<32x128xf32>
      %51 = math.erf %50 : vector<32x128xf32>
      %cst_27 = arith.constant 1.000000e+00 : f32
      %52 = vector.broadcast %cst_27 : f32 to vector<32x128xf32>
      %53 = arith.addf %52, %51 : vector<32x128xf32>
      %54 = arith.mulf %48, %53 : vector<32x128xf32>
      %55 = arith.truncf %54 : vector<32x128xf32> to vector<32x128xbf16>
      %c0_28 = arith.constant 0 : index
      %c0_29 = arith.constant 0 : index
      %56 = vector.load %arg8[%c0_28, %c0_29] : memref<32x128xbf16, #tpu.memory_space<vmem>>, vector<32x128xbf16>
      tpu.vector_store %arg8[%c0_28, %c0_29], %55 {strides = array<i32>} : memref<32x128xbf16, #tpu.memory_space<vmem>>, vector<32x128xbf16>,
    } else {
    }
    return
  }
  func.func @transform_0(%arg0: i32, %arg1: i32, %arg2: i32) -> (i32, i32) {
    %c0_i32 = arith.constant 0 : i32
    return %arg0, %arg2 : i32, i32
  }
  func.func @transform_1(%arg0: i32, %arg1: i32, %arg2: i32) -> (i32, i32) {
    %c0_i32 = arith.constant 0 : i32
    return %arg2, %arg1 : i32, i32
  }
  func.func @transform_2(%arg0: i32, %arg1: i32, %arg2: i32) -> (i32, i32) {
    %c0_i32 = arith.constant 0 : i32
    %c0_i32_0 = arith.constant 0 : i32
    return %c0_i32, %arg1 : i32, i32
  }
  func.func @transform_3(%arg0: i32, %arg1: i32, %arg2: i32) -> (i32, i32) {
    %c0_i32 = arith.constant 0 : i32
    %c0_i32_0 = arith.constant 0 : i32
    return %c0_i32, %arg2 : i32, i32
  }
  func.func @transform_4(%arg0: i32, %arg1: i32, %arg2: i32) -> (i32, i32) {
    %c0_i32 = arith.constant 0 : i32
    %c0_i32_0 = arith.constant 0 : i32
    return %c0_i32, %arg2 : i32, i32
  }
  func.func @transform_5(%arg0: i32, %arg1: i32, %arg2: i32) -> (i32, i32) {
    %c0_i32 = arith.constant 0 : i32
    return %arg0, %arg1 : i32, i32
  }
}

module attributes {stable_mosaic.version = 11 : i64} {
  func.func @_tail_kernel(%arg0: i32, %arg1: memref<2x16x32xbf16, #tpu.memory_space<vmem>>, %arg2: memref<1x32xf32, #tpu.memory_space<vmem>>, %arg3: memref<1x32xf32, #tpu.memory_space<vmem>>, %arg4: memref<32x10xbf16, #tpu.memory_space<vmem>>, %arg5: memref<1x10xf32, #tpu.memory_space<vmem>>, %arg6: memref<2x10xf32, #tpu.memory_space<vmem>>) attributes {dimension_semantics = [#tpu.dimension_semantics<parallel>], iteration_bounds = array<i64: 1>, scalar_prefetch = 0 : i64, scratch_operands = 0 : i64, tpu.core_type = #tpu.core_type<tc>, window_params = [{transform_indices = @transform_0, window_bounds = array<i64: 2, 16, 32>}, {pipeline_mode = #tpu.pipeline_mode<synchronous>, transform_indices = @transform_1, window_bounds = array<i64: 1, 32>}, {pipeline_mode = #tpu.pipeline_mode<synchronous>, transform_indices = @transform_2, window_bounds = array<i64: 1, 32>}, {pipeline_mode = #tpu.pipeline_mode<synchronous>, transform_indices = @transform_3, window_bounds = array<i64: 32, 10>}, {pipeline_mode = #tpu.pipeline_mode<synchronous>, transform_indices = @transform_4, window_bounds = array<i64: 1, 10>}, {transform_indices = @transform_5, window_bounds = array<i64: 2, 10>}]} {
    %c0 = arith.constant 0 : index
    %c0_0 = arith.constant 0 : index
    %c0_1 = arith.constant 0 : index
    %0 = vector.load %arg1[%c0, %c0_0, %c0_1] : memref<2x16x32xbf16, #tpu.memory_space<vmem>>, vector<2x16x32xbf16>
    %1 = arith.extf %0 : vector<2x16x32xbf16> to vector<2x16x32xf32>
    %cst = arith.constant dense<0.000000e+00> : vector<2x32xf32>
    %2 = vector.multi_reduction <add>, %1, %cst [1] : vector<2x16x32xf32> to vector<2x32xf32>
    %cst_2 = arith.constant 1.600000e+01 : f32
    %3 = vector.broadcast %cst_2 : f32 to vector<2x32xf32>
    %4 = arith.divf %2, %3 : vector<2x32xf32>
    %cst_3 = arith.constant dense<0.000000e+00> : vector<2xf32>
    %5 = vector.multi_reduction <add>, %4, %cst_3 [1] : vector<2x32xf32> to vector<2xf32>
    %6 = vector.shape_cast %5 : vector<2xf32> to vector<2x1xf32>
    %cst_4 = arith.constant 3.200000e+01 : f32
    %7 = vector.broadcast %cst_4 : f32 to vector<2x1xf32>
    %8 = arith.divf %6, %7 : vector<2x1xf32>
    %9 = vector.broadcast %8 : vector<2x1xf32> to vector<2x32xf32>
    %10 = arith.subf %4, %9 : vector<2x32xf32>
    %11 = arith.mulf %10, %10 : vector<2x32xf32>
    %cst_5 = arith.constant dense<0.000000e+00> : vector<2xf32>
    %12 = vector.multi_reduction <add>, %11, %cst_5 [1] : vector<2x32xf32> to vector<2xf32>
    %13 = vector.shape_cast %12 : vector<2xf32> to vector<2x1xf32>
    %cst_6 = arith.constant 3.200000e+01 : f32
    %14 = vector.broadcast %cst_6 : f32 to vector<2x1xf32>
    %15 = arith.divf %13, %14 : vector<2x1xf32>
    %16 = vector.broadcast %8 : vector<2x1xf32> to vector<2x32xf32>
    %17 = arith.subf %4, %16 : vector<2x32xf32>
    %cst_7 = arith.constant 9.99999974E-6 : f32
    %18 = vector.broadcast %cst_7 : f32 to vector<2x1xf32>
    %19 = arith.addf %15, %18 : vector<2x1xf32>
    %20 = math.rsqrt %19 : vector<2x1xf32>
    %21 = vector.broadcast %20 : vector<2x1xf32> to vector<2x32xf32>
    %22 = arith.mulf %17, %21 : vector<2x32xf32>
    %c0_8 = arith.constant 0 : index
    %c0_9 = arith.constant 0 : index
    %23 = vector.load %arg2[%c0_8, %c0_9] : memref<1x32xf32, #tpu.memory_space<vmem>>, vector<1x32xf32>
    %24 = vector.broadcast %23 : vector<1x32xf32> to vector<2x32xf32>
    %25 = arith.mulf %22, %24 : vector<2x32xf32>
    %c0_10 = arith.constant 0 : index
    %c0_11 = arith.constant 0 : index
    %26 = vector.load %arg3[%c0_10, %c0_11] : memref<1x32xf32, #tpu.memory_space<vmem>>, vector<1x32xf32>
    %27 = vector.broadcast %26 : vector<1x32xf32> to vector<2x32xf32>
    %28 = arith.addf %25, %27 : vector<2x32xf32>
    %29 = arith.truncf %28 : vector<2x32xf32> to vector<2x32xbf16>
    %c0_12 = arith.constant 0 : index
    %c0_13 = arith.constant 0 : index
    %30 = vector.load %arg4[%c0_12, %c0_13] : memref<32x10xbf16, #tpu.memory_space<vmem>>, vector<32x10xbf16>
    %cst_14 = arith.constant dense<0.000000e+00> : vector<2x10xf32>
    %31 = tpu.matmul %29, %30, %cst_14 {dimension_numbers = #tpu.dot_dimension_numbers<[1], [0], [0], [1], [0, 0, 1, 1], [], []>} : vector<2x32xbf16>, vector<32x10xbf16>, vector<2x10xf32> -> vector<2x10xf32>
    %c0_15 = arith.constant 0 : index
    %c0_16 = arith.constant 0 : index
    %32 = vector.load %arg5[%c0_15, %c0_16] : memref<1x10xf32, #tpu.memory_space<vmem>>, vector<1x10xf32>
    %33 = vector.broadcast %32 : vector<1x10xf32> to vector<2x10xf32>
    %34 = arith.addf %31, %33 : vector<2x10xf32>
    %c0_17 = arith.constant 0 : index
    %c0_18 = arith.constant 0 : index
    %35 = vector.load %arg6[%c0_17, %c0_18] : memref<2x10xf32, #tpu.memory_space<vmem>>, vector<2x10xf32>
    tpu.vector_store %arg6[%c0_17, %c0_18], %34 {strides = array<i32>} : memref<2x10xf32, #tpu.memory_space<vmem>>, vector<2x10xf32>,
    return
  }
  func.func @transform_0(%arg0: i32) -> (i32, i32, i32) {
    %c0_i32 = arith.constant 0 : i32
    %c0_i32_0 = arith.constant 0 : i32
    %c0_i32_1 = arith.constant 0 : i32
    return %arg0, %c0_i32, %c0_i32_0 : i32, i32, i32
  }
  func.func @transform_1(%arg0: i32) -> (i32, i32) {
    %c0_i32 = arith.constant 0 : i32
    %c0_i32_0 = arith.constant 0 : i32
    %c0_i32_1 = arith.constant 0 : i32
    return %c0_i32, %c0_i32_0 : i32, i32
  }
  func.func @transform_2(%arg0: i32) -> (i32, i32) {
    %c0_i32 = arith.constant 0 : i32
    %c0_i32_0 = arith.constant 0 : i32
    %c0_i32_1 = arith.constant 0 : i32
    return %c0_i32, %c0_i32_0 : i32, i32
  }
  func.func @transform_3(%arg0: i32) -> (i32, i32) {
    %c0_i32 = arith.constant 0 : i32
    %c0_i32_0 = arith.constant 0 : i32
    %c0_i32_1 = arith.constant 0 : i32
    return %c0_i32, %c0_i32_0 : i32, i32
  }
  func.func @transform_4(%arg0: i32) -> (i32, i32) {
    %c0_i32 = arith.constant 0 : i32
    %c0_i32_0 = arith.constant 0 : i32
    %c0_i32_1 = arith.constant 0 : i32
    return %c0_i32, %c0_i32_0 : i32, i32
  }
  func.func @transform_5(%arg0: i32) -> (i32, i32) {
    %c0_i32 = arith.constant 0 : i32
    %c0_i32_0 = arith.constant 0 : i32
    return %arg0, %c0_i32 : i32, i32
  }
}

module attributes {stable_mosaic.version = 11 : i64} {
  func.func @_attn_kernel(%arg0: i32, %arg1: memref<2x16x96xbf16, #tpu.memory_space<vmem>>, %arg2: memref<2x16x32xbf16, #tpu.memory_space<vmem>>) attributes {dimension_semantics = [#tpu.dimension_semantics<parallel>], iteration_bounds = array<i64: 1>, scalar_prefetch = 0 : i64, scratch_operands = 0 : i64, tpu.core_type = #tpu.core_type<tc>, window_params = [{transform_indices = @transform_0, window_bounds = array<i64: 2, 16, 96>}, {transform_indices = @transform_1, window_bounds = array<i64: 2, 16, 32>}]} {
    %c0 = arith.constant 0 : index
    %c0_0 = arith.constant 0 : index
    %c0_1 = arith.constant 0 : index
    %0 = vector.load %arg1[%c0, %c0_0, %c0_1] : memref<2x16x96xbf16, #tpu.memory_space<vmem>>, vector<1x16x96xbf16>
    %1 = vector.shape_cast %0 : vector<1x16x96xbf16> to vector<16x96xbf16>
    %2 = vector.extract_strided_slice %1 {offsets = [0, 0], sizes = [16, 8], strides = [1, 1]} : vector<16x96xbf16> to vector<16x8xbf16>
    %3 = vector.extract_strided_slice %1 {offsets = [0, 32], sizes = [16, 8], strides = [1, 1]} : vector<16x96xbf16> to vector<16x8xbf16>
    %4 = vector.extract_strided_slice %1 {offsets = [0, 64], sizes = [16, 8], strides = [1, 1]} : vector<16x96xbf16> to vector<16x8xbf16>
    %cst = arith.constant dense<0.000000e+00> : vector<16x16xf32>
    %5 = tpu.matmul %2, %3, %cst {dimension_numbers = #tpu.dot_dimension_numbers<[1], [1], [0], [0], [0, 0, 1, 0], [], []>} : vector<16x8xbf16>, vector<16x8xbf16>, vector<16x16xf32> -> vector<16x16xf32>
    %cst_2 = arith.constant 0.353553385 : f32
    %6 = vector.broadcast %cst_2 : f32 to vector<16x16xf32>
    %7 = arith.mulf %5, %6 : vector<16x16xf32>
    %cst_3 = arith.constant dense<0xFF800000> : vector<16xf32>
    %8 = vector.multi_reduction <maximumf>, %7, %cst_3 [1] : vector<16x16xf32> to vector<16xf32>
    %9 = vector.shape_cast %8 : vector<16xf32> to vector<16x1xf32>
    %10 = vector.broadcast %9 : vector<16x1xf32> to vector<16x16xf32>
    %11 = arith.subf %7, %10 : vector<16x16xf32>
    %12 = math.exp %11 : vector<16x16xf32>
    %cst_4 = arith.constant dense<0.000000e+00> : vector<16xf32>
    %13 = vector.multi_reduction <add>, %12, %cst_4 [1] : vector<16x16xf32> to vector<16xf32>
    %14 = vector.shape_cast %13 : vector<16xf32> to vector<16x1xf32>
    %15 = tpu.reciprocal %14 {approx = true} : vector<16x1xf32> -> vector<16x1xf32>
    %16 = vector.broadcast %15 : vector<16x1xf32> to vector<16x16xf32>
    %17 = arith.mulf %12, %16 : vector<16x16xf32>
    %18 = arith.truncf %17 : vector<16x16xf32> to vector<16x16xbf16>
    %cst_5 = arith.constant dense<0.000000e+00> : vector<16x8xf32>
    %19 = tpu.matmul %18, %4, %cst_5 {dimension_numbers = #tpu.dot_dimension_numbers<[1], [0], [0], [1], [0, 0, 1, 1], [], []>} : vector<16x16xbf16>, vector<16x8xbf16>, vector<16x8xf32> -> vector<16x8xf32>
    %20 = arith.truncf %19 : vector<16x8xf32> to vector<16x8xbf16>
    %c0_6 = arith.constant 0 : index
    %c0_7 = arith.constant 0 : index
    %c0_8 = arith.constant 0 : index
    %21 = vector.load %arg2[%c0_6, %c0_7, %c0_8] : memref<2x16x32xbf16, #tpu.memory_space<vmem>>, vector<1x16x8xbf16>
    %22 = vector.shape_cast %21 : vector<1x16x8xbf16> to vector<16x8xbf16>
    %23 = vector.shape_cast %20 : vector<16x8xbf16> to vector<1x16x8xbf16>
    tpu.vector_store %arg2[%c0_6, %c0_7, %c0_8], %23 {strides = array<i32>} : memref<2x16x32xbf16, #tpu.memory_space<vmem>>, vector<1x16x8xbf16>,
    %24 = vector.extract_strided_slice %1 {offsets = [0, 8], sizes = [16, 8], strides = [1, 1]} : vector<16x96xbf16> to vector<16x8xbf16>
    %25 = vector.extract_strided_slice %1 {offsets = [0, 40], sizes = [16, 8], strides = [1, 1]} : vector<16x96xbf16> to vector<16x8xbf16>
    %26 = vector.extract_strided_slice %1 {offsets = [0, 72], sizes = [16, 8], strides = [1, 1]} : vector<16x96xbf16> to vector<16x8xbf16>
    %cst_9 = arith.constant dense<0.000000e+00> : vector<16x16xf32>
    %27 = tpu.matmul %24, %25, %cst_9 {dimension_numbers = #tpu.dot_dimension_numbers<[1], [1], [0], [0], [0, 0, 1, 0], [], []>} : vector<16x8xbf16>, vector<16x8xbf16>, vector<16x16xf32> -> vector<16x16xf32>
    %cst_10 = arith.constant 0.353553385 : f32
    %28 = vector.broadcast %cst_10 : f32 to vector<16x16xf32>
    %29 = arith.mulf %27, %28 : vector<16x16xf32>
    %cst_11 = arith.constant dense<0xFF800000> : vector<16xf32>
    %30 = vector.multi_reduction <maximumf>, %29, %cst_11 [1] : vector<16x16xf32> to vector<16xf32>
    %31 = vector.shape_cast %30 : vector<16xf32> to vector<16x1xf32>
    %32 = vector.broadcast %31 : vector<16x1xf32> to vector<16x16xf32>
    %33 = arith.subf %29, %32 : vector<16x16xf32>
    %34 = math.exp %33 : vector<16x16xf32>
    %cst_12 = arith.constant dense<0.000000e+00> : vector<16xf32>
    %35 = vector.multi_reduction <add>, %34, %cst_12 [1] : vector<16x16xf32> to vector<16xf32>
    %36 = vector.shape_cast %35 : vector<16xf32> to vector<16x1xf32>
    %37 = tpu.reciprocal %36 {approx = true} : vector<16x1xf32> -> vector<16x1xf32>
    %38 = vector.broadcast %37 : vector<16x1xf32> to vector<16x16xf32>
    %39 = arith.mulf %34, %38 : vector<16x16xf32>
    %40 = arith.truncf %39 : vector<16x16xf32> to vector<16x16xbf16>
    %cst_13 = arith.constant dense<0.000000e+00> : vector<16x8xf32>
    %41 = tpu.matmul %40, %26, %cst_13 {dimension_numbers = #tpu.dot_dimension_numbers<[1], [0], [0], [1], [0, 0, 1, 1], [], []>} : vector<16x16xbf16>, vector<16x8xbf16>, vector<16x8xf32> -> vector<16x8xf32>
    %42 = arith.truncf %41 : vector<16x8xf32> to vector<16x8xbf16>
    %c0_14 = arith.constant 0 : index
    %c0_15 = arith.constant 0 : index
    %c8 = arith.constant 8 : index
    %43 = vector.load %arg2[%c0_14, %c0_15, %c8] : memref<2x16x32xbf16, #tpu.memory_space<vmem>>, vector<1x16x8xbf16>
    %44 = vector.shape_cast %43 : vector<1x16x8xbf16> to vector<16x8xbf16>
    %45 = vector.shape_cast %42 : vector<16x8xbf16> to vector<1x16x8xbf16>
    tpu.vector_store %arg2[%c0_14, %c0_15, %c8], %45 {strides = array<i32>} : memref<2x16x32xbf16, #tpu.memory_space<vmem>>, vector<1x16x8xbf16>,
    %46 = vector.extract_strided_slice %1 {offsets = [0, 16], sizes = [16, 8], strides = [1, 1]} : vector<16x96xbf16> to vector<16x8xbf16>
    %47 = vector.extract_strided_slice %1 {offsets = [0, 48], sizes = [16, 8], strides = [1, 1]} : vector<16x96xbf16> to vector<16x8xbf16>
    %48 = vector.extract_strided_slice %1 {offsets = [0, 80], sizes = [16, 8], strides = [1, 1]} : vector<16x96xbf16> to vector<16x8xbf16>
    %cst_16 = arith.constant dense<0.000000e+00> : vector<16x16xf32>
    %49 = tpu.matmul %46, %47, %cst_16 {dimension_numbers = #tpu.dot_dimension_numbers<[1], [1], [0], [0], [0, 0, 1, 0], [], []>} : vector<16x8xbf16>, vector<16x8xbf16>, vector<16x16xf32> -> vector<16x16xf32>
    %cst_17 = arith.constant 0.353553385 : f32
    %50 = vector.broadcast %cst_17 : f32 to vector<16x16xf32>
    %51 = arith.mulf %49, %50 : vector<16x16xf32>
    %cst_18 = arith.constant dense<0xFF800000> : vector<16xf32>
    %52 = vector.multi_reduction <maximumf>, %51, %cst_18 [1] : vector<16x16xf32> to vector<16xf32>
    %53 = vector.shape_cast %52 : vector<16xf32> to vector<16x1xf32>
    %54 = vector.broadcast %53 : vector<16x1xf32> to vector<16x16xf32>
    %55 = arith.subf %51, %54 : vector<16x16xf32>
    %56 = math.exp %55 : vector<16x16xf32>
    %cst_19 = arith.constant dense<0.000000e+00> : vector<16xf32>
    %57 = vector.multi_reduction <add>, %56, %cst_19 [1] : vector<16x16xf32> to vector<16xf32>
    %58 = vector.shape_cast %57 : vector<16xf32> to vector<16x1xf32>
    %59 = tpu.reciprocal %58 {approx = true} : vector<16x1xf32> -> vector<16x1xf32>
    %60 = vector.broadcast %59 : vector<16x1xf32> to vector<16x16xf32>
    %61 = arith.mulf %56, %60 : vector<16x16xf32>
    %62 = arith.truncf %61 : vector<16x16xf32> to vector<16x16xbf16>
    %cst_20 = arith.constant dense<0.000000e+00> : vector<16x8xf32>
    %63 = tpu.matmul %62, %48, %cst_20 {dimension_numbers = #tpu.dot_dimension_numbers<[1], [0], [0], [1], [0, 0, 1, 1], [], []>} : vector<16x16xbf16>, vector<16x8xbf16>, vector<16x8xf32> -> vector<16x8xf32>
    %64 = arith.truncf %63 : vector<16x8xf32> to vector<16x8xbf16>
    %c0_21 = arith.constant 0 : index
    %c0_22 = arith.constant 0 : index
    %c16 = arith.constant 16 : index
    %65 = vector.load %arg2[%c0_21, %c0_22, %c16] : memref<2x16x32xbf16, #tpu.memory_space<vmem>>, vector<1x16x8xbf16>
    %66 = vector.shape_cast %65 : vector<1x16x8xbf16> to vector<16x8xbf16>
    %67 = vector.shape_cast %64 : vector<16x8xbf16> to vector<1x16x8xbf16>
    tpu.vector_store %arg2[%c0_21, %c0_22, %c16], %67 {strides = array<i32>} : memref<2x16x32xbf16, #tpu.memory_space<vmem>>, vector<1x16x8xbf16>,
    %68 = vector.extract_strided_slice %1 {offsets = [0, 24], sizes = [16, 8], strides = [1, 1]} : vector<16x96xbf16> to vector<16x8xbf16>
    %69 = vector.extract_strided_slice %1 {offsets = [0, 56], sizes = [16, 8], strides = [1, 1]} : vector<16x96xbf16> to vector<16x8xbf16>
    %70 = vector.extract_strided_slice %1 {offsets = [0, 88], sizes = [16, 8], strides = [1, 1]} : vector<16x96xbf16> to vector<16x8xbf16>
    %cst_23 = arith.constant dense<0.000000e+00> : vector<16x16xf32>
    %71 = tpu.matmul %68, %69, %cst_23 {dimension_numbers = #tpu.dot_dimension_numbers<[1], [1], [0], [0], [0, 0, 1, 0], [], []>} : vector<16x8xbf16>, vector<16x8xbf16>, vector<16x16xf32> -> vector<16x16xf32>
    %cst_24 = arith.constant 0.353553385 : f32
    %72 = vector.broadcast %cst_24 : f32 to vector<16x16xf32>
    %73 = arith.mulf %71, %72 : vector<16x16xf32>
    %cst_25 = arith.constant dense<0xFF800000> : vector<16xf32>
    %74 = vector.multi_reduction <maximumf>, %73, %cst_25 [1] : vector<16x16xf32> to vector<16xf32>
    %75 = vector.shape_cast %74 : vector<16xf32> to vector<16x1xf32>
    %76 = vector.broadcast %75 : vector<16x1xf32> to vector<16x16xf32>
    %77 = arith.subf %73, %76 : vector<16x16xf32>
    %78 = math.exp %77 : vector<16x16xf32>
    %cst_26 = arith.constant dense<0.000000e+00> : vector<16xf32>
    %79 = vector.multi_reduction <add>, %78, %cst_26 [1] : vector<16x16xf32> to vector<16xf32>
    %80 = vector.shape_cast %79 : vector<16xf32> to vector<16x1xf32>
    %81 = tpu.reciprocal %80 {approx = true} : vector<16x1xf32> -> vector<16x1xf32>
    %82 = vector.broadcast %81 : vector<16x1xf32> to vector<16x16xf32>
    %83 = arith.mulf %78, %82 : vector<16x16xf32>
    %84 = arith.truncf %83 : vector<16x16xf32> to vector<16x16xbf16>
    %cst_27 = arith.constant dense<0.000000e+00> : vector<16x8xf32>
    %85 = tpu.matmul %84, %70, %cst_27 {dimension_numbers = #tpu.dot_dimension_numbers<[1], [0], [0], [1], [0, 0, 1, 1], [], []>} : vector<16x16xbf16>, vector<16x8xbf16>, vector<16x8xf32> -> vector<16x8xf32>
    %86 = arith.truncf %85 : vector<16x8xf32> to vector<16x8xbf16>
    %c0_28 = arith.constant 0 : index
    %c0_29 = arith.constant 0 : index
    %c24 = arith.constant 24 : index
    %87 = vector.load %arg2[%c0_28, %c0_29, %c24] : memref<2x16x32xbf16, #tpu.memory_space<vmem>>, vector<1x16x8xbf16>
    %88 = vector.shape_cast %87 : vector<1x16x8xbf16> to vector<16x8xbf16>
    %89 = vector.shape_cast %86 : vector<16x8xbf16> to vector<1x16x8xbf16>
    tpu.vector_store %arg2[%c0_28, %c0_29, %c24], %89 {strides = array<i32>} : memref<2x16x32xbf16, #tpu.memory_space<vmem>>, vector<1x16x8xbf16>,
    %c1 = arith.constant 1 : index
    %c0_30 = arith.constant 0 : index
    %c0_31 = arith.constant 0 : index
    %90 = vector.load %arg1[%c1, %c0_30, %c0_31] : memref<2x16x96xbf16, #tpu.memory_space<vmem>>, vector<1x16x96xbf16>
    %91 = vector.shape_cast %90 : vector<1x16x96xbf16> to vector<16x96xbf16>
    %92 = vector.extract_strided_slice %91 {offsets = [0, 0], sizes = [16, 8], strides = [1, 1]} : vector<16x96xbf16> to vector<16x8xbf16>
    %93 = vector.extract_strided_slice %91 {offsets = [0, 32], sizes = [16, 8], strides = [1, 1]} : vector<16x96xbf16> to vector<16x8xbf16>
    %94 = vector.extract_strided_slice %91 {offsets = [0, 64], sizes = [16, 8], strides = [1, 1]} : vector<16x96xbf16> to vector<16x8xbf16>
    %cst_32 = arith.constant dense<0.000000e+00> : vector<16x16xf32>
    %95 = tpu.matmul %92, %93, %cst_32 {dimension_numbers = #tpu.dot_dimension_numbers<[1], [1], [0], [0], [0, 0, 1, 0], [], []>} : vector<16x8xbf16>, vector<16x8xbf16>, vector<16x16xf32> -> vector<16x16xf32>
    %cst_33 = arith.constant 0.353553385 : f32
    %96 = vector.broadcast %cst_33 : f32 to vector<16x16xf32>
    %97 = arith.mulf %95, %96 : vector<16x16xf32>
    %cst_34 = arith.constant dense<0xFF800000> : vector<16xf32>
    %98 = vector.multi_reduction <maximumf>, %97, %cst_34 [1] : vector<16x16xf32> to vector<16xf32>
    %99 = vector.shape_cast %98 : vector<16xf32> to vector<16x1xf32>
    %100 = vector.broadcast %99 : vector<16x1xf32> to vector<16x16xf32>
    %101 = arith.subf %97, %100 : vector<16x16xf32>
    %102 = math.exp %101 : vector<16x16xf32>
    %cst_35 = arith.constant dense<0.000000e+00> : vector<16xf32>
    %103 = vector.multi_reduction <add>, %102, %cst_35 [1] : vector<16x16xf32> to vector<16xf32>
    %104 = vector.shape_cast %103 : vector<16xf32> to vector<16x1xf32>
    %105 = tpu.reciprocal %104 {approx = true} : vector<16x1xf32> -> vector<16x1xf32>
    %106 = vector.broadcast %105 : vector<16x1xf32> to vector<16x16xf32>
    %107 = arith.mulf %102, %106 : vector<16x16xf32>
    %108 = arith.truncf %107 : vector<16x16xf32> to vector<16x16xbf16>
    %cst_36 = arith.constant dense<0.000000e+00> : vector<16x8xf32>
    %109 = tpu.matmul %108, %94, %cst_36 {dimension_numbers = #tpu.dot_dimension_numbers<[1], [0], [0], [1], [0, 0, 1, 1], [], []>} : vector<16x16xbf16>, vector<16x8xbf16>, vector<16x8xf32> -> vector<16x8xf32>
    %110 = arith.truncf %109 : vector<16x8xf32> to vector<16x8xbf16>
    %c1_37 = arith.constant 1 : index
    %c0_38 = arith.constant 0 : index
    %c0_39 = arith.constant 0 : index
    %111 = vector.load %arg2[%c1_37, %c0_38, %c0_39] : memref<2x16x32xbf16, #tpu.memory_space<vmem>>, vector<1x16x8xbf16>
    %112 = vector.shape_cast %111 : vector<1x16x8xbf16> to vector<16x8xbf16>
    %113 = vector.shape_cast %110 : vector<16x8xbf16> to vector<1x16x8xbf16>
    tpu.vector_store %arg2[%c1_37, %c0_38, %c0_39], %113 {strides = array<i32>} : memref<2x16x32xbf16, #tpu.memory_space<vmem>>, vector<1x16x8xbf16>,
    %114 = vector.extract_strided_slice %91 {offsets = [0, 8], sizes = [16, 8], strides = [1, 1]} : vector<16x96xbf16> to vector<16x8xbf16>
    %115 = vector.extract_strided_slice %91 {offsets = [0, 40], sizes = [16, 8], strides = [1, 1]} : vector<16x96xbf16> to vector<16x8xbf16>
    %116 = vector.extract_strided_slice %91 {offsets = [0, 72], sizes = [16, 8], strides = [1, 1]} : vector<16x96xbf16> to vector<16x8xbf16>
    %cst_40 = arith.constant dense<0.000000e+00> : vector<16x16xf32>
    %117 = tpu.matmul %114, %115, %cst_40 {dimension_numbers = #tpu.dot_dimension_numbers<[1], [1], [0], [0], [0, 0, 1, 0], [], []>} : vector<16x8xbf16>, vector<16x8xbf16>, vector<16x16xf32> -> vector<16x16xf32>
    %cst_41 = arith.constant 0.353553385 : f32
    %118 = vector.broadcast %cst_41 : f32 to vector<16x16xf32>
    %119 = arith.mulf %117, %118 : vector<16x16xf32>
    %cst_42 = arith.constant dense<0xFF800000> : vector<16xf32>
    %120 = vector.multi_reduction <maximumf>, %119, %cst_42 [1] : vector<16x16xf32> to vector<16xf32>
    %121 = vector.shape_cast %120 : vector<16xf32> to vector<16x1xf32>
    %122 = vector.broadcast %121 : vector<16x1xf32> to vector<16x16xf32>
    %123 = arith.subf %119, %122 : vector<16x16xf32>
    %124 = math.exp %123 : vector<16x16xf32>
    %cst_43 = arith.constant dense<0.000000e+00> : vector<16xf32>
    %125 = vector.multi_reduction <add>, %124, %cst_43 [1] : vector<16x16xf32> to vector<16xf32>
    %126 = vector.shape_cast %125 : vector<16xf32> to vector<16x1xf32>
    %127 = tpu.reciprocal %126 {approx = true} : vector<16x1xf32> -> vector<16x1xf32>
    %128 = vector.broadcast %127 : vector<16x1xf32> to vector<16x16xf32>
    %129 = arith.mulf %124, %128 : vector<16x16xf32>
    %130 = arith.truncf %129 : vector<16x16xf32> to vector<16x16xbf16>
    %cst_44 = arith.constant dense<0.000000e+00> : vector<16x8xf32>
    %131 = tpu.matmul %130, %116, %cst_44 {dimension_numbers = #tpu.dot_dimension_numbers<[1], [0], [0], [1], [0, 0, 1, 1], [], []>} : vector<16x16xbf16>, vector<16x8xbf16>, vector<16x8xf32> -> vector<16x8xf32>
    %132 = arith.truncf %131 : vector<16x8xf32> to vector<16x8xbf16>
    %c1_45 = arith.constant 1 : index
    %c0_46 = arith.constant 0 : index
    %c8_47 = arith.constant 8 : index
    %133 = vector.load %arg2[%c1_45, %c0_46, %c8_47] : memref<2x16x32xbf16, #tpu.memory_space<vmem>>, vector<1x16x8xbf16>
    %134 = vector.shape_cast %133 : vector<1x16x8xbf16> to vector<16x8xbf16>
    %135 = vector.shape_cast %132 : vector<16x8xbf16> to vector<1x16x8xbf16>
    tpu.vector_store %arg2[%c1_45, %c0_46, %c8_47], %135 {strides = array<i32>} : memref<2x16x32xbf16, #tpu.memory_space<vmem>>, vector<1x16x8xbf16>,
    %136 = vector.extract_strided_slice %91 {offsets = [0, 16], sizes = [16, 8], strides = [1, 1]} : vector<16x96xbf16> to vector<16x8xbf16>
    %137 = vector.extract_strided_slice %91 {offsets = [0, 48], sizes = [16, 8], strides = [1, 1]} : vector<16x96xbf16> to vector<16x8xbf16>
    %138 = vector.extract_strided_slice %91 {offsets = [0, 80], sizes = [16, 8], strides = [1, 1]} : vector<16x96xbf16> to vector<16x8xbf16>
    %cst_48 = arith.constant dense<0.000000e+00> : vector<16x16xf32>
    %139 = tpu.matmul %136, %137, %cst_48 {dimension_numbers = #tpu.dot_dimension_numbers<[1], [1], [0], [0], [0, 0, 1, 0], [], []>} : vector<16x8xbf16>, vector<16x8xbf16>, vector<16x16xf32> -> vector<16x16xf32>
    %cst_49 = arith.constant 0.353553385 : f32
    %140 = vector.broadcast %cst_49 : f32 to vector<16x16xf32>
    %141 = arith.mulf %139, %140 : vector<16x16xf32>
    %cst_50 = arith.constant dense<0xFF800000> : vector<16xf32>
    %142 = vector.multi_reduction <maximumf>, %141, %cst_50 [1] : vector<16x16xf32> to vector<16xf32>
    %143 = vector.shape_cast %142 : vector<16xf32> to vector<16x1xf32>
    %144 = vector.broadcast %143 : vector<16x1xf32> to vector<16x16xf32>
    %145 = arith.subf %141, %144 : vector<16x16xf32>
    %146 = math.exp %145 : vector<16x16xf32>
    %cst_51 = arith.constant dense<0.000000e+00> : vector<16xf32>
    %147 = vector.multi_reduction <add>, %146, %cst_51 [1] : vector<16x16xf32> to vector<16xf32>
    %148 = vector.shape_cast %147 : vector<16xf32> to vector<16x1xf32>
    %149 = tpu.reciprocal %148 {approx = true} : vector<16x1xf32> -> vector<16x1xf32>
    %150 = vector.broadcast %149 : vector<16x1xf32> to vector<16x16xf32>
    %151 = arith.mulf %146, %150 : vector<16x16xf32>
    %152 = arith.truncf %151 : vector<16x16xf32> to vector<16x16xbf16>
    %cst_52 = arith.constant dense<0.000000e+00> : vector<16x8xf32>
    %153 = tpu.matmul %152, %138, %cst_52 {dimension_numbers = #tpu.dot_dimension_numbers<[1], [0], [0], [1], [0, 0, 1, 1], [], []>} : vector<16x16xbf16>, vector<16x8xbf16>, vector<16x8xf32> -> vector<16x8xf32>
    %154 = arith.truncf %153 : vector<16x8xf32> to vector<16x8xbf16>
    %c1_53 = arith.constant 1 : index
    %c0_54 = arith.constant 0 : index
    %c16_55 = arith.constant 16 : index
    %155 = vector.load %arg2[%c1_53, %c0_54, %c16_55] : memref<2x16x32xbf16, #tpu.memory_space<vmem>>, vector<1x16x8xbf16>
    %156 = vector.shape_cast %155 : vector<1x16x8xbf16> to vector<16x8xbf16>
    %157 = vector.shape_cast %154 : vector<16x8xbf16> to vector<1x16x8xbf16>
    tpu.vector_store %arg2[%c1_53, %c0_54, %c16_55], %157 {strides = array<i32>} : memref<2x16x32xbf16, #tpu.memory_space<vmem>>, vector<1x16x8xbf16>,
    %158 = vector.extract_strided_slice %91 {offsets = [0, 24], sizes = [16, 8], strides = [1, 1]} : vector<16x96xbf16> to vector<16x8xbf16>
    %159 = vector.extract_strided_slice %91 {offsets = [0, 56], sizes = [16, 8], strides = [1, 1]} : vector<16x96xbf16> to vector<16x8xbf16>
    %160 = vector.extract_strided_slice %91 {offsets = [0, 88], sizes = [16, 8], strides = [1, 1]} : vector<16x96xbf16> to vector<16x8xbf16>
    %cst_56 = arith.constant dense<0.000000e+00> : vector<16x16xf32>
    %161 = tpu.matmul %158, %159, %cst_56 {dimension_numbers = #tpu.dot_dimension_numbers<[1], [1], [0], [0], [0, 0, 1, 0], [], []>} : vector<16x8xbf16>, vector<16x8xbf16>, vector<16x16xf32> -> vector<16x16xf32>
    %cst_57 = arith.constant 0.353553385 : f32
    %162 = vector.broadcast %cst_57 : f32 to vector<16x16xf32>
    %163 = arith.mulf %161, %162 : vector<16x16xf32>
    %cst_58 = arith.constant dense<0xFF800000> : vector<16xf32>
    %164 = vector.multi_reduction <maximumf>, %163, %cst_58 [1] : vector<16x16xf32> to vector<16xf32>
    %165 = vector.shape_cast %164 : vector<16xf32> to vector<16x1xf32>
    %166 = vector.broadcast %165 : vector<16x1xf32> to vector<16x16xf32>
    %167 = arith.subf %163, %166 : vector<16x16xf32>
    %168 = math.exp %167 : vector<16x16xf32>
    %cst_59 = arith.constant dense<0.000000e+00> : vector<16xf32>
    %169 = vector.multi_reduction <add>, %168, %cst_59 [1] : vector<16x16xf32> to vector<16xf32>
    %170 = vector.shape_cast %169 : vector<16xf32> to vector<16x1xf32>
    %171 = tpu.reciprocal %170 {approx = true} : vector<16x1xf32> -> vector<16x1xf32>
    %172 = vector.broadcast %171 : vector<16x1xf32> to vector<16x16xf32>
    %173 = arith.mulf %168, %172 : vector<16x16xf32>
    %174 = arith.truncf %173 : vector<16x16xf32> to vector<16x16xbf16>
    %cst_60 = arith.constant dense<0.000000e+00> : vector<16x8xf32>
    %175 = tpu.matmul %174, %160, %cst_60 {dimension_numbers = #tpu.dot_dimension_numbers<[1], [0], [0], [1], [0, 0, 1, 1], [], []>} : vector<16x16xbf16>, vector<16x8xbf16>, vector<16x8xf32> -> vector<16x8xf32>
    %176 = arith.truncf %175 : vector<16x8xf32> to vector<16x8xbf16>
    %c1_61 = arith.constant 1 : index
    %c0_62 = arith.constant 0 : index
    %c24_63 = arith.constant 24 : index
    %177 = vector.load %arg2[%c1_61, %c0_62, %c24_63] : memref<2x16x32xbf16, #tpu.memory_space<vmem>>, vector<1x16x8xbf16>
    %178 = vector.shape_cast %177 : vector<1x16x8xbf16> to vector<16x8xbf16>
    %179 = vector.shape_cast %176 : vector<16x8xbf16> to vector<1x16x8xbf16>
    tpu.vector_store %arg2[%c1_61, %c0_62, %c24_63], %179 {strides = array<i32>} : memref<2x16x32xbf16, #tpu.memory_space<vmem>>, vector<1x16x8xbf16>,
    return
  }
  func.func @transform_0(%arg0: i32) -> (i32, i32, i32) {
    %c0_i32 = arith.constant 0 : i32
    %c0_i32_0 = arith.constant 0 : i32
    %c0_i32_1 = arith.constant 0 : i32
    return %arg0, %c0_i32, %c0_i32_0 : i32, i32, i32
  }
  func.func @transform_1(%arg0: i32) -> (i32, i32, i32) {
    %c0_i32 = arith.constant 0 : i32
    %c0_i32_0 = arith.constant 0 : i32
    %c0_i32_1 = arith.constant 0 : i32
    return %arg0, %c0_i32, %c0_i32_0 : i32, i32, i32
  }
}

</mosaic_0001>

<bundles_post_ra>
// kernel: simple_vit_forward.25
= control target key start
LH: loop header
LB: loop body
LE: loop exit
PB: predicated region body
PF: predicated region fallthrough
CT: control target
= control target key end

     0   :  { %s324_s1 = inlined_call_operand.vmem [shape: bf16[128,128], index: 1, kind: input, shape index: {}]   ;;  %s325_s2 = inlined_call_operand.vmem [shape: f32[1,128], index: 2, kind: input, shape index: {}]   ;;  %s326_s0 = inlined_call_operand.vmem [shape: bf16[32,128], index: 0, kind: input, shape index: {}]   ;;  %s327_s3 = inlined_call_operand.vmem [shape: bf16[32,128], index: 3, kind: input, shape index: {}]   ;;  %s328_s4 = inlined_call_operand.vmem [shape: bf16[32,128], index: 4, kind: output, shape index: {}]  }
   0x1   :  { %v224_v0 = vld [vmem:[%s324_s1 + $0x38] sm:$0xff]  ;;  %v223_v1 = vld [vmem:[%s324_s1 + $0x30] sm:$0xff]  ;;  %v222_v2 = vld [vmem:[%s324_s1 + $0x28] sm:$0xff] }
   0x2   :  { %109 = vmatpush.bf16.msra.mxu0 %v224_v0  ;;  %245 = vmatpush.bf16.msra.mxu1 %v224_v0  ;;  %v221_v3 = vld [vmem:[%s324_s1 + $0x20] sm:$0xff]  ;;  %v220_v4 = vld [vmem:[%s324_s1 + $0x18] sm:$0xff]  ;;  %v219_v5 = vld [vmem:[%s324_s1 + $0x10] sm:$0xff] }
   0x3   :  { %v218_v6 = vld [vmem:[%s324_s1 + $0x8] sm:$0xff]  ;;  %v217_v7 = vld [vmem:[%s324_s1] sm:$0xff] }
   0x4   :  { %v215_v8 = vld [vmem:[%s326_s0] sm:$0xff]  ;;  %v216_v9 = vld [vmem:[%s326_s0 + $0x8] sm:$0xff] }
   0x5   :  { %v253_v12 = vld [vmem:[%s325_s2] ss:$0 sm:$0xff]  ;;  %v243_v14 = vld [vmem:[%s327_s3 + $0x8] sm:$0xff]  }
   0x6   :  { %110 = vmatpush.bf16.msra.mxu0 %v223_v1  ;;  %246 = vmatpush.bf16.msra.mxu1 %v223_v1  ;;  %v226_v13 = vld [vmem:[%s327_s3] sm:$0xff]   ;;  %v231_v16 = vunpack.c.l.bf16 %v243_v14  ;;  %v232_v20 = vunpack.c.h.bf16 %v243_v14 }
   0x7   :  { %v227_v15 = vunpack.c.l.bf16 %v226_v13  ;;  %v228_v19 = vunpack.c.h.bf16 %v226_v13 }
   0xa   :  { %111 = vmatpush.bf16.msra.mxu0 %v222_v2  ;;  %247 = vmatpush.bf16.msra.mxu1 %v222_v2 }
   0xe   :  { %112 = vmatpush.bf16.msra.mxu0 %v221_v3  ;;  %248 = vmatpush.bf16.msra.mxu1 %v221_v3 }
  0x12   :  { %113 = vmatpush.bf16.msra.mxu0 %v220_v4  ;;  %249 = vmatpush.bf16.msra.mxu1 %v220_v4 }
  0x16   :  { %114 = vmatpush.bf16.msra.mxu0 %v219_v5  ;;  %250 = vmatpush.bf16.msra.mxu1 %v219_v5 }
  0x1a   :  { %115 = vmatpush.bf16.msra.mxu0 %v218_v6  ;;  %251 = vmatpush.bf16.msra.mxu1 %v218_v6 }
  0x1e   :  { %116 = vmatpush.bf16.msra.mxu0 %v217_v7  ;;  %252 = vmatpush.bf16.msra.mxu1 %v217_v7 }
  0x21   :  { %117 = vmatmul.bf16.vlgmr.msra.gmra.mxu0 %v215_v8  ;;  %122 = vmatmul.bf16.vlgmr.msra.gmra.mxu1 %v216_v9 }
  0x9e   :  { %v118_v10 = vpop.f32.mrf.mxu0  ;;  %v123_v11 = vpop.f32.mrf.mxu1 }
  0x9f   :  { %v147_v17 = vadd.f32 %v253_v12, %v118_v10  ;;  %v149_v18 = vadd.f32 %v253_v12, %v123_v11 }
  0xa1   :  { %v159_v25 = vadd.f32 %v227_v15, %v147_v17  ;;  %v161_v26 = vadd.f32 %v231_v16, %v149_v18 }
  0xa6   :  { %v120_v21 = vpop.f32.mrf.mxu0  ;;  %v125_v22 = vpop.f32.mrf.mxu1 }
  0xa7   :  { %v148_v23 = vadd.f32 %v253_v12, %v120_v21  ;;  %v150_v24 = vadd.f32 %v253_v12, %v125_v22 }
  0xa9   :  { %v160_v27 = vadd.f32 %v228_v19, %v148_v23  ;;  %v162_v28 = vadd.f32 %v232_v20, %v150_v24 }
  0xab   :  { %v236_v29 = vpack.c.bf16 %v160_v27, %v159_v25  ;;  %v241_v30 = vpack.c.bf16 %v162_v28, %v161_v26 }
  0xad   :  { %237 = vst [vmem:[%s328_s4] sm:$0xff] %v236_v29  }
  0xae   :  { %244 = vst [vmem:[%s328_s4 + $0x8] sm:$0xff] %v241_v30  }

// kernel: simple_vit_forward.23
= control target key start
LH: loop header
LB: loop body
LE: loop exit
PB: predicated region body
PF: predicated region fallthrough
CT: control target
= control target key end

     0   :  { %v36_v0 = vlaneseq  ;;  %s449_s0 = inlined_call_operand.vmem [shape: bf16[32,128], index: 0, kind: input, shape index: {}]   ;;  %s450_s3 = inlined_call_operand.vmem [shape: f32[1,128], index: 3, kind: input, shape index: {}]   ;;  %s451_s4 = inlined_call_operand.vmem [shape: f32[1,128], index: 4, kind: input, shape index: {}]   ;;  %s452_s2 = inlined_call_operand.vmem [shape: f32[1,128], index: 2, kind: input, shape index: {}]   ;;  %s453_s1 = inlined_call_operand.vmem [shape: bf16[128,128], index: 1, kind: input, shape index: {}]   ;;  %s454_s5 = inlined_call_operand.vmem [shape: bf16[32,128], index: 5, kind: output, shape index: {}]  }
   0x1   :  { %v325_v1 = vld [vmem:[%s449_s0 + $0x8] sm:$0xff]   ;;  %v308_v2 = vld [vmem:[%s449_s0] sm:$0xff]   ;;  %v306_v32 = vld [vmem:[%s453_s1 + $0x38] sm:$0xff] }
   0x2   :  { %v313_v3 = vunpack.c.l.bf16 %v325_v1  ;;  %v37_v4 = vand.u32 127, %v36_v0  ;;  %v309_v5 = vunpack.c.l.bf16 %v308_v2  ;;  %v314_v8 = vunpack.c.h.bf16 %v325_v1  ;;  %213 = vmatpush.bf16.msra.mxu0 %v306_v32  ;;  %327 = vmatpush.bf16.msra.mxu1 %v306_v32  ;;  %v305_v33 = vld [vmem:[%s453_s1 + $0x30] sm:$0xff]  ;;  %v304_v34 = vld [vmem:[%s453_s1 + $0x28] sm:$0xff]  ;;  %v303_v35 = vld [vmem:[%s453_s1 + $0x20] sm:$0xff] }
   0x3   :  { %v310_v9 = vunpack.c.h.bf16 %v308_v2  ;;  %v302_v36 = vld [vmem:[%s453_s1 + $0x18] sm:$0xff]  ;;  %v301_v37 = vld [vmem:[%s453_s1 + $0x10] sm:$0xff]  ;;  %v300_v38 = vld [vmem:[%s453_s1 + $0x8] sm:$0xff] }
   0x4   :  { %vm38_vm0 = vcmp.lt.s32.totalorder %v37_v4, 32  ;;  %v299_v43 = vld [vmem:[%s453_s1] sm:$0xff] }
   0x5   :  { %v41_v6 = vsel %vm38_vm0, %v313_v3, 0.0  ;;  %v39_v7 = vsel %vm38_vm0, %v309_v5, 0.0  ;;  %v42_v10 = vsel %vm38_vm0, %v314_v8, 0.0  ;;  %v40_v11 = vsel %vm38_vm0, %v310_v9, 0.0 }
   0x6   :  { %47 = vadd.xlane.f32.xlu1 %v41_v6  ;;  %43 = vadd.xlane.f32.xlu0 %v39_v7 }
   0x7   :  { %214 = vmatpush.bf16.msra.mxu0 %v305_v33  ;;  %328 = vmatpush.bf16.msra.mxu1 %v305_v33 }
   0xb   :  { %215 = vmatpush.bf16.msra.mxu0 %v304_v34  ;;  %329 = vmatpush.bf16.msra.mxu1 %v304_v34 }
   0xe   :  { %49 = vadd.xlane.f32.xlu1 %v42_v10  ;;  %45 = vadd.xlane.f32.xlu0 %v40_v11 }
   0xf   :  { %216 = vmatpush.bf16.msra.mxu0 %v303_v35  ;;  %330 = vmatpush.bf16.msra.mxu1 %v303_v35 }
  0x13   :  { %217 = vmatpush.bf16.msra.mxu0 %v302_v36  ;;  %331 = vmatpush.bf16.msra.mxu1 %v302_v36 }
  0x17   :  { %218 = vmatpush.bf16.msra.mxu0 %v301_v37  ;;  %332 = vmatpush.bf16.msra.mxu1 %v301_v37 }
  0x1b   :  { %219 = vmatpush.bf16.msra.mxu0 %v300_v38  ;;  %333 = vmatpush.bf16.msra.mxu1 %v300_v38 }
  0x1f   :  { %220 = vmatpush.bf16.msra.mxu0 %v299_v43  ;;  %334 = vmatpush.bf16.msra.mxu1 %v299_v43 }
  0x79   :  { %v48_v12 = vpop.xlane.xlu1 %47  ;;  %v44_v13 = vpop.xlane.xlu0 %43 }
  0x7a   :  { %v53_v14 = vmul.f32 0.03125, %v48_v12  ;;  %v51_v15 = vmul.f32 0.03125, %v44_v13  ;;  %v335_v12 = vld [vmem:[%s450_s3] ss:$0 sm:$0xff] }
  0x7c   :  { %v57_v16 = vsub.f32 %v41_v6, %v53_v14  ;;  %v55_v17 = vsub.f32 %v39_v7, %v51_v15 }
  0x7e   :  { %v387_v18 = vsel %vm38_vm0, %v57_v16, 0.0  ;;  %v390_v19 = vsel %vm38_vm0, %v55_v17, 0.0 }
  0x7f   :  { %v65_v20 = vmul.f32 %v387_v18, %v387_v18  ;;  %v63_v21 = vmul.f32 %v390_v19, %v390_v19 }
  0x81   :  { %v50_v22 = vpop.xlane.xlu1 %49  ;;  %71 = vadd.xlane.f32.xlu0 %v65_v20  ;;  %67 = vadd.xlane.f32.xlu2 %v63_v21  ;;  %v46_v23 = vpop.xlane.xlu0 %45  ;;  %v336_v21 = vld [vmem:[%s451_s4] ss:$0 sm:$0xff] }
  0x82   :  { %v54_v24 = vmul.f32 0.03125, %v50_v22  ;;  %v52_v25 = vmul.f32 0.03125, %v46_v23 }
  0x84   :  { %v58_v26 = vsub.f32 %v42_v10, %v54_v24  ;;  %v56_v27 = vsub.f32 %v40_v11, %v52_v25 }
  0x86   :  { %v397_v28 = vsel %vm38_vm0, %v58_v26, 0.0  ;;  %v400_v29 = vsel %vm38_vm0, %v56_v27, 0.0 }
  0x87   :  { %v66_v30 = vmul.f32 %v397_v28, %v397_v28  ;;  %v64_v31 = vmul.f32 %v400_v29, %v400_v29 }
  0x89   :  { %73 = vadd.xlane.f32.xlu1 %v66_v30  ;;  %69 = vadd.xlane.f32.xlu2 %v64_v31 }
  0xf4   :  { %v68_v39 = vpop.xlane.xlu2 %67  ;;  %v72_v40 = vpop.xlane.xlu0 %71 }
  0xf5   :  { %v75_v41 = vmul.f32 0.03125, %v68_v39  ;;  %v77_v42 = vmul.f32 0.03125, %v72_v40 }
  0xf7   :  { %v79_v44 = vadd.f32 1e-05, %v75_v41  ;;  %v81_v45 = vadd.f32 1e-05, %v77_v42 }
  0xf9   :  { %338 = vrsqrt.f32 %v79_v44  ;;  %vm109_vm3 = vweird.f32 %v81_v45  ;;  %vm89_vm4 = vweird.f32 %v79_v44 }
  0xfa   :  { %340 = vrsqrt.f32 %v81_v45 }
  0xfc   :  { %v74_v46 = vpop.xlane.xlu1 %73  ;;  %v70_v47 = vpop.xlane.xlu2 %69 }
  0xfd   :  { %v78_v48 = vmul.f32 0.03125, %v74_v46  ;;  %v76_v49 = vmul.f32 0.03125, %v70_v47 }
  0xff   :  { %v339_v50 = vpop.eup %338  ;;  %v82_v51 = vadd.f32 1e-05, %v78_v48  ;;  %v80_v52 = vadd.f32 1e-05, %v76_v49 }
 0x100   :  { %v341_v53 = vpop.eup %340  ;;  %v84_v54 = vmul.f32 %v339_v50, %v79_v44  ;;  %vm90_vm2 = vweird.f32 %v339_v50 }
 0x101   :  { %v104_v55 = vmul.f32 %v341_v53, %v81_v45  ;;  %342 = vrsqrt.f32 %v82_v51  ;;  %vm110_vm1 = vweird.f32 %v341_v53  ;;  %vm91_vm6 = vmor %vm89_vm4, %vm90_vm2  ;;  %vm119_vm9 = vweird.f32 %v82_v51 }
 0x102   :  { %v85_v56 = vmul.f32 %v339_v50, %v84_v54  ;;  %344 = vrsqrt.f32 %v80_v52  ;;  %vm111_vm5 = vmor %vm109_vm3, %vm110_vm1  ;;  %vm99_vm11 = vweird.f32 %v80_v52 }
 0x103   :  { %v105_v57 = vmul.f32 %v341_v53, %v104_v55 }
 0x104   :  { %v86_v58 = vmul.f32 0.5, %v85_v56 }
 0x105   :  { %v106_v59 = vmul.f32 0.5, %v105_v57 }
 0x106   :  { %v87_v60 = vsub.f32 1.5, %v86_v58 }
 0x107   :  { %v343_v61 = vpop.eup %342  ;;  %v107_v62 = vsub.f32 1.5, %v106_v59 }
 0x108   :  { %v345_v63 = vpop.eup %344  ;;  %v114_v0 = vmul.f32 %v343_v61, %v82_v51  ;;  %v88_v1 = vmul.f32 %v339_v50, %v87_v60  ;;  %vm120_vm7 = vweird.f32 %v343_v61 }
 0x109   :  { %v108_v2 = vmul.f32 %v341_v53, %v107_v62  ;;  %v94_v3 = vmul.f32 %v345_v63, %v80_v52  ;;  %vm100_vm8 = vweird.f32 %v345_v63  ;;  %vm121_vm10 = vmor %vm119_vm9, %vm120_vm7 }
 0x10a   :  { %v115_v4 = vmul.f32 %v343_v61, %v114_v0  ;;  %v92_v9 = vsel %vm91_vm6, %v339_v50, %v88_v1  ;;  %vm101_vm12 = vmor %vm99_vm11, %vm100_vm8 }
 0x10b   :  { %v95_v5 = vmul.f32 %v345_v63, %v94_v3  ;;  %v112_v6 = vsel %vm111_vm5, %v341_v53, %v108_v2  ;;  %v123_v15 = vmul.f32 %v92_v9, %v390_v19 }
 0x10c   :  { %v116_v7 = vmul.f32 0.5, %v115_v4  ;;  %v125_v13 = vmul.f32 %v112_v6, %v387_v18 }
 0x10d   :  { %v96_v8 = vmul.f32 0.5, %v95_v5  ;;  %v131_v18 = vmul.f32 %v335_v12, %v123_v15 }
 0x10e   :  { %v117_v10 = vsub.f32 1.5, %v116_v7  ;;  %v133_v23 = vmul.f32 %v335_v12, %v125_v13 }
 0x10f   :  { %v97_v11 = vsub.f32 1.5, %v96_v8  ;;  %v139_v30 = vadd.f32 %v336_v21, %v131_v18 }
 0x110   :  { %v118_v14 = vmul.f32 %v343_v61, %v117_v10  ;;  %v141_v27 = vadd.f32 %v336_v21, %v133_v23 }
 0x111   :  { %v98_v16 = vmul.f32 %v345_v63, %v97_v11 }
 0x112   :  { %v122_v17 = vsel %vm121_vm10, %v343_v61, %v118_v14 }
 0x113   :  { %v102_v20 = vsel %vm101_vm12, %v345_v63, %v98_v16  ;;  %v126_v22 = vmul.f32 %v122_v17, %v397_v28  ;;  %v337_v28 = vld [vmem:[%s452_s2] ss:$0 sm:$0xff] }
 0x114   :  { %v124_v24 = vmul.f32 %v102_v20, %v400_v29 }
 0x115   :  { %v134_v25 = vmul.f32 %v335_v12, %v126_v22 }
 0x116   :  { %v132_v26 = vmul.f32 %v335_v12, %v124_v24 }
 0x117   :  { %v142_v19 = vadd.f32 %v336_v21, %v134_v25 }
 0x118   :  { %v140_v31 = vadd.f32 %v336_v21, %v132_v26 }
 0x119   :  { %v144_v32 = vpack.c.bf16 %v142_v19, %v141_v27 }
 0x11a   :  { %v143_v33 = vpack.c.bf16 %v140_v31, %v139_v30 }
 0x11b   :  { %226 = vmatmul.bf16.vlgmr.msra.gmra.mxu1 %v144_v32 }
 0x11c   :  { %221 = vmatmul.bf16.vlgmr.msra.gmra.mxu0 %v143_v33 }
 0x198   :  { %v227_v34 = vpop.f32.mrf.mxu1 }
 0x199   :  { %v222_v35 = vpop.f32.mrf.mxu0  ;;  %v253_v37 = vadd.f32 %v337_v28, %v227_v34 }
 0x19a   :  { %v251_v39 = vadd.f32 %v337_v28, %v222_v35 }
 0x1a0   :  { %v229_v36 = vpop.f32.mrf.mxu1 }
 0x1a1   :  { %v224_v29 = vpop.f32.mrf.mxu0  ;;  %v254_v38 = vadd.f32 %v337_v28, %v229_v36 }
 0x1a2   :  { %v252_v40 = vadd.f32 %v337_v28, %v224_v29 }
 0x1a3   :  { %v323_v41 = vpack.c.bf16 %v254_v38, %v253_v37 }
 0x1a4   :  { %v318_v42 = vpack.c.bf16 %v252_v40, %v251_v39 }
 0x1a5   :  { %326 = vst [vmem:[%s454_s5 + $0x8] sm:$0xff] %v323_v41  }
 0x1a6   :  { %319 = vst [vmem:[%s454_s5] sm:$0xff] %v318_v42  }

// kernel: simple_vit_forward.22
= control target key start
LH: loop header
LB: loop body
LE: loop exit
PB: predicated region body
PF: predicated region fallthrough
CT: control target
= control target key end

     0   :  { %s289_s1 = inlined_call_operand.vmem [shape: bf16[128,128], index: 1, kind: input, shape index: {}]   ;;  %s290_s2 = inlined_call_operand.vmem [shape: f32[1,128], index: 2, kind: input, shape index: {}]   ;;  %s291_s0 = inlined_call_operand.vmem [shape: bf16[32,128], index: 0, kind: input, shape index: {}]   ;;  %s292_s3 = inlined_call_operand.vmem [shape: bf16[32,128], index: 3, kind: output, shape index: {}]  }
   0x1   :  { %v209_v0 = vld [vmem:[%s289_s1 + $0x38] sm:$0xff]  ;;  %v208_v1 = vld [vmem:[%s289_s1 + $0x30] sm:$0xff]  ;;  %v207_v2 = vld [vmem:[%s289_s1 + $0x28] sm:$0xff] }
   0x2   :  { %106 = vmatpush.bf16.msra.mxu0 %v209_v0  ;;  %221 = vmatpush.bf16.msra.mxu1 %v209_v0  ;;  %v206_v3 = vld [vmem:[%s289_s1 + $0x20] sm:$0xff]  ;;  %v205_v4 = vld [vmem:[%s289_s1 + $0x18] sm:$0xff]  ;;  %v204_v5 = vld [vmem:[%s289_s1 + $0x10] sm:$0xff] }
   0x3   :  { %v203_v6 = vld [vmem:[%s289_s1 + $0x8] sm:$0xff]  ;;  %v202_v7 = vld [vmem:[%s289_s1] sm:$0xff] }
   0x4   :  { %v200_v8 = vld [vmem:[%s291_s0] sm:$0xff]  ;;  %v201_v9 = vld [vmem:[%s291_s0 + $0x8] sm:$0xff] }
   0x5   :  { %v229_v12 = vld [vmem:[%s290_s2] ss:$0 sm:$0xff] }
   0x6   :  { %107 = vmatpush.bf16.msra.mxu0 %v208_v1  ;;  %222 = vmatpush.bf16.msra.mxu1 %v208_v1 }
   0xa   :  { %108 = vmatpush.bf16.msra.mxu0 %v207_v2  ;;  %223 = vmatpush.bf16.msra.mxu1 %v207_v2 }
   0xe   :  { %109 = vmatpush.bf16.msra.mxu0 %v206_v3  ;;  %224 = vmatpush.bf16.msra.mxu1 %v206_v3 }
  0x12   :  { %110 = vmatpush.bf16.msra.mxu0 %v205_v4  ;;  %225 = vmatpush.bf16.msra.mxu1 %v205_v4 }
  0x16   :  { %111 = vmatpush.bf16.msra.mxu0 %v204_v5  ;;  %226 = vmatpush.bf16.msra.mxu1 %v204_v5 }
  0x1a   :  { %112 = vmatpush.bf16.msra.mxu0 %v203_v6  ;;  %227 = vmatpush.bf16.msra.mxu1 %v203_v6 }
  0x1e   :  { %113 = vmatpush.bf16.msra.mxu0 %v202_v7  ;;  %228 = vmatpush.bf16.msra.mxu1 %v202_v7 }
  0x21   :  { %114 = vmatmul.bf16.vlgmr.msra.gmra.mxu0 %v200_v8  ;;  %119 = vmatmul.bf16.vlgmr.msra.gmra.mxu1 %v201_v9 }
  0x9e   :  { %v115_v10 = vpop.f32.mrf.mxu0  ;;  %v120_v11 = vpop.f32.mrf.mxu1 }
  0x9f   :  { %v144_v15 = vadd.f32 %v229_v12, %v115_v10  ;;  %v146_v16 = vadd.f32 %v229_v12, %v120_v11 }
  0xa6   :  { %v117_v13 = vpop.f32.mrf.mxu0  ;;  %v122_v14 = vpop.f32.mrf.mxu1 }
  0xa7   :  { %v145_v17 = vadd.f32 %v229_v12, %v117_v13  ;;  %v147_v18 = vadd.f32 %v229_v12, %v122_v14 }
  0xa9   :  { %v213_v19 = vpack.c.bf16 %v145_v17, %v144_v15  ;;  %v218_v20 = vpack.c.bf16 %v147_v18, %v146_v16 }
  0xab   :  { %214 = vst [vmem:[%s292_s3] sm:$0xff] %v213_v19  }
  0xac   :  { %220 = vst [vmem:[%s292_s3 + $0x8] sm:$0xff] %v218_v20  }

// kernel: simple_vit_forward.26
= control target key start
LH: loop header
LB: loop body
LE: loop exit
PB: predicated region body
PF: predicated region fallthrough
CT: control target
= control target key end

     0   :  { %v36_v0 = vlaneseq  ;;  %s741_s0 = inlined_call_operand.vmem [shape: bf16[32,128], index: 0, kind: input, shape index: {}]   ;;  %s742_s3 = inlined_call_operand.vmem [shape: f32[1,128], index: 3, kind: input, shape index: {}]   ;;  %s743_s4 = inlined_call_operand.vmem [shape: f32[1,128], index: 4, kind: input, shape index: {}]   ;;  %s744_s2 = inlined_call_operand.vmem [shape: f32[1,128], index: 2, kind: input, shape index: {}]   ;;  %s745_s1 = inlined_call_operand.vmem [shape: bf16[128,128], index: 1, kind: input, shape index: {}]   ;;  %s746_s5 = inlined_call_operand.vmem [shape: bf16[32,128], index: 5, kind: output, shape index: {}]  }
   0x1   :  { %v505_v1 = vld [vmem:[%s741_s0 + $0x8] sm:$0xff]   ;;  %v488_v2 = vld [vmem:[%s741_s0] sm:$0xff]   ;;  %v486_v32 = vld [vmem:[%s745_s1 + $0x38] sm:$0xff] }
   0x2   :  { %v493_v3 = vunpack.c.l.bf16 %v505_v1  ;;  %v37_v4 = vand.u32 127, %v36_v0  ;;  %v489_v5 = vunpack.c.l.bf16 %v488_v2  ;;  %v494_v8 = vunpack.c.h.bf16 %v505_v1  ;;  %213 = vmatpush.bf16.msra.mxu0 %v486_v32  ;;  %507 = vmatpush.bf16.msra.mxu1 %v486_v32  ;;  %v485_v33 = vld [vmem:[%s745_s1 + $0x30] sm:$0xff]  ;;  %v484_v34 = vld [vmem:[%s745_s1 + $0x28] sm:$0xff]  ;;  %v483_v35 = vld [vmem:[%s745_s1 + $0x20] sm:$0xff] }
   0x3   :  { %v490_v9 = vunpack.c.h.bf16 %v488_v2  ;;  %v482_v36 = vld [vmem:[%s745_s1 + $0x18] sm:$0xff]  ;;  %v481_v37 = vld [vmem:[%s745_s1 + $0x10] sm:$0xff]  ;;  %v480_v38 = vld [vmem:[%s745_s1 + $0x8] sm:$0xff] }
   0x4   :  { %vm38_vm0 = vcmp.lt.s32.totalorder %v37_v4, 32  ;;  %v479_v43 = vld [vmem:[%s745_s1] sm:$0xff] }
   0x5   :  { %v41_v6 = vsel %vm38_vm0, %v493_v3, 0.0  ;;  %v39_v7 = vsel %vm38_vm0, %v489_v5, 0.0  ;;  %v42_v10 = vsel %vm38_vm0, %v494_v8, 0.0  ;;  %v40_v11 = vsel %vm38_vm0, %v490_v9, 0.0 }
   0x6   :  { %47 = vadd.xlane.f32.xlu1 %v41_v6  ;;  %43 = vadd.xlane.f32.xlu0 %v39_v7 }
   0x7   :  { %214 = vmatpush.bf16.msra.mxu0 %v485_v33  ;;  %508 = vmatpush.bf16.msra.mxu1 %v485_v33 }
   0xb   :  { %215 = vmatpush.bf16.msra.mxu0 %v484_v34  ;;  %509 = vmatpush.bf16.msra.mxu1 %v484_v34  ;;  %v517_v34 = vld [vmem:[%s744_s2] ss:$0 sm:$0xff] }
   0xe   :  { %49 = vadd.xlane.f32.xlu1 %v42_v10  ;;  %45 = vadd.xlane.f32.xlu0 %v40_v11 }
   0xf   :  { %216 = vmatpush.bf16.msra.mxu0 %v483_v35  ;;  %510 = vmatpush.bf16.msra.mxu1 %v483_v35 }
  0x13   :  { %217 = vmatpush.bf16.msra.mxu0 %v482_v36  ;;  %511 = vmatpush.bf16.msra.mxu1 %v482_v36 }
  0x17   :  { %218 = vmatpush.bf16.msra.mxu0 %v481_v37  ;;  %512 = vmatpush.bf16.msra.mxu1 %v481_v37 }
  0x1b   :  { %219 = vmatpush.bf16.msra.mxu0 %v480_v38  ;;  %513 = vmatpush.bf16.msra.mxu1 %v480_v38 }
  0x1f   :  { %220 = vmatpush.bf16.msra.mxu0 %v479_v43  ;;  %514 = vmatpush.bf16.msra.mxu1 %v479_v43 }
  0x79   :  { %v48_v12 = vpop.xlane.xlu1 %47  ;;  %v44_v13 = vpop.xlane.xlu0 %43 }
  0x7a   :  { %v53_v14 = vmul.f32 0.03125, %v48_v12  ;;  %v51_v15 = vmul.f32 0.03125, %v44_v13  ;;  %v515_v12 = vld [vmem:[%s742_s3] ss:$0 sm:$0xff] }
  0x7c   :  { %v57_v16 = vsub.f32 %v41_v6, %v53_v14  ;;  %v55_v17 = vsub.f32 %v39_v7, %v51_v15 }
  0x7e   :  { %v575_v18 = vsel %vm38_vm0, %v57_v16, 0.0  ;;  %v578_v19 = vsel %vm38_vm0, %v55_v17, 0.0 }
  0x7f   :  { %v65_v20 = vmul.f32 %v575_v18, %v575_v18  ;;  %v63_v21 = vmul.f32 %v578_v19, %v578_v19 }
  0x81   :  { %v50_v22 = vpop.xlane.xlu1 %49  ;;  %71 = vadd.xlane.f32.xlu0 %v65_v20  ;;  %67 = vadd.xlane.f32.xlu2 %v63_v21  ;;  %v46_v23 = vpop.xlane.xlu0 %45  ;;  %v516_v21 = vld [vmem:[%s743_s4] ss:$0 sm:$0xff] }
  0x82   :  { %v54_v24 = vmul.f32 0.03125, %v50_v22  ;;  %v52_v25 = vmul.f32 0.03125, %v46_v23 }
  0x84   :  { %v58_v26 = vsub.f32 %v42_v10, %v54_v24  ;;  %v56_v27 = vsub.f32 %v40_v11, %v52_v25 }
  0x86   :  { %v585_v28 = vsel %vm38_vm0, %v58_v26, 0.0  ;;  %v588_v29 = vsel %vm38_vm0, %v56_v27, 0.0 }
  0x87   :  { %v66_v30 = vmul.f32 %v585_v28, %v585_v28  ;;  %v64_v31 = vmul.f32 %v588_v29, %v588_v29 }
  0x89   :  { %73 = vadd.xlane.f32.xlu1 %v66_v30  ;;  %69 = vadd.xlane.f32.xlu2 %v64_v31 }
  0xf4   :  { %v68_v39 = vpop.xlane.xlu2 %67  ;;  %v72_v40 = vpop.xlane.xlu0 %71 }
  0xf5   :  { %v75_v41 = vmul.f32 0.03125, %v68_v39  ;;  %v77_v42 = vmul.f32 0.03125, %v72_v40 }
  0xf7   :  { %v79_v44 = vadd.f32 1e-05, %v75_v41  ;;  %v81_v45 = vadd.f32 1e-05, %v77_v42 }
  0xf9   :  { %518 = vrsqrt.f32 %v79_v44  ;;  %vm109_vm3 = vweird.f32 %v81_v45  ;;  %vm89_vm4 = vweird.f32 %v79_v44 }
  0xfa   :  { %520 = vrsqrt.f32 %v81_v45 }
  0xfc   :  { %v74_v46 = vpop.xlane.xlu1 %73  ;;  %v70_v47 = vpop.xlane.xlu2 %69 }
  0xfd   :  { %v78_v48 = vmul.f32 0.03125, %v74_v46  ;;  %v76_v49 = vmul.f32 0.03125, %v70_v47 }
  0xff   :  { %v519_v50 = vpop.eup %518  ;;  %v82_v51 = vadd.f32 1e-05, %v78_v48  ;;  %v80_v52 = vadd.f32 1e-05, %v76_v49 }
 0x100   :  { %v521_v53 = vpop.eup %520  ;;  %v84_v54 = vmul.f32 %v519_v50, %v79_v44  ;;  %vm90_vm2 = vweird.f32 %v519_v50 }
 0x101   :  { %v104_v55 = vmul.f32 %v521_v53, %v81_v45  ;;  %522 = vrsqrt.f32 %v82_v51  ;;  %vm110_vm1 = vweird.f32 %v521_v53  ;;  %vm91_vm6 = vmor %vm89_vm4, %vm90_vm2  ;;  %vm119_vm9 = vweird.f32 %v82_v51 }
 0x102   :  { %v85_v56 = vmul.f32 %v519_v50, %v84_v54  ;;  %524 = vrsqrt.f32 %v80_v52  ;;  %vm111_vm5 = vmor %vm109_vm3, %vm110_vm1  ;;  %vm99_vm11 = vweird.f32 %v80_v52 }
 0x103   :  { %v105_v57 = vmul.f32 %v521_v53, %v104_v55 }
 0x104   :  { %v86_v58 = vmul.f32 0.5, %v85_v56 }
 0x105   :  { %v106_v59 = vmul.f32 0.5, %v105_v57 }
 0x106   :  { %v87_v60 = vsub.f32 1.5, %v86_v58 }
 0x107   :  { %v523_v61 = vpop.eup %522  ;;  %v107_v62 = vsub.f32 1.5, %v106_v59 }
 0x108   :  { %v525_v63 = vpop.eup %524  ;;  %v114_v0 = vmul.f32 %v523_v61, %v82_v51  ;;  %v88_v1 = vmul.f32 %v519_v50, %v87_v60  ;;  %vm120_vm7 = vweird.f32 %v523_v61 }
 0x109   :  { %v108_v2 = vmul.f32 %v521_v53, %v107_v62  ;;  %v94_v3 = vmul.f32 %v525_v63, %v80_v52  ;;  %vm100_vm8 = vweird.f32 %v525_v63  ;;  %vm121_vm10 = vmor %vm119_vm9, %vm120_vm7 }
 0x10a   :  { %v115_v4 = vmul.f32 %v523_v61, %v114_v0  ;;  %v92_v9 = vsel %vm91_vm6, %v519_v50, %v88_v1  ;;  %vm101_vm12 = vmor %vm99_vm11, %vm100_vm8 }
 0x10b   :  { %v95_v5 = vmul.f32 %v525_v63, %v94_v3  ;;  %v112_v6 = vsel %vm111_vm5, %v521_v53, %v108_v2  ;;  %v123_v15 = vmul.f32 %v92_v9, %v578_v19 }
 0x10c   :  { %v116_v7 = vmul.f32 0.5, %v115_v4  ;;  %v125_v13 = vmul.f32 %v112_v6, %v575_v18 }
 0x10d   :  { %v96_v8 = vmul.f32 0.5, %v95_v5  ;;  %v131_v18 = vmul.f32 %v515_v12, %v123_v15 }
 0x10e   :  { %v117_v10 = vsub.f32 1.5, %v116_v7  ;;  %v133_v23 = vmul.f32 %v515_v12, %v125_v13 }
 0x10f   :  { %v97_v11 = vsub.f32 1.5, %v96_v8  ;;  %v139_v30 = vadd.f32 %v516_v21, %v131_v18 }
 0x110   :  { %v118_v14 = vmul.f32 %v523_v61, %v117_v10  ;;  %v141_v27 = vadd.f32 %v516_v21, %v133_v23 }
 0x111   :  { %v98_v16 = vmul.f32 %v525_v63, %v97_v11 }
 0x112   :  { %v122_v17 = vsel %vm121_vm10, %v523_v61, %v118_v14 }
 0x113   :  { %v102_v20 = vsel %vm101_vm12, %v525_v63, %v98_v16  ;;  %v126_v22 = vmul.f32 %v122_v17, %v585_v28 }
 0x114   :  { %v124_v24 = vmul.f32 %v102_v20, %v588_v29 }
 0x115   :  { %v134_v25 = vmul.f32 %v515_v12, %v126_v22 }
 0x116   :  { %v132_v26 = vmul.f32 %v515_v12, %v124_v24 }
 0x117   :  { %v142_v19 = vadd.f32 %v516_v21, %v134_v25 }
 0x118   :  { %v140_v31 = vadd.f32 %v516_v21, %v132_v26 }
 0x119   :  { %v144_v32 = vpack.c.bf16 %v142_v19, %v141_v27 }
 0x11a   :  { %v143_v33 = vpack.c.bf16 %v140_v31, %v139_v30 }
 0x11b   :  { %226 = vmatmul.bf16.vlgmr.msra.gmra.mxu1 %v144_v32 }
 0x11c   :  { %221 = vmatmul.bf16.vlgmr.msra.gmra.mxu0 %v143_v33 }
 0x198   :  { %v227_v35 = vpop.f32.mrf.mxu1 }
 0x199   :  { %v222_v28 = vpop.f32.mrf.mxu0  ;;  %v631_v36 = vadd.f32 %v517_v34, %v227_v35 }
 0x19a   :  { %v633_v29 = vadd.f32 %v517_v34, %v222_v28 }
 0x19b   :  { %v636_v37 = vmul.f32 0.70710677, %v631_v36 }
 0x19c   :  { %v639_v38 = vmul.f32 0.70710677, %v633_v29 }
 0x19d   :  { %v343_v39 = vmul.f32 %v636_v37, %v636_v37 }
 0x19e   :  { %v263_v40 = vmul.f32 %v639_v38, %v639_v38 }
 0x19f   :  { %v645_v41 = vmin.f32 %v343_v39, 16.0 }
 0x1a0   :  { %v647_v42 = vmin.f32 %v263_v40, 16.0  ;;  %v229_v43 = vpop.f32.mrf.mxu1 }
 0x1a1   :  { %v356_v44 = vmul.f32 3.8918573e-05, %v645_v41  ;;  %v224_v45 = vpop.f32.mrf.mxu0  ;;  %v650_v46 = vadd.f32 %v517_v34, %v229_v43  ;;  %v345_v52 = vmul.f32 2.1237322e-06, %v645_v41 }
 0x1a2   :  { %v265_v47 = vmul.f32 2.1237322e-06, %v647_v42  ;;  %v276_v48 = vmul.f32 3.8918573e-05, %v647_v42  ;;  %v654_v49 = vadd.f32 %v517_v34, %v224_v45 }
 0x1a3   :  { %v357_v50 = vadd.f32 0.001143296, %v356_v44  ;;  %v662_v56 = vmul.f32 0.70710677, %v650_v46  ;;  %v346_v62 = vadd.f32 0.00028619796, %v345_v52 }
 0x1a4   :  { %v277_v51 = vadd.f32 0.001143296, %v276_v48  ;;  %v266_v53 = vadd.f32 0.00028619796, %v265_v47  ;;  %v659_v55 = vmul.f32 0.70710677, %v654_v49 }
 0x1a5   :  { %v358_v54 = vmul.f32 %v357_v50, %v645_v41  ;;  %v383_v60 = vmul.f32 %v662_v56, %v662_v56  ;;  %v347_v7 = vmul.f32 %v346_v62, %v645_v41 }
 0x1a6   :  { %v278_v57 = vmul.f32 %v277_v51, %v647_v42  ;;  %v303_v59 = vmul.f32 %v659_v55, %v659_v55  ;;  %v267_v63 = vmul.f32 %v266_v53, %v647_v42 }
 0x1a7   :  { %v359_v58 = vadd.f32 0.014752088, %v358_v54  ;;  %v673_v2 = vmin.f32 %v383_v60, 16.0  ;;  %v348_v22 = vadd.f32 0.0036580483, %v347_v7 }
 0x1a8   :  { %v279_v61 = vadd.f32 0.014752088, %v278_v57  ;;  %v671_v1 = vmin.f32 %v303_v59, 16.0  ;;  %v268_v9 = vadd.f32 0.0036580483, %v267_v63 }
 0x1a9   :  { %v360_v0 = vmul.f32 %v359_v58, %v645_v41  ;;  %v385_v12 = vmul.f32 2.1237322e-06, %v673_v2  ;;  %v396_v15 = vmul.f32 3.8918573e-05, %v673_v2  ;;  %v349_v34 = vmul.f32 %v348_v22, %v645_v41 }
 0x1aa   :  { %v280_v3 = vmul.f32 %v279_v61, %v647_v42  ;;  %v305_v5 = vmul.f32 2.1237322e-06, %v671_v1  ;;  %v316_v8 = vmul.f32 3.8918573e-05, %v671_v1  ;;  %v269_v18 = vmul.f32 %v268_v9, %v647_v42 }
 0x1ab   :  { %v361_v4 = vadd.f32 0.112945676, %v360_v0  ;;  %v386_v20 = vadd.f32 0.00028619796, %v385_v12  ;;  %v397_v24 = vadd.f32 0.001143296, %v396_v15 }
 0x1ac   :  { %v281_v6 = vadd.f32 0.112945676, %v280_v3  ;;  %v306_v11 = vadd.f32 0.00028619796, %v305_v5  ;;  %v317_v14 = vadd.f32 0.001143296, %v316_v8 }
 0x1ad   :  { %v362_v10 = vmul.f32 %v361_v4, %v645_v41  ;;  %v398_v30 = vmul.f32 %v397_v24, %v673_v2  ;;  %v387_v32 = vmul.f32 %v386_v20, %v673_v2  ;;  %v270_v39 = vadd.f32 0.05243302, %v269_v18 }
 0x1ae   :  { %v282_v13 = vmul.f32 %v281_v6, %v647_v42  ;;  %v307_v17 = vmul.f32 %v306_v11, %v671_v1  ;;  %v318_v23 = vmul.f32 %v317_v14, %v671_v1  ;;  %v350_v44 = vadd.f32 0.05243302, %v349_v34 }
 0x1af   :  { %v363_v16 = vadd.f32 0.4994258, %v362_v10  ;;  %v399_v28 = vadd.f32 0.014752088, %v398_v30  ;;  %v388_v43 = vadd.f32 0.0036580483, %v387_v32  ;;  %v271_v48 = vmul.f32 %v270_v39, %v647_v42 }
 0x1b0   :  { %v283_v21 = vadd.f32 0.4994258, %v282_v13  ;;  %v308_v27 = vadd.f32 0.0036580483, %v307_v17  ;;  %v319_v19 = vadd.f32 0.014752088, %v318_v23  ;;  %v351_v58 = vmul.f32 %v350_v44, %v645_v41 }
 0x1b1   :  { %v364_v25 = vmul.f32 %v363_v16, %v645_v41  ;;  %v400_v47 = vmul.f32 %v399_v28, %v673_v2  ;;  %v389_v54 = vmul.f32 %v388_v43, %v673_v2  ;;  %v272_v63 = vadd.f32 0.18741608, %v271_v48 }
 0x1b2   :  { %v284_v26 = vmul.f32 %v283_v21, %v647_v42  ;;  %v320_v35 = vmul.f32 %v319_v19, %v671_v1  ;;  %v309_v40 = vmul.f32 %v308_v27, %v671_v1  ;;  %v352_v8 = vadd.f32 0.18741608, %v351_v58 }
 0x1b3   :  { %v689_v31 = vadd.f32 1.0, %v364_v25  ;;  %v401_v52 = vadd.f32 0.112945676, %v400_v47  ;;  %v390_v6 = vadd.f32 0.05243302, %v389_v54  ;;  %v273_v13 = vmul.f32 %v272_v63, %v647_v42 }
 0x1b4   :  { %v285_v33 = vadd.f32 1.0, %v284_v26  ;;  %v321_v45 = vadd.f32 0.112945676, %v320_v35  ;;  %v310_v50 = vadd.f32 0.05243302, %v309_v40  ;;  %v353_v21 = vmul.f32 %v352_v8, %v645_v41 }
 0x1b5   :  { %526 = vrcp.f32 %v689_v31  ;;  %v402_v62 = vmul.f32 %v401_v52, %v673_v2  ;;  %v391_v16 = vmul.f32 %v390_v6, %v673_v2  ;;  %v274_v24 = vadd.f32 1.1283791, %v273_v13 }
 0x1b6   :  { %528 = vrcp.f32 %v285_v33  ;;  %v322_v51 = vmul.f32 %v321_v45, %v671_v1  ;;  %v311_v3 = vmul.f32 %v310_v50, %v671_v1  ;;  %v297_v20 = vand.u32 2147483648, %v285_v33 }
 0x1b7   :  { %v403_v7 = vadd.f32 0.4994258, %v402_v62  ;;  %vm291_vm14 = vweird.f32 %v285_v33  ;;  %v295_v22 = vand.u32 2147483647, %v285_v33  ;;  %v377_v42 = vand.u32 2147483648, %v689_v31 }
 0x1b8   :  { %v323_v60 = vadd.f32 0.4994258, %v322_v51  ;;  %v312_v14 = vadd.f32 0.18741608, %v311_v3  ;;  %vm371_vm1 = vweird.f32 %v689_v31  ;;  %v375_v41 = vand.u32 2147483647, %v689_v31 }
 0x1b9   :  { %v404_v12 = vmul.f32 %v403_v7, %v673_v2  ;;  %v392_v27 = vadd.f32 0.18741608, %v391_v16  ;;  %v298_v30 = vor.u32 1.1754944e-38, %v297_v20  ;;  %vm296_vm3 = vcmp.eq.f32.partialorder %v295_v22, 8.507059e+37 }
 0x1ba   :  { %v324_v4 = vmul.f32 %v323_v60, %v671_v1  ;;  %v313_v25 = vmul.f32 %v312_v14, %v671_v1  ;;  %v354_v32 = vadd.f32 1.1283791, %v353_v21  ;;  %v275_v35 = vmul.f32 %v274_v24, %v639_v38 }
 0x1bb   :  { %v527_v53 = vpop.eup %526  ;;  %v708_v17 = vadd.f32 1.0, %v404_v12  ;;  %v378_v28 = vor.u32 1.1754944e-38, %v377_v42  ;;  %vm376_vm4 = vcmp.eq.f32.partialorder %v375_v41, 8.507059e+37  ;;  %v393_v44 = vmul.f32 %v392_v27, %v673_v2 }
 0x1bc   :  { %v529_v57 = vpop.eup %528  ;;  %v367_v59 = vmul.f32 %v527_v53, %v689_v31  ;;  %v325_v9 = vadd.f32 1.0, %v324_v4  ;;  %vm372_vm15 = vweird.f32 %v527_v53  ;;  %v314_v39 = vadd.f32 1.1283791, %v313_v25 }
 0x1bd   :  { %v287_v61 = vmul.f32 %v529_v57, %v285_v33  ;;  %vm292_vm13 = vweird.f32 %v529_v57  ;;  %vm373_vm2 = vmor %vm371_vm1, %vm372_vm15  ;;  %v355_v52 = vmul.f32 %v354_v32, %v636_v37  ;;  %v394_v54 = vadd.f32 1.1283791, %v393_v44 }
 0x1be   :  { %v368_v0 = vsub.f32 1.0, %v367_v59  ;;  %530 = vrcp.f32 %v325_v9  ;;  %vm711_vm0 = vmor %vm291_vm14, %vm292_vm13  ;;  %v335_v43 = vand.u32 2147483647, %v325_v9  ;;  %v337_v47 = vand.u32 2147483648, %v325_v9 }
 0x1bf   :  { %v288_v5 = vsub.f32 1.0, %v287_v61  ;;  %532 = vrcp.f32 %v708_v17  ;;  %v315_v38 = vmul.f32 %v314_v39, %v659_v55  ;;  %vm331_vm6 = vweird.f32 %v325_v9 }
 0x1c0   :  { %v369_v11 = vmul.f32 %v527_v53, %v368_v0  ;;  %vm336_vm7 = vcmp.eq.f32.partialorder %v335_v43, 8.507059e+37  ;;  %v338_v2 = vor.u32 1.1754944e-38, %v337_v47  ;;  %v415_v59 = vand.u32 2147483647, %v708_v17 }
 0x1c1   :  { %v289_v10 = vmul.f32 %v529_v57, %v288_v5  ;;  %v417_v60 = vand.u32 2147483648, %v708_v17  ;;  %vm411_vm10 = vweird.f32 %v708_v17  ;;  %v395_v4 = vmul.f32 %v394_v54, %v662_v56 }
 0x1c2   :  { %v370_v23 = vadd.f32 %v527_v53, %v369_v11  ;;  %vm416_vm12 = vcmp.eq.f32.partialorder %v415_v59, 8.507059e+37  ;;  %v256_v11 = vmul.f32 0.5, %v654_v49  ;;  %v257_v20 = vmul.f32 0.5, %v631_v36 }
 0x1c3   :  { %v290_v15 = vadd.f32 %v529_v57, %v289_v10  ;;  %v418_v5 = vor.u32 1.1754944e-38, %v417_v60  ;;  %v255_v10 = vmul.f32 0.5, %v633_v29  ;;  %v258_v21 = vmul.f32 0.5, %v650_v46 }
 0x1c4   :  { %v531_v19 = vpop.eup %530  ;;  %v374_v33 = vsel %vm373_vm2, %v527_v53, %v370_v23 }
 0x1c5   :  { %v294_v26 = vsel %vm711_vm0, %v529_v57, %v290_v15  ;;  %v327_v34 = vmul.f32 %v531_v19, %v325_v9  ;;  %v533_v45 = vpop.eup %532  ;;  %v379_v31 = vsel %vm376_vm4, %v378_v28, %v374_v33  ;;  %vm332_vm5 = vweird.f32 %v531_v19 }
 0x1c6   :  { %v299_v1 = vsel %vm296_vm3, %v298_v30, %v294_v26  ;;  %v407_v51 = vmul.f32 %v533_v45, %v708_v17  ;;  %v380_v58 = vmul.f32 %v379_v31, %v355_v52  ;;  %vm333_vm8 = vmor %vm331_vm6, %vm332_vm5  ;;  %vm412_vm9 = vweird.f32 %v533_v45 }
 0x1c7   :  { %v328_v40 = vsub.f32 1.0, %v327_v34  ;;  %v300_v48 = vmul.f32 %v299_v1, %v275_v35  ;;  %vm413_vm11 = vmor %vm411_vm10, %vm412_vm9 }
 0x1c8   :  { %v408_v57 = vsub.f32 1.0, %v407_v51  ;;  %v477_v55 = vclamps-f32 %v380_v58, 1.0 }
 0x1c9   :  { %v329_v50 = vmul.f32 %v531_v19, %v328_v40  ;;  %v475_v61 = vclamps-f32 %v300_v48, 1.0 }
 0x1ca   :  { %v409_v63 = vmul.f32 %v533_v45, %v408_v57  ;;  %v425_v15 = vadd.f32 1.0, %v477_v55 }
 0x1cb   :  { %v330_v53 = vadd.f32 %v531_v19, %v329_v50  ;;  %v423_v6 = vadd.f32 1.0, %v475_v61 }
 0x1cc   :  { %v410_v3 = vadd.f32 %v533_v45, %v409_v63  ;;  %v429_v23 = vmul.f32 %v425_v15, %v257_v20 }
 0x1cd   :  { %v334_v62 = vsel %vm333_vm8, %v531_v19, %v330_v53  ;;  %v427_v14 = vmul.f32 %v423_v6, %v255_v10 }
 0x1ce   :  { %v339_v0 = vsel %vm336_vm7, %v338_v2, %v334_v62  ;;  %v414_v8 = vsel %vm413_vm11, %v533_v45, %v410_v3 }
 0x1cf   :  { %v340_v37 = vmul.f32 %v339_v0, %v315_v38  ;;  %v419_v9 = vsel %vm416_vm12, %v418_v5, %v414_v8 }
 0x1d0   :  { %v420_v13 = vmul.f32 %v419_v9, %v395_v4 }
 0x1d1   :  { %v476_v7 = vclamps-f32 %v340_v37, 1.0 }
 0x1d2   :  { %v478_v17 = vclamps-f32 %v420_v13, 1.0 }
 0x1d3   :  { %v424_v12 = vadd.f32 1.0, %v476_v7 }
 0x1d4   :  { %v426_v22 = vadd.f32 1.0, %v478_v17 }
 0x1d5   :  { %v428_v16 = vmul.f32 %v424_v12, %v256_v11 }
 0x1d6   :  { %v430_v29 = vmul.f32 %v426_v22, %v258_v21 }
 0x1d7   :  { %v498_v56 = vpack.c.bf16 %v428_v16, %v427_v14 }
 0x1d8   :  { %v503_v24 = vpack.c.bf16 %v430_v29, %v429_v23 }
 0x1d9   :  { %499 = vst [vmem:[%s746_s5] sm:$0xff] %v498_v56  }
 0x1da   :  { %506 = vst [vmem:[%s746_s5 + $0x8] sm:$0xff] %v503_v24  }

// kernel: simple_vit_forward.43
= control target key start
LH: loop header
LB: loop body
LE: loop exit
PB: predicated region body
PF: predicated region fallthrough
CT: control target
= control target key end

     0   :  { %vm30_vm0 = vcmask 261120   ;;  %v242_v6 = vmov 16.0   ;;  %s309_s0 = inlined_call_operand.vmem [shape: bf16[2,16,32], index: 0, kind: input, shape index: {}]   ;;  %s310_s1 = inlined_call_operand.vmem [shape: f32[1,32], index: 1, kind: input, shape index: {}]   ;;  %s311_s2 = inlined_call_operand.vmem [shape: f32[1,32], index: 2, kind: input, shape index: {}]   ;;  %s312_s3 = inlined_call_operand.vmem [shape: bf16[32,10], index: 3, kind: input, shape index: {}]   ;;  %s313_s4 = inlined_call_operand.vmem [shape: f32[1,10], index: 4, kind: input, shape index: {}]   ;;  %s314_s5 = inlined_call_operand.hbm [shape: f32[2,10], index: 5, kind: output, shape index: {}]  }
   0x1   :  { %v196_v0 = vld [vmem:[%s309_s0] sm:$0xff]   ;;  %v203_v1 = vld [vmem:[%s309_s0 + $0x8] sm:$0xff]   ;;  %210 = vrcp.f32 %v242_v6 }
   0x2   :  { %v197_v2 = vunpack.c.l.bf16 %v196_v0  ;;  %v198_v3 = vunpack.c.h.bf16 %v196_v0  ;;  %v201_v4 = vunpack.c.l.bf16 %v203_v1  ;;  %v202_v5 = vunpack.c.h.bf16 %v203_v1 }
   0x3   :  { %10 = vsyncpa [#allocation3], 0  ;;  %vm60_vm2 = vcmask 1041409   ;;  %vm63_vm3 = vcmask 254976   ;;  %v243_v35 = vmov 32.0   ;;  %v194_v52 = vld [vmem:[%s312_s3 + $0x8] sm:$0xff] }
   0x4   :  { %v31_v7 = vsel %vm30_vm0, %v197_v2, 0.0  ;;  %v32_v8 = vsel %vm30_vm0, %v198_v3, 0.0  ;;  %v40_v9 = vsel %vm30_vm0, %v201_v4, 0.0  ;;  %v41_v10 = vsel %vm30_vm0, %v202_v5, 0.0  ;;  %159 = vmatpush.bf16.msra.mxu0 %v194_v52  ;;  %v193_v53 = vld [vmem:[%s312_s3] sm:$0xff]  ;;  %s175_s7 = sshll.u32 %s314_s5, 4  ;;  %s176_s7 = int_to_ptr.hbm [resolvable:$true] %s175_s7 }
   0x5   :  { %v33_v11 = vadd.f32 %v32_v8, %v31_v7  ;;  %v42_v12 = vadd.f32 %v41_v10, %v40_v9  ;;  %212 = vrcp.f32 %v243_v35  ;;  %v207_v63 = vld [vmem:[%s310_s1] ss:$0 sm:$0xff]  ;;  %vm166_vm8 = vcmask 74752  }
   0x6   :  { %v208_v3 = vld [vmem:[%s311_s2] ss:$0 sm:$0xff]  ;;  %s244_s2 = smov [#allocation2]  }
   0x7   :  { %v34_v13 = vrot.slane %v33_v11, 4  ;;  %v43_v14 = vrot.slane %v42_v12, 4  ;;  %v211_v15 = vpop.eup %210  ;;  %s173_s29 = sshll.u32 %s244_s2, 4  ;;  %s174_s29 = int_to_ptr.vmem [resolvable:$true] %s173_s29 }
   0x8   :  { %v50_v18 = vmul.f32 16.0, %v211_v15  ;;  %vm54_vm1 = vweird.f32 %v211_v15  ;;  %160 = vmatpush.bf16.msra.mxu0 %v193_v53 }
   0x9   :  { %v35_v16 = vadd.f32 %v34_v13, %v33_v11  ;;  %v44_v17 = vadd.f32 %v43_v14, %v42_v12 }
   0xa   :  { %v51_v21 = vsub.f32 1.0, %v50_v18 }
   0xb   :  { %v36_v19 = vrot.slane %v35_v16, 2  ;;  %v45_v20 = vrot.slane %v44_v17, 2  ;;  %v213_v36 = vpop.eup %212 }
   0xc   :  { %v52_v24 = vmul.f32 %v211_v15, %v51_v21  ;;  %v68_v37 = vmul.f32 32.0, %v213_v36  ;;  %vm72_vm4 = vweird.f32 %v213_v36 }
   0xd   :  { %v37_v22 = vadd.f32 %v36_v19, %v35_v16  ;;  %v46_v23 = vadd.f32 %v45_v20, %v44_v17  ;;  %v209_v16 = vld [vmem:[%s313_s4] ss:$0 sm:$0xff] }
   0xe   :  { %v53_v27 = vadd.f32 %v211_v15, %v52_v24  ;;  %v69_v38 = vsub.f32 1.0, %v68_v37 }
   0xf   :  { %v38_v25 = vrot.slane %v37_v22, 1  ;;  %v47_v26 = vrot.slane %v46_v23, 1 }
  0x10   :  { %v55_v30 = vsel %vm54_vm1, %v211_v15, %v53_v27  ;;  %v70_v39 = vmul.f32 %v213_v36, %v69_v38 }
  0x11   :  { %v39_v28 = vadd.f32 %v38_v25, %v37_v22  ;;  %v48_v29 = vadd.f32 %v47_v26, %v46_v23 }
  0x12   :  { %v71_v40 = vadd.f32 %v213_v36, %v70_v39 }
  0x13   :  { %v56_v31 = vmul.f32 %v55_v30, %v39_v28  ;;  %v57_v32 = vmul.f32 %v55_v30, %v48_v29 }
  0x14   :  { %v73_v41 = vsel %vm72_vm4, %v213_v36, %v71_v40 }
  0x15   :  { %v61_v33 = vsel %vm60_vm2, %v57_v32, %v56_v31 }
  0x16   :  { %v64_v34 = vsel %vm63_vm3, %v61_v33, 0.0 }
  0x17   :  { %65 = vadd.xlane.f32.xlu0 %v64_v34 }
  0x8a   :  { %v66_v42 = vpop.xlane.xlu0 %65 }
  0x8b   :  { %v74_v43 = vmul.f32 %v73_v41, %v66_v42 }
  0x8d   :  { %v76_v44 = vrot.slane %v74_v43, 1  ;;  %v79_v45 = vsub.f32 %v56_v31, %v74_v43 }
  0x8f   :  { %v80_v46 = vsub.f32 %v57_v32, %v76_v44  ;;  %v81_v48 = vmul.f32 %v79_v45, %v79_v45 }
  0x91   :  { %v82_v47 = vmul.f32 %v80_v46, %v80_v46 }
  0x93   :  { %v85_v49 = vrot.slane %v82_v47, 7 }
  0x95   :  { %v86_v50 = vsel %vm60_vm2, %v85_v49, %v81_v48 }
  0x96   :  { %v88_v51 = vsel %vm63_vm3, %v86_v50, 0.0 }
  0x97   :  { %89 = vadd.xlane.f32.xlu0 %v88_v51 }
 0x10a   :  { %v90_v54 = vpop.xlane.xlu0 %89 }
 0x10b   :  { %v91_v55 = vmul.f32 %v90_v54, %v73_v41 }
 0x10d   :  { %v92_v56 = vadd.f32 1e-05, %v91_v55 }
 0x10f   :  { %214 = vrsqrt.f32 %v92_v56  ;;  %vm99_vm6 = vweird.f32 %v92_v56 }
 0x115   :  { %v215_v57 = vpop.eup %214 }
 0x116   :  { %v94_v58 = vmul.f32 %v215_v57, %v92_v56  ;;  %vm100_vm5 = vweird.f32 %v215_v57 }
 0x117   :  { %vm101_vm7 = vmor %vm99_vm6, %vm100_vm5 }
 0x118   :  { %v95_v59 = vmul.f32 %v215_v57, %v94_v58 }
 0x11a   :  { %v96_v60 = vmul.f32 0.5, %v95_v59 }
 0x11c   :  { %v97_v61 = vsub.f32 1.5, %v96_v60 }
 0x11e   :  { %v98_v62 = vmul.f32 %v215_v57, %v97_v61 }
 0x120   :  { %v102_v0 = vsel %vm101_vm7, %v215_v57, %v98_v62 }
 0x121   :  { %v104_v1 = vrot.slane %v102_v0, 1  ;;  %v107_v2 = vmul.f32 %v102_v0, %v79_v45 }
 0x123   :  { %v108_v4 = vmul.f32 %v104_v1, %v80_v46  ;;  %v113_v5 = vmul.f32 %v207_v63, %v107_v2 }
 0x125   :  { %v114_v6 = vmul.f32 %v207_v63, %v108_v4  ;;  %v119_v7 = vadd.f32 %v208_v3, %v113_v5 }
 0x127   :  { %v120_v8 = vadd.f32 %v208_v3, %v114_v6  ;;  %v121_v9 = vpack.c.bf16 %v119_v7, %v119_v7 }
 0x129   :  { %v122_v10 = vpack.c.bf16 %v120_v8, %v120_v8  ;;  %v133_v12 = vunpack.c.l.b16 %v121_v9 }
 0x12b   :  { %v134_v11 = vunpack.c.l.b16 %v122_v10 }
 0x12d   :  { %v135_v13 = vrot.slane %v134_v11, 7 }
 0x12f   :  { %v136_v14 = vsel %vm60_vm2, %v135_v13, %v133_v12 }
 0x130   :  { %v137_v15 = vpack.c.b16 %v136_v14, %v136_v14 }
 0x132   :  { %192 = vmatmul.msk.bf16.vlgmr.msra.gmra.mxu0 %vm30_vm0, %v137_v15 }
 0x1af   :  { %v162_v17 = vpop.f32.mrf.mxu0 }
 0x1b0   :  { %v163_v18 = vadd.f32 %v209_v16, %v162_v17 }
 0x1b2   :  { %167 = vst.msk [vmem:[#allocation2] sm:$0x3] %vm166_vm8, %v163_v18 }
 0x1b3   :  { %178 = dma.vmem_to_hbm [thread:$0]  %s174_s29, 32, %s176_s7, [#allocation3]  }
 0x1b7   :  { %v164_v19 = vpop.f32.mrf.mxu0 }
 0x1b8   :  { %240 = dma.done.wait [#allocation3], 32  }
 0x1b9   :  { %241 = vsyncadd [#allocation3], 4294967264 }
 0x1ba   :  { %183 = vsyncpa [#allocation3], 1 }

// kernel: simple_vit_forward.29
= control target key start
LH: loop header
LB: loop body
LE: loop exit
PB: predicated region body
PF: predicated region fallthrough
CT: control target
= control target key end

     0   :  { %s777_s8 = smov 96   ;;  %vm18_vm0 = vcmask 64512   ;;  %s778_s9 = smov 120   ;;  %vm41_vm1 = vcmask 130048   ;;  %vm87_vm2 = vcmask 60416   ;;  %vm169_vm3 = vcmask 126016   ;;  %s1083_s0 = inlined_call_operand.vmem [shape: bf16[2,16,96], index: 0, kind: input, shape index: {}]   ;;  %s1084_s1 = inlined_call_operand.vmem [shape: bf16[2,16,32], index: 1, kind: output, shape index: {}]  }
   0x1   :  { %v804_v0 = vld [vmem:[%s1083_s0] sm:$0xff]  ;;  %s779_s10 = smov 80   ;;  %s780_s11 = smov 112   ;;  %v828_v11 = vld [vmem:[%s1083_s0 + $0x8] sm:$0xff]  ;;  %vm251_vm4 = vcmask 191616   ;;  %vm333_vm5 = vcmask 257216  }
   0x2   :  { %16 = vrot.lane.b32.xlu0 %v804_v0, %s777_s8  ;;  %90 = vrot.lane.b32.xlu2 %v804_v0, %s778_s9  ;;  %s781_s12 = smov 88   ;;  %s782_s13 = smov 64  }
   0x3   :  { %s783_s14 = smov 72   ;;  %s784_s15 = smov 104  }
   0x4   :  { %s785_s21 = smov 56   ;;  %s786_s22 = smov 48  }
   0x5   :  { %s787_s23 = smov 40   ;;  %s788_s24 = smov 8  }
   0x6   :  { %s789_s25 = smov 24   ;;  %s790_s30 = smov 16  }
   0xa   :  { %174 = vrot.lane.b32.xlu2 %v804_v0, %s779_s10 }
  0x12   :  { %172 = vrot.lane.b32.xlu2 %v804_v0, %s780_s11 }
  0x5c   :  { %v91_v20 = vpop.permute.xlu2 %90 }
  0x64   :  { %v175_v23 = vpop.permute.xlu2 %174 }
  0x65   :  { %v180_v24 = vsel %vm18_vm0, %v175_v23, 0 }
  0x6c   :  { %v173_v29 = vpop.permute.xlu2 %172 }
  0x74   :  { %v17_v1 = vpop.permute.xlu0 %16 }
  0x75   :  { %v23_v2 = vsel %vm18_vm0, %v17_v1, 0 }
  0x76   :  { %32 = vmatpush.bf16.xpose.msra.mxu0 %v23_v2 }
  0x7d   :  { %667 = vmatmul.msk.bf16.vlgmr.msra.gmra.mxu0 %vm18_vm0, %v804_v0 }
  0xfa   :  { %v34_v3 = vpop.f32.mrf.mxu0 }
  0xfb   :  { %v39_v4 = vmul.f32 0.35355338, %v34_v3 }
  0xfd   :  { %v42_v5 = vsel %vm41_vm1, %v39_v4, -inf }
  0xfe   :  { %43 = vmax.xlane.f32.xlu0 %v42_v5 }
 0x102   :  { %v36_v6 = vpop.f32.mrf.mxu0 }
 0x103   :  { %v40_v7 = vmul.f32 0.35355338, %v36_v6 }
 0x105   :  { %v45_v8 = vsel %vm41_vm1, %v40_v7, -inf }
 0x106   :  { %46 = vmax.xlane.f32.xlu1 %v45_v8 }
 0x112   :  { %344 = vrot.lane.b32.xlu0 %v828_v11, %s777_s8 }
 0x11a   :  { %497 = vrot.lane.b32.xlu0 %v828_v11, %s780_s11 }
 0x11f   :  { %92 = vrot.lane.b32.xlu1 %v804_v0, %s781_s12 }
 0x127   :  { %65 = vrot.lane.b32.xlu1 %v804_v0, %s782_s13 }
 0x12f   :  { %256 = vrot.lane.b32.xlu1 %v804_v0, %s783_s14 }
 0x137   :  { %254 = vrot.lane.b32.xlu1 %v804_v0, %s784_s15 }
 0x13f   :  { %416 = vrot.lane.b32.xlu1 %v828_v11, %s778_s9 }
 0x147   :  { %580 = vrot.lane.b32.xlu1 %v828_v11, %s783_s14 }
 0x171   :  { %v44_v9 = vpop.xlane.xlu0 %43 }
 0x172   :  { %v48_v10 = vsub.f32 %v39_v4, %v44_v9 }
 0x174   :  { %v50_v12 = vmul.f32 1.442695, %v48_v10 }
 0x176   :  { %713 = vpow2.f32 %v50_v12 }
 0x179   :  { %v47_v13 = vpop.xlane.xlu1 %46 }
 0x17a   :  { %v49_v14 = vsub.f32 %v40_v7, %v47_v13 }
 0x17c   :  { %v714_v15 = vpop.eup %713  ;;  %v52_v16 = vmul.f32 1.442695, %v49_v14 }
 0x17d   :  { %v54_v17 = vsel %vm41_vm1, %v714_v15, 0.0 }
 0x17e   :  { %715 = vpow2.f32 %v52_v16  ;;  %55 = vadd.xlane.f32.xlu2 %v54_v17 }
 0x184   :  { %v716_v18 = vpop.eup %715  ;;  %v345_v36 = vpop.permute.xlu0 %344 }
 0x185   :  { %v57_v19 = vsel %vm41_vm1, %v716_v18, 0.0  ;;  %v350_v43 = vsel %vm18_vm0, %v345_v36, 0 }
 0x186   :  { %58 = vadd.xlane.f32.xlu2 %v57_v19 }
 0x18c   :  { %v498_v59 = vpop.permute.xlu0 %497 }
 0x191   :  { %v93_v21 = vpop.permute.xlu1 %92 }
 0x192   :  { %v98_v22 = vsel %vm18_vm0, %v93_v21, 0 }
 0x193   :  { %107 = vmatpush.bf16.xpose.msra.mxu2 %v98_v22 }
 0x199   :  { %v66_v25 = vpop.permute.xlu1 %65 }
 0x19a   :  { %669 = vmatmul.msk.bf16.vlgmr.msra.gmra.mxu2 %vm18_vm0, %v91_v20  ;;  %78 = vmatpush.bf16.msra.mxu1 %v66_v25 }
 0x19e   :  { %189 = vmatpush.bf16.xpose.msrb.mxu1 %v180_v24  ;;  %418 = vrot.lane.b32.xlu2 %v828_v11, %s781_s12 }
 0x1a1   :  { %v257_v26 = vpop.permute.xlu1 %256 }
 0x1a2   :  { %v262_v27 = vsel %vm18_vm0, %v257_v26, 0 }
 0x1a3   :  { %271 = vmatpush.bf16.xpose.msrb.mxu0 %v262_v27 }
 0x1a6   :  { %499 = vrot.lane.b32.xlu2 %v828_v11, %s779_s10 }
 0x1a9   :  { %v255_v28 = vpop.permute.xlu1 %254 }
 0x1aa   :  { %673 = vmatmul.msk.bf16.vlgmr.msrb.gmra.mxu0 %vm18_vm0, %v255_v28 }
 0x1ae   :  { %578 = vrot.lane.b32.xlu2 %v828_v11, %s784_s15 }
 0x1b1   :  { %v417_v31 = vpop.permute.xlu1 %416 }
 0x1b9   :  { %v581_v34 = vpop.permute.xlu1 %580 }
 0x1ba   :  { %v586_v40 = vsel %vm18_vm0, %v581_v34, 0 }
 0x1f1   :  { %v56_v30 = vpop.xlane.xlu2 %55 }
 0x1f2   :  { %717 = vrcp.f32 %v56_v30 }
 0x1f8   :  { %v718_v33 = vpop.eup %717 }
 0x1f9   :  { %v59_v32 = vpop.xlane.xlu2 %58  ;;  %v62_v38 = vmul.f32 %v718_v33, %v714_v15 }
 0x1fa   :  { %719 = vrcp.f32 %v59_v32 }
 0x200   :  { %v720_v35 = vpop.eup %719 }
 0x201   :  { %v419_v37 = vpop.permute.xlu2 %418  ;;  %v63_v39 = vmul.f32 %v720_v35, %v716_v18 }
 0x202   :  { %v424_v41 = vsel %vm18_vm0, %v419_v37, 0 }
 0x203   :  { %433 = vmatpush.bf16.xpose.msra.mxu0 %v424_v41  ;;  %v64_v42 = vpack.c.bf16 %v63_v39, %v62_v38 }
 0x205   :  { %668 = vmatmul.msk.bf16.vlgmr.msra.gmra.mxu1 %vm41_vm1, %v64_v42 }
 0x206   :  { %359 = vmatpush.bf16.xpose.msra.mxu1 %v350_v43 }
 0x209   :  { %v500_v44 = vpop.permute.xlu2 %499 }
 0x20a   :  { %685 = vmatmul.msk.bf16.vlgmr.msra.gmra.mxu0 %vm18_vm0, %v417_v31  ;;  %v505_v45 = vsel %vm18_vm0, %v500_v44, 0 }
 0x20b   :  { %595 = vmatpush.bf16.xpose.msrb.mxu0 %v586_v40 }
 0x211   :  { %v579_v46 = vpop.permute.xlu2 %578 }
 0x215   :  { %671 = vmatmul.msk.bf16.vlgmr.msrb.gmra.mxu1 %vm18_vm0, %v173_v29 }
 0x216   :  { %514 = vmatpush.bf16.xpose.msrb.mxu1 %v505_v45 }
 0x21a   :  { %693 = vmatmul.msk.bf16.vlgmr.msrb.gmra.mxu0 %vm18_vm0, %v579_v46 }
 0x21d   :  { %v109_v47 = vpop.f32.mrf.mxu2 }
 0x21e   :  { %v114_v48 = vmul.f32 0.35355338, %v109_v47 }
 0x220   :  { %v116_v49 = vsel %vm41_vm1, %v114_v48, -inf }
 0x221   :  { %117 = vmax.xlane.f32.xlu1 %v116_v49 }
 0x225   :  { %v111_v50 = vpop.f32.mrf.mxu2  ;;  %681 = vmatmul.msk.bf16.vlgmr.msra.gmra.mxu1 %vm18_vm0, %v828_v11 }
 0x226   :  { %v115_v51 = vmul.f32 0.35355338, %v111_v50 }
 0x227   :  { %v273_v52 = vpop.f32.mrf.mxu0 }
 0x228   :  { %v119_v53 = vsel %vm41_vm1, %v115_v51, -inf  ;;  %v861_v54 = vmul.f32 0.35355338, %v273_v52 }
 0x229   :  { %120 = vmax.xlane.f32.xlu0 %v119_v53 }
 0x22a   :  { %v280_v55 = vsel %vm41_vm1, %v861_v54, -inf }
 0x22f   :  { %v275_v56 = vpop.f32.mrf.mxu0 }
 0x230   :  { %v279_v57 = vmul.f32 0.35355338, %v275_v56 }
 0x231   :  { %281 = vmax.xlane.f32.xlu0 %v280_v55 }
 0x232   :  { %v283_v58 = vsel %vm41_vm1, %v279_v57, -inf }
 0x233   :  { %284 = vmax.xlane.f32.xlu2 %v283_v58 }
 0x235   :  { %689 = vmatmul.msk.bf16.vlgmr.msrb.gmra.mxu1 %vm18_vm0, %v498_v59 }
 0x282   :  { %v80_v60 = vpop.f32.mrf.mxu1 }
 0x283   :  { %v85_v61 = vpack.c.bf16 %v80_v60, %v80_v60 }
 0x285   :  { %88 = vst.msk [vmem:[%s1084_s1] sm:$0xf] %vm87_vm2, %v85_v61 }
 0x287   :  { %v435_v62 = vpop.f32.mrf.mxu0 }
 0x288   :  { %v871_v63 = vmul.f32 0.35355338, %v435_v62 }
 0x28a   :  { %v82_v1 = vpop.f32.mrf.mxu1  ;;  %v442_v2 = vsel %vm41_vm1, %v871_v63, -inf }
 0x28b   :  { %v86_v3 = vpack.c.bf16 %v82_v1, %v82_v1  ;;  %443 = vmax.xlane.f32.xlu2 %v442_v2 }
 0x28d   :  { %89 = vst.msk [vmem:[%s1084_s1 + $0x4] sm:$0xf] %vm87_vm2, %v86_v3 }
 0x28f   :  { %v437_v4 = vpop.f32.mrf.mxu0 }
 0x290   :  { %v879_v5 = vmul.f32 0.35355338, %v437_v4 }
 0x292   :  { %v445_v6 = vsel %vm41_vm1, %v879_v5, -inf  ;;  %v191_v26 = vpop.f32.mrf.mxu1 }
 0x293   :  { %446 = vmax.xlane.f32.xlu1 %v445_v6  ;;  %v918_v41 = vmul.f32 0.35355338, %v191_v26 }
 0x294   :  { %v118_v7 = vpop.xlane.xlu1 %117 }
 0x295   :  { %v122_v8 = vsub.f32 %v114_v48, %v118_v7  ;;  %v198_v43 = vsel %vm41_vm1, %v918_v41, -inf }
 0x297   :  { %v124_v9 = vmul.f32 1.442695, %v122_v8  ;;  %v597_v10 = vpop.f32.mrf.mxu0 }
 0x298   :  { %v883_v12 = vmul.f32 0.35355338, %v597_v10 }
 0x299   :  { %721 = vpow2.f32 %v124_v9 }
 0x29a   :  { %v604_v13 = vsel %vm41_vm1, %v883_v12, -inf  ;;  %v193_v30 = vpop.f32.mrf.mxu1 }
 0x29b   :  { %605 = vmax.xlane.f32.xlu1 %v604_v13  ;;  %v903_v31 = vmul.f32 0.35355338, %v193_v30 }
 0x29c   :  { %v121_v14 = vpop.xlane.xlu0 %120 }
 0x29d   :  { %v123_v15 = vsub.f32 %v115_v51, %v121_v14  ;;  %v201_v32 = vsel %vm41_vm1, %v903_v31, -inf }
 0x29f   :  { %v887_v16 = vpop.eup %721  ;;  %v126_v17 = vmul.f32 1.442695, %v123_v15  ;;  %v599_v18 = vpop.f32.mrf.mxu0 }
 0x2a0   :  { %v889_v19 = vmul.f32 0.35355338, %v599_v18  ;;  %v128_v20 = vsel %vm41_vm1, %v887_v16, 0.0 }
 0x2a1   :  { %723 = vpow2.f32 %v126_v17  ;;  %129 = vadd.xlane.f32.xlu2 %v128_v20 }
 0x2a2   :  { %v607_v21 = vsel %vm41_vm1, %v889_v19, -inf  ;;  %v361_v33 = vpop.f32.mrf.mxu1 }
 0x2a3   :  { %608 = vmax.xlane.f32.xlu0 %v607_v21  ;;  %v926_v45 = vmul.f32 0.35355338, %v361_v33 }
 0x2a4   :  { %v282_v34 = vpop.xlane.xlu0 %281 }
 0x2a5   :  { %v286_v35 = vsub.f32 %v861_v54, %v282_v34  ;;  %v368_v46 = vsel %vm41_vm1, %v926_v45, -inf }
 0x2a6   :  { %v285_v22 = vpop.xlane.xlu2 %284 }
 0x2a7   :  { %v895_v23 = vpop.eup %723  ;;  %v287_v24 = vsub.f32 %v279_v57, %v285_v22  ;;  %v288_v36 = vmul.f32 1.442695, %v286_v35 }
 0x2a8   :  { %v131_v25 = vsel %vm41_vm1, %v895_v23, 0.0 }
 0x2a9   :  { %v290_v27 = vmul.f32 1.442695, %v287_v24  ;;  %132 = vadd.xlane.f32.xlu1 %v131_v25 }
 0x2aa   :  { %v363_v37 = vpop.f32.mrf.mxu1 }
 0x2ab   :  { %725 = vpow2.f32 %v290_v27  ;;  %v942_v58 = vmul.f32 0.35355338, %v363_v37 }
 0x2ac   :  { %727 = vpow2.f32 %v288_v36 }
 0x2ad   :  { %v371_v59 = vsel %vm41_vm1, %v942_v58, -inf }
 0x2b1   :  { %v899_v28 = vpop.eup %725 }
 0x2b2   :  { %v295_v29 = vsel %vm41_vm1, %v899_v28, 0.0  ;;  %v914_v38 = vpop.eup %727  ;;  %v516_v39 = vpop.f32.mrf.mxu1 }
 0x2b3   :  { %296 = vadd.xlane.f32.xlu1 %v295_v29  ;;  %v292_v40 = vsel %vm41_vm1, %v914_v38, 0.0  ;;  %v521_v62 = vmul.f32 0.35355338, %v516_v39 }
 0x2b5   :  { %v523_v1 = vsel %vm41_vm1, %v521_v62, -inf }
 0x2b7   :  { %139 = vrot.lane.b32.xlu0 %v804_v0, %s785_s21 }
 0x2b9   :  { %221 = vrot.lane.b32.xlu2 %v804_v0, %s786_s22 }
 0x2ba   :  { %v518_v42 = vpop.f32.mrf.mxu1 }
 0x2bb   :  { %202 = vmax.xlane.f32.xlu1 %v201_v32  ;;  %v922_v44 = vmul.f32 0.35355338, %v518_v42 }
 0x2d4   :  { %303 = vrot.lane.b32.xlu1 %v804_v0, %s787_s23  ;;  %v526_v0 = vsel %vm41_vm1, %v922_v44, -inf }
 0x2e2   :  { %293 = vadd.xlane.f32.xlu2 %v292_v40 }
 0x2ea   :  { %199 = vmax.xlane.f32.xlu2 %v198_v43 }
 0x2f2   :  { %527 = vmax.xlane.f32.xlu2 %v526_v0 }
 0x2fe   :  { %v444_v47 = vpop.xlane.xlu2 %443  ;;  %369 = vmax.xlane.f32.xlu1 %v368_v46 }
 0x2ff   :  { %v448_v48 = vsub.f32 %v871_v63, %v444_v47 }
 0x301   :  { %v450_v49 = vmul.f32 1.442695, %v448_v48 }
 0x303   :  { %729 = vpow2.f32 %v450_v49 }
 0x306   :  { %v447_v50 = vpop.xlane.xlu1 %446 }
 0x307   :  { %v449_v51 = vsub.f32 %v879_v5, %v447_v50 }
 0x309   :  { %v932_v52 = vpop.eup %729  ;;  %v452_v53 = vmul.f32 1.442695, %v449_v51 }
 0x30a   :  { %v454_v54 = vsel %vm41_vm1, %v932_v52, 0.0 }
 0x30b   :  { %731 = vpow2.f32 %v452_v53  ;;  %455 = vadd.xlane.f32.xlu1 %v454_v54 }
 0x30e   :  { %v940_v57 = vpop.xlane.xlu1 %605 }
 0x30f   :  { %v610_v39 = vsub.f32 %v883_v12, %v940_v57 }
 0x311   :  { %v936_v55 = vpop.eup %731  ;;  %v612_v42 = vmul.f32 1.442695, %v610_v39 }
 0x312   :  { %v457_v56 = vsel %vm41_vm1, %v936_v55, 0.0 }
 0x313   :  { %458 = vadd.xlane.f32.xlu0 %v457_v56 }
 0x314   :  { %v130_v61 = vpop.xlane.xlu2 %129 }
 0x316   :  { %v946_v63 = vpop.xlane.xlu0 %608 }
 0x31b   :  { %372 = vmax.xlane.f32.xlu0 %v371_v59 }
 0x31c   :  { %v133_v60 = vpop.xlane.xlu1 %132  ;;  %v222_v8 = vpop.permute.xlu2 %221 }
 0x31d   :  { %733 = vrcp.f32 %v133_v60 }
 0x31e   :  { %735 = vrcp.f32 %v130_v61 }
 0x323   :  { %524 = vmax.xlane.f32.xlu0 %v523_v1  ;;  %v734_v2 = vpop.eup %733 }
 0x324   :  { %v736_v3 = vpop.eup %735  ;;  %v137_v5 = vmul.f32 %v734_v2, %v895_v23 }
 0x325   :  { %v136_v7 = vmul.f32 %v736_v3, %v887_v16 }
 0x326   :  { %v297_v4 = vpop.xlane.xlu1 %296 }
 0x327   :  { %v138_v9 = vpack.c.bf16 %v137_v5, %v136_v7 }
 0x329   :  { %v140_v6 = vpop.permute.xlu0 %139 }
 0x32a   :  { %152 = vmatpush.bf16.msra.mxu3 %v140_v6 }
 0x32d   :  { %670 = vmatmul.msk.bf16.vlgmr.msra.gmra.mxu3 %vm41_vm1, %v138_v9 }
 0x32e   :  { %234 = vmatpush.bf16.msrb.mxu3 %v222_v8  ;;  %v203_v10 = vpop.xlane.xlu1 %202 }
 0x32f   :  { %v205_v13 = vsub.f32 %v903_v31, %v203_v10 }
 0x331   :  { %v208_v14 = vmul.f32 1.442695, %v205_v13 }
 0x333   :  { %737 = vpow2.f32 %v208_v14 }
 0x334   :  { %739 = vrcp.f32 %v297_v4 }
 0x339   :  { %v953_v15 = vpop.eup %737 }
 0x33a   :  { %v213_v17 = vsel %vm41_vm1, %v953_v15, 0.0  ;;  %v740_v20 = vpop.eup %739 }
 0x33b   :  { %214 = vadd.xlane.f32.xlu1 %v213_v17  ;;  %v301_v22 = vmul.f32 %v740_v20, %v899_v28 }
 0x346   :  { %v304_v18 = vpop.permute.xlu1 %303 }
 0x347   :  { %316 = vmatpush.bf16.msrb.mxu2 %v304_v18 }
 0x355   :  { %v294_v16 = vpop.xlane.xlu2 %293 }
 0x356   :  { %741 = vrcp.f32 %v294_v16 }
 0x35c   :  { %v742_v21 = vpop.eup %741 }
 0x35d   :  { %v300_v23 = vmul.f32 %v742_v21, %v914_v38  ;;  %v200_v24 = vpop.xlane.xlu2 %199 }
 0x35e   :  { %v204_v25 = vsub.f32 %v918_v41, %v200_v24 }
 0x35f   :  { %v302_v26 = vpack.c.bf16 %v301_v22, %v300_v23 }
 0x360   :  { %v206_v27 = vmul.f32 1.442695, %v204_v25 }
 0x361   :  { %674 = vmatmul.msk.bf16.vlgmr.msrb.gmra.mxu2 %vm41_vm1, %v302_v26 }
 0x362   :  { %743 = vpow2.f32 %v206_v27 }
 0x365   :  { %v528_v49 = vpop.xlane.xlu2 %527 }
 0x366   :  { %v530_v50 = vsub.f32 %v922_v44, %v528_v49 }
 0x368   :  { %v961_v29 = vpop.eup %743  ;;  %v533_v53 = vmul.f32 1.442695, %v530_v50 }
 0x369   :  { %v210_v30 = vsel %vm41_vm1, %v961_v29, 0.0 }
 0x36a   :  { %211 = vadd.xlane.f32.xlu2 %v210_v30 }
 0x371   :  { %v370_v31 = vpop.xlane.xlu1 %369 }
 0x372   :  { %v374_v32 = vsub.f32 %v926_v45, %v370_v31  ;;  %v611_v45 = vsub.f32 %v889_v19, %v946_v63 }
 0x374   :  { %v376_v28 = vmul.f32 1.442695, %v374_v32  ;;  %v614_v47 = vmul.f32 1.442695, %v611_v45 }
 0x376   :  { %745 = vpow2.f32 %v376_v28 }
 0x37c   :  { %v966_v33 = vpop.eup %745 }
 0x37d   :  { %v380_v34 = vsel %vm41_vm1, %v966_v33, 0.0 }
 0x37e   :  { %381 = vadd.xlane.f32.xlu0 %v380_v34  ;;  %v456_v61 = vpop.xlane.xlu1 %455 }
 0x382   :  { %465 = vrot.lane.b32.xlu2 %v828_v11, %s785_s21 }
 0x386   :  { %v459_v35 = vpop.xlane.xlu0 %458 }
 0x38e   :  { %v373_v36 = vpop.xlane.xlu0 %372 }
 0x38f   :  { %v375_v40 = vsub.f32 %v942_v58, %v373_v36 }
 0x391   :  { %v378_v43 = vmul.f32 1.442695, %v375_v40 }
 0x392   :  { %391 = vrot.lane.b32.xlu0 %v828_v11, %s782_s13 }
 0x396   :  { %v525_v37 = vpop.xlane.xlu0 %524 }
 0x397   :  { %v529_v38 = vsub.f32 %v521_v62, %v525_v37 }
 0x399   :  { %v531_v41 = vmul.f32 1.442695, %v529_v38 }
 0x39b   :  { %747 = vpow2.f32 %v531_v41 }
 0x39c   :  { %749 = vpow2.f32 %v612_v42 }
 0x39d   :  { %751 = vpow2.f32 %v378_v43 }
 0x39e   :  { %753 = vpow2.f32 %v614_v47 }
 0x39f   :  { %755 = vpow2.f32 %v533_v53 }
 0x3a0   :  { %757 = vrcp.f32 %v459_v35 }
 0x3a1   :  { %v977_v0 = vpop.eup %747  ;;  %759 = vrcp.f32 %v456_v61 }
 0x3a2   :  { %v535_v46 = vsel %vm41_vm1, %v977_v0, 0.0  ;;  %v983_v48 = vpop.eup %749 }
 0x3a3   :  { %536 = vadd.xlane.f32.xlu1 %v535_v46  ;;  %v985_v12 = vpop.eup %751  ;;  %v616_v19 = vsel %vm41_vm1, %v983_v48, 0.0 }
 0x3a4   :  { %v383_v51 = vsel %vm41_vm1, %v985_v12, 0.0  ;;  %v992_v54 = vpop.eup %753 }
 0x3a5   :  { %v619_v56 = vsel %vm41_vm1, %v992_v54, 0.0  ;;  %v996_v57 = vpop.eup %755 }
 0x3a6   :  { %v538_v44 = vsel %vm41_vm1, %v996_v57, 0.0  ;;  %v758_v2 = vpop.eup %757 }
 0x3a7   :  { %v760_v3 = vpop.eup %759  ;;  %v463_v5 = vmul.f32 %v758_v2, %v936_v55 }
 0x3ab   :  { %384 = vadd.xlane.f32.xlu2 %v383_v51  ;;  %617 = vadd.xlane.f32.xlu1 %v616_v19 }
 0x3ae   :  { %v215_v63 = vpop.xlane.xlu1 %214 }
 0x3af   :  { %761 = vrcp.f32 %v215_v63 }
 0x3b0   :  { %v154_v58 = vpop.f32.mrf.mxu3 }
 0x3b1   :  { %v159_v59 = vpack.c.bf16 %v154_v58, %v154_v58 }
 0x3b3   :  { %620 = vadd.xlane.f32.xlu1 %v619_v56 }
 0x3b5   :  { %v762_v4 = vpop.eup %761 }
 0x3b6   :  { %v219_v8 = vmul.f32 %v762_v4, %v953_v15 }
 0x3b8   :  { %v156_v60 = vpop.f32.mrf.mxu3 }
 0x3b9   :  { %v160_v62 = vpack.c.bf16 %v156_v60, %v156_v60 }
 0x3bc   :  { %539 = vadd.xlane.f32.xlu0 %v538_v44 }
 0x3c3   :  { %546 = vrot.lane.b32.xlu2 %v828_v11, %s786_s22 }
 0x3cb   :  { %163 = vrot.lane.b32.xlu2 %v159_v59, %s788_s24 }
 0x3cc   :  { %627 = vrot.lane.b32.xlu1 %v828_v11, %s787_s23  ;;  %v462_v11 = vmul.f32 %v760_v3, %v932_v52 }
 0x3ce   :  { %v464_v14 = vpack.c.bf16 %v463_v5, %v462_v11 }
 0x3d3   :  { %165 = vrot.lane.b32.xlu2 %v160_v62, %s788_s24 }
 0x3dd   :  { %v212_v1 = vpop.xlane.xlu2 %211 }
 0x3de   :  { %763 = vrcp.f32 %v212_v1 }
 0x3e4   :  { %v764_v6 = vpop.eup %763  ;;  %v318_v7 = vpop.f32.mrf.mxu2 }
 0x3e5   :  { %v218_v9 = vmul.f32 %v764_v6, %v961_v29  ;;  %v323_v10 = vpack.c.bf16 %v318_v7, %v318_v7  ;;  %v466_v13 = vpop.permute.xlu2 %465 }
 0x3e6   :  { %478 = vmatpush.bf16.msra.mxu2 %v466_v13 }
 0x3e7   :  { %327 = vrot.lane.b32.xlu1 %v323_v10, %s789_s25  ;;  %v220_v17 = vpack.c.bf16 %v219_v8, %v218_v9 }
 0x3e9   :  { %672 = vmatmul.msk.bf16.vlgmr.msrb.gmra.mxu3 %vm41_vm1, %v220_v17  ;;  %686 = vmatmul.msk.bf16.vlgmr.msra.gmra.mxu2 %vm41_vm1, %v464_v14 }
 0x3ec   :  { %v320_v55 = vpop.f32.mrf.mxu2 }
 0x3ed   :  { %v324_v18 = vpack.c.bf16 %v320_v55, %v320_v55 }
 0x3ef   :  { %329 = vrot.lane.b32.xlu2 %v324_v18, %s789_s25 }
 0x3f1   :  { %v382_v52 = vpop.xlane.xlu0 %381 }
 0x3f2   :  { %765 = vrcp.f32 %v382_v52 }
 0x3f8   :  { %v766_v21 = vpop.eup %765 }
 0x3f9   :  { %v388_v23 = vmul.f32 %v766_v21, %v966_v33 }
 0x404   :  { %v392_v15 = vpop.permute.xlu0 %391 }
 0x405   :  { %404 = vmatpush.bf16.msra.mxu3 %v392_v15 }
 0x416   :  { %v537_v16 = vpop.xlane.xlu1 %536 }
 0x41e   :  { %v385_v20 = vpop.xlane.xlu2 %384  ;;  %v618_v25 = vpop.xlane.xlu1 %617 }
 0x41f   :  { %767 = vrcp.f32 %v385_v20 }
 0x420   :  { %769 = vrcp.f32 %v537_v16 }
 0x425   :  { %v768_v22 = vpop.eup %767 }
 0x426   :  { %v389_v24 = vmul.f32 %v768_v22, %v985_v12  ;;  %v547_v26 = vpop.permute.xlu2 %546  ;;  %v621_v31 = vpop.xlane.xlu1 %620 }
 0x427   :  { %559 = vmatpush.bf16.msrb.mxu3 %v547_v26  ;;  %v770_v32 = vpop.eup %769 }
 0x428   :  { %v390_v27 = vpack.c.bf16 %v389_v24, %v388_v23  ;;  %v543_v34 = vmul.f32 %v770_v32, %v977_v0 }
 0x42a   :  { %682 = vmatmul.msk.bf16.vlgmr.msra.gmra.mxu3 %vm41_vm1, %v390_v27 }
 0x42e   :  { %v164_v29 = vpop.permute.xlu2 %163 }
 0x42f   :  { %170 = vst.msk [vmem:[%s1084_s1] sm:$0xf] %vm169_vm3, %v164_v29  ;;  %v540_v30 = vpop.xlane.xlu0 %539 }
 0x430   :  { %771 = vrcp.f32 %v540_v30 }
 0x431   :  { %773 = vrcp.f32 %v621_v31 }
 0x432   :  { %775 = vrcp.f32 %v618_v25 }
 0x436   :  { %v772_v28 = vpop.eup %771  ;;  %v166_v33 = vpop.permute.xlu2 %165 }
 0x437   :  { %v544_v35 = vmul.f32 %v772_v28, %v996_v57  ;;  %171 = vst.msk [vmem:[%s1084_s1 + $0x4] sm:$0xf] %vm169_vm3, %v166_v33  ;;  %v774_v36 = vpop.eup %773 }
 0x438   :  { %v776_v38 = vpop.eup %775  ;;  %v625_v39 = vmul.f32 %v774_v36, %v992_v54 }
 0x439   :  { %v545_v37 = vpack.c.bf16 %v544_v35, %v543_v34  ;;  %v624_v40 = vmul.f32 %v776_v38, %v983_v48 }
 0x43b   :  { %690 = vmatmul.msk.bf16.vlgmr.msrb.gmra.mxu3 %vm41_vm1, %v545_v37  ;;  %v626_v42 = vpack.c.bf16 %v625_v39, %v624_v40 }
 0x43e   :  { %v628_v41 = vpop.permute.xlu1 %627 }
 0x43f   :  { %640 = vmatpush.bf16.msrb.mxu2 %v628_v41 }
 0x442   :  { %694 = vmatmul.msk.bf16.vlgmr.msrb.gmra.mxu2 %vm41_vm1, %v626_v42 }
 0x449   :  { %v330_v60 = vpop.permute.xlu2 %329 }
 0x459   :  { %v328_v1 = vpop.permute.xlu1 %327 }
 0x46c   :  { %v236_v43 = vpop.f32.mrf.mxu3  ;;  %v480_v0 = vpop.f32.mrf.mxu2 }
 0x46d   :  { %v485_v45 = vpack.c.bf16 %v480_v0, %v480_v0  ;;  %v241_v50 = vpack.c.bf16 %v236_v43, %v236_v43 }
 0x46f   :  { %489 = vrot.lane.b32.xlu1 %v485_v45, %s788_s24 }
 0x474   :  { %v238_v46 = vpop.f32.mrf.mxu3  ;;  %v482_v47 = vpop.f32.mrf.mxu2 }
 0x475   :  { %v242_v12 = vpack.c.bf16 %v238_v46, %v238_v46  ;;  %v486_v49 = vpack.c.bf16 %v482_v47, %v482_v47 }
 0x477   :  { %491 = vrot.lane.b32.xlu2 %v486_v49, %s788_s24  ;;  %247 = vrot.lane.b32.xlu0 %v242_v12, %s790_s30 }
 0x47f   :  { %245 = vrot.lane.b32.xlu2 %v241_v50, %s790_s30 }
 0x4ad   :  { %v406_v48 = vpop.f32.mrf.mxu3 }
 0x4ae   :  { %v411_v51 = vpack.c.bf16 %v406_v48, %v406_v48 }
 0x4b0   :  { %683 = vst.msk [vmem:[%s1084_s1 + $0x8] sm:$0xf] %vm87_vm2, %v411_v51 }
 0x4b5   :  { %v408_v19 = vpop.f32.mrf.mxu3 }
 0x4b6   :  { %v412_v53 = vpack.c.bf16 %v408_v19, %v408_v19 }
 0x4b8   :  { %684 = vst.msk [vmem:[%s1084_s1 + $0xc] sm:$0xf] %vm87_vm2, %v412_v53 }
 0x4be   :  { %v561_v54 = vpop.f32.mrf.mxu3 }
 0x4bf   :  { %v566_v56 = vpack.c.bf16 %v561_v54, %v561_v54 }
 0x4c1   :  { %570 = vrot.lane.b32.xlu1 %v566_v56, %s790_s30 }
 0x4c5   :  { %v642_v57 = vpop.f32.mrf.mxu2 }
 0x4c6   :  { %v647_v44 = vpack.c.bf16 %v642_v57, %v642_v57  ;;  %v563_v58 = vpop.f32.mrf.mxu3 }
 0x4c7   :  { %v567_v59 = vpack.c.bf16 %v563_v58, %v563_v58 }
 0x4c8   :  { %651 = vrot.lane.b32.xlu2 %v647_v44, %s789_s25 }
 0x4c9   :  { %572 = vrot.lane.b32.xlu0 %v567_v59, %s790_s30 }
 0x4cd   :  { %v644_v61 = vpop.f32.mrf.mxu2 }
 0x4ce   :  { %v648_v62 = vpack.c.bf16 %v644_v61, %v644_v61 }
 0x4d0   :  { %653 = vrot.lane.b32.xlu1 %v648_v62, %s789_s25 }
 0x4d1   :  { %v492_v63 = vpop.permute.xlu2 %491 }
 0x4d2   :  { %688 = vst.msk [vmem:[%s1084_s1 + $0xc] sm:$0xf] %vm169_vm3, %v492_v63 }
 0x4d9   :  { %v246_v2 = vpop.permute.xlu2 %245 }
 0x4da   :  { %252 = vst.msk [vmem:[%s1084_s1] sm:$0xf] %vm251_vm4, %v246_v2 }
 0x4db   :  { %334 = vst.msk [vmem:[%s1084_s1] sm:$0xf] %vm333_vm5, %v328_v1 }
 0x4e1   :  { %v490_v3 = vpop.permute.xlu1 %489 }
 0x4e2   :  { %687 = vst.msk [vmem:[%s1084_s1 + $0x8] sm:$0xf] %vm169_vm3, %v490_v3 }
 0x4e9   :  { %v248_v4 = vpop.permute.xlu0 %247 }
 0x4ea   :  { %253 = vst.msk [vmem:[%s1084_s1 + $0x4] sm:$0xf] %vm251_vm4, %v248_v4 }
 0x4eb   :  { %335 = vst.msk [vmem:[%s1084_s1 + $0x4] sm:$0xf] %vm333_vm5, %v330_v60 }
 0x522   :  { %v652_v6 = vpop.permute.xlu2 %651 }
 0x533   :  { %v571_v5 = vpop.permute.xlu1 %570 }
 0x534   :  { %691 = vst.msk [vmem:[%s1084_s1 + $0x8] sm:$0xf] %vm251_vm4, %v571_v5 }
 0x535   :  { %695 = vst.msk [vmem:[%s1084_s1 + $0x8] sm:$0xf] %vm333_vm5, %v652_v6 }
 0x53b   :  { %v573_v7 = vpop.permute.xlu0 %572 }
 0x53c   :  { %692 = vst.msk [vmem:[%s1084_s1 + $0xc] sm:$0xf] %vm251_vm4, %v573_v7 }
 0x542   :  { %v654_v11 = vpop.permute.xlu1 %653 }
 0x543   :  { %696 = vst.msk [vmem:[%s1084_s1 + $0xc] sm:$0xf] %vm333_vm5, %v654_v11 }

// kernel: simple_vit_forward.24
= control target key start
LH: loop header
LB: loop body
LE: loop exit
PB: predicated region body
PF: predicated region fallthrough
CT: control target
= control target key end

     0   :  { %s2636_s8 = smov 96   ;;  %s2637_s9 = smov 64   ;;  %vm16_vm0 = vcmask 64512   ;;  %vm58_vm1 = vcmask 1041408   ;;  %vm36_vm2 = vcmask 27648   ;;  %vm54_vm3 = vcmask 31744   ;;  %s3718_s0 = inlined_call_operand.vmem [shape: bf16[8,4,96], index: 0, kind: input, shape index: {}]   ;;  %s3719_s1 = inlined_call_operand.vmem [shape: bf16[8,4,32], index: 1, kind: output, shape index: {}]  }
   0x1   :  { %v2663_v0 = vld [vmem:[%s3718_s0] sm:$0x3]  ;;  %s2638_s10 = smov 120   ;;  %s2639_s11 = smov 88   ;;  %v2689_v11 = vld [vmem:[%s3718_s0 + $0x2] sm:$0x3] }
   0x2   :  { %11 = vst [vmem:[#allocation1] ss:$4 sm:$0xff] %v2663_v0  ;;  %s2640_s12 = smov 56   ;;  %s2641_s13 = smov 112   ;;  %v2723_v32 = vld [vmem:[%s3718_s0 + $0x4] sm:$0x3] }
   0x3   :  { %s2642_s14 = smov 80   ;;  %s2643_s15 = smov 48   ;;  %v2760_v58 = vld [vmem:[%s3718_s0 + $0x6] sm:$0x3]  ;;  %vm76_vm4 = vcmask 58368   ;;  %vm154_vm5 = vcmask 123968  }
   0x4   :  { %s2644_s16 = smov 104   ;;  %s2645_s17 = smov 72   ;;  %vm232_vm6 = vcmask 189568   ;;  %vm310_vm7 = vcmask 255168  }
   0x5   :  { %s2646_s20 = smov 40   ;;  %s2647_s5 = smov 8  }
   0x6   :  { %s2648_s6 = smov 24  }
   0x9   :  { %v12_v1 = vld.sshfl [vmem:[#allocation1] sm:$0xff pattern:$0x73625140] }
   0xa   :  { %14 = vrot.lane.b32.xlu0 %v12_v1, %s2636_s8  ;;  %49 = vst [vmem:[#allocation1] ss:$4 sm:$0xff] %v2663_v0 }
  0x11   :  { %v50_v2 = vld.sshfl [vmem:[#allocation1] sm:$0xff pattern:$0x73625140] }
  0x12   :  { %78 = vst [vmem:[#allocation1] ss:$4 sm:$0xff] %v2663_v0  ;;  %52 = vrot.lane.b32.xlu1 %v50_v2, %s2637_s9 }
  0x19   :  { %v79_v3 = vld.sshfl [vmem:[#allocation1] sm:$0xff pattern:$0x73625140] }
  0x1a   :  { %81 = vrot.lane.b32.xlu2 %v79_v3, %s2638_s10  ;;  %83 = vst [vmem:[#allocation1] ss:$4 sm:$0xff] %v2663_v0 }
  0x21   :  { %v84_v4 = vld.sshfl [vmem:[#allocation1] sm:$0xff pattern:$0x73625140] }
  0x22   :  { %86 = vrot.lane.b32.xlu2 %v84_v4, %s2639_s11  ;;  %120 = vst [vmem:[#allocation1] ss:$4 sm:$0xff] %v2663_v0 }
  0x29   :  { %v121_v5 = vld.sshfl [vmem:[#allocation1] sm:$0xff pattern:$0x73625140] }
  0x2a   :  { %123 = vrot.lane.b32.xlu0 %v121_v5, %s2640_s12  ;;  %156 = vst [vmem:[#allocation1] ss:$4 sm:$0xff] %v2663_v0 }
  0x31   :  { %v157_v6 = vld.sshfl [vmem:[#allocation1] sm:$0xff pattern:$0x73625140] }
  0x32   :  { %159 = vrot.lane.b32.xlu0 %v157_v6, %s2641_s13  ;;  %161 = vst [vmem:[#allocation1] ss:$4 sm:$0xff] %v2663_v0 }
  0x39   :  { %v162_v7 = vld.sshfl [vmem:[#allocation1] sm:$0xff pattern:$0x73625140] }
  0x3a   :  { %164 = vrot.lane.b32.xlu1 %v162_v7, %s2642_s14  ;;  %198 = vst [vmem:[#allocation1] ss:$4 sm:$0xff] %v2663_v0 }
  0x41   :  { %v199_v8 = vld.sshfl [vmem:[#allocation1] sm:$0xff pattern:$0x73625140] }
  0x42   :  { %201 = vrot.lane.b32.xlu1 %v199_v8, %s2643_s15  ;;  %234 = vst [vmem:[#allocation1] ss:$4 sm:$0xff] %v2663_v0 }
  0x49   :  { %v235_v9 = vld.sshfl [vmem:[#allocation1] sm:$0xff pattern:$0x73625140] }
  0x4a   :  { %239 = vst [vmem:[#allocation1] ss:$4 sm:$0xff] %v2663_v0  ;;  %237 = vrot.lane.b32.xlu1 %v235_v9, %s2644_s16 }
  0x51   :  { %v240_v10 = vld.sshfl [vmem:[#allocation1] sm:$0xff pattern:$0x73625140] }
  0x52   :  { %242 = vrot.lane.b32.xlu0 %v240_v10, %s2645_s17  ;;  %276 = vst [vmem:[#allocation1] ss:$4 sm:$0xff] %v2663_v0 }
  0x59   :  { %v277_v12 = vld.sshfl [vmem:[#allocation1] sm:$0xff pattern:$0x73625140] }
  0x5a   :  { %315 = vst [vmem:[#allocation1] ss:$4 sm:$0xff] %v2689_v11  ;;  %279 = vrot.lane.b32.xlu2 %v277_v12, %s2646_s20 }
  0x61   :  { %v316_v13 = vld.sshfl [vmem:[#allocation1] sm:$0xff pattern:$0x73625140] }
  0x62   :  { %351 = vst [vmem:[#allocation1] ss:$4 sm:$0xff] %v2689_v11  ;;  %318 = vrot.lane.b32.xlu0 %v316_v13, %s2636_s8 }
  0x69   :  { %v352_v14 = vld.sshfl [vmem:[#allocation1] sm:$0xff pattern:$0x73625140] }
  0x6a   :  { %354 = vrot.lane.b32.xlu1 %v352_v14, %s2637_s9  ;;  %378 = vst [vmem:[#allocation1] ss:$4 sm:$0xff] %v2689_v11 }
  0x71   :  { %v379_v15 = vld.sshfl [vmem:[#allocation1] sm:$0xff pattern:$0x73625140] }
  0x72   :  { %381 = vrot.lane.b32.xlu1 %v379_v15, %s2638_s10  ;;  %383 = vst [vmem:[#allocation1] ss:$4 sm:$0xff] %v2689_v11 }
  0x74   :  { %v82_v16 = vpop.permute.xlu2 %81 }
  0x79   :  { %v384_v17 = vld.sshfl [vmem:[#allocation1] sm:$0xff pattern:$0x73625140] }
  0x7a   :  { %386 = vrot.lane.b32.xlu2 %v384_v17, %s2639_s11  ;;  %420 = vst [vmem:[#allocation1] ss:$4 sm:$0xff] %v2689_v11 }
  0x7c   :  { %v87_v18 = vpop.permute.xlu2 %86  ;;  %v15_v19 = vpop.permute.xlu0 %14 }
  0x7d   :  { %v92_v20 = vsel %vm16_vm0, %v87_v18, 0  ;;  %v20_v21 = vsel %vm16_vm0, %v15_v19, 0 }
  0x7e   :  { %101 = vmatpush.bf16.xpose.msra.mxu2 %v92_v20  ;;  %29 = vmatpush.bf16.xpose.msra.mxu0 %v20_v21 }
  0x81   :  { %v421_v22 = vld.sshfl [vmem:[#allocation1] sm:$0xff pattern:$0x73625140] }
  0x82   :  { %423 = vrot.lane.b32.xlu0 %v421_v22, %s2640_s12  ;;  %455 = vst [vmem:[#allocation1] ss:$4 sm:$0xff] %v2689_v11 }
  0x84   :  { %v53_v28 = vpop.permute.xlu1 %52 }
  0x85   :  { %2397 = vmatmul.msk.bf16.vlgmr.msra.gmra.mxu2 %vm16_vm0, %v82_v16  ;;  %2395 = vmatmul.msk.bf16.vlgmr.msra.gmra.mxu0 %vm16_vm0, %v2663_v0  ;;  %v60_v30 = vsel %vm58_vm1, %v53_v28, 0 }
  0x86   :  { %69 = vmatpush.bf16.msra.mxu1 %v60_v30 }
  0x89   :  { %v456_v23 = vld.sshfl [vmem:[#allocation1] sm:$0xff pattern:$0x73625140] }
  0x8a   :  { %458 = vrot.lane.b32.xlu0 %v456_v23, %s2641_s13  ;;  %460 = vst [vmem:[#allocation1] ss:$4 sm:$0xff] %v2689_v11 }
  0x91   :  { %v461_v24 = vld.sshfl [vmem:[#allocation1] sm:$0xff pattern:$0x73625140] }
  0x92   :  { %497 = vst [vmem:[#allocation1] ss:$4 sm:$0xff] %v2689_v11  ;;  %463 = vrot.lane.b32.xlu2 %v461_v24, %s2642_s14 }
  0x99   :  { %v498_v25 = vld.sshfl [vmem:[#allocation1] sm:$0xff pattern:$0x73625140] }
  0x9a   :  { %532 = vst [vmem:[#allocation1] ss:$4 sm:$0xff] %v2689_v11  ;;  %500 = vrot.lane.b32.xlu1 %v498_v25, %s2643_s15 }
  0x9c   :  { %v124_v29 = vpop.permute.xlu0 %123 }
  0x9d   :  { %v129_v31 = vsel %vm58_vm1, %v124_v29, 0 }
  0x9e   :  { %138 = vmatpush.bf16.msra.mxu3 %v129_v31 }
  0xa1   :  { %v533_v26 = vld.sshfl [vmem:[#allocation1] sm:$0xff pattern:$0x73625140] }
  0xa2   :  { %537 = vst [vmem:[#allocation1] ss:$4 sm:$0xff] %v2689_v11  ;;  %535 = vrot.lane.b32.xlu1 %v533_v26, %s2644_s16 }
  0xa4   :  { %v2727_v36 = vpop.permute.xlu0 %159 }
  0xa9   :  { %v538_v27 = vld.sshfl [vmem:[#allocation1] sm:$0xff pattern:$0x73625140] }
  0xaa   :  { %540 = vrot.lane.b32.xlu0 %v538_v27, %s2645_s17  ;;  %574 = vst [vmem:[#allocation1] ss:$4 sm:$0xff] %v2689_v11 }
  0xac   :  { %v165_v34 = vpop.permute.xlu1 %164 }
  0xad   :  { %v170_v37 = vsel %vm16_vm0, %v165_v34, 0 }
  0xae   :  { %179 = vmatpush.bf16.xpose.msrb.mxu1 %v170_v37 }
  0xb1   :  { %v575_v33 = vld.sshfl [vmem:[#allocation1] sm:$0xff pattern:$0x73625140] }
  0xb2   :  { %577 = vrot.lane.b32.xlu2 %v575_v33, %s2646_s20  ;;  %612 = vst [vmem:[#allocation1] ss:$4 sm:$0xff] %v2723_v32  ;;  %v2814_v33 = vld [vmem:[%s3718_s0 + $0x8] sm:$0x3] }
  0xb4   :  { %v202_v38 = vpop.permute.xlu1 %201  ;;  %v280_v45 = vpop.permute.xlu2 %279 }
  0xb5   :  { %v207_v42 = vsel %vm58_vm1, %v202_v38, 0  ;;  %v285_v62 = vsel %vm58_vm1, %v280_v45, 0 }
  0xb6   :  { %216 = vmatpush.bf16.msrb.mxu3 %v207_v42  ;;  %294 = vmatpush.bf16.msrb.mxu2 %v285_v62 }
  0xb9   :  { %v613_v35 = vld.sshfl [vmem:[#allocation1] sm:$0xff pattern:$0x73625140] }
  0xba   :  { %615 = vrot.lane.b32.xlu0 %v613_v35, %s2636_s8  ;;  %648 = vst [vmem:[#allocation1] ss:$4 sm:$0xff] %v2723_v32 }
  0xbc   :  { %v238_v44 = vpop.permute.xlu1 %237 }
  0xc1   :  { %v649_v39 = vld.sshfl [vmem:[#allocation1] sm:$0xff pattern:$0x73625140] }
  0xc2   :  { %651 = vrot.lane.b32.xlu1 %v649_v39, %s2637_s9  ;;  %675 = vst [vmem:[#allocation1] ss:$4 sm:$0xff] %v2723_v32 }
  0xc4   :  { %v243_v40 = vpop.permute.xlu0 %242 }
  0xc5   :  { %v248_v41 = vsel %vm16_vm0, %v243_v40, 0 }
  0xc6   :  { %257 = vmatpush.bf16.xpose.msrb.mxu0 %v248_v41 }
  0xc9   :  { %v676_v43 = vld.sshfl [vmem:[#allocation1] sm:$0xff pattern:$0x73625140] }
  0xca   :  { %680 = vst [vmem:[#allocation1] ss:$4 sm:$0xff] %v2723_v32  ;;  %678 = vrot.lane.b32.xlu1 %v676_v43, %s2638_s10 }
  0xcd   :  { %2401 = vmatmul.msk.bf16.vlgmr.msrb.gmra.mxu0 %vm16_vm0, %v238_v44 }
  0xd1   :  { %v681_v46 = vld.sshfl [vmem:[#allocation1] sm:$0xff pattern:$0x73625140] }
  0xd2   :  { %683 = vrot.lane.b32.xlu2 %v681_v46, %s2639_s11  ;;  %717 = vst [vmem:[#allocation1] ss:$4 sm:$0xff] %v2723_v32 }
  0xd4   :  { %v387_v47 = vpop.permute.xlu2 %386  ;;  %v2765_v63 = vpop.permute.xlu0 %318 }
  0xd5   :  { %v392_v48 = vsel %vm16_vm0, %v387_v47, 0 }
  0xd6   :  { %401 = vmatpush.bf16.xpose.msra.mxu0 %v392_v48 }
  0xd9   :  { %v718_v49 = vld.sshfl [vmem:[#allocation1] sm:$0xff pattern:$0x73625140] }
  0xda   :  { %720 = vrot.lane.b32.xlu0 %v718_v49, %s2640_s12  ;;  %752 = vst [vmem:[#allocation1] ss:$4 sm:$0xff] %v2723_v32 }
  0xdc   :  { %v2744_v50 = vpop.permute.xlu1 %354 }
  0xe1   :  { %v753_v51 = vld.sshfl [vmem:[#allocation1] sm:$0xff pattern:$0x73625140] }
  0xe2   :  { %755 = vrot.lane.b32.xlu2 %v753_v51, %s2641_s13  ;;  %757 = vst [vmem:[#allocation1] ss:$4 sm:$0xff] %v2723_v32 }
  0xe4   :  { %v382_v52 = vpop.permute.xlu1 %381 }
  0xe5   :  { %2407 = vmatmul.msk.bf16.vlgmr.msra.gmra.mxu0 %vm16_vm0, %v382_v52 }
  0xe9   :  { %v758_v53 = vld.sshfl [vmem:[#allocation1] sm:$0xff pattern:$0x73625140] }
  0xea   :  { %760 = vrot.lane.b32.xlu0 %v758_v53, %s2642_s14  ;;  %794 = vst [vmem:[#allocation1] ss:$4 sm:$0xff] %v2723_v32 }
  0xec   :  { %v2772_v5 = vpop.permute.xlu2 %463 }
  0xf1   :  { %v795_v54 = vld.sshfl [vmem:[#allocation1] sm:$0xff pattern:$0x73625140] }
  0xf2   :  { %829 = vst [vmem:[#allocation1] ss:$4 sm:$0xff] %v2723_v32  ;;  %797 = vrot.lane.b32.xlu1 %v795_v54, %s2643_s15 }
  0xf4   :  { %v424_v2 = vpop.permute.xlu0 %423 }
  0xf5   :  { %v429_v3 = vsel %vm58_vm1, %v424_v2, 0 }
  0xf6   :  { %438 = vmatpush.bf16.msra.mxu2 %v429_v3 }
  0xf9   :  { %v830_v55 = vld.sshfl [vmem:[#allocation1] sm:$0xff pattern:$0x73625140] }
  0xfa   :  { %832 = vrot.lane.b32.xlu2 %v830_v55, %s2644_s16  ;;  %834 = vst [vmem:[#allocation1] ss:$4 sm:$0xff] %v2723_v32 }
  0xfc   :  { %v2774_v6 = vpop.permute.xlu0 %458 }
 0x101   :  { %v835_v56 = vld.sshfl [vmem:[#allocation1] sm:$0xff pattern:$0x73625140] }
 0x102   :  { %837 = vrot.lane.b32.xlu0 %v835_v56, %s2645_s17  ;;  %871 = vst [vmem:[#allocation1] ss:$4 sm:$0xff] %v2723_v32  ;;  %v31_v57 = vpop.f32.mrf.mxu0 }
 0x103   :  { %v2779_v9 = vmul.f32 0.35355338, %v31_v57 }
 0x105   :  { %v37_v12 = vsel %vm36_vm2, %v2779_v9, -inf }
 0x108   :  { %v103_v59 = vpop.f32.mrf.mxu2 }
 0x109   :  { %v872_v60 = vld.sshfl [vmem:[#allocation1] sm:$0xff pattern:$0x73625140]  ;;  %v2791_v20 = vmul.f32 0.35355338, %v103_v59 }
 0x10a   :  { %874 = vrot.lane.b32.xlu2 %v872_v60, %s2646_s20  ;;  %909 = vst [vmem:[#allocation1] ss:$4 sm:$0xff] %v2760_v58  ;;  %v33_v61 = vpop.f32.mrf.mxu0 }
 0x10b   :  { %v108_v22 = vsel %vm36_vm2, %v2791_v20, -inf }
 0x10c   :  { %v2777_v8 = vpop.permute.xlu2 %577  ;;  %v2784_v15 = vpop.permute.xlu1 %500 }
 0x110   :  { %v105_v0 = vpop.f32.mrf.mxu2 }
 0x111   :  { %v910_v1 = vld.sshfl [vmem:[#allocation1] sm:$0xff pattern:$0x73625140] }
 0x112   :  { %912 = vrot.lane.b32.xlu2 %v910_v1, %s2636_s8  ;;  %945 = vst [vmem:[#allocation1] ss:$4 sm:$0xff] %v2760_v58 }
 0x114   :  { %v536_v19 = vpop.permute.xlu1 %535 }
 0x119   :  { %v946_v4 = vld.sshfl [vmem:[#allocation1] sm:$0xff pattern:$0x73625140] }
 0x11a   :  { %948 = vrot.lane.b32.xlu1 %v946_v4, %s2637_s9  ;;  %972 = vst [vmem:[#allocation1] ss:$4 sm:$0xff] %v2760_v58 }
 0x11c   :  { %v541_v10 = vpop.permute.xlu0 %540 }
 0x11d   :  { %v546_v14 = vsel %vm16_vm0, %v541_v10, 0 }
 0x11e   :  { %555 = vmatpush.bf16.xpose.msrb.mxu0 %v546_v14 }
 0x121   :  { %v973_v7 = vld.sshfl [vmem:[#allocation1] sm:$0xff pattern:$0x73625140] }
 0x122   :  { %977 = vst [vmem:[#allocation1] ss:$4 sm:$0xff] %v2760_v58 }
 0x125   :  { %2413 = vmatmul.msk.bf16.vlgmr.msrb.gmra.mxu0 %vm16_vm0, %v536_v19 }
 0x129   :  { %v978_v13 = vld.sshfl [vmem:[#allocation1] sm:$0xff pattern:$0x73625140] }
 0x12a   :  { %980 = vrot.lane.b32.xlu1 %v978_v13, %s2639_s11  ;;  %1014 = vst [vmem:[#allocation1] ss:$4 sm:$0xff] %v2760_v58 }
 0x12c   :  { %38 = vmax.xlane.f32.xlu0 %v37_v12  ;;  %v684_v16 = vpop.permute.xlu2 %683  ;;  %v2808_v30 = vpop.permute.xlu0 %615 }
 0x12d   :  { %v689_v17 = vsel %vm16_vm0, %v684_v16, 0 }
 0x12e   :  { %698 = vmatpush.bf16.xpose.msra.mxu0 %v689_v17 }
 0x131   :  { %v1015_v18 = vld.sshfl [vmem:[#allocation1] sm:$0xff pattern:$0x73625140] }
 0x132   :  { %1049 = vst [vmem:[#allocation1] ss:$4 sm:$0xff] %v2760_v58 }
 0x134   :  { %v2797_v23 = vpop.permute.xlu1 %651 }
 0x139   :  { %v1050_v21 = vld.sshfl [vmem:[#allocation1] sm:$0xff pattern:$0x73625140] }
 0x13a   :  { %1054 = vst [vmem:[#allocation1] ss:$4 sm:$0xff] %v2760_v58  ;;  %1052 = vrot.lane.b32.xlu1 %v1050_v21, %s2641_s13 }
 0x13b   :  { %109 = vmax.xlane.f32.xlu2 %v108_v22 }
 0x13c   :  { %v679_v25 = vpop.permute.xlu1 %678  ;;  %v2828_v44 = vpop.permute.xlu2 %755 }
 0x13d   :  { %2420 = vmatmul.msk.bf16.vlgmr.msra.gmra.mxu0 %vm16_vm0, %v679_v25 }
 0x140   :  { %975 = vrot.lane.b32.xlu0 %v973_v7, %s2638_s10 }
 0x141   :  { %v1055_v24 = vld.sshfl [vmem:[#allocation1] sm:$0xff pattern:$0x73625140] }
 0x142   :  { %1091 = vst [vmem:[#allocation1] ss:$4 sm:$0xff] %v2760_v58  ;;  %1057 = vrot.lane.b32.xlu1 %v1055_v24, %s2642_s14 }
 0x148   :  { %1017 = vrot.lane.b32.xlu0 %v1015_v18, %s2640_s12  ;;  %v2873_v18 = vld [vmem:[%s3718_s0 + $0xa] sm:$0x3] }
 0x149   :  { %v1092_v26 = vld.sshfl [vmem:[#allocation1] sm:$0xff pattern:$0x73625140] }
 0x14a   :  { %1126 = vst [vmem:[#allocation1] ss:$4 sm:$0xff] %v2760_v58  ;;  %v259_v27 = vpop.f32.mrf.mxu0 }
 0x14b   :  { %v2831_v46 = vmul.f32 0.35355338, %v259_v27 }
 0x14c   :  { %v2816_v34 = vpop.permute.xlu0 %720 }
 0x14d   :  { %v264_v48 = vsel %vm36_vm2, %v2831_v46, -inf }
 0x151   :  { %v1127_v28 = vld.sshfl [vmem:[#allocation1] sm:$0xff pattern:$0x73625140] }
 0x152   :  { %v261_v29 = vpop.f32.mrf.mxu0  ;;  %1129 = vrot.lane.b32.xlu1 %v1127_v28, %s2644_s16  ;;  %1131 = vst [vmem:[#allocation1] ss:$4 sm:$0xff] %v2760_v58 }
 0x153   :  { %1094 = vrot.lane.b32.xlu2 %v1092_v26, %s2643_s15 }
 0x154   :  { %v833_v51 = vpop.permute.xlu2 %832 }
 0x159   :  { %v1132_v31 = vld.sshfl [vmem:[#allocation1] sm:$0xff pattern:$0x73625140] }
 0x15a   :  { %1168 = vst [vmem:[#allocation1] ss:$4 sm:$0xff] %v2760_v58 }
 0x15c   :  { %v2820_v39 = vpop.permute.xlu0 %760 }
 0x161   :  { %v1169_v35 = vld.sshfl [vmem:[#allocation1] sm:$0xff pattern:$0x73625140] }
 0x162   :  { %v403_v37 = vpop.f32.mrf.mxu0  ;;  %1171 = vrot.lane.b32.xlu1 %v1169_v35, %s2646_s20  ;;  %1206 = vst [vmem:[#allocation1] ss:$4 sm:$0xff] %v2814_v33 }
 0x163   :  { %v2824_v41 = vmul.f32 0.35355338, %v403_v37 }
 0x164   :  { %v2839_v53 = vpop.permute.xlu1 %797  ;;  %v2849_v59 = vpop.permute.xlu2 %874 }
 0x165   :  { %v408_v42 = vsel %vm36_vm2, %v2824_v41, -inf }
 0x169   :  { %v1207_v38 = vld.sshfl [vmem:[#allocation1] sm:$0xff pattern:$0x73625140] }
 0x16a   :  { %1209 = vrot.lane.b32.xlu1 %v1207_v38, %s2636_s8  ;;  %1242 = vst [vmem:[#allocation1] ss:$4 sm:$0xff] %v2814_v33  ;;  %v405_v40 = vpop.f32.mrf.mxu0 }
 0x16c   :  { %v2858_v3 = vpop.permute.xlu2 %912 }
 0x171   :  { %v1243_v43 = vld.sshfl [vmem:[#allocation1] sm:$0xff pattern:$0x73625140] }
 0x172   :  { %409 = vmax.xlane.f32.xlu0 %v408_v42  ;;  %1269 = vst [vmem:[#allocation1] ss:$4 sm:$0xff] %v2814_v33 }
 0x174   :  { %v838_v45 = vpop.permute.xlu0 %837 }
 0x175   :  { %v843_v47 = vsel %vm16_vm0, %v838_v45, 0 }
 0x176   :  { %852 = vmatpush.bf16.xpose.msrb.mxu0 %v843_v47 }
 0x179   :  { %v1270_v49 = vld.sshfl [vmem:[#allocation1] sm:$0xff pattern:$0x73625140] }
 0x17a   :  { %1274 = vst [vmem:[#allocation1] ss:$4 sm:$0xff] %v2814_v33 }
 0x17c   :  { %265 = vmax.xlane.f32.xlu2 %v264_v48 }
 0x17d   :  { %2426 = vmatmul.msk.bf16.vlgmr.msrb.gmra.mxu0 %vm16_vm0, %v833_v51 }
 0x181   :  { %v1275_v52 = vld.sshfl [vmem:[#allocation1] sm:$0xff pattern:$0x73625140] }
 0x182   :  { %1311 = vst [vmem:[#allocation1] ss:$4 sm:$0xff] %v2814_v33 }
 0x189   :  { %v1312_v54 = vld.sshfl [vmem:[#allocation1] sm:$0xff pattern:$0x73625140] }
 0x18a   :  { %1314 = vrot.lane.b32.xlu0 %v1312_v54, %s2640_s12  ;;  %1346 = vst [vmem:[#allocation1] ss:$4 sm:$0xff] %v2814_v33 }
 0x18c   :  { %v2843_v56 = vpop.permute.xlu1 %948 }
 0x191   :  { %v1347_v55 = vld.sshfl [vmem:[#allocation1] sm:$0xff pattern:$0x73625140] }
 0x192   :  { %1351 = vst [vmem:[#allocation1] ss:$4 sm:$0xff] %v2814_v33 }
 0x194   :  { %1134 = vrot.lane.b32.xlu2 %v1132_v31, %s2645_s17 }
 0x199   :  { %v1352_v57 = vld.sshfl [vmem:[#allocation1] sm:$0xff pattern:$0x73625140] }
 0x19a   :  { %1354 = vrot.lane.b32.xlu0 %v1352_v57, %s2642_s14  ;;  %1388 = vst [vmem:[#allocation1] ss:$4 sm:$0xff] %v2814_v33 }
 0x19c   :  { %1245 = vrot.lane.b32.xlu2 %v1243_v43, %s2637_s9  ;;  %v981_v60 = vpop.permute.xlu1 %980 }
 0x19d   :  { %v986_v61 = vsel %vm16_vm0, %v981_v60, 0 }
 0x19e   :  { %995 = vmatpush.bf16.xpose.msra.mxu0 %v986_v61 }
 0x19f   :  { %v39_v62 = vpop.xlane.xlu0 %38 }
 0x1a0   :  { %v40_v0 = vsub.f32 %v2779_v9, %v39_v62 }
 0x1a1   :  { %v2854_v1 = vld.sshfl [vmem:[#allocation1] sm:$0xff pattern:$0x73625140] }
 0x1a2   :  { %v41_v2 = vmul.f32 1.442695, %v40_v0  ;;  %1423 = vst [vmem:[#allocation1] ss:$4 sm:$0xff] %v2814_v33  ;;  %v557_v16 = vpop.f32.mrf.mxu0 }
 0x1a3   :  { %v2888_v29 = vmul.f32 0.35355338, %v557_v16 }
 0x1a4   :  { %2508 = vpow2.f32 %v41_v2  ;;  %1272 = vrot.lane.b32.xlu2 %v1270_v49, %s2638_s10 }
 0x1a5   :  { %v562_v35 = vsel %vm36_vm2, %v2888_v29, -inf }
 0x1a9   :  { %v1424_v4 = vld.sshfl [vmem:[#allocation1] sm:$0xff pattern:$0x73625140] }
 0x1aa   :  { %v2860_v7 = vpop.eup %2508  ;;  %1428 = vst [vmem:[#allocation1] ss:$4 sm:$0xff] %v2814_v33 }
 0x1ab   :  { %v43_v10 = vsel %vm36_vm2, %v2860_v7, 0.0 }
 0x1ac   :  { %44 = vadd.xlane.f32.xlu1 %v43_v10  ;;  %1277 = vrot.lane.b32.xlu2 %v1275_v52, %s2639_s11  ;;  %v2902_v43 = vpop.permute.xlu1 %1052 }
 0x1ae   :  { %v110_v9 = vpop.xlane.xlu2 %109 }
 0x1af   :  { %v111_v12 = vsub.f32 %v2791_v20, %v110_v9  ;;  %v559_v20 = vpop.f32.mrf.mxu0 }
 0x1b1   :  { %v112_v13 = vmul.f32 1.442695, %v111_v12  ;;  %v1429_v14 = vld.sshfl [vmem:[#allocation1] sm:$0xff pattern:$0x73625140] }
 0x1b2   :  { %v976_v17 = vpop.permute.xlu0 %975  ;;  %1465 = vst [vmem:[#allocation1] ss:$4 sm:$0xff] %v2814_v33 }
 0x1b3   :  { %2510 = vpow2.f32 %v112_v13  ;;  %2433 = vmatmul.msk.bf16.vlgmr.msra.gmra.mxu0 %vm16_vm0, %v976_v17 }
 0x1b4   :  { %1349 = vrot.lane.b32.xlu2 %v1347_v55, %s2641_s13  ;;  %v2907_v52 = vpop.permute.xlu1 %1057 }
 0x1b6   :  { %v2898_v40 = vpop.permute.xlu2 %1094 }
 0x1b9   :  { %v2875_v19 = vpop.eup %2510  ;;  %v2877_v21 = vld.sshfl [vmem:[#allocation1] sm:$0xff pattern:$0x73625140] }
 0x1ba   :  { %v114_v22 = vsel %vm36_vm2, %v2875_v19, 0.0  ;;  %1503 = vst [vmem:[#allocation1] ss:$4 sm:$0xff] %v2873_v18  ;;  %v700_v25 = vpop.f32.mrf.mxu0 }
 0x1bb   :  { %115 = vadd.xlane.f32.xlu1 %v114_v22  ;;  %v2896_v38 = vmul.f32 0.35355338, %v700_v25 }
 0x1bd   :  { %v705_v42 = vsel %vm36_vm2, %v2896_v38, -inf }
 0x1c1   :  { %v1504_v24 = vld.sshfl [vmem:[#allocation1] sm:$0xff pattern:$0x73625140] }
 0x1c2   :  { %1506 = vrot.lane.b32.xlu0 %v1504_v24, %s2636_s8  ;;  %1539 = vst [vmem:[#allocation1] ss:$4 sm:$0xff] %v2873_v18  ;;  %v702_v27 = vpop.f32.mrf.mxu0  ;;  %v2948_v24 = vpop.permute.xlu0 %1017 }
 0x1c4   :  { %v1130_v62 = vpop.permute.xlu1 %1129 }
 0x1c9   :  { %v2884_v26 = vld.sshfl [vmem:[#allocation1] sm:$0xff pattern:$0x73625140] }
 0x1ca   :  { %1566 = vst [vmem:[#allocation1] ss:$4 sm:$0xff] %v2873_v18 }
 0x1d1   :  { %v1567_v28 = vld.sshfl [vmem:[#allocation1] sm:$0xff pattern:$0x73625140] }
 0x1d2   :  { %1571 = vst [vmem:[#allocation1] ss:$4 sm:$0xff] %v2873_v18 }
 0x1d4   :  { %v2929_v12 = vpop.permute.xlu1 %1171 }
 0x1d9   :  { %v1572_v31 = vld.sshfl [vmem:[#allocation1] sm:$0xff pattern:$0x73625140] }
 0x1da   :  { %1608 = vst [vmem:[#allocation1] ss:$4 sm:$0xff] %v2873_v18 }
 0x1dc   :  { %v2943_v20 = vpop.permute.xlu1 %1209 }
 0x1dd   :  { %563 = vmax.xlane.f32.xlu2 %v562_v35 }
 0x1e1   :  { %v2893_v37 = vld.sshfl [vmem:[#allocation1] sm:$0xff pattern:$0x73625140] }
 0x1e2   :  { %1643 = vst [vmem:[#allocation1] ss:$4 sm:$0xff] %v2873_v18 }
 0x1e5   :  { %v410_v35 = vpop.xlane.xlu0 %409 }
 0x1e9   :  { %v1644_v45 = vld.sshfl [vmem:[#allocation1] sm:$0xff pattern:$0x73625140] }
 0x1ea   :  { %1648 = vst [vmem:[#allocation1] ss:$4 sm:$0xff] %v2873_v18 }
 0x1ec   :  { %706 = vmax.xlane.f32.xlu0 %v705_v42 }
 0x1ef   :  { %v266_v47 = vpop.xlane.xlu2 %265 }
 0x1f0   :  { %v267_v48 = vsub.f32 %v2831_v46, %v266_v47  ;;  %v323_v47 = vsel %vm16_vm0, %v2765_v63, 0 }
 0x1f1   :  { %v1649_v49 = vld.sshfl [vmem:[#allocation1] sm:$0xff pattern:$0x73625140] }
 0x1f2   :  { %v268_v51 = vmul.f32 1.442695, %v267_v48  ;;  %1685 = vst [vmem:[#allocation1] ss:$4 sm:$0xff] %v2873_v18  ;;  %v411_v48 = vsub.f32 %v2824_v41, %v410_v35 }
 0x1f4   :  { %2512 = vpow2.f32 %v268_v51  ;;  %v412_v51 = vmul.f32 1.442695, %v411_v48 }
 0x1f5   :  { %1426 = vrot.lane.b32.xlu2 %v1424_v4, %s2644_s16 }
 0x1f7   :  { %v1135_v54 = vpop.permute.xlu2 %1134 }
 0x1f8   :  { %v1140_v55 = vsel %vm16_vm0, %v1135_v54, 0 }
 0x1f9   :  { %1149 = vmatpush.bf16.xpose.msrb.mxu0 %v1140_v55  ;;  %v2911_v57 = vld.sshfl [vmem:[#allocation1] sm:$0xff pattern:$0x73625140] }
 0x1fa   :  { %v2913_v60 = vpop.eup %2512  ;;  %v2915_v61 = vpop.f32.mrf.mxu0  ;;  %1720 = vst [vmem:[#allocation1] ss:$4 sm:$0xff] %v2873_v18 }
 0x1fb   :  { %v270_v46 = vsel %vm36_vm2, %v2913_v60, 0.0 }
 0x1fc   :  { %271 = vadd.xlane.f32.xlu1 %v270_v46 }
 0x1fd   :  { %1431 = vrot.lane.b32.xlu2 %v1429_v14, %s2645_s17  ;;  %v2935_v14 = vld [vmem:[%s3718_s0 + $0xc] sm:$0x3] }
 0x1ff   :  { %v2921_v0 = vpop.permute.xlu2 %1245 }
 0x200   :  { %2439 = vmatmul.msk.bf16.vlgmr.msrb.gmra.mxu0 %vm16_vm0, %v1130_v62  ;;  %1569 = vrot.lane.b32.xlu0 %v1567_v28, %s2638_s10 }
 0x201   :  { %v1721_v2 = vld.sshfl [vmem:[#allocation1] sm:$0xff pattern:$0x73625140] }
 0x202   :  { %v856_v4 = vpop.f32.mrf.mxu0  ;;  %1725 = vst [vmem:[#allocation1] ss:$4 sm:$0xff] %v2873_v18 }
 0x205   :  { %1574 = vrot.lane.b32.xlu2 %v1572_v31, %s2639_s11 }
 0x207   :  { %v1273_v10 = vpop.permute.xlu2 %1272 }
 0x208   :  { %1723 = vrot.lane.b32.xlu0 %v1721_v2, %s2644_s16 }
 0x209   :  { %v1726_v9 = vld.sshfl [vmem:[#allocation1] sm:$0xff pattern:$0x73625140] }
 0x20a   :  { %1762 = vst [vmem:[#allocation1] ss:$4 sm:$0xff] %v2873_v18 }
 0x20d   :  { %1646 = vrot.lane.b32.xlu2 %v1644_v45, %s2641_s13 }
 0x20f   :  { %v1278_v13 = vpop.permute.xlu2 %1277 }
 0x210   :  { %v1283_v16 = vsel %vm16_vm0, %v1278_v13, 0 }
 0x211   :  { %1292 = vmatpush.bf16.xpose.msra.mxu0 %v1283_v16  ;;  %v2938_v17 = vld.sshfl [vmem:[#allocation1] sm:$0xff pattern:$0x73625140] }
 0x212   :  { %1800 = vst [vmem:[#allocation1] ss:$4 sm:$0xff] %v2935_v14 }
 0x215   :  { %1651 = vrot.lane.b32.xlu1 %v1649_v49, %s2642_s14  ;;  %1728 = vrot.lane.b32.xlu2 %v1726_v9, %s2645_s17  ;;  %v469_v9 = vsel %vm16_vm0, %v2772_v5, 0 }
 0x217   :  { %v2988_v5 = vpop.permute.xlu2 %1349 }
 0x218   :  { %2446 = vmatmul.msk.bf16.vlgmr.msra.gmra.mxu0 %vm16_vm0, %v1273_v10  ;;  %v360_v10 = vsel %vm58_vm1, %v2744_v50, 0  ;;  %v2983_v50 = vmul.f32 0.35355338, %v2915_v61 }
 0x219   :  { %v1801_v22 = vld.sshfl [vmem:[#allocation1] sm:$0xff pattern:$0x73625140] }
 0x21a   :  { %1836 = vst [vmem:[#allocation1] ss:$4 sm:$0xff] %v2935_v14  ;;  %v859_v16 = vsel %vm36_vm2, %v2983_v50, -inf }
 0x21d   :  { %1803 = vrot.lane.b32.xlu2 %v1801_v22, %s2636_s8  ;;  %v620_v22 = vsel %vm16_vm0, %v2808_v30, 0 }
 0x21f   :  { %v45_v25 = vpop.xlane.xlu1 %44 }
 0x220   :  { %2514 = vrcp.f32 %v45_v25 }
 0x221   :  { %v2950_v27 = vld.sshfl [vmem:[#allocation1] sm:$0xff pattern:$0x73625140] }
 0x222   :  { %1863 = vst [vmem:[#allocation1] ss:$4 sm:$0xff] %v2935_v14 }
 0x226   :  { %v2515_v28 = vpop.eup %2514 }
 0x227   :  { %v47_v31 = vmul.f32 %v2515_v28, %v2860_v7 }
 0x229   :  { %v48_v42 = vpack.c.bf16 %v47_v31, %v47_v31  ;;  %v1864_v45 = vld.sshfl [vmem:[#allocation1] sm:$0xff pattern:$0x73625140]  ;;  %v3001_v31 = vpop.permute.xlu0 %1314 }
 0x22a   :  { %1868 = vst [vmem:[#allocation1] ss:$4 sm:$0xff] %v2935_v14  ;;  %1866 = vrot.lane.b32.xlu2 %v1864_v45, %s2638_s10 }
 0x22b   :  { %2396 = vmatmul.msk.bf16.vlgmr.msra.gmra.mxu1 %vm54_vm3, %v48_v42 }
 0x22c   :  { %332 = vmatpush.bf16.xpose.msra.mxu1 %v323_v47 }
 0x22e   :  { %v116_v49 = vpop.xlane.xlu1 %115 }
 0x22f   :  { %2516 = vrcp.f32 %v116_v49 }
 0x230   :  { %v997_v7 = vpop.f32.mrf.mxu0  ;;  %2518 = vpow2.f32 %v412_v51 }
 0x231   :  { %v2960_v54 = vmul.f32 0.35355338, %v997_v7  ;;  %v1869_v55 = vld.sshfl [vmem:[#allocation1] sm:$0xff pattern:$0x73625140]  ;;  %v917_v7 = vsel %vm16_vm0, %v2858_v3, 0 }
 0x232   :  { %1905 = vst [vmem:[#allocation1] ss:$4 sm:$0xff] %v2935_v14  ;;  %1468 = vrot.lane.b32.xlu2 %v2877_v21, %s2646_s20 }
 0x233   :  { %v1002_v63 = vsel %vm36_vm2, %v2960_v54, -inf }
 0x234   :  { %1003 = vmax.xlane.f32.xlu0 %v1002_v63 }
 0x235   :  { %v2517_v46 = vpop.eup %2516 }
 0x236   :  { %v118_v41 = vmul.f32 %v2517_v46, %v2875_v19  ;;  %v2974_v21 = vpop.eup %2518 }
 0x237   :  { %v414_v19 = vsel %vm36_vm2, %v2974_v21, 0.0 }
 0x238   :  { %v119_v62 = vpack.c.bf16 %v118_v41, %v118_v41  ;;  %v999_v2 = vpop.f32.mrf.mxu0 }
 0x239   :  { %v2968_v4 = vld.sshfl [vmem:[#allocation1] sm:$0xff pattern:$0x73625140] }
 0x23a   :  { %2398 = vmatmul.msk.bf16.vlgmr.msra.gmra.mxu3 %vm54_vm3, %v119_v62  ;;  %1940 = vst [vmem:[#allocation1] ss:$4 sm:$0xff] %v2935_v14 }
 0x23b   :  { %369 = vmatpush.bf16.msra.mxu3 %v360_v10  ;;  %2399 = vmatmul.msk.bf16.vlgmr.msrb.gmra.mxu1 %vm16_vm0, %v2727_v36 }
 0x23c   :  { %478 = vmatpush.bf16.xpose.msrb.mxu1 %v469_v9 }
 0x23f   :  { %415 = vadd.xlane.f32.xlu1 %v414_v19 }
 0x241   :  { %v1941_v13 = vld.sshfl [vmem:[#allocation1] sm:$0xff pattern:$0x73625140] }
 0x242   :  { %1945 = vst [vmem:[#allocation1] ss:$4 sm:$0xff] %v2935_v14 }
 0x247   :  { %860 = vmax.xlane.f32.xlu1 %v859_v16  ;;  %v583_v16 = vsel %vm58_vm1, %v2777_v8, 0 }
 0x248   :  { %1871 = vrot.lane.b32.xlu0 %v1869_v55, %s2639_s11 }
 0x249   :  { %v1946_v36 = vld.sshfl [vmem:[#allocation1] sm:$0xff pattern:$0x73625140] }
 0x24a   :  { %1982 = vst [vmem:[#allocation1] ss:$4 sm:$0xff] %v2935_v14 }
 0x24b   :  { %2404 = vmatmul.msk.bf16.vlgmr.msra.gmra.mxu1 %vm16_vm0, %v2689_v11 }
 0x24c   :  { %629 = vmatpush.bf16.xpose.msra.mxu1 %v620_v22  ;;  %v1063_v22 = vsel %vm16_vm0, %v2907_v52, 0 }
 0x250   :  { %v564_v61 = vpop.xlane.xlu2 %563  ;;  %1542 = vrot.lane.b32.xlu0 %v2884_v26, %s2637_s9  ;;  %v766_v26 = vsel %vm16_vm0, %v2820_v39, 0 }
 0x251   :  { %v565_v25 = vsub.f32 %v2888_v29, %v564_v61  ;;  %v2999_v28 = vld.sshfl [vmem:[#allocation1] sm:$0xff pattern:$0x73625140]  ;;  %v3012_v29 = vpop.permute.xlu0 %1354 }
 0x252   :  { %2017 = vst [vmem:[#allocation1] ss:$4 sm:$0xff] %v2935_v14 }
 0x253   :  { %v566_v35 = vmul.f32 1.442695, %v565_v25 }
 0x255   :  { %2520 = vpow2.f32 %v566_v35 }
 0x258   :  { %v1427_v42 = vpop.permute.xlu2 %1426 }
 0x259   :  { %v2018_v30 = vld.sshfl [vmem:[#allocation1] sm:$0xff pattern:$0x73625140]  ;;  %v3019_v39 = vpop.permute.xlu0 %1506 }
 0x25a   :  { %2020 = vrot.lane.b32.xlu2 %v2018_v30, %s2644_s16  ;;  %2022 = vst [vmem:[#allocation1] ss:$4 sm:$0xff] %v2935_v14 }
 0x25b   :  { %v3006_v11 = vpop.eup %2520  ;;  %2410 = vmatmul.msk.bf16.vlgmr.msrb.gmra.mxu1 %vm16_vm0, %v2774_v6  ;;  %v3024_v6 = vld [vmem:[%s3718_s0 + $0xe] sm:$0x3] }
 0x25c   :  { %775 = vmatpush.bf16.xpose.msrb.mxu1 %v766_v26  ;;  %v568_v45 = vsel %vm36_vm2, %v3006_v11, 0.0 }
 0x25d   :  { %569 = vadd.xlane.f32.xlu1 %v568_v45 }
 0x260   :  { %v1432_v47 = vpop.permute.xlu2 %1431 }
 0x261   :  { %v2023_v48 = vld.sshfl [vmem:[#allocation1] sm:$0xff pattern:$0x73625140]  ;;  %v1437_v49 = vsel %vm16_vm0, %v1432_v47, 0  ;;  %v707_v41 = vpop.xlane.xlu0 %706 }
 0x262   :  { %2025 = vrot.lane.b32.xlu2 %v2023_v48, %s2645_s17  ;;  %2059 = vst [vmem:[#allocation1] ss:$4 sm:$0xff] %v2935_v14  ;;  %1446 = vmatpush.bf16.xpose.msrb.mxu0 %v1437_v49  ;;  %v708_v45 = vsub.f32 %v2896_v38, %v707_v41 }
 0x268   :  { %v1575_v55 = vpop.permute.xlu2 %1574 }
 0x269   :  { %v3026_v51 = vld.sshfl [vmem:[#allocation1] sm:$0xff pattern:$0x73625140]  ;;  %2452 = vmatmul.msk.bf16.vlgmr.msrb.gmra.mxu0 %vm16_vm0, %v1427_v42  ;;  %v1580_v63 = vsel %vm16_vm0, %v1575_v55, 0 }
 0x26a   :  { %2097 = vst [vmem:[#allocation1] ss:$4 sm:$0xff] %v3024_v6  ;;  %1589 = vmatpush.bf16.xpose.msra.mxu0 %v1580_v63 }
 0x26b   :  { %2417 = vmatmul.msk.bf16.vlgmr.msra.gmra.mxu1 %vm16_vm0, %v2723_v32 }
 0x26c   :  { %926 = vmatpush.bf16.xpose.msra.mxu1 %v917_v7  ;;  %v709_v7 = vmul.f32 1.442695, %v708_v45 }
 0x26f   :  { %v272_v46 = vpop.xlane.xlu1 %271 }
 0x270   :  { %2522 = vrcp.f32 %v272_v46  ;;  %v3042_v19 = vpop.permute.xlu2 %1646 }
 0x271   :  { %v3035_v62 = vld.sshfl [vmem:[#allocation1] sm:$0xff pattern:$0x73625140]  ;;  %2524 = vpow2.f32 %v709_v7 }
 0x272   :  { %2133 = vst [vmem:[#allocation1] ss:$4 sm:$0xff] %v3024_v6  ;;  %v1570_v10 = vpop.permute.xlu0 %1569 }
 0x276   :  { %v2523_v2 = vpop.eup %2522  ;;  %1943 = vrot.lane.b32.xlu1 %v1941_v13, %s2641_s13 }
 0x277   :  { %v274_v3 = vmul.f32 %v2523_v2, %v2913_v60  ;;  %v3084_v46 = vpop.eup %2524 }
 0x278   :  { %v1729_v8 = vpop.permute.xlu2 %1728  ;;  %v711_v41 = vsel %vm36_vm2, %v3084_v46, 0.0 }
 0x279   :  { %v3040_v9 = vld.sshfl [vmem:[#allocation1] sm:$0xff pattern:$0x73625140]  ;;  %v275_v32 = vpack.c.bf16 %v274_v3, %v274_v3  ;;  %2459 = vmatmul.msk.bf16.vlgmr.msra.gmra.mxu0 %vm16_vm0, %v1570_v10  ;;  %v1734_v52 = vsel %vm16_vm0, %v1729_v8, 0 }
 0x27a   :  { %2160 = vst [vmem:[#allocation1] ss:$4 sm:$0xff] %v3024_v6  ;;  %1743 = vmatpush.bf16.xpose.msrb.mxu0 %v1734_v52  ;;  %v1724_v35 = vpop.permute.xlu0 %1723 }
 0x27b   :  { %2402 = vmatmul.msk.bf16.vlgmr.msrb.gmra.mxu2 %vm54_vm3, %v275_v32  ;;  %2423 = vmatmul.msk.bf16.vlgmr.msrb.gmra.mxu1 %vm16_vm0, %v2828_v44  ;;  %v1511_v32 = vsel %vm16_vm0, %v3019_v39, 0 }
 0x27c   :  { %592 = vmatpush.bf16.msrb.mxu2 %v583_v16  ;;  %1072 = vmatpush.bf16.xpose.msrb.mxu1 %v1063_v22 }
 0x27d   :  { %v1151_v60 = vpop.f32.mrf.mxu0 }
 0x27e   :  { %v3053_v13 = vmul.f32 0.35355338, %v1151_v60  ;;  %1948 = vrot.lane.b32.xlu1 %v1946_v36, %s2642_s14  ;;  %v1214_v36 = vsel %vm16_vm0, %v2943_v20, 0 }
 0x280   :  { %v1156_v61 = vsel %vm36_vm2, %v3053_v13, -inf  ;;  %v3074_v48 = vpop.permute.xlu2 %1803 }
 0x281   :  { %v3058_v25 = vld.sshfl [vmem:[#allocation1] sm:$0xff pattern:$0x73625140]  ;;  %1157 = vmax.xlane.f32.xlu0 %v1156_v61 }
 0x282   :  { %2165 = vst [vmem:[#allocation1] ss:$4 sm:$0xff] %v3024_v6 }
 0x285   :  { %v1153_v44 = vpop.f32.mrf.mxu0 }
 0x287   :  { %v1652_v10 = vpop.permute.xlu1 %1651 }
 0x288   :  { %v1867_v55 = vpop.permute.xlu2 %1866 }
 0x289   :  { %v2166_v42 = vld.sshfl [vmem:[#allocation1] sm:$0xff pattern:$0x73625140]  ;;  %2465 = vmatmul.msk.bf16.vlgmr.msrb.gmra.mxu0 %vm16_vm0, %v1724_v35 }
 0x28a   :  { %2202 = vst [vmem:[#allocation1] ss:$4 sm:$0xff] %v3024_v6 }
 0x28b   :  { %2430 = vmatmul.msk.bf16.vlgmr.msra.gmra.mxu1 %vm16_vm0, %v2760_v58  ;;  %v1360_v58 = vsel %vm16_vm0, %v3012_v29, 0 }
 0x28c   :  { %1223 = vmatpush.bf16.xpose.msra.mxu1 %v1214_v36  ;;  %v1657_v36 = vsel %vm16_vm0, %v1652_v10, 0 }
 0x291   :  { %v3068_v30 = vld.sshfl [vmem:[#allocation1] sm:$0xff pattern:$0x73625140] }
 0x292   :  { %2237 = vst [vmem:[#allocation1] ss:$4 sm:$0xff] %v3024_v6 }
 0x295   :  { %v1294_v26 = vpop.f32.mrf.mxu0 }
 0x296   :  { %v3072_v47 = vmul.f32 0.35355338, %v1294_v26 }
 0x298   :  { %v1299_v49 = vsel %vm36_vm2, %v3072_v47, -inf }
 0x299   :  { %1300 = vmax.xlane.f32.xlu2 %v1299_v49  ;;  %v2238_v20 = vld.sshfl [vmem:[#allocation1] sm:$0xff pattern:$0x73625140] }
 0x29a   :  { %2242 = vst [vmem:[#allocation1] ss:$4 sm:$0xff] %v3024_v6 }
 0x29b   :  { %2436 = vmatmul.msk.bf16.vlgmr.msrb.gmra.mxu1 %vm16_vm0, %v2902_v43  ;;  %v3090_v43 = vpop.permute.xlu2 %1468 }
 0x29c   :  { %1369 = vmatpush.bf16.xpose.msrb.mxu1 %v1360_v58 }
 0x29d   :  { %v1296_v38 = vpop.f32.mrf.mxu0 }
 0x2a1   :  { %v2243_v63 = vld.sshfl [vmem:[#allocation1] sm:$0xff pattern:$0x73625140] }
 0x2a2   :  { %2279 = vst [vmem:[#allocation1] ss:$4 sm:$0xff] %v3024_v6 }
 0x2a7   :  { %v3102_v22 = vpop.xlane.xlu0 %1003 }
 0x2a8   :  { %v71_v2 = vpop.f32.mrf.mxu1  ;;  %712 = vadd.xlane.f32.xlu1 %v711_v41 }
 0x2a9   :  { %v75_v3 = vpack.c.bf16 %v71_v2, %v71_v2  ;;  %v3088_v29 = vld.sshfl [vmem:[#allocation1] sm:$0xff pattern:$0x73625140] }
 0x2aa   :  { %2314 = vst [vmem:[#allocation1] ss:$4 sm:$0xff] %v3024_v6 }
 0x2ab   :  { %77 = vst.msk [vmem:[%s3719_s1] sm:$0x3] %vm76_vm4, %v75_v3  ;;  %2443 = vmatmul.msk.bf16.vlgmr.msra.gmra.mxu1 %vm16_vm0, %v2814_v33 }
 0x2ac   :  { %1520 = vmatpush.bf16.xpose.msra.mxu1 %v1511_v32 }
 0x2b0   :  { %v73_v16 = vpop.f32.mrf.mxu1 }
 0x2b1   :  { %2168 = vrot.lane.b32.xlu2 %v2166_v42, %s2639_s11  ;;  %v2315_v58 = vld.sshfl [vmem:[#allocation1] sm:$0xff pattern:$0x73625140] }
 0x2b2   :  { %v416_v60 = vpop.xlane.xlu1 %415  ;;  %2319 = vst [vmem:[#allocation1] ss:$4 sm:$0xff] %v3024_v6 }
 0x2b3   :  { %2526 = vrcp.f32 %v416_v60 }
 0x2b4   :  { %v2021_v61 = vpop.permute.xlu2 %2020 }
 0x2b8   :  { %v181_v8 = vpop.f32.mrf.mxu1 }
 0x2b9   :  { %v2527_v52 = vpop.eup %2526  ;;  %2240 = vrot.lane.b32.xlu2 %v2238_v20, %s2641_s13  ;;  %v3126_v2 = vmul.f32 0.35355338, %v181_v8 }
 0x2ba   :  { %v418_v39 = vmul.f32 %v2527_v52, %v2974_v21  ;;  %v861_v44 = vpop.xlane.xlu1 %860  ;;  %v1872_v35 = vpop.permute.xlu0 %1871  ;;  %v726_v21 = vsel %vm58_vm1, %v2816_v34, 0 }
 0x2bb   :  { %v862_v33 = vsub.f32 %v2983_v50, %v861_v44  ;;  %v1877_v26 = vsel %vm16_vm0, %v1872_v35, 0  ;;  %2449 = vmatmul.msk.bf16.vlgmr.msrb.gmra.mxu1 %vm16_vm0, %v2988_v5 }
 0x2bc   :  { %v419_v42 = vpack.c.bf16 %v418_v39, %v418_v39  ;;  %1666 = vmatpush.bf16.xpose.msrb.mxu1 %v1657_v36  ;;  %1886 = vmatpush.bf16.xpose.msra.mxu0 %v1877_v26  ;;  %v2026_v45 = vpop.permute.xlu2 %2025 }
 0x2bd   :  { %v863_v49 = vmul.f32 1.442695, %v862_v33  ;;  %v140_v7 = vpop.f32.mrf.mxu3  ;;  %v2031_v20 = vsel %vm16_vm0, %v2026_v45, 0 }
 0x2be   :  { %2408 = vmatmul.msk.bf16.vlgmr.msra.gmra.mxu2 %vm54_vm3, %v419_v42  ;;  %v144_v26 = vpack.c.bf16 %v140_v7, %v140_v7 }
 0x2bf   :  { %2528 = vpow2.f32 %v863_v49  ;;  %735 = vmatpush.bf16.msra.mxu2 %v726_v21 }
 0x2c0   :  { %v183_v50 = vpop.f32.mrf.mxu1 }
 0x2c1   :  { %1391 = vrot.lane.b32.xlu1 %v2854_v1, %s2643_s15  ;;  %2245 = vrot.lane.b32.xlu2 %v2243_v63, %s2642_s14  ;;  %v1808_v1 = vsel %vm16_vm0, %v3074_v48, 0 }
 0x2c3   :  { %2472 = vmatmul.msk.bf16.vlgmr.msra.gmra.mxu0 %vm16_vm0, %v1867_v55  ;;  %v186_v55 = vsel %vm36_vm2, %v3126_v2, -inf }
 0x2c4   :  { %2040 = vmatpush.bf16.xpose.msrb.mxu0 %v2031_v20  ;;  %v2320_v20 = vld.sshfl [vmem:[#allocation1] sm:$0xff pattern:$0x73625140] }
 0x2c5   :  { %v3120_v5 = vpop.eup %2528  ;;  %v142_v38 = vpop.f32.mrf.mxu3  ;;  %2356 = vst [vmem:[#allocation1] ss:$4 sm:$0xff] %v3024_v6 }
 0x2c6   :  { %v865_v34 = vsel %vm36_vm2, %v3120_v5, 0.0 }
 0x2c7   :  { %866 = vadd.xlane.f32.xlu0 %v865_v34 }
 0x2c8   :  { %v334_v41 = vpop.f32.mrf.mxu1 }
 0x2c9   :  { %2100 = vrot.lane.b32.xlu1 %v3035_v62, %s2636_s8  ;;  %v3143_v60 = vmul.f32 0.35355338, %v334_v41 }
 0x2cb   :  { %2456 = vmatmul.msk.bf16.vlgmr.msra.gmra.mxu1 %vm16_vm0, %v2873_v18  ;;  %v880_v18 = vsel %vm58_vm1, %v2849_v59, 0 }
 0x2cc   :  { %1817 = vmatpush.bf16.xpose.msra.mxu1 %v1808_v1 }
 0x2cf   :  { %187 = vmax.xlane.f32.xlu0 %v186_v55 }
 0x2d0   :  { %v336_v63 = vpop.f32.mrf.mxu1  ;;  %v570_v3 = vpop.xlane.xlu1 %569 }
 0x2d1   :  { %2530 = vrcp.f32 %v570_v3  ;;  %2163 = vrot.lane.b32.xlu1 %v3058_v25, %s2638_s10  ;;  %s2649_s10 = smov 16  }
 0x2d3   :  { %2478 = vmatmul.msk.bf16.vlgmr.msrb.gmra.mxu0 %vm16_vm0, %v2021_v61 }
 0x2d7   :  { %v2531_v62 = vpop.eup %2530 }
 0x2d8   :  { %v572_v10 = vmul.f32 %v2531_v62, %v3006_v11  ;;  %v480_v48 = vpop.f32.mrf.mxu1  ;;  %v339_v11 = vsel %vm36_vm2, %v3143_v60, -inf }
 0x2d9   :  { %v3163_v21 = vmul.f32 0.35355338, %v480_v48 }
 0x2da   :  { %v573_v32 = vpack.c.bf16 %v572_v10, %v572_v10 }
 0x2db   :  { %2462 = vmatmul.msk.bf16.vlgmr.msrb.gmra.mxu1 %vm16_vm0, %v3042_v19  ;;  %v1005_v19 = vsub.f32 %v2960_v54, %v3102_v22  ;;  %v146_v54 = vrot.slane %v144_v26, 2  ;;  %v485_v34 = vsel %vm36_vm2, %v3163_v21, -inf }
 0x2dc   :  { %2414 = vmatmul.msk.bf16.vlgmr.msrb.gmra.mxu2 %vm54_vm3, %v573_v32 }
 0x2dd   :  { %889 = vmatpush.bf16.msrb.mxu2 %v880_v18  ;;  %v1006_v59 = vmul.f32 1.442695, %v1005_v19  ;;  %v149_v45 = vsel %vm58_vm1, %v144_v26, %v146_v54 }
 0x2df   :  { %2532 = vpow2.f32 %v1006_v59 }
 0x2e0   :  { %v482_v16 = vpop.f32.mrf.mxu1 }
 0x2e3   :  { %2317 = vrot.lane.b32.xlu0 %v2315_v58, %s2644_s16 }
 0x2e5   :  { %v3153_v36 = vpop.eup %2532 }
 0x2e6   :  { %v1448_v25 = vpop.f32.mrf.mxu0  ;;  %v1008_v42 = vsel %vm36_vm2, %v3153_v36, 0.0 }
 0x2e7   :  { %v3184_v59 = vmul.f32 0.35355338, %v1448_v25 }
 0x2e8   :  { %v631_v61 = vpop.f32.mrf.mxu1  ;;  %v1944_v8 = vpop.permute.xlu1 %1943 }
 0x2ea   :  { %340 = vmax.xlane.f32.xlu2 %v339_v11 }
 0x2eb   :  { %2469 = vmatmul.msk.bf16.vlgmr.msra.gmra.mxu1 %vm16_vm0, %v2935_v14 }
 0x2ee   :  { %v1450_v52 = vpop.f32.mrf.mxu0 }
 0x2ef   :  { %v1023_v52 = vsel %vm58_vm1, %v2948_v24, 0 }
 0x2f0   :  { %v633_v39 = vpop.f32.mrf.mxu1  ;;  %v1949_v44 = vpop.permute.xlu1 %1948 }
 0x2f1   :  { %v1954_v35 = vsel %vm16_vm0, %v1949_v44, 0  ;;  %v1453_v39 = vsel %vm36_vm2, %v3184_v59, -inf }
 0x2f2   :  { %1963 = vmatpush.bf16.xpose.msrb.mxu1 %v1954_v35 }
 0x2f6   :  { %v3159_v49 = vpop.f32.mrf.mxu0 }
 0x2f8   :  { %v777_v33 = vpop.f32.mrf.mxu1 }
 0x2fb   :  { %2475 = vmatmul.msk.bf16.vlgmr.msrb.gmra.mxu1 %vm16_vm0, %v1944_v8  ;;  %1009 = vadd.xlane.f32.xlu1 %v1008_v42  ;;  %v3181_v8 = vpop.permute.xlu0 %1542 }
 0x2fe   :  { %v296_v14 = vpop.f32.mrf.mxu2  ;;  %v1593_v58 = vpop.f32.mrf.mxu0 }
 0x2ff   :  { %v300_v3 = vpack.c.bf16 %v296_v14, %v296_v14  ;;  %v3200_v14 = vmul.f32 0.35355338, %v777_v33 }
 0x300   :  { %v779_v22 = vpop.f32.mrf.mxu1 }
 0x301   :  { %v302_v32 = vrot.slane %v300_v3, 2 }
 0x302   :  { %151 = vrot.lane.b32.xlu2 %v149_v45, %s2647_s5 }
 0x303   :  { %v305_v16 = vsel %vm58_vm1, %v300_v3, %v302_v32  ;;  %v1158_v44 = vpop.xlane.xlu0 %1157 }
 0x304   :  { %v1159_v25 = vsub.f32 %v3053_v13, %v1158_v44 }
 0x306   :  { %v298_v7 = vpop.f32.mrf.mxu2  ;;  %v3171_v1 = vpop.f32.mrf.mxu0  ;;  %v1160_v54 = vmul.f32 1.442695, %v1159_v25 }
 0x308   :  { %v3165_v50 = vpop.f32.mrf.mxu1 }
 0x30c   :  { %v3167_v38 = vpop.xlane.xlu2 %1300 }
 0x30d   :  { %486 = vmax.xlane.f32.xlu0 %v485_v34 }
 0x30e   :  { %v1747_v10 = vpop.f32.mrf.mxu0 }
 0x310   :  { %v930_v41 = vpop.f32.mrf.mxu1 }
 0x314   :  { %1611 = vrot.lane.b32.xlu1 %v2893_v37, %s2640_s12  ;;  %v2169_v55 = vpop.permute.xlu2 %2168 }
 0x315   :  { %v2174_v63 = vsel %vm16_vm0, %v2169_v55, 0 }
 0x316   :  { %2183 = vmatpush.bf16.xpose.msra.mxu0 %v2174_v63 }
 0x318   :  { %v1074_v62 = vpop.f32.mrf.mxu1 }
 0x31b   :  { %v713_v48 = vpop.xlane.xlu1 %712 }
 0x31c   :  { %2534 = vrcp.f32 %v713_v48  ;;  %1688 = vrot.lane.b32.xlu1 %v2911_v57, %s2643_s15  ;;  %v2241_v35 = vpop.permute.xlu2 %2240 }
 0x31d   :  { %2536 = vpow2.f32 %v1160_v54 }
 0x320   :  { %v1076_v18 = vpop.f32.mrf.mxu1 }
 0x321   :  { %307 = vrot.lane.b32.xlu0 %v305_v16, %s2648_s6  ;;  %v1177_v18 = vsel %vm58_vm1, %v2929_v12, 0  ;;  %v3216_v16 = vmul.f32 0.35355338, %v1074_v62  ;;  %v3231_v62 = vmul.f32 0.35355338, %v3171_v1 }
 0x322   :  { %v2535_v37 = vpop.eup %2534 }
 0x323   :  { %v715_v11 = vmul.f32 %v2535_v37, %v3084_v46  ;;  %v3193_v46 = vmul.f32 0.35355338, %v631_v61  ;;  %v782_v61 = vsel %vm36_vm2, %v3200_v14, -inf  ;;  %v3206_v34 = vpop.eup %2536 }
 0x324   :  { %2322 = vrot.lane.b32.xlu1 %v2320_v20, %s2645_s17  ;;  %v2246_v45 = vpop.permute.xlu2 %2245  ;;  %v1162_v10 = vsel %vm36_vm2, %v3206_v34, 0.0 }
 0x325   :  { %v716_v19 = vpack.c.bf16 %v715_v11, %v715_v11  ;;  %v636_v42 = vsel %vm36_vm2, %v3193_v46, -inf  ;;  %v2251_v58 = vsel %vm16_vm0, %v2246_v45, 0  ;;  %v3222_v11 = vmul.f32 0.35355338, %v3159_v49 }
 0x327   :  { %2421 = vmatmul.msk.bf16.vlgmr.msra.gmra.mxu2 %vm54_vm3, %v716_v19  ;;  %v1596_v12 = vsel %vm36_vm2, %v3222_v11, -inf }
 0x328   :  { %1032 = vmatpush.bf16.msra.mxu2 %v1023_v52  ;;  %v3189_v57 = vpop.f32.mrf.mxu1  ;;  %v1302_v52 = vsub.f32 %v3072_v47, %v3167_v38 }
 0x32a   :  { %v1303_v49 = vmul.f32 1.442695, %v1302_v52 }
 0x32b   :  { %1454 = vmax.xlane.f32.xlu2 %v1453_v39  ;;  %v3234_v39 = vmul.f32 0.35355338, %v3165_v50 }
 0x32d   :  { %v933_v47 = vsel %vm36_vm2, %v3234_v39, -inf }
 0x330   :  { %v1227_v26 = vpop.f32.mrf.mxu1 }
 0x333   :  { %v3198_v24 = vpop.permute.xlu1 %1391  ;;  %637 = vmax.xlane.f32.xlu2 %v636_v42  ;;  %v1750_v42 = vsel %vm36_vm2, %v3231_v62, -inf }
 0x338   :  { %v1371_v22 = vpop.f32.mrf.mxu1 }
 0x33a   :  { %v867_v20 = vpop.xlane.xlu0 %866 }
 0x33b   :  { %2538 = vrcp.f32 %v867_v20  ;;  %v2101_v7 = vpop.permute.xlu1 %2100  ;;  %783 = vmax.xlane.f32.xlu2 %v782_v61 }
 0x33c   :  { %v2105_v13 = vsel %vm16_vm0, %v2101_v7, 0  ;;  %2540 = vpow2.f32 %v1303_v49 }
 0x33d   :  { %2114 = vmatpush.bf16.xpose.msra.mxu1 %v2105_v13 }
 0x340   :  { %v1373_v33 = vpop.f32.mrf.mxu1  ;;  %v1888_v41 = vpop.f32.mrf.mxu0 }
 0x341   :  { %v2539_v55 = vpop.eup %2538  ;;  %v440_v63 = vpop.f32.mrf.mxu2  ;;  %v3250_v33 = vmul.f32 0.35355338, %v1371_v22 }
 0x342   :  { %v869_v3 = vmul.f32 %v2539_v55, %v3120_v5  ;;  %v444_v25 = vpack.c.bf16 %v440_v63, %v440_v63  ;;  %v3243_v54 = vpop.eup %2540  ;;  %v188_v49 = vpop.xlane.xlu0 %187 }
 0x343   :  { %1163 = vadd.xlane.f32.xlu2 %v1162_v10  ;;  %v2164_v48 = vpop.permute.xlu1 %2163  ;;  %v1305_v61 = vsel %vm36_vm2, %v3243_v54, 0.0  ;;  %v1376_v63 = vsel %vm36_vm2, %v3250_v33, -inf }
 0x344   :  { %v870_v32 = vpack.c.bf16 %v869_v3, %v869_v3  ;;  %2482 = vmatmul.msk.bf16.vlgmr.msra.gmra.mxu1 %vm16_vm0, %v3024_v6  ;;  %2485 = vmatmul.msk.bf16.vlgmr.msra.gmra.mxu0 %vm16_vm0, %v2164_v48  ;;  %v1079_v6 = vsel %vm36_vm2, %v3216_v16, -inf  ;;  %v446_v38 = vrot.slane %v444_v25, 2  ;;  %v3260_v48 = vmul.f32 0.35355338, %v1888_v41 }
 0x345   :  { %2260 = vmatpush.bf16.xpose.msrb.mxu1 %v2251_v58 }
 0x346   :  { %2427 = vmatmul.msk.bf16.vlgmr.msrb.gmra.mxu2 %vm54_vm3, %v870_v32  ;;  %v449_v45 = vsel %vm58_vm1, %v444_v25, %v446_v38  ;;  %v1893_v32 = vsel %vm36_vm2, %v3260_v48, -inf  ;;  %v1320_v38 = vsel %vm58_vm1, %v3001_v31, 0 }
 0x347   :  { %1186 = vmatpush.bf16.msrb.mxu2 %v1177_v18 }
 0x348   :  { %v3219_v5 = vpop.f32.mrf.mxu1  ;;  %v1890_v37 = vpop.f32.mrf.mxu0 }
 0x349   :  { %v442_v19 = vpop.f32.mrf.mxu2 }
 0x34b   :  { %1080 = vmax.xlane.f32.xlu0 %v1079_v6 }
 0x34e   :  { %1597 = vmax.xlane.f32.xlu1 %v1596_v12 }
 0x350   :  { %v1524_v44 = vpop.f32.mrf.mxu1  ;;  %v3236_v26 = vpop.f32.mrf.mxu0 }
 0x353   :  { %1751 = vmax.xlane.f32.xlu0 %v1750_v42 }
 0x354   :  { %2488 = vmatmul.msk.bf16.vlgmr.msrb.gmra.mxu1 %vm16_vm0, %v2241_v35 }
 0x356   :  { %934 = vmax.xlane.f32.xlu1 %v933_v47 }
 0x358   :  { %v1668_v1 = vpop.f32.mrf.mxu1  ;;  %v2044_v50 = vpop.f32.mrf.mxu0 }
 0x359   :  { %v3266_v19 = vmul.f32 0.35355338, %v1668_v1  ;;  %v189_v1 = vsub.f32 %v3126_v2, %v188_v49 }
 0x35b   :  { %451 = vrot.lane.b32.xlu2 %v449_v45, %s2647_s5  ;;  %v1673_v12 = vsel %vm36_vm2, %v3266_v19, -inf  ;;  %v190_v45 = vmul.f32 1.442695, %v189_v1 }
 0x35d   :  { %v341_v20 = vpop.xlane.xlu2 %340 }
 0x35e   :  { %v342_v7 = vsub.f32 %v3143_v60, %v341_v20  ;;  %1306 = vadd.xlane.f32.xlu1 %v1305_v61  ;;  %v3282_v20 = vmul.f32 0.35355338, %v3189_v57  ;;  %v2318_v61 = vpop.permute.xlu0 %2317 }
 0x35f   :  { %v594_v13 = vpop.f32.mrf.mxu2 }
 0x360   :  { %v343_v58 = vmul.f32 1.442695, %v342_v7  ;;  %v1670_v35 = vpop.f32.mrf.mxu1  ;;  %v598_v52 = vpack.c.bf16 %v594_v13, %v594_v13  ;;  %v1230_v2 = vsel %vm36_vm2, %v3282_v20, -inf }
 0x362   :  { %2542 = vpow2.f32 %v343_v58  ;;  %v600_v47 = vrot.slane %v598_v52, 2 }
 0x365   :  { %v152_v55 = vpop.permute.xlu2 %151 }
 0x366   :  { %155 = vst.msk [vmem:[%s3719_s1] sm:$0x3] %vm154_vm5, %v152_v55  ;;  %1377 = vmax.xlane.f32.xlu1 %v1376_v63 }
 0x367   :  { %v596_v3 = vpop.f32.mrf.mxu2 }
 0x368   :  { %v3258_v60 = vpop.eup %2542  ;;  %v1819_v10 = vpop.f32.mrf.mxu1  ;;  %v3298_v3 = vmul.f32 0.35355338, %v3219_v5 }
 0x369   :  { %v345_v22 = vsel %vm36_vm2, %v3258_v60, 0.0  ;;  %v3271_v44 = vmul.f32 0.35355338, %v1819_v10 }
 0x36a   :  { %346 = vadd.xlane.f32.xlu0 %v345_v22 }
 0x36b   :  { %v1824_v50 = vsel %vm36_vm2, %v3271_v44, -inf }
 0x36e   :  { %v1010_v18 = vpop.xlane.xlu1 %1009  ;;  %1894 = vmax.xlane.f32.xlu1 %v1893_v32  ;;  %v1527_v32 = vsel %vm36_vm2, %v3298_v3, -inf }
 0x36f   :  { %2544 = vrcp.f32 %v1010_v18 }
 0x370   :  { %v1821_v37 = vpop.f32.mrf.mxu1  ;;  %2546 = vpow2.f32 %v190_v45 }
 0x375   :  { %v2545_v6 = vpop.eup %2544 }
 0x376   :  { %v1012_v41 = vmul.f32 %v2545_v6, %v3153_v36  ;;  %1674 = vmax.xlane.f32.xlu1 %v1673_v12  ;;  %v603_v36 = vsel %vm58_vm1, %v598_v52, %v600_v47  ;;  %v3292_v55 = vpop.eup %2546 }
 0x377   :  { %v192_v63 = vsel %vm36_vm2, %v3292_v55, 0.0 }
 0x378   :  { %v1013_v25 = vpack.c.bf16 %v1012_v41, %v1012_v41  ;;  %v1965_v42 = vpop.f32.mrf.mxu1 }
 0x379   :  { %v3284_v31 = vmul.f32 0.35355338, %v1965_v42 }
 0x37a   :  { %2434 = vmatmul.msk.bf16.vlgmr.msra.gmra.mxu2 %vm54_vm3, %v1013_v25 }
 0x37b   :  { %1329 = vmatpush.bf16.msra.mxu2 %v1320_v38  ;;  %v1970_v13 = vsel %vm36_vm2, %v3284_v31, -inf }
 0x37e   :  { %605 = vrot.lane.b32.xlu0 %v603_v36, %s2648_s6  ;;  %1825 = vmax.xlane.f32.xlu1 %v1824_v50 }
 0x380   :  { %v1967_v7 = vpop.f32.mrf.mxu1  ;;  %v487_v35 = vpop.xlane.xlu0 %486 }
 0x381   :  { %v488_v57 = vsub.f32 %v3163_v21, %v487_v35 }
 0x383   :  { %v489_v10 = vmul.f32 1.442695, %v488_v57 }
 0x384   :  { %1231 = vmax.xlane.f32.xlu2 %v1230_v2 }
 0x385   :  { %2548 = vpow2.f32 %v489_v10 }
 0x386   :  { %v3290_v58 = vpop.permute.xlu1 %1611  ;;  %1971 = vmax.xlane.f32.xlu1 %v1970_v13 }
 0x38b   :  { %v3305_v6 = vpop.eup %2548 }
 0x38c   :  { %193 = vadd.xlane.f32.xlu2 %v192_v63  ;;  %v491_v21 = vsel %vm36_vm2, %v3305_v6, 0.0 }
 0x38e   :  { %v3300_v22 = vpop.permute.xlu1 %1688 }
 0x393   :  { %v3323_v13 = vpop.permute.xlu0 %307 }
 0x394   :  { %1528 = vmax.xlane.f32.xlu2 %v1527_v32 }
 0x396   :  { %v2323_v18 = vpop.permute.xlu1 %2322 }
 0x397   :  { %v2328_v37 = vsel %vm16_vm0, %v2323_v18, 0 }
 0x398   :  { %2337 = vmatpush.bf16.xpose.msrb.mxu0 %v2328_v37 }
 0x39c   :  { %492 = vadd.xlane.f32.xlu2 %v491_v21 }
 0x39e   :  { %v1455_v5 = vpop.xlane.xlu2 %1454 }
 0x39f   :  { %v1456_v52 = vsub.f32 %v3184_v59, %v1455_v5  ;;  %2491 = vmatmul.msk.bf16.vlgmr.msrb.gmra.mxu0 %vm16_vm0, %v2318_v61 }
 0x3a1   :  { %v1457_v12 = vmul.f32 1.442695, %v1456_v52 }
 0x3a3   :  { %2550 = vpow2.f32 %v1457_v12  ;;  %v1474_v12 = vsel %vm58_vm1, %v3090_v43, 0 }
 0x3a6   :  { %v638_v41 = vpop.xlane.xlu2 %637 }
 0x3a7   :  { %v639_v49 = vsub.f32 %v3193_v46, %v638_v41 }
 0x3a9   :  { %v3312_v25 = vpop.eup %2550  ;;  %v640_v42 = vmul.f32 1.442695, %v639_v49 }
 0x3aa   :  { %v737_v47 = vpop.f32.mrf.mxu2  ;;  %v1459_v38 = vsel %vm36_vm2, %v3312_v25, 0.0 }
 0x3ab   :  { %2552 = vpow2.f32 %v640_v42  ;;  %v741_v1 = vpack.c.bf16 %v737_v47, %v737_v47  ;;  %1460 = vadd.xlane.f32.xlu0 %v1459_v38 }
 0x3ad   :  { %v743_v36 = vrot.slane %v741_v1, 2 }
 0x3ae   :  { %v784_v50 = vpop.xlane.xlu2 %783 }
 0x3af   :  { %v785_v59 = vsub.f32 %v3200_v14, %v784_v50  ;;  %v746_v2 = vsel %vm58_vm1, %v741_v1, %v743_v36 }
 0x3b1   :  { %v3317_v45 = vpop.eup %2552  ;;  %v786_v61 = vmul.f32 1.442695, %v785_v59 }
 0x3b2   :  { %v739_v7 = vpop.f32.mrf.mxu2  ;;  %v642_v46 = vsel %vm36_vm2, %v3317_v45, 0.0 }
 0x3b3   :  { %2554 = vpow2.f32 %v786_v61  ;;  %643 = vadd.xlane.f32.xlu0 %v642_v46 }
 0x3b4   :  { %748 = vrot.lane.b32.xlu2 %v746_v2, %s2647_s5 }
 0x3b6   :  { %v1164_v35 = vpop.xlane.xlu2 %1163 }
 0x3b7   :  { %2556 = vrcp.f32 %v1164_v35 }
 0x3b9   :  { %v3325_v57 = vpop.eup %2554 }
 0x3ba   :  { %v788_v14 = vsel %vm36_vm2, %v3325_v57, 0.0 }
 0x3bb   :  { %789 = vadd.xlane.f32.xlu0 %v788_v14  ;;  %v3349_v14 = vmul.f32 0.35355338, %v3236_v26 }
 0x3bd   :  { %v2557_v63 = vpop.eup %2556 }
 0x3be   :  { %v1166_v10 = vmul.f32 %v2557_v63, %v3206_v34  ;;  %v1081_v32 = vpop.xlane.xlu0 %1080 }
 0x3bf   :  { %v1082_v18 = vsub.f32 %v3216_v16, %v1081_v32 }
 0x3c0   :  { %v1167_v37 = vpack.c.bf16 %v1166_v10, %v1166_v10 }
 0x3c1   :  { %v1083_v21 = vmul.f32 1.442695, %v1082_v18  ;;  %v2116_v5 = vpop.f32.mrf.mxu1  ;;  %v1598_v52 = vpop.xlane.xlu1 %1597 }
 0x3c2   :  { %v1599_v41 = vsub.f32 %v3222_v11, %v1598_v52  ;;  %2440 = vmatmul.msk.bf16.vlgmr.msrb.gmra.mxu2 %vm54_vm3, %v1167_v37  ;;  %v2185_v49 = vpop.f32.mrf.mxu0  ;;  %v2047_v37 = vsel %vm36_vm2, %v3349_v14, -inf  ;;  %v3361_v52 = vmul.f32 0.35355338, %v2116_v5 }
 0x3c3   :  { %2558 = vpow2.f32 %v1083_v21  ;;  %1483 = vmatpush.bf16.msrb.mxu2 %v1474_v12  ;;  %v3365_v12 = vpop.permute.xlu2 %451 }
 0x3c4   :  { %v1600_v42 = vmul.f32 1.442695, %v1599_v41 }
 0x3c6   :  { %2560 = vpow2.f32 %v1600_v42 }
 0x3c9   :  { %v3335_v34 = vpop.eup %2558  ;;  %v891_v47 = vpop.f32.mrf.mxu2 }
 0x3ca   :  { %v2118_v16 = vpop.f32.mrf.mxu1  ;;  %v935_v38 = vpop.xlane.xlu1 %934  ;;  %v1085_v1 = vsel %vm36_vm2, %v3335_v34, 0.0 }
 0x3cb   :  { %v2187_v50 = vpop.f32.mrf.mxu0  ;;  %1086 = vadd.xlane.f32.xlu1 %v1085_v1  ;;  %v936_v46 = vsub.f32 %v3234_v39, %v935_v38  ;;  %v1617_v39 = vsel %vm58_vm1, %v3290_v58, 0 }
 0x3cc   :  { %v3339_v43 = vpop.eup %2560 }
 0x3cd   :  { %v1602_v11 = vsel %vm36_vm2, %v3339_v43, 0.0  ;;  %v937_v35 = vmul.f32 1.442695, %v936_v46 }
 0x3ce   :  { %1603 = vadd.xlane.f32.xlu0 %v1602_v11  ;;  %v1752_v11 = vpop.xlane.xlu0 %1751 }
 0x3d1   :  { %v893_v36 = vpop.f32.mrf.mxu2 }
 0x3d2   :  { %v2262_v59 = vpop.f32.mrf.mxu1  ;;  %v1307_v7 = vpop.xlane.xlu1 %1306 }
 0x3d3   :  { %v3343_v61 = vmul.f32 0.35355338, %v2262_v59  ;;  %2562 = vrcp.f32 %v1307_v7  ;;  %v895_v7 = vpack.c.bf16 %v891_v47, %v891_v47 }
 0x3d4   :  { %2564 = vpow2.f32 %v937_v35 }
 0x3d5   :  { %v2267_v2 = vsel %vm36_vm2, %v3343_v61, -inf }
 0x3d6   :  { %2268 = vmax.xlane.f32.xlu1 %v2267_v2  ;;  %v3376_v2 = vmul.f32 0.35355338, %v2185_v49 }
 0x3d8   :  { %v2190_v47 = vsel %vm36_vm2, %v3376_v2, -inf }
 0x3d9   :  { %v2563_v63 = vpop.eup %2562 }
 0x3da   :  { %v2264_v10 = vpop.f32.mrf.mxu1  ;;  %v1309_v32 = vmul.f32 %v2563_v63, %v3243_v54  ;;  %v3357_v21 = vpop.eup %2564  ;;  %v2121_v54 = vsel %vm36_vm2, %v3361_v52, -inf  ;;  %v897_v63 = vrot.slane %v895_v7, 2 }
 0x3db   :  { %v939_v26 = vsel %vm36_vm2, %v3357_v21, 0.0 }
 0x3dc   :  { %v1310_v18 = vpack.c.bf16 %v1309_v32, %v1309_v32 }
 0x3dd   :  { %2048 = vmax.xlane.f32.xlu2 %v2047_v37  ;;  %v347_v10 = vpop.xlane.xlu0 %346 }
 0x3de   :  { %2447 = vmatmul.msk.bf16.vlgmr.msra.gmra.mxu2 %vm54_vm3, %v1310_v18  ;;  %v506_v18 = vsel %vm58_vm1, %v2784_v15, 0 }
 0x3df   :  { %1626 = vmatpush.bf16.msra.mxu2 %v1617_v39 }
 0x3e5   :  { %940 = vadd.xlane.f32.xlu2 %v939_v26 }
 0x3ed   :  { %2122 = vmax.xlane.f32.xlu2 %v2121_v54  ;;  %v1378_v54 = vpop.xlane.xlu1 %1377 }
 0x3f0   :  { %v3391_v37 = vpop.permute.xlu0 %605 }
 0x3f7   :  { %v1232_v41 = vpop.xlane.xlu2 %1231 }
 0x3f8   :  { %v1233_v58 = vsub.f32 %v3282_v20, %v1232_v41 }
 0x3fa   :  { %v1234_v42 = vmul.f32 1.442695, %v1233_v58 }
 0x3fc   :  { %2566 = vpow2.f32 %v1234_v42 }
 0x3fd   :  { %v1034_v16 = vpop.f32.mrf.mxu2 }
 0x3fe   :  { %v1038_v38 = vpack.c.bf16 %v1034_v16, %v1034_v16 }
 0x3ff   :  { %v194_v1 = vpop.xlane.xlu2 %193 }
 0x400   :  { %v1040_v50 = vrot.slane %v1038_v38, 2  ;;  %2568 = vrcp.f32 %v194_v1 }
 0x401   :  { %2570 = vrcp.f32 %v347_v10 }
 0x402   :  { %v3368_v36 = vpop.eup %2566  ;;  %v1043_v5 = vsel %vm58_vm1, %v1038_v38, %v1040_v50  ;;  %v1895_v38 = vpop.xlane.xlu1 %1894 }
 0x403   :  { %1045 = vrot.lane.b32.xlu1 %v1043_v5, %s2647_s5  ;;  %v1236_v59 = vsel %vm36_vm2, %v3368_v36, 0.0 }
 0x404   :  { %1237 = vadd.xlane.f32.xlu0 %v1236_v59 }
 0x405   :  { %v1036_v20 = vpop.f32.mrf.mxu2  ;;  %1765 = vrot.lane.b32.xlu2 %v2938_v17, %s2646_s20  ;;  %v900_v17 = vsel %vm58_vm1, %v895_v7, %v897_v63 }
 0x406   :  { %v2569_v46 = vpop.eup %2568  ;;  %v803_v20 = vsel %vm58_vm1, %v2839_v53, 0 }
 0x407   :  { %v196_v35 = vmul.f32 %v2569_v46, %v3292_v55  ;;  %v1529_v55 = vpop.xlane.xlu2 %1528  ;;  %v2571_v49 = vpop.eup %2570 }
 0x408   :  { %v349_v15 = vmul.f32 %v2571_v49, %v3258_v60  ;;  %v1753_v60 = vsub.f32 %v3231_v62, %v1752_v11  ;;  %v1530_v10 = vsub.f32 %v3298_v3, %v1529_v55  ;;  %v1896_v3 = vsub.f32 %v3260_v48, %v1895_v38 }
 0x409   :  { %v197_v32 = vpack.c.bf16 %v196_v35, %v196_v35 }
 0x40a   :  { %v350_v39 = vpack.c.bf16 %v349_v15, %v349_v15  ;;  %v1754_v50 = vmul.f32 1.442695, %v1753_v60  ;;  %v1675_v62 = vpop.xlane.xlu1 %1674 }
 0x40b   :  { %2400 = vmatmul.msk.bf16.vlgmr.msrb.gmra.mxu3 %vm54_vm3, %v197_v32  ;;  %1908 = vrot.lane.b32.xlu1 %v2968_v4, %s2640_s12  ;;  %v657_v4 = vsel %vm58_vm1, %v2797_v23, 0  ;;  %v1676_v46 = vsub.f32 %v3266_v19, %v1675_v62 }
 0x40c   :  { %515 = vmatpush.bf16.msrb.mxu3 %v506_v18  ;;  %2191 = vmax.xlane.f32.xlu0 %v2190_v47 }
 0x40d   :  { %902 = vrot.lane.b32.xlu2 %v900_v17, %s2648_s6  ;;  %v1677_v63 = vmul.f32 1.442695, %v1676_v46  ;;  %v954_v17 = vsel %vm58_vm1, %v2843_v56, 0 }
 0x40f   :  { %v493_v26 = vpop.xlane.xlu2 %492 }
 0x410   :  { %2572 = vrcp.f32 %v493_v26  ;;  %v1897_v26 = vmul.f32 1.442695, %v1896_v3  ;;  %v1397_v3 = vsel %vm58_vm1, %v3198_v24, 0 }
 0x413   :  { %1985 = vrot.lane.b32.xlu1 %v2999_v28, %s2643_s15 }
 0x416   :  { %v2573_v28 = vpop.eup %2572 }
 0x417   :  { %v495_v23 = vmul.f32 %v2573_v28, %v3305_v6  ;;  %v3431_v48 = vpop.permute.xlu2 %748 }
 0x419   :  { %v496_v59 = vpack.c.bf16 %v495_v23, %v495_v23 }
 0x41b   :  { %2405 = vmatmul.msk.bf16.vlgmr.msra.gmra.mxu3 %vm54_vm3, %v350_v39 }
 0x41c   :  { %666 = vmatpush.bf16.msra.mxu3 %v657_v4  ;;  %v3396_v41 = vpop.f32.mrf.mxu0 }
 0x41e   :  { %v1461_v58 = vpop.xlane.xlu0 %1460 }
 0x41f   :  { %2574 = vrcp.f32 %v1461_v58 }
 0x420   :  { %1839 = vrot.lane.b32.xlu0 %v2950_v27, %s2637_s9  ;;  %2576 = vpow2.f32 %v1754_v50  ;;  %v1379_v27 = vsub.f32 %v3250_v33, %v1378_v54  ;;  %v1826_v33 = vpop.xlane.xlu1 %1825 }
 0x421   :  { %v1827_v19 = vsub.f32 %v3271_v44, %v1826_v33 }
 0x422   :  { %v1380_v6 = vmul.f32 1.442695, %v1379_v27 }
 0x423   :  { %v1828_v55 = vmul.f32 1.442695, %v1827_v19 }
 0x424   :  { %v2341_v42 = vpop.f32.mrf.mxu0 }
 0x425   :  { %v2575_v16 = vpop.eup %2574 }
 0x426   :  { %v1463_v1 = vmul.f32 %v2575_v16, %v3312_v25  ;;  %v644_v7 = vpop.xlane.xlu0 %643  ;;  %v3408_v11 = vpop.eup %2576 }
 0x427   :  { %2578 = vrcp.f32 %v644_v7  ;;  %v1756_v53 = vsel %vm36_vm2, %v3408_v11, 0.0 }
 0x428   :  { %v1464_v5 = vpack.c.bf16 %v1463_v1, %v1463_v1  ;;  %2580 = vpow2.f32 %v1380_v6 }
 0x429   :  { %2582 = vpow2.f32 %v1677_v63 }
 0x42a   :  { %2453 = vmatmul.msk.bf16.vlgmr.msrb.gmra.mxu2 %vm54_vm3, %v1464_v5 }
 0x42b   :  { %2411 = vmatmul.msk.bf16.vlgmr.msrb.gmra.mxu3 %vm54_vm3, %v496_v59 }
 0x42c   :  { %812 = vmatpush.bf16.msrb.mxu3 %v803_v20  ;;  %v1972_v20 = vpop.xlane.xlu1 %1971 }
 0x42d   :  { %v2579_v25 = vpop.eup %2578 }
 0x42e   :  { %v646_v35 = vmul.f32 %v2579_v25, %v3317_v45  ;;  %v790_v18 = vpop.xlane.xlu0 %789  ;;  %v3415_v47 = vpop.eup %2580  ;;  %v1531_v45 = vmul.f32 1.442695, %v1530_v10 }
 0x42f   :  { %2584 = vrcp.f32 %v790_v18  ;;  %v1382_v49 = vsel %vm36_vm2, %v3415_v47, 0.0  ;;  %v3424_v15 = vpop.eup %2582 }
 0x430   :  { %v647_v32 = vpack.c.bf16 %v646_v35, %v646_v35  ;;  %2586 = vpow2.f32 %v1531_v45  ;;  %v1679_v54 = vsel %vm36_vm2, %v3424_v15, 0.0 }
 0x435   :  { %v2585_v56 = vpop.eup %2584 }
 0x436   :  { %1757 = vadd.xlane.f32.xlu2 %v1756_v53  ;;  %v792_v44 = vmul.f32 %v2585_v56, %v3325_v57  ;;  %v3429_v58 = vpop.eup %2586  ;;  %v1100_v57 = vsel %vm58_vm1, %v2898_v40, 0  ;;  %v3449_v40 = vmul.f32 0.35355338, %v3396_v41  ;;  %v1251_v41 = vsel %vm58_vm1, %v2921_v0, 0 }
 0x437   :  { %v1533_v16 = vsel %vm36_vm2, %v3429_v58, 0.0 }
 0x438   :  { %v793_v60 = vpack.c.bf16 %v792_v44, %v792_v44  ;;  %v2344_v27 = vsel %vm36_vm2, %v3449_v40, -inf }
 0x43b   :  { %2418 = vmatmul.msk.bf16.vlgmr.msra.gmra.mxu3 %vm54_vm3, %v647_v32 }
 0x43c   :  { %963 = vmatpush.bf16.msra.mxu3 %v954_v17 }
 0x43e   :  { %1383 = vadd.xlane.f32.xlu2 %v1382_v49  ;;  %v1087_v46 = vpop.xlane.xlu1 %1086 }
 0x441   :  { %v1604_v39 = vpop.xlane.xlu0 %1603 }
 0x442   :  { %2588 = vrcp.f32 %v1604_v39 }
 0x443   :  { %2590 = vpow2.f32 %v1828_v55 }
 0x444   :  { %2592 = vpow2.f32 %v1897_v26 }
 0x445   :  { %v1188_v4 = vpop.f32.mrf.mxu2 }
 0x446   :  { %1680 = vadd.xlane.f32.xlu2 %v1679_v54  ;;  %v1192_v33 = vpack.c.bf16 %v1188_v4, %v1188_v4 }
 0x448   :  { %v2589_v28 = vpop.eup %2588  ;;  %v1194_v32 = vrot.slane %v1192_v33, 2 }
 0x449   :  { %v1606_v42 = vmul.f32 %v2589_v28, %v3339_v43  ;;  %v3436_v38 = vpop.eup %2590  ;;  %v1973_v28 = vsub.f32 %v3284_v31, %v1972_v20 }
 0x44a   :  { %1534 = vadd.xlane.f32.xlu0 %v1533_v16  ;;  %v1830_v50 = vsel %vm36_vm2, %v3436_v38, 0.0  ;;  %v3444_v43 = vpop.eup %2592  ;;  %v1197_v45 = vsel %vm58_vm1, %v1192_v33, %v1194_v32  ;;  %v2269_v16 = vpop.xlane.xlu1 %2268  ;;  %v2357_v33 = vld.sshfl [vmem:[#allocation1] sm:$0xff pattern:$0x73625140] }
 0x44b   :  { %v1607_v23 = vpack.c.bf16 %v1606_v42, %v1606_v42  ;;  %2424 = vmatmul.msk.bf16.vlgmr.msrb.gmra.mxu3 %vm54_vm3, %v793_v60  ;;  %v1899_v59 = vsel %vm36_vm2, %v3444_v43, 0.0  ;;  %v1974_v42 = vmul.f32 1.442695, %v1973_v28 }
 0x44c   :  { %1109 = vmatpush.bf16.msrb.mxu3 %v1100_v57 }
 0x44d   :  { %v1190_v1 = vpop.f32.mrf.mxu2  ;;  %2460 = vmatmul.msk.bf16.vlgmr.msra.gmra.mxu2 %vm54_vm3, %v1607_v23 }
 0x44e   :  { %1831 = vadd.xlane.f32.xlu2 %v1830_v50 }
 0x450   :  { %v2049_v5 = vpop.xlane.xlu2 %2048 }
 0x451   :  { %v2050_v39 = vsub.f32 %v3349_v14, %v2049_v5 }
 0x452   :  { %1900 = vadd.xlane.f32.xlu0 %v1899_v59 }
 0x453   :  { %v2051_v44 = vmul.f32 1.442695, %v2050_v39 }
 0x458   :  { %v941_v7 = vpop.xlane.xlu2 %940 }
 0x459   :  { %2594 = vrcp.f32 %v941_v7 }
 0x45a   :  { %2345 = vmax.xlane.f32.xlu0 %v2344_v27  ;;  %2596 = vrcp.f32 %v1087_v46 }
 0x45f   :  { %v2595_v62 = vpop.eup %2594 }
 0x460   :  { %v943_v6 = vmul.f32 %v2595_v62, %v3357_v21  ;;  %v2123_v25 = vpop.xlane.xlu2 %2122  ;;  %v2597_v17 = vpop.eup %2596 }
 0x461   :  { %v2124_v35 = vsub.f32 %v3361_v52, %v2123_v25  ;;  %v3455_v53 = vpop.f32.mrf.mxu2  ;;  %v1089_v49 = vmul.f32 %v2597_v17, %v3335_v34  ;;  %v1548_v34 = vsel %vm58_vm1, %v3181_v8, 0 }
 0x462   :  { %v944_v63 = vpack.c.bf16 %v943_v6, %v943_v6 }
 0x463   :  { %v2125_v10 = vmul.f32 1.442695, %v2124_v35 }
 0x464   :  { %2431 = vmatmul.msk.bf16.vlgmr.msra.gmra.mxu3 %vm54_vm3, %v944_v63  ;;  %v2270_v63 = vsub.f32 %v3343_v61, %v2269_v16 }
 0x465   :  { %2598 = vpow2.f32 %v2125_v10  ;;  %1260 = vmatpush.bf16.msra.mxu3 %v1251_v41 }
 0x466   :  { %2062 = vrot.lane.b32.xlu2 %v3026_v51, %s2646_s20  ;;  %v1090_v51 = vpack.c.bf16 %v1089_v49, %v1089_v49  ;;  %v2271_v32 = vmul.f32 1.442695, %v2270_v63 }
 0x468   :  { %v1766_v21 = vpop.permute.xlu2 %1765 }
 0x469   :  { %v1771_v52 = vsel %vm58_vm1, %v1766_v21, 0  ;;  %v1333_v18 = vpop.f32.mrf.mxu2 }
 0x46a   :  { %1780 = vmatpush.bf16.msrb.mxu2 %v1771_v52 }
 0x46b   :  { %v3463_v19 = vpop.eup %2598 }
 0x46c   :  { %v2127_v0 = vsel %vm36_vm2, %v3463_v19, 0.0 }
 0x46d   :  { %2128 = vadd.xlane.f32.xlu1 %v2127_v0 }
 0x46e   :  { %1199 = vrot.lane.b32.xlu0 %v1197_v45, %s2648_s6 }
 0x470   :  { %v3497_v25 = vpop.permute.xlu2 %902 }
 0x474   :  { %2437 = vmatmul.msk.bf16.vlgmr.msrb.gmra.mxu3 %vm54_vm3, %v1090_v51 }
 0x475   :  { %1406 = vmatpush.bf16.msrb.mxu3 %v1397_v3  ;;  %v3490_v31 = vpop.permute.xlu1 %1045 }
 0x477   :  { %v1238_v55 = vpop.xlane.xlu0 %1237 }
 0x478   :  { %2600 = vrcp.f32 %v1238_v55 }
 0x479   :  { %2602 = vpow2.f32 %v2051_v44 }
 0x47d   :  { %v1909_v20 = vpop.permute.xlu1 %1908 }
 0x47e   :  { %v2601_v56 = vpop.eup %2600  ;;  %v1914_v62 = vsel %vm58_vm1, %v1909_v20, 0 }
 0x47f   :  { %v1240_v26 = vmul.f32 %v2601_v56, %v3368_v36  ;;  %v2192_v54 = vpop.xlane.xlu0 %2191  ;;  %v3480_v14 = vpop.eup %2602  ;;  %1923 = vmatpush.bf16.msra.mxu2 %v1914_v62 }
 0x480   :  { %v2193_v24 = vsub.f32 %v3376_v2, %v2192_v54  ;;  %v2053_v57 = vsel %vm36_vm2, %v3480_v14, 0.0 }
 0x481   :  { %v1241_v4 = vpack.c.bf16 %v1240_v26, %v1240_v26 }
 0x482   :  { %v2194_v60 = vmul.f32 1.442695, %v2193_v24 }
 0x484   :  { %2444 = vmatmul.msk.bf16.vlgmr.msra.gmra.mxu3 %vm54_vm3, %v1241_v4  ;;  %2604 = vpow2.f32 %v2194_v60 }
 0x485   :  { %1557 = vmatpush.bf16.msra.mxu3 %v1548_v34  ;;  %2606 = vpow2.f32 %v1974_v42 }
 0x48a   :  { %v3484_v1 = vpop.eup %2604 }
 0x48b   :  { %v3487_v50 = vpop.eup %2606  ;;  %v2196_v59 = vsel %vm36_vm2, %v3484_v1, 0.0 }
 0x48c   :  { %v1976_v7 = vsel %vm36_vm2, %v3487_v50, 0.0 }
 0x48e   :  { %v218_v36 = vpop.f32.mrf.mxu3 }
 0x48f   :  { %v222_v8 = vpack.c.bf16 %v218_v36, %v218_v36  ;;  %2054 = vadd.xlane.f32.xlu2 %v2053_v57 }
 0x491   :  { %v224_v23 = vrot.slane %v222_v8, 2 }
 0x492   :  { %v1840_v61 = vpop.permute.xlu0 %1839 }
 0x493   :  { %v227_v2 = vsel %vm58_vm1, %v222_v8, %v224_v23  ;;  %v1845_v24 = vsel %vm58_vm1, %v1840_v61, 0 }
 0x494   :  { %229 = vrot.lane.b32.xlu1 %v227_v2, %s2649_s10 }
 0x496   :  { %v220_v5 = vpop.f32.mrf.mxu3 }
 0x497   :  { %2197 = vadd.xlane.f32.xlu2 %v2196_v59 }
 0x498   :  { %1977 = vadd.xlane.f32.xlu0 %v1976_v7 }
 0x49e   :  { %v371_v27 = vpop.f32.mrf.mxu3 }
 0x49f   :  { %v375_v6 = vpack.c.bf16 %v371_v27, %v371_v27 }
 0x4a1   :  { %2406 = vst.msk [vmem:[%s3719_s1 + $0x2] sm:$0x3] %vm76_vm4, %v375_v6  ;;  %v1986_v6 = vpop.permute.xlu1 %1985 }
 0x4a2   :  { %2409 = vst.msk [vmem:[%s3719_s1 + $0x2] sm:$0x3] %vm154_vm5, %v3365_v12 }
 0x4a6   :  { %v373_v46 = vpop.f32.mrf.mxu3 }
 0x4a9   :  { %v1758_v35 = vpop.xlane.xlu2 %1757 }
 0x4aa   :  { %2608 = vrcp.f32 %v1758_v35  ;;  %v1991_v35 = vsel %vm58_vm1, %v1986_v6, 0 }
 0x4ac   :  { %2136 = vrot.lane.b32.xlu0 %v3040_v9, %s2637_s9 }
 0x4ad   :  { %v3511_v10 = vpop.f32.mrf.mxu2 }
 0x4ae   :  { %v3513_v41 = vpop.f32.mrf.mxu3  ;;  %v1489_v63 = vpack.c.bf16 %v3511_v10, %v3511_v10 }
 0x4af   :  { %2359 = vrot.lane.b32.xlu2 %v2357_v33, %s2646_s20 }
 0x4b0   :  { %v2609_v21 = vpop.eup %2608 }
 0x4b1   :  { %v1760_v52 = vmul.f32 %v2609_v21, %v3408_v11  ;;  %v1384_v12 = vpop.xlane.xlu2 %1383  ;;  %v1694_v11 = vsel %vm58_vm1, %v3300_v22, 0  ;;  %v521_v21 = vpack.c.bf16 %v3513_v41, %v3513_v41 }
 0x4b2   :  { %2610 = vrcp.f32 %v1384_v12 }
 0x4b3   :  { %v1761_v18 = vpack.c.bf16 %v1760_v52, %v1760_v52  ;;  %2612 = vpow2.f32 %v2271_v32 }
 0x4b4   :  { %2205 = vrot.lane.b32.xlu0 %v3068_v30, %s2640_s12 }
 0x4b5   :  { %v1487_v9 = vpop.f32.mrf.mxu2  ;;  %2466 = vmatmul.msk.bf16.vlgmr.msrb.gmra.mxu2 %vm54_vm3, %v1761_v18  ;;  %v523_v18 = vrot.slane %v521_v21, 2 }
 0x4b6   :  { %v519_v17 = vpop.f32.mrf.mxu3 }
 0x4b7   :  { %v526_v41 = vsel %vm58_vm1, %v521_v21, %v523_v18 }
 0x4b8   :  { %v2611_v0 = vpop.eup %2610 }
 0x4b9   :  { %v1386_v45 = vmul.f32 %v2611_v0, %v3415_v47  ;;  %v3521_v49 = vpop.eup %2612  ;;  %v1681_v39 = vpop.xlane.xlu2 %1680 }
 0x4ba   :  { %v2273_v30 = vsel %vm36_vm2, %v3521_v49, 0.0 }
 0x4bb   :  { %v1387_v51 = vpack.c.bf16 %v1386_v45, %v1386_v45 }
 0x4bd   :  { %v1535_v3 = vpop.xlane.xlu0 %1534  ;;  %2450 = vmatmul.msk.bf16.vlgmr.msrb.gmra.mxu3 %vm54_vm3, %v1387_v51 }
 0x4be   :  { %2614 = vrcp.f32 %v1535_v3  ;;  %1703 = vmatpush.bf16.msrb.mxu3 %v1694_v11  ;;  %v668_v55 = vpop.f32.mrf.mxu3  ;;  %2274 = vadd.xlane.f32.xlu1 %v2273_v30 }
 0x4bf   :  { %v672_v56 = vpack.c.bf16 %v668_v55, %v668_v55 }
 0x4c1   :  { %2419 = vst.msk [vmem:[%s3719_s1 + $0x4] sm:$0x3] %vm76_vm4, %v672_v56  ;;  %v1832_v4 = vpop.xlane.xlu2 %1831 }
 0x4c2   :  { %2422 = vst.msk [vmem:[%s3719_s1 + $0x4] sm:$0x3] %vm154_vm5, %v3431_v48 }
 0x4c4   :  { %v2615_v22 = vpop.eup %2614 }
 0x4c5   :  { %v1901_v47 = vpop.xlane.xlu0 %1900  ;;  %v1537_v44 = vmul.f32 %v2615_v22, %v3429_v58 }
 0x4c6   :  { %2616 = vrcp.f32 %v1901_v47  ;;  %v670_v26 = vpop.f32.mrf.mxu3 }
 0x4c7   :  { %v1538_v54 = vpack.c.bf16 %v1537_v44, %v1537_v44  ;;  %2618 = vrcp.f32 %v1681_v39 }
 0x4c9   :  { %v2063_v58 = vpop.permute.xlu2 %2062 }
 0x4ca   :  { %v2068_v23 = vsel %vm58_vm1, %v2063_v58, 0 }
 0x4cb   :  { %2077 = vmatpush.bf16.msrb.mxu2 %v2068_v23 }
 0x4cc   :  { %v2617_v34 = vpop.eup %2616 }
 0x4cd   :  { %v1903_v28 = vmul.f32 %v2617_v34, %v3444_v43  ;;  %v2346_v60 = vpop.xlane.xlu0 %2345  ;;  %2457 = vmatmul.msk.bf16.vlgmr.msra.gmra.mxu3 %vm54_vm3, %v1538_v54  ;;  %v2619_v43 = vpop.eup %2618 }
 0x4ce   :  { %v2347_v42 = vsub.f32 %v3449_v40, %v2346_v60  ;;  %1854 = vmatpush.bf16.msra.mxu3 %v1845_v24  ;;  %v814_v48 = vpop.f32.mrf.mxu3  ;;  %v1335_v40 = vpack.c.bf16 %v3455_v53, %v3455_v53  ;;  %v1683_v7 = vmul.f32 %v2619_v43, %v3424_v15  ;;  %v1491_v15 = vrot.slane %v1489_v63, 2 }
 0x4cf   :  { %v1904_v16 = vpack.c.bf16 %v1903_v28, %v1903_v28 }
 0x4d0   :  { %v2348_v36 = vmul.f32 1.442695, %v2347_v42  ;;  %v1628_v57 = vpop.f32.mrf.mxu2  ;;  %v1337_v62 = vrot.slane %v1335_v40, 2  ;;  %v1684_v46 = vpack.c.bf16 %v1683_v7, %v1683_v7  ;;  %v1494_v32 = vsel %vm58_vm1, %v1489_v63, %v1491_v15 }
 0x4d1   :  { %v1632_v8 = vpack.c.bf16 %v1628_v57, %v1628_v57  ;;  %2473 = vmatmul.msk.bf16.vlgmr.msra.gmra.mxu2 %vm54_vm3, %v1904_v16 }
 0x4d2   :  { %2620 = vpow2.f32 %v2348_v36 }
 0x4d3   :  { %v1634_v2 = vrot.slane %v1632_v8, 2  ;;  %2622 = vrcp.f32 %v1832_v4 }
 0x4d5   :  { %v1637_v5 = vsel %vm58_vm1, %v1632_v8, %v1634_v2 }
 0x4d6   :  { %v816_v59 = vpop.f32.mrf.mxu3  ;;  %1639 = vrot.lane.b32.xlu2 %v1637_v5, %s2647_s5 }
 0x4d7   :  { %2282 = vrot.lane.b32.xlu1 %v3088_v29, %s2643_s15  ;;  %v1340_v29 = vsel %vm58_vm1, %v1335_v40, %v1337_v62 }
 0x4d8   :  { %v1630_v20 = vpop.f32.mrf.mxu2  ;;  %v3551_v27 = vpop.eup %2620 }
 0x4d9   :  { %v2350_v53 = vsel %vm36_vm2, %v3551_v27, 0.0  ;;  %v2623_v33 = vpop.eup %2622 }
 0x4da   :  { %v1834_v52 = vmul.f32 %v2623_v33, %v3436_v38  ;;  %v818_v38 = vpack.c.bf16 %v814_v48, %v814_v48 }
 0x4dc   :  { %v1835_v61 = vpack.c.bf16 %v1834_v52, %v1834_v52  ;;  %v820_v17 = vrot.slane %v818_v38, 2 }
 0x4dd   :  { %2463 = vmatmul.msk.bf16.vlgmr.msrb.gmra.mxu3 %vm54_vm3, %v1684_v46 }
 0x4de   :  { %2000 = vmatpush.bf16.msrb.mxu3 %v1991_v35  ;;  %2351 = vadd.xlane.f32.xlu0 %v2350_v53  ;;  %v823_v0 = vsel %vm58_vm1, %v818_v38, %v820_v17 }
 0x4df   :  { %1342 = vrot.lane.b32.xlu1 %v1340_v29, %s2647_s5 }
 0x4e0   :  { %v3582_v39 = vpop.permute.xlu0 %1199 }
 0x4e7   :  { %v965_v12 = vpop.f32.mrf.mxu3  ;;  %1496 = vrot.lane.b32.xlu1 %v1494_v32, %s2648_s6 }
 0x4e8   :  { %v969_v10 = vpack.c.bf16 %v965_v12, %v965_v12 }
 0x4ea   :  { %2432 = vst.msk [vmem:[%s3719_s1 + $0x6] sm:$0x3] %vm76_vm4, %v969_v10 }
 0x4eb   :  { %2435 = vst.msk [vmem:[%s3719_s1 + $0x6] sm:$0x3] %vm154_vm5, %v3490_v31  ;;  %v2129_v31 = vpop.xlane.xlu1 %2128 }
 0x4ed   :  { %2470 = vmatmul.msk.bf16.vlgmr.msra.gmra.mxu3 %vm54_vm3, %v1835_v61 }
 0x4ef   :  { %v967_v9 = vpop.f32.mrf.mxu3  ;;  %528 = vrot.lane.b32.xlu1 %v526_v41, %s2649_s10 }
 0x4f7   :  { %v1111_v45 = vpop.f32.mrf.mxu3  ;;  %825 = vrot.lane.b32.xlu1 %v823_v0, %s2649_s10 }
 0x4f8   :  { %v1115_v51 = vpack.c.bf16 %v1111_v45, %v1111_v45 }
 0x4fa   :  { %v1117_v11 = vrot.slane %v1115_v51, 2 }
 0x4fc   :  { %v1120_v3 = vsel %vm58_vm1, %v1115_v51, %v1117_v11 }
 0x4fd   :  { %1122 = vrot.lane.b32.xlu2 %v1120_v3, %s2649_s10 }
 0x4ff   :  { %v1113_v30 = vpop.f32.mrf.mxu3 }
 0x502   :  { %v2055_v55 = vpop.xlane.xlu2 %2054 }
 0x503   :  { %2624 = vrcp.f32 %v2055_v55 }
 0x506   :  { %v230_v56 = vpop.permute.xlu1 %229 }
 0x507   :  { %233 = vst.msk [vmem:[%s3719_s1] sm:$0x3] %vm232_vm6, %v230_v56  ;;  %v1262_v22 = vpop.f32.mrf.mxu3 }
 0x508   :  { %311 = vst.msk [vmem:[%s3719_s1] sm:$0x3] %vm310_vm7, %v3323_v13  ;;  %v1266_v47 = vpack.c.bf16 %v1262_v22, %v1262_v22 }
 0x509   :  { %v2625_v26 = vpop.eup %2624 }
 0x50a   :  { %v2057_v44 = vmul.f32 %v2625_v26, %v3480_v14  ;;  %2445 = vst.msk [vmem:[%s3719_s1 + $0x8] sm:$0x3] %vm76_vm4, %v1266_v47  ;;  %v2198_v13 = vpop.xlane.xlu2 %2197 }
 0x50b   :  { %v1978_v4 = vpop.xlane.xlu0 %1977 }
 0x50c   :  { %v2058_v54 = vpack.c.bf16 %v2057_v44, %v2057_v44  ;;  %2626 = vrcp.f32 %v1978_v4 }
 0x50d   :  { %2628 = vrcp.f32 %v2129_v31 }
 0x50e   :  { %2479 = vmatmul.msk.bf16.vlgmr.msrb.gmra.mxu2 %vm54_vm3, %v2058_v54  ;;  %2630 = vrcp.f32 %v2198_v13 }
 0x50f   :  { %v1264_v34 = vpop.f32.mrf.mxu3 }
 0x512   :  { %v2627_v24 = vpop.eup %2626  ;;  %v2360_v58 = vpop.permute.xlu2 %2359 }
 0x513   :  { %v1980_v28 = vmul.f32 %v2627_v24, %v3487_v50  ;;  %v2629_v14 = vpop.eup %2628  ;;  %v2365_v50 = vsel %vm58_vm1, %v2360_v58, 0 }
 0x514   :  { %v2131_v16 = vmul.f32 %v2629_v14, %v3463_v19  ;;  %v2631_v36 = vpop.eup %2630 }
 0x515   :  { %v1981_v60 = vpack.c.bf16 %v1980_v28, %v1980_v28  ;;  %v2200_v8 = vmul.f32 %v2631_v36, %v3484_v1 }
 0x516   :  { %v2132_v57 = vpack.c.bf16 %v2131_v16, %v2131_v16 }
 0x517   :  { %2476 = vmatmul.msk.bf16.vlgmr.msrb.gmra.mxu3 %vm54_vm3, %v1981_v60  ;;  %v2201_v43 = vpack.c.bf16 %v2200_v8, %v2200_v8 }
 0x51e   :  { %v2137_v42 = vpop.permute.xlu0 %2136 }
 0x51f   :  { %v2142_v48 = vsel %vm58_vm1, %v2137_v42, 0 }
 0x520   :  { %2151 = vmatpush.bf16.msra.mxu3 %v2142_v48 }
 0x526   :  { %v2206_v23 = vpop.permute.xlu0 %2205 }
 0x527   :  { %v2211_v2 = vsel %vm58_vm1, %v2206_v23, 0  ;;  %2483 = vmatmul.msk.bf16.vlgmr.msra.gmra.mxu3 %vm54_vm3, %v2132_v57 }
 0x528   :  { %2220 = vmatpush.bf16.msra.mxu2 %v2211_v2 }
 0x52b   :  { %2486 = vmatmul.msk.bf16.vlgmr.msra.gmra.mxu2 %vm54_vm3, %v2201_v43 }
 0x52c   :  { %2374 = vmatpush.bf16.msrb.mxu2 %v2365_v50 }
 0x530   :  { %v1640_v21 = vpop.permute.xlu2 %1639 }
 0x531   :  { %v2275_v59 = vpop.xlane.xlu1 %2274 }
 0x532   :  { %2632 = vrcp.f32 %v2275_v59 }
 0x538   :  { %v1782_v5 = vpop.f32.mrf.mxu2  ;;  %v2633_v46 = vpop.eup %2632 }
 0x539   :  { %v1786_v40 = vpack.c.bf16 %v1782_v5, %v1782_v5  ;;  %v2277_v53 = vmul.f32 %v2633_v46, %v3521_v49 }
 0x53b   :  { %v1788_v19 = vrot.slane %v1786_v40, 2  ;;  %v2278_v33 = vpack.c.bf16 %v2277_v53, %v2277_v53 }
 0x53d   :  { %v1791_v7 = vsel %vm58_vm1, %v1786_v40, %v1788_v19 }
 0x53e   :  { %1793 = vrot.lane.b32.xlu0 %v1791_v7, %s2648_s6 }
 0x540   :  { %v1408_v1 = vpop.f32.mrf.mxu3  ;;  %v1784_v20 = vpop.f32.mrf.mxu2 }
 0x541   :  { %v1412_v62 = vpack.c.bf16 %v1408_v1, %v1408_v1 }
 0x543   :  { %v1414_v6 = vrot.slane %v1412_v62, 2 }
 0x545   :  { %v1417_v35 = vsel %vm58_vm1, %v1412_v62, %v1414_v6 }
 0x546   :  { %1419 = vrot.lane.b32.xlu2 %v1417_v35, %s2649_s10 }
 0x548   :  { %v1410_v63 = vpop.f32.mrf.mxu3 }
 0x549   :  { %v2283_v29 = vpop.permute.xlu1 %2282 }
 0x54a   :  { %v2288_v15 = vsel %vm58_vm1, %v2283_v29, 0 }
 0x54b   :  { %2297 = vmatpush.bf16.msrb.mxu3 %v2288_v15 }
 0x54e   :  { %2489 = vmatmul.msk.bf16.vlgmr.msrb.gmra.mxu3 %vm54_vm3, %v2278_v33 }
 0x550   :  { %v1559_v32 = vpop.f32.mrf.mxu3 }
 0x551   :  { %v1563_v52 = vpack.c.bf16 %v1559_v32, %v1559_v32  ;;  %v2352_v12 = vpop.xlane.xlu0 %2351  ;;  %v1343_v10 = vpop.permute.xlu1 %1342 }
 0x552   :  { %2634 = vrcp.f32 %v2352_v12  ;;  %2448 = vst.msk [vmem:[%s3719_s1 + $0x8] sm:$0x3] %vm154_vm5, %v1343_v10 }
 0x553   :  { %2458 = vst.msk [vmem:[%s3719_s1 + $0xa] sm:$0x3] %vm76_vm4, %v1563_v52 }
 0x554   :  { %2461 = vst.msk [vmem:[%s3719_s1 + $0xa] sm:$0x3] %vm154_vm5, %v1640_v21  ;;  %v1925_v49 = vpop.f32.mrf.mxu2 }
 0x555   :  { %v1929_v18 = vpack.c.bf16 %v1925_v49, %v1925_v49 }
 0x557   :  { %v1931_v61 = vrot.slane %v1929_v18, 2  ;;  %v1123_v38 = vpop.permute.xlu2 %1122 }
 0x558   :  { %v2635_v41 = vpop.eup %2634  ;;  %2438 = vst.msk [vmem:[%s3719_s1 + $0x6] sm:$0x3] %vm232_vm6, %v1123_v38  ;;  %v1561_v9 = vpop.f32.mrf.mxu3 }
 0x559   :  { %v2354_v17 = vmul.f32 %v2635_v41, %v3551_v27  ;;  %2441 = vst.msk [vmem:[%s3719_s1 + $0x6] sm:$0x3] %vm310_vm7, %v3582_v39  ;;  %v1497_v0 = vpop.permute.xlu1 %1496  ;;  %v1934_v45 = vsel %vm58_vm1, %v1929_v18, %v1931_v61 }
 0x55a   :  { %1936 = vrot.lane.b32.xlu2 %v1934_v45, %s2647_s5 }
 0x55b   :  { %v2355_v51 = vpack.c.bf16 %v2354_v17, %v2354_v17 }
 0x55c   :  { %v1927_v11 = vpop.f32.mrf.mxu2 }
 0x55d   :  { %2492 = vmatmul.msk.bf16.vlgmr.msrb.gmra.mxu2 %vm54_vm3, %v2355_v51 }
 0x560   :  { %v1705_v3 = vpop.f32.mrf.mxu3 }
 0x561   :  { %v1709_v31 = vpack.c.bf16 %v1705_v3, %v1705_v3  ;;  %v529_v30 = vpop.permute.xlu1 %528 }
 0x562   :  { %2412 = vst.msk [vmem:[%s3719_s1 + $0x2] sm:$0x3] %vm232_vm6, %v529_v30 }
 0x563   :  { %v1711_v27 = vrot.slane %v1709_v31, 2  ;;  %2415 = vst.msk [vmem:[%s3719_s1 + $0x2] sm:$0x3] %vm310_vm7, %v3391_v37 }
 0x565   :  { %v1714_v55 = vsel %vm58_vm1, %v1709_v31, %v1711_v27 }
 0x566   :  { %1716 = vrot.lane.b32.xlu1 %v1714_v55, %s2649_s10 }
 0x568   :  { %v1707_v39 = vpop.f32.mrf.mxu3 }
 0x569   :  { %v826_v56 = vpop.permute.xlu1 %825 }
 0x56a   :  { %2425 = vst.msk [vmem:[%s3719_s1 + $0x4] sm:$0x3] %vm232_vm6, %v826_v56 }
 0x56b   :  { %2428 = vst.msk [vmem:[%s3719_s1 + $0x4] sm:$0x3] %vm310_vm7, %v3497_v25 }
 0x570   :  { %v1856_v22 = vpop.f32.mrf.mxu3 }
 0x571   :  { %v1860_v47 = vpack.c.bf16 %v1856_v22, %v1856_v22 }
 0x573   :  { %2471 = vst.msk [vmem:[%s3719_s1 + $0xc] sm:$0x3] %vm76_vm4, %v1860_v47 }
 0x578   :  { %v1858_v37 = vpop.f32.mrf.mxu3 }
 0x591   :  { %v2079_v26 = vpop.f32.mrf.mxu2 }
 0x592   :  { %v2083_v44 = vpack.c.bf16 %v2079_v26, %v2079_v26 }
 0x594   :  { %v2085_v4 = vrot.slane %v2083_v44, 2 }
 0x596   :  { %v2088_v54 = vsel %vm58_vm1, %v2083_v44, %v2085_v4 }
 0x597   :  { %2090 = vrot.lane.b32.xlu2 %v2088_v54, %s2648_s6 }
 0x599   :  { %v2081_v34 = vpop.f32.mrf.mxu2 }
 0x59a   :  { %v2002_v24 = vpop.f32.mrf.mxu3 }
 0x59b   :  { %v2006_v28 = vpack.c.bf16 %v2002_v24, %v2002_v24 }
 0x59d   :  { %v2008_v60 = vrot.slane %v2006_v28, 2 }
 0x59f   :  { %v2011_v25 = vsel %vm58_vm1, %v2006_v28, %v2008_v60 }
 0x5a0   :  { %2013 = vrot.lane.b32.xlu1 %v2011_v25, %s2649_s10  ;;  %v1420_v13 = vpop.permute.xlu2 %1419 }
 0x5a1   :  { %2451 = vst.msk [vmem:[%s3719_s1 + $0x8] sm:$0x3] %vm232_vm6, %v1420_v13 }
 0x5a2   :  { %2454 = vst.msk [vmem:[%s3719_s1 + $0x8] sm:$0x3] %vm310_vm7, %v1497_v0  ;;  %v2004_v14 = vpop.f32.mrf.mxu3 }
 0x5aa   :  { %v2153_v42 = vpop.f32.mrf.mxu3 }
 0x5ab   :  { %v2157_v48 = vpack.c.bf16 %v2153_v42, %v2153_v42 }
 0x5ad   :  { %2484 = vst.msk [vmem:[%s3719_s1 + $0xe] sm:$0x3] %vm76_vm4, %v2157_v48 }
 0x5ae   :  { %v2222_v16 = vpop.f32.mrf.mxu2 }
 0x5af   :  { %v2226_v36 = vpack.c.bf16 %v2222_v16, %v2222_v16 }
 0x5b0   :  { %v1794_v59 = vpop.permute.xlu0 %1793 }
 0x5b1   :  { %v2228_v57 = vrot.slane %v2226_v36, 2 }
 0x5b2   :  { %v2155_v8 = vpop.f32.mrf.mxu3 }
 0x5b3   :  { %v2231_v58 = vsel %vm58_vm1, %v2226_v36, %v2228_v57 }
 0x5b4   :  { %2233 = vrot.lane.b32.xlu1 %v2231_v58, %s2647_s5  ;;  %v1937_v23 = vpop.permute.xlu2 %1936 }
 0x5b5   :  { %2474 = vst.msk [vmem:[%s3719_s1 + $0xc] sm:$0x3] %vm154_vm5, %v1937_v23 }
 0x5b6   :  { %v2224_v50 = vpop.f32.mrf.mxu2 }
 0x5d1   :  { %v2299_v2 = vpop.f32.mrf.mxu3 }
 0x5d2   :  { %v2303_v43 = vpack.c.bf16 %v2299_v2, %v2299_v2 }
 0x5d4   :  { %v2305_v5 = vrot.slane %v2303_v43, 2 }
 0x5d6   :  { %v2308_v40 = vsel %vm58_vm1, %v2303_v43, %v2305_v5 }
 0x5d7   :  { %2310 = vrot.lane.b32.xlu0 %v2308_v40, %s2649_s10 }
 0x5d8   :  { %v1717_v19 = vpop.permute.xlu1 %1716 }
 0x5d9   :  { %2464 = vst.msk [vmem:[%s3719_s1 + $0xa] sm:$0x3] %vm232_vm6, %v1717_v19  ;;  %v2301_v7 = vpop.f32.mrf.mxu3 }
 0x5da   :  { %2467 = vst.msk [vmem:[%s3719_s1 + $0xa] sm:$0x3] %vm310_vm7, %v1794_v59 }
 0x5e0   :  { %v2376_v1 = vpop.f32.mrf.mxu2 }
 0x5e1   :  { %v2380_v20 = vpack.c.bf16 %v2376_v1, %v2376_v1 }
 0x5e3   :  { %v2382_v62 = vrot.slane %v2380_v20, 2 }
 0x5e5   :  { %v2385_v6 = vsel %vm58_vm1, %v2380_v20, %v2382_v62 }
 0x5e6   :  { %2387 = vrot.lane.b32.xlu2 %v2385_v6, %s2648_s6 }
 0x5e8   :  { %v2378_v46 = vpop.f32.mrf.mxu2 }
 0x5f1   :  { %v2091_v53 = vpop.permute.xlu2 %2090 }
 0x612   :  { %v2014_v35 = vpop.permute.xlu1 %2013 }
 0x613   :  { %2477 = vst.msk [vmem:[%s3719_s1 + $0xc] sm:$0x3] %vm232_vm6, %v2014_v35 }
 0x614   :  { %2480 = vst.msk [vmem:[%s3719_s1 + $0xc] sm:$0x3] %vm310_vm7, %v2091_v53 }
 0x626   :  { %v2234_v63 = vpop.permute.xlu1 %2233 }
 0x627   :  { %2487 = vst.msk [vmem:[%s3719_s1 + $0xe] sm:$0x3] %vm154_vm5, %v2234_v63 }
 0x640   :  { %v2388_v15 = vpop.permute.xlu2 %2387 }
 0x649   :  { %v2311_v29 = vpop.permute.xlu0 %2310 }
 0x64a   :  { %2490 = vst.msk [vmem:[%s3719_s1 + $0xe] sm:$0x3] %vm232_vm6, %v2311_v29 }
 0x64b   :  { %2493 = vst.msk [vmem:[%s3719_s1 + $0xe] sm:$0x3] %vm310_vm7, %v2388_v15 }

</bundles_post_ra>
